<compile_context>
chip_gen: v7x
topology: tpu7x:2x2x1
jax: 0.10.0
libtpu: 0.0.40
codegen_flags: <defaults>
</compile_context>

<pallas_src>
import jax
import jax.numpy as jnp
from jax.experimental import pallas as pl
from jax.experimental.pallas import tpu as pltpu

NEG_SLOPE = 0.01  # nn.LeakyReLU default

DW_NAMES = (
    "mid1_0_0", "mid1_0_1", "mid1_1_0", "mid1_1_1",
    "mid2_0_0", "mid2_0_1", "mid2_1_0", "mid2_1_1",
)


def _leaky(y):
    return jnp.where(y > 0, y, NEG_SLOPE * y)


# ---------------------------------------------------------------------------
# Fused MSAB forward (single pallas_call)
# ---------------------------------------------------------------------------

def msab_forward(x_nchw, p):
    """MSAB forward.  Input/output: NCHW (PyTorch convention)."""
    N, in_c, H, W = x_nchw.shape
    out_c = p["conv2_w"].shape[1]
    P = H * W

    # NCHW -> (N, C, H*W): free reshape; this is already the kernel's layout.
    x_flat = x_nchw.reshape(N, in_c, P).astype(jnp.float32)

    # ---- pack weights into kernel-friendly 2D channel-major shapes ---------
    def prep_dw(dp):
        c = dp["dw_w"].shape[2]
        return [
            dp["dw_w"].reshape(9, c).T.astype(jnp.float32),   # (C, 9), tap k = 3*ky + kx
            dp["dw_b"].reshape(c, 1).astype(jnp.float32),     # (C, 1)
            dp["pw_w"].T.astype(jnp.float32),                 # (Cout, Cin)
            dp["pw_b"].reshape(-1, 1).astype(jnp.float32),    # (Cout, 1)
        ]

    flat_w = [p["conv1_w"].T.astype(jnp.float32),
              p["conv1_b"].reshape(-1, 1).astype(jnp.float32)]
    for name in DW_NAMES:
        flat_w += prep_dw(p[name])
    flat_w += [p["conv2_w"].T.astype(jnp.float32),
               p["conv2_b"].reshape(-1, 1).astype(jnp.float32),
               p["ca_w"].T.astype(jnp.float32)]

    # ---- fused kernel: one batch element per grid step ---------------------
    def kernel(x_ref, *refs):
        cat_ref = refs[-1]          # (in_c, P) VMEM scratch for channel concat
        o_ref = refs[-2]            # (out_c, P) output block
        it = iter(refs[:-2])

        def nxt():
            return next(it)[...]

        w1t, b1 = nxt(), nxt()
        dw = {name: (nxt(), nxt(), nxt(), nxt()) for name in DW_NAMES}
        w2t, b2 = nxt(), nxt()
        wct = nxt()

        # Flattened-pixel coordinates (hoisted once; reused by all 8 depthwise convs).
        lane = jax.lax.broadcasted_iota(jnp.int32, (1, P), 1)
        if (W & (W - 1)) == 0:            # power-of-two width: pure bit ops (VPU)
            yy = lane >> (W.bit_length() - 1)
            xx = lane & (W - 1)
        else:                             # generic fallback
            yy = lane // W
            xx = lane - yy * W

        def make_taps(d):
            taps = []
            for dy in (-d, 0, d):
                for dx in (-d, 0, d):
                    off = dy * W + dx
                    valid = ((yy + dy >= 0) & (yy + dy < H) &
                             (xx + dx >= 0) & (xx + dx < W))
                    taps.append((off, valid))
            return taps

        taps_d1 = make_taps(1)
        taps_d2 = make_taps(2)

        def pointwise(h, wt, b):
            # 1x1 conv + bias + LeakyReLU as unrolled VPU broadcast-FMA.
            # (K<=8 / Cout<=8 would waste >99% of the MXU; keep it on the VPU.)
            cout, cin = wt.shape
            acc = jnp.broadcast_to(b, (cout, P))
            for c in range(cin):
                acc = acc + wt[:, c:c + 1] * h[c:c + 1, :]
            return _leaky(acc)

        def depthwise(h, wk, b, taps):
            # 3x3 depthwise conv (stride 1, 'same' padding, dilation d) + bias
            # + LeakyReLU.  Halo via pltpu.roll on the flat pixel axis + masks.
            ch = h.shape[0]
            acc = jnp.broadcast_to(b, (ch, P))
            for k, (off, valid) in enumerate(taps):
                tap = h if off == 0 else pltpu.roll(h, shift=(-off) % P, axis=1)
                tap = jnp.where(valid, tap, 0.0)
                acc = acc + tap * wk[:, k:k + 1]
            return _leaky(acc)

        def dwconv(h, params, taps):
            dw_wk, dw_b, pw_wt, pw_b = params
            return pointwise(depthwise(h, dw_wk, dw_b, taps), pw_wt, pw_b)

        x = x_ref[...]                                    # (in_c, P)
        m = pointwise(x, w1t, b1)                         # conv1 -> (mid_c, P)

        for i in range(2):
            m1 = dwconv(m, dw[f"mid1_{i}_0"], taps_d1)
            m1 = dwconv(m1, dw[f"mid1_{i}_1"], taps_d1)
            m2 = dwconv(m, dw[f"mid2_{i}_0"], taps_d2)    # dilation=2, padding=2
            m2 = dwconv(m2, dw[f"mid2_{i}_1"], taps_d1)
            # torch.cat([m1, m2], dim=1): write channel rows into VMEM scratch.
            c1, c2 = m1.shape[0], m2.shape[0]
            cat_ref[0:c1, :] = m1
            cat_ref[c1:c1 + c2, :] = m2
            m = cat_ref[0:c1 + c2, :]

        features = m + x                                  # residual
        out = pointwise(features, w2t, b2)                # conv2 -> (out_c, P)

        # ChannelAttension ('ca'): out * sigmoid(GAP_hw(out) @ W_ca)
        gap = jnp.mean(out, axis=1, keepdims=True)        # (out_c, 1) lane reduce
        y = jnp.zeros((out_c, 1), jnp.float32)
        for c in range(out_c):
            y = y + wct[:, c:c + 1] * gap[c:c + 1, :]
        scale = pl.reciprocal(1.0 + jnp.exp(-y), approx=True)   # sigmoid (EUP)
        o_ref[...] = out * scale

    in_specs = [pl.BlockSpec((None, in_c, P), lambda n: (n, 0, 0))]
    in_specs += [pl.BlockSpec(w.shape, lambda n: (0, 0)) for w in flat_w]

    out_flat = pl.pallas_call(
        kernel,
        out_shape=jax.ShapeDtypeStruct((N, out_c, P), jnp.float32),
        grid=(N,),
        in_specs=in_specs,
        out_specs=pl.BlockSpec((None, out_c, P), lambda n: (n, 0, 0)),
        scratch_shapes=[pltpu.VMEM((in_c, P), jnp.float32)],
        compiler_params=pltpu.CompilerParams(
            dimension_semantics=("parallel",),            # v7x: 1 batch elem / TC
            vmem_limit_bytes=32 * 1024 * 1024,
        ),
    )(x_flat, *flat_w)

    return out_flat.reshape(N, out_c, H, W)


# ---------------------------------------------------------------------------
# Pure-JAX reference (for correctness check), deterministic init, self-test
# ---------------------------------------------------------------------------

def msab_reference(x_nchw, p):
    """Pure-JAX (XLA) reference matching the kernel's math."""
    hi = jax.lax.Precision.HIGHEST
    x = jnp.transpose(x_nchw, (0, 2, 3, 1)).astype(jnp.float32)   # NHWC

    def pw(h, w, b):
        return _leaky(jnp.einsum("nhwc,co->nhwo", h, w, precision=hi) + b)

    def dwc(h, w, b, d):
        n, hh, ww, c = h.shape
        hp = jnp.pad(h, ((0, 0), (d, d), (d, d), (0, 0)))
        acc = jnp.zeros_like(h) + b
        for i in range(3):
            for j in range(3):
                acc = acc + hp[:, i * d:i * d + hh, j * d:j * d + ww, :] * w[i, j]
        return _leaky(acc)

    def dwconv(h, dp, d):
        return pw(dwc(h, dp["dw_w"], dp["dw_b"], d), dp["pw_w"], dp["pw_b"])

    m = pw(x, p["conv1_w"], p["conv1_b"])
    for i in range(2):
        m1 = dwconv(m, p[f"mid1_{i}_0"], 1)
        m1 = dwconv(m1, p[f"mid1_{i}_1"], 1)
        m2 = dwconv(m, p[f"mid2_{i}_0"], 2)
        m2 = dwconv(m2, p[f"mid2_{i}_1"], 1)
        m = jnp.concatenate([m1, m2], axis=-1)
    features = m + x
    out = pw(features, p["conv2_w"], p["conv2_b"])
    gap = jnp.mean(out, axis=(1, 2))
    s = jax.nn.sigmoid(jnp.einsum("nc,co->no", gap, p["ca_w"], precision=hi))
    out = out * s[:, None, None, :]
    return jnp.transpose(out, (0, 3, 1, 2))


def _init_dwconv(key, in_c, out_c):
    k1, k2, k3, k4 = jax.random.split(key, 4)
    return {
        "dw_w": 0.1 * jax.random.normal(k1, (3, 3, in_c), jnp.float32),
        "dw_b": 0.05 * jax.random.normal(k2, (in_c,), jnp.float32),
        "pw_w": 0.1 * jax.random.normal(k3, (in_c, out_c), jnp.float32),
        "pw_b": 0.05 * jax.random.normal(k4, (out_c,), jnp.float32),
    }


def init_msab_params(key, in_c, out_c):
    mid_c = in_c // 2
    half = mid_c // 2
    keys = jax.random.split(key, 14)
    return {
        "conv1_w": 0.1 * jax.random.normal(keys[0], (in_c, mid_c), jnp.float32),
        "conv1_b": 0.05 * jax.random.normal(keys[1], (mid_c,), jnp.float32),
        "mid1_0_0": _init_dwconv(keys[2], mid_c, half),
        "mid1_0_1": _init_dwconv(keys[3], half, half),
        "mid1_1_0": _init_dwconv(keys[4], mid_c, mid_c),
        "mid1_1_1": _init_dwconv(keys[5], mid_c, mid_c),
        "mid2_0_0": _init_dwconv(keys[6], mid_c, half),
        "mid2_0_1": _init_dwconv(keys[7], half, half),
        "mid2_1_0": _init_dwconv(keys[8], mid_c, mid_c),
        "mid2_1_1": _init_dwconv(keys[9], mid_c, mid_c),
        "conv2_w": 0.1 * jax.random.normal(keys[10], (in_c, out_c), jnp.float32),
        "conv2_b": 0.05 * jax.random.normal(keys[11], (out_c,), jnp.float32),
        "ca_w": 0.1 * jax.random.normal(keys[12], (out_c, out_c), jnp.float32),
    }


if __name__ == "__main__":
    # in_c=8 -> mid_c=4, mid_c//2=2, out_c=8
    N, IN_C, OUT_C, H, W = 2, 8, 8, 16, 16
    key = jax.random.PRNGKey(0)
    k_x, k_p = jax.random.split(key)
    x = jax.random.normal(k_x, (N, IN_C, H, W), jnp.float32)     # NCHW input
    params = init_msab_params(k_p, IN_C, OUT_C)

    fwd = jax.jit(msab_forward)
    out = fwd(x, params)
    jax.block_until_ready(out)

    assert out.shape == (N, OUT_C, H, W), out.shape
    assert bool(jnp.all(jnp.isfinite(out)))

    ref = msab_reference(x, params)
    assert bool(jnp.allclose(out, ref, atol=1e-2, rtol=1e-2)), \
        float(jnp.max(jnp.abs(out - ref)))

    print("KERNEL_OK")
</pallas_src>

<mosaic_0001>
module attributes {stable_mosaic.version = 11 : i64} {
  func.func @kernel(%arg0: i32, %arg1: memref<1x8x256xf32, #tpu.memory_space<vmem>>, %arg2: memref<4x8xf32, #tpu.memory_space<vmem>>, %arg3: memref<4x1xf32, #tpu.memory_space<vmem>>, %arg4: memref<4x9xf32, #tpu.memory_space<vmem>>, %arg5: memref<4x1xf32, #tpu.memory_space<vmem>>, %arg6: memref<2x4xf32, #tpu.memory_space<vmem>>, %arg7: memref<2x1xf32, #tpu.memory_space<vmem>>, %arg8: memref<2x9xf32, #tpu.memory_space<vmem>>, %arg9: memref<2x1xf32, #tpu.memory_space<vmem>>, %arg10: memref<2x2xf32, #tpu.memory_space<vmem>>, %arg11: memref<2x1xf32, #tpu.memory_space<vmem>>, %arg12: memref<4x9xf32, #tpu.memory_space<vmem>>, %arg13: memref<4x1xf32, #tpu.memory_space<vmem>>, %arg14: memref<4x4xf32, #tpu.memory_space<vmem>>, %arg15: memref<4x1xf32, #tpu.memory_space<vmem>>, %arg16: memref<4x9xf32, #tpu.memory_space<vmem>>, %arg17: memref<4x1xf32, #tpu.memory_space<vmem>>, %arg18: memref<4x4xf32, #tpu.memory_space<vmem>>, %arg19: memref<4x1xf32, #tpu.memory_space<vmem>>, %arg20: memref<4x9xf32, #tpu.memory_space<vmem>>, %arg21: memref<4x1xf32, #tpu.memory_space<vmem>>, %arg22: memref<2x4xf32, #tpu.memory_space<vmem>>, %arg23: memref<2x1xf32, #tpu.memory_space<vmem>>, %arg24: memref<2x9xf32, #tpu.memory_space<vmem>>, %arg25: memref<2x1xf32, #tpu.memory_space<vmem>>, %arg26: memref<2x2xf32, #tpu.memory_space<vmem>>, %arg27: memref<2x1xf32, #tpu.memory_space<vmem>>, %arg28: memref<4x9xf32, #tpu.memory_space<vmem>>, %arg29: memref<4x1xf32, #tpu.memory_space<vmem>>, %arg30: memref<4x4xf32, #tpu.memory_space<vmem>>, %arg31: memref<4x1xf32, #tpu.memory_space<vmem>>, %arg32: memref<4x9xf32, #tpu.memory_space<vmem>>, %arg33: memref<4x1xf32, #tpu.memory_space<vmem>>, %arg34: memref<4x4xf32, #tpu.memory_space<vmem>>, %arg35: memref<4x1xf32, #tpu.memory_space<vmem>>, %arg36: memref<8x8xf32, #tpu.memory_space<vmem>>, %arg37: memref<8x1xf32, #tpu.memory_space<vmem>>, %arg38: memref<8x8xf32, #tpu.memory_space<vmem>>, %arg39: memref<1x8x256xf32, #tpu.memory_space<vmem>>, %arg40: memref<8x256xf32, #tpu.memory_space<vmem>>) attributes {dimension_semantics = [#tpu.dimension_semantics<parallel>], iteration_bounds = array<i64: 2>, scalar_prefetch = 0 : i64, scratch_operands = 1 : i64, tpu.core_type = #tpu.core_type<tc>, window_params = [{transform_indices = @transform_0, window_bounds = array<i64: 1, 8, 256>}, {pipeline_mode = #tpu.pipeline_mode<synchronous>, transform_indices = @transform_1, window_bounds = array<i64: 4, 8>}, {pipeline_mode = #tpu.pipeline_mode<synchronous>, transform_indices = @transform_2, window_bounds = array<i64: 4, 1>}, {pipeline_mode = #tpu.pipeline_mode<synchronous>, transform_indices = @transform_3, window_bounds = array<i64: 4, 9>}, {pipeline_mode = #tpu.pipeline_mode<synchronous>, transform_indices = @transform_4, window_bounds = array<i64: 4, 1>}, {pipeline_mode = #tpu.pipeline_mode<synchronous>, transform_indices = @transform_5, window_bounds = array<i64: 2, 4>}, {pipeline_mode = #tpu.pipeline_mode<synchronous>, transform_indices = @transform_6, window_bounds = array<i64: 2, 1>}, {pipeline_mode = #tpu.pipeline_mode<synchronous>, transform_indices = @transform_7, window_bounds = array<i64: 2, 9>}, {pipeline_mode = #tpu.pipeline_mode<synchronous>, transform_indices = @transform_8, window_bounds = array<i64: 2, 1>}, {pipeline_mode = #tpu.pipeline_mode<synchronous>, transform_indices = @transform_9, window_bounds = array<i64: 2, 2>}, {pipeline_mode = #tpu.pipeline_mode<synchronous>, transform_indices = @transform_10, window_bounds = array<i64: 2, 1>}, {pipeline_mode = #tpu.pipeline_mode<synchronous>, transform_indices = @transform_11, window_bounds = array<i64: 4, 9>}, {pipeline_mode = #tpu.pipeline_mode<synchronous>, transform_indices = @transform_12, window_bounds = array<i64: 4, 1>}, {pipeline_mode = #tpu.pipeline_mode<synchronous>, transform_indices = @transform_13, window_bounds = array<i64: 4, 4>}, {pipeline_mode = #tpu.pipeline_mode<synchronous>, transform_indices = @transform_14, window_bounds = array<i64: 4, 1>}, {pipeline_mode = #tpu.pipeline_mode<synchronous>, transform_indices = @transform_15, window_bounds = array<i64: 4, 9>}, {pipeline_mode = #tpu.pipeline_mode<synchronous>, transform_indices = @transform_16, window_bounds = array<i64: 4, 1>}, {pipeline_mode = #tpu.pipeline_mode<synchronous>, transform_indices = @transform_17, window_bounds = array<i64: 4, 4>}, {pipeline_mode = #tpu.pipeline_mode<synchronous>, transform_indices = @transform_18, window_bounds = array<i64: 4, 1>}, {pipeline_mode = #tpu.pipeline_mode<synchronous>, transform_indices = @transform_19, window_bounds = array<i64: 4, 9>}, {pipeline_mode = #tpu.pipeline_mode<synchronous>, transform_indices = @transform_20, window_bounds = array<i64: 4, 1>}, {pipeline_mode = #tpu.pipeline_mode<synchronous>, transform_indices = @transform_21, window_bounds = array<i64: 2, 4>}, {pipeline_mode = #tpu.pipeline_mode<synchronous>, transform_indices = @transform_22, window_bounds = array<i64: 2, 1>}, {pipeline_mode = #tpu.pipeline_mode<synchronous>, transform_indices = @transform_23, window_bounds = array<i64: 2, 9>}, {pipeline_mode = #tpu.pipeline_mode<synchronous>, transform_indices = @transform_24, window_bounds = array<i64: 2, 1>}, {pipeline_mode = #tpu.pipeline_mode<synchronous>, transform_indices = @transform_25, window_bounds = array<i64: 2, 2>}, {pipeline_mode = #tpu.pipeline_mode<synchronous>, transform_indices = @transform_26, window_bounds = array<i64: 2, 1>}, {pipeline_mode = #tpu.pipeline_mode<synchronous>, transform_indices = @transform_27, window_bounds = array<i64: 4, 9>}, {pipeline_mode = #tpu.pipeline_mode<synchronous>, transform_indices = @transform_28, window_bounds = array<i64: 4, 1>}, {pipeline_mode = #tpu.pipeline_mode<synchronous>, transform_indices = @transform_29, window_bounds = array<i64: 4, 4>}, {pipeline_mode = #tpu.pipeline_mode<synchronous>, transform_indices = @transform_30, window_bounds = array<i64: 4, 1>}, {pipeline_mode = #tpu.pipeline_mode<synchronous>, transform_indices = @transform_31, window_bounds = array<i64: 4, 9>}, {pipeline_mode = #tpu.pipeline_mode<synchronous>, transform_indices = @transform_32, window_bounds = array<i64: 4, 1>}, {pipeline_mode = #tpu.pipeline_mode<synchronous>, transform_indices = @transform_33, window_bounds = array<i64: 4, 4>}, {pipeline_mode = #tpu.pipeline_mode<synchronous>, transform_indices = @transform_34, window_bounds = array<i64: 4, 1>}, {pipeline_mode = #tpu.pipeline_mode<synchronous>, transform_indices = @transform_35, window_bounds = array<i64: 8, 8>}, {pipeline_mode = #tpu.pipeline_mode<synchronous>, transform_indices = @transform_36, window_bounds = array<i64: 8, 1>}, {pipeline_mode = #tpu.pipeline_mode<synchronous>, transform_indices = @transform_37, window_bounds = array<i64: 8, 8>}, {transform_indices = @transform_38, window_bounds = array<i64: 1, 8, 256>}]} {
    %c0 = arith.constant 0 : index
    %c0_0 = arith.constant 0 : index
    %0 = vector.load %arg2[%c0, %c0_0] : memref<4x8xf32, #tpu.memory_space<vmem>>, vector<4x8xf32>
    %c0_1 = arith.constant 0 : index
    %c0_2 = arith.constant 0 : index
    %1 = vector.load %arg3[%c0_1, %c0_2] : memref<4x1xf32, #tpu.memory_space<vmem>>, vector<4x1xf32>
    %c0_3 = arith.constant 0 : index
    %c0_4 = arith.constant 0 : index
    %2 = vector.load %arg4[%c0_3, %c0_4] : memref<4x9xf32, #tpu.memory_space<vmem>>, vector<4x9xf32>
    %c0_5 = arith.constant 0 : index
    %c0_6 = arith.constant 0 : index
    %3 = vector.load %arg5[%c0_5, %c0_6] : memref<4x1xf32, #tpu.memory_space<vmem>>, vector<4x1xf32>
    %c0_7 = arith.constant 0 : index
    %c0_8 = arith.constant 0 : index
    %4 = vector.load %arg6[%c0_7, %c0_8] : memref<2x4xf32, #tpu.memory_space<vmem>>, vector<2x4xf32>
    %c0_9 = arith.constant 0 : index
    %c0_10 = arith.constant 0 : index
    %5 = vector.load %arg7[%c0_9, %c0_10] : memref<2x1xf32, #tpu.memory_space<vmem>>, vector<2x1xf32>
    %c0_11 = arith.constant 0 : index
    %c0_12 = arith.constant 0 : index
    %6 = vector.load %arg8[%c0_11, %c0_12] : memref<2x9xf32, #tpu.memory_space<vmem>>, vector<2x9xf32>
    %c0_13 = arith.constant 0 : index
    %c0_14 = arith.constant 0 : index
    %7 = vector.load %arg9[%c0_13, %c0_14] : memref<2x1xf32, #tpu.memory_space<vmem>>, vector<2x1xf32>
    %c0_15 = arith.constant 0 : index
    %c0_16 = arith.constant 0 : index
    %8 = vector.load %arg10[%c0_15, %c0_16] : memref<2x2xf32, #tpu.memory_space<vmem>>, vector<2x2xf32>
    %c0_17 = arith.constant 0 : index
    %c0_18 = arith.constant 0 : index
    %9 = vector.load %arg11[%c0_17, %c0_18] : memref<2x1xf32, #tpu.memory_space<vmem>>, vector<2x1xf32>
    %c0_19 = arith.constant 0 : index
    %c0_20 = arith.constant 0 : index
    %10 = vector.load %arg12[%c0_19, %c0_20] : memref<4x9xf32, #tpu.memory_space<vmem>>, vector<4x9xf32>
    %c0_21 = arith.constant 0 : index
    %c0_22 = arith.constant 0 : index
    %11 = vector.load %arg13[%c0_21, %c0_22] : memref<4x1xf32, #tpu.memory_space<vmem>>, vector<4x1xf32>
    %c0_23 = arith.constant 0 : index
    %c0_24 = arith.constant 0 : index
    %12 = vector.load %arg14[%c0_23, %c0_24] : memref<4x4xf32, #tpu.memory_space<vmem>>, vector<4x4xf32>
    %c0_25 = arith.constant 0 : index
    %c0_26 = arith.constant 0 : index
    %13 = vector.load %arg15[%c0_25, %c0_26] : memref<4x1xf32, #tpu.memory_space<vmem>>, vector<4x1xf32>
    %c0_27 = arith.constant 0 : index
    %c0_28 = arith.constant 0 : index
    %14 = vector.load %arg16[%c0_27, %c0_28] : memref<4x9xf32, #tpu.memory_space<vmem>>, vector<4x9xf32>
    %c0_29 = arith.constant 0 : index
    %c0_30 = arith.constant 0 : index
    %15 = vector.load %arg17[%c0_29, %c0_30] : memref<4x1xf32, #tpu.memory_space<vmem>>, vector<4x1xf32>
    %c0_31 = arith.constant 0 : index
    %c0_32 = arith.constant 0 : index
    %16 = vector.load %arg18[%c0_31, %c0_32] : memref<4x4xf32, #tpu.memory_space<vmem>>, vector<4x4xf32>
    %c0_33 = arith.constant 0 : index
    %c0_34 = arith.constant 0 : index
    %17 = vector.load %arg19[%c0_33, %c0_34] : memref<4x1xf32, #tpu.memory_space<vmem>>, vector<4x1xf32>
    %c0_35 = arith.constant 0 : index
    %c0_36 = arith.constant 0 : index
    %18 = vector.load %arg20[%c0_35, %c0_36] : memref<4x9xf32, #tpu.memory_space<vmem>>, vector<4x9xf32>
    %c0_37 = arith.constant 0 : index
    %c0_38 = arith.constant 0 : index
    %19 = vector.load %arg21[%c0_37, %c0_38] : memref<4x1xf32, #tpu.memory_space<vmem>>, vector<4x1xf32>
    %c0_39 = arith.constant 0 : index
    %c0_40 = arith.constant 0 : index
    %20 = vector.load %arg22[%c0_39, %c0_40] : memref<2x4xf32, #tpu.memory_space<vmem>>, vector<2x4xf32>
    %c0_41 = arith.constant 0 : index
    %c0_42 = arith.constant 0 : index
    %21 = vector.load %arg23[%c0_41, %c0_42] : memref<2x1xf32, #tpu.memory_space<vmem>>, vector<2x1xf32>
    %c0_43 = arith.constant 0 : index
    %c0_44 = arith.constant 0 : index
    %22 = vector.load %arg24[%c0_43, %c0_44] : memref<2x9xf32, #tpu.memory_space<vmem>>, vector<2x9xf32>
    %c0_45 = arith.constant 0 : index
    %c0_46 = arith.constant 0 : index
    %23 = vector.load %arg25[%c0_45, %c0_46] : memref<2x1xf32, #tpu.memory_space<vmem>>, vector<2x1xf32>
    %c0_47 = arith.constant 0 : index
    %c0_48 = arith.constant 0 : index
    %24 = vector.load %arg26[%c0_47, %c0_48] : memref<2x2xf32, #tpu.memory_space<vmem>>, vector<2x2xf32>
    %c0_49 = arith.constant 0 : index
    %c0_50 = arith.constant 0 : index
    %25 = vector.load %arg27[%c0_49, %c0_50] : memref<2x1xf32, #tpu.memory_space<vmem>>, vector<2x1xf32>
    %c0_51 = arith.constant 0 : index
    %c0_52 = arith.constant 0 : index
    %26 = vector.load %arg28[%c0_51, %c0_52] : memref<4x9xf32, #tpu.memory_space<vmem>>, vector<4x9xf32>
    %c0_53 = arith.constant 0 : index
    %c0_54 = arith.constant 0 : index
    %27 = vector.load %arg29[%c0_53, %c0_54] : memref<4x1xf32, #tpu.memory_space<vmem>>, vector<4x1xf32>
    %c0_55 = arith.constant 0 : index
    %c0_56 = arith.constant 0 : index
    %28 = vector.load %arg30[%c0_55, %c0_56] : memref<4x4xf32, #tpu.memory_space<vmem>>, vector<4x4xf32>
    %c0_57 = arith.constant 0 : index
    %c0_58 = arith.constant 0 : index
    %29 = vector.load %arg31[%c0_57, %c0_58] : memref<4x1xf32, #tpu.memory_space<vmem>>, vector<4x1xf32>
    %c0_59 = arith.constant 0 : index
    %c0_60 = arith.constant 0 : index
    %30 = vector.load %arg32[%c0_59, %c0_60] : memref<4x9xf32, #tpu.memory_space<vmem>>, vector<4x9xf32>
    %c0_61 = arith.constant 0 : index
    %c0_62 = arith.constant 0 : index
    %31 = vector.load %arg33[%c0_61, %c0_62] : memref<4x1xf32, #tpu.memory_space<vmem>>, vector<4x1xf32>
    %c0_63 = arith.constant 0 : index
    %c0_64 = arith.constant 0 : index
    %32 = vector.load %arg34[%c0_63, %c0_64] : memref<4x4xf32, #tpu.memory_space<vmem>>, vector<4x4xf32>
    %c0_65 = arith.constant 0 : index
    %c0_66 = arith.constant 0 : index
    %33 = vector.load %arg35[%c0_65, %c0_66] : memref<4x1xf32, #tpu.memory_space<vmem>>, vector<4x1xf32>
    %c0_67 = arith.constant 0 : index
    %c0_68 = arith.constant 0 : index
    %34 = vector.load %arg36[%c0_67, %c0_68] : memref<8x8xf32, #tpu.memory_space<vmem>>, vector<8x8xf32>
    %c0_69 = arith.constant 0 : index
    %c0_70 = arith.constant 0 : index
    %35 = vector.load %arg37[%c0_69, %c0_70] : memref<8x1xf32, #tpu.memory_space<vmem>>, vector<8x1xf32>
    %c0_71 = arith.constant 0 : index
    %c0_72 = arith.constant 0 : index
    %36 = vector.load %arg38[%c0_71, %c0_72] : memref<8x8xf32, #tpu.memory_space<vmem>>, vector<8x8xf32>
    %37 = tpu.iota {dimensions = array<i32: 1>} : vector<1x256xi32>
    %c4_i32 = arith.constant 4 : i32
    %38 = vector.broadcast %c4_i32 : i32 to vector<1x256xi32>
    %39 = arith.shrsi %37, %38 : vector<1x256xi32>
    %c15_i32 = arith.constant 15 : i32
    %40 = vector.broadcast %c15_i32 : i32 to vector<1x256xi32>
    %41 = arith.andi %37, %40 : vector<1x256xi32>
    %c-1_i32 = arith.constant -1 : i32
    %42 = vector.broadcast %c-1_i32 : i32 to vector<1x256xi32>
    %43 = arith.addi %39, %42 : vector<1x256xi32>
    %c0_i32 = arith.constant 0 : i32
    %44 = vector.broadcast %c0_i32 : i32 to vector<1x256xi32>
    %45 = arith.cmpi sge, %43, %44 : vector<1x256xi32>
    %c-1_i32_73 = arith.constant -1 : i32
    %46 = vector.broadcast %c-1_i32_73 : i32 to vector<1x256xi32>
    %47 = arith.addi %39, %46 : vector<1x256xi32>
    %c16_i32 = arith.constant 16 : i32
    %48 = vector.broadcast %c16_i32 : i32 to vector<1x256xi32>
    %49 = arith.cmpi slt, %47, %48 : vector<1x256xi32>
    %50 = arith.andi %45, %49 : vector<1x256xi1>
    %c-1_i32_74 = arith.constant -1 : i32
    %51 = vector.broadcast %c-1_i32_74 : i32 to vector<1x256xi32>
    %52 = arith.addi %41, %51 : vector<1x256xi32>
    %c0_i32_75 = arith.constant 0 : i32
    %53 = vector.broadcast %c0_i32_75 : i32 to vector<1x256xi32>
    %54 = arith.cmpi sge, %52, %53 : vector<1x256xi32>
    %55 = arith.andi %50, %54 : vector<1x256xi1>
    %c-1_i32_76 = arith.constant -1 : i32
    %56 = vector.broadcast %c-1_i32_76 : i32 to vector<1x256xi32>
    %57 = arith.addi %41, %56 : vector<1x256xi32>
    %c16_i32_77 = arith.constant 16 : i32
    %58 = vector.broadcast %c16_i32_77 : i32 to vector<1x256xi32>
    %59 = arith.cmpi slt, %57, %58 : vector<1x256xi32>
    %60 = arith.andi %55, %59 : vector<1x256xi1>
    %c-1_i32_78 = arith.constant -1 : i32
    %61 = vector.broadcast %c-1_i32_78 : i32 to vector<1x256xi32>
    %62 = arith.addi %39, %61 : vector<1x256xi32>
    %c0_i32_79 = arith.constant 0 : i32
    %63 = vector.broadcast %c0_i32_79 : i32 to vector<1x256xi32>
    %64 = arith.cmpi sge, %62, %63 : vector<1x256xi32>
    %c-1_i32_80 = arith.constant -1 : i32
    %65 = vector.broadcast %c-1_i32_80 : i32 to vector<1x256xi32>
    %66 = arith.addi %39, %65 : vector<1x256xi32>
    %c16_i32_81 = arith.constant 16 : i32
    %67 = vector.broadcast %c16_i32_81 : i32 to vector<1x256xi32>
    %68 = arith.cmpi slt, %66, %67 : vector<1x256xi32>
    %69 = arith.andi %64, %68 : vector<1x256xi1>
    %c0_i32_82 = arith.constant 0 : i32
    %70 = vector.broadcast %c0_i32_82 : i32 to vector<1x256xi32>
    %71 = arith.addi %41, %70 : vector<1x256xi32>
    %c0_i32_83 = arith.constant 0 : i32
    %72 = vector.broadcast %c0_i32_83 : i32 to vector<1x256xi32>
    %73 = arith.cmpi sge, %71, %72 : vector<1x256xi32>
    %74 = arith.andi %69, %73 : vector<1x256xi1>
    %c0_i32_84 = arith.constant 0 : i32
    %75 = vector.broadcast %c0_i32_84 : i32 to vector<1x256xi32>
    %76 = arith.addi %41, %75 : vector<1x256xi32>
    %c16_i32_85 = arith.constant 16 : i32
    %77 = vector.broadcast %c16_i32_85 : i32 to vector<1x256xi32>
    %78 = arith.cmpi slt, %76, %77 : vector<1x256xi32>
    %79 = arith.andi %74, %78 : vector<1x256xi1>
    %c-1_i32_86 = arith.constant -1 : i32
    %80 = vector.broadcast %c-1_i32_86 : i32 to vector<1x256xi32>
    %81 = arith.addi %39, %80 : vector<1x256xi32>
    %c0_i32_87 = arith.constant 0 : i32
    %82 = vector.broadcast %c0_i32_87 : i32 to vector<1x256xi32>
    %83 = arith.cmpi sge, %81, %82 : vector<1x256xi32>
    %c-1_i32_88 = arith.constant -1 : i32
    %84 = vector.broadcast %c-1_i32_88 : i32 to vector<1x256xi32>
    %85 = arith.addi %39, %84 : vector<1x256xi32>
    %c16_i32_89 = arith.constant 16 : i32
    %86 = vector.broadcast %c16_i32_89 : i32 to vector<1x256xi32>
    %87 = arith.cmpi slt, %85, %86 : vector<1x256xi32>
    %88 = arith.andi %83, %87 : vector<1x256xi1>
    %c1_i32 = arith.constant 1 : i32
    %89 = vector.broadcast %c1_i32 : i32 to vector<1x256xi32>
    %90 = arith.addi %41, %89 : vector<1x256xi32>
    %c0_i32_90 = arith.constant 0 : i32
    %91 = vector.broadcast %c0_i32_90 : i32 to vector<1x256xi32>
    %92 = arith.cmpi sge, %90, %91 : vector<1x256xi32>
    %93 = arith.andi %88, %92 : vector<1x256xi1>
    %c1_i32_91 = arith.constant 1 : i32
    %94 = vector.broadcast %c1_i32_91 : i32 to vector<1x256xi32>
    %95 = arith.addi %41, %94 : vector<1x256xi32>
    %c16_i32_92 = arith.constant 16 : i32
    %96 = vector.broadcast %c16_i32_92 : i32 to vector<1x256xi32>
    %97 = arith.cmpi slt, %95, %96 : vector<1x256xi32>
    %98 = arith.andi %93, %97 : vector<1x256xi1>
    %c0_i32_93 = arith.constant 0 : i32
    %99 = vector.broadcast %c0_i32_93 : i32 to vector<1x256xi32>
    %100 = arith.addi %39, %99 : vector<1x256xi32>
    %c0_i32_94 = arith.constant 0 : i32
    %101 = vector.broadcast %c0_i32_94 : i32 to vector<1x256xi32>
    %102 = arith.cmpi sge, %100, %101 : vector<1x256xi32>
    %c0_i32_95 = arith.constant 0 : i32
    %103 = vector.broadcast %c0_i32_95 : i32 to vector<1x256xi32>
    %104 = arith.addi %39, %103 : vector<1x256xi32>
    %c16_i32_96 = arith.constant 16 : i32
    %105 = vector.broadcast %c16_i32_96 : i32 to vector<1x256xi32>
    %106 = arith.cmpi slt, %104, %105 : vector<1x256xi32>
    %107 = arith.andi %102, %106 : vector<1x256xi1>
    %c-1_i32_97 = arith.constant -1 : i32
    %108 = vector.broadcast %c-1_i32_97 : i32 to vector<1x256xi32>
    %109 = arith.addi %41, %108 : vector<1x256xi32>
    %c0_i32_98 = arith.constant 0 : i32
    %110 = vector.broadcast %c0_i32_98 : i32 to vector<1x256xi32>
    %111 = arith.cmpi sge, %109, %110 : vector<1x256xi32>
    %112 = arith.andi %107, %111 : vector<1x256xi1>
    %c-1_i32_99 = arith.constant -1 : i32
    %113 = vector.broadcast %c-1_i32_99 : i32 to vector<1x256xi32>
    %114 = arith.addi %41, %113 : vector<1x256xi32>
    %c16_i32_100 = arith.constant 16 : i32
    %115 = vector.broadcast %c16_i32_100 : i32 to vector<1x256xi32>
    %116 = arith.cmpi slt, %114, %115 : vector<1x256xi32>
    %117 = arith.andi %112, %116 : vector<1x256xi1>
    %c0_i32_101 = arith.constant 0 : i32
    %118 = vector.broadcast %c0_i32_101 : i32 to vector<1x256xi32>
    %119 = arith.addi %39, %118 : vector<1x256xi32>
    %c0_i32_102 = arith.constant 0 : i32
    %120 = vector.broadcast %c0_i32_102 : i32 to vector<1x256xi32>
    %121 = arith.cmpi sge, %119, %120 : vector<1x256xi32>
    %c0_i32_103 = arith.constant 0 : i32
    %122 = vector.broadcast %c0_i32_103 : i32 to vector<1x256xi32>
    %123 = arith.addi %39, %122 : vector<1x256xi32>
    %c16_i32_104 = arith.constant 16 : i32
    %124 = vector.broadcast %c16_i32_104 : i32 to vector<1x256xi32>
    %125 = arith.cmpi slt, %123, %124 : vector<1x256xi32>
    %126 = arith.andi %121, %125 : vector<1x256xi1>
    %c0_i32_105 = arith.constant 0 : i32
    %127 = vector.broadcast %c0_i32_105 : i32 to vector<1x256xi32>
    %128 = arith.addi %41, %127 : vector<1x256xi32>
    %c0_i32_106 = arith.constant 0 : i32
    %129 = vector.broadcast %c0_i32_106 : i32 to vector<1x256xi32>
    %130 = arith.cmpi sge, %128, %129 : vector<1x256xi32>
    %131 = arith.andi %126, %130 : vector<1x256xi1>
    %c0_i32_107 = arith.constant 0 : i32
    %132 = vector.broadcast %c0_i32_107 : i32 to vector<1x256xi32>
    %133 = arith.addi %41, %132 : vector<1x256xi32>
    %c16_i32_108 = arith.constant 16 : i32
    %134 = vector.broadcast %c16_i32_108 : i32 to vector<1x256xi32>
    %135 = arith.cmpi slt, %133, %134 : vector<1x256xi32>
    %136 = arith.andi %131, %135 : vector<1x256xi1>
    %c0_i32_109 = arith.constant 0 : i32
    %137 = vector.broadcast %c0_i32_109 : i32 to vector<1x256xi32>
    %138 = arith.addi %39, %137 : vector<1x256xi32>
    %c0_i32_110 = arith.constant 0 : i32
    %139 = vector.broadcast %c0_i32_110 : i32 to vector<1x256xi32>
    %140 = arith.cmpi sge, %138, %139 : vector<1x256xi32>
    %c0_i32_111 = arith.constant 0 : i32
    %141 = vector.broadcast %c0_i32_111 : i32 to vector<1x256xi32>
    %142 = arith.addi %39, %141 : vector<1x256xi32>
    %c16_i32_112 = arith.constant 16 : i32
    %143 = vector.broadcast %c16_i32_112 : i32 to vector<1x256xi32>
    %144 = arith.cmpi slt, %142, %143 : vector<1x256xi32>
    %145 = arith.andi %140, %144 : vector<1x256xi1>
    %c1_i32_113 = arith.constant 1 : i32
    %146 = vector.broadcast %c1_i32_113 : i32 to vector<1x256xi32>
    %147 = arith.addi %41, %146 : vector<1x256xi32>
    %c0_i32_114 = arith.constant 0 : i32
    %148 = vector.broadcast %c0_i32_114 : i32 to vector<1x256xi32>
    %149 = arith.cmpi sge, %147, %148 : vector<1x256xi32>
    %150 = arith.andi %145, %149 : vector<1x256xi1>
    %c1_i32_115 = arith.constant 1 : i32
    %151 = vector.broadcast %c1_i32_115 : i32 to vector<1x256xi32>
    %152 = arith.addi %41, %151 : vector<1x256xi32>
    %c16_i32_116 = arith.constant 16 : i32
    %153 = vector.broadcast %c16_i32_116 : i32 to vector<1x256xi32>
    %154 = arith.cmpi slt, %152, %153 : vector<1x256xi32>
    %155 = arith.andi %150, %154 : vector<1x256xi1>
    %c1_i32_117 = arith.constant 1 : i32
    %156 = vector.broadcast %c1_i32_117 : i32 to vector<1x256xi32>
    %157 = arith.addi %39, %156 : vector<1x256xi32>
    %c0_i32_118 = arith.constant 0 : i32
    %158 = vector.broadcast %c0_i32_118 : i32 to vector<1x256xi32>
    %159 = arith.cmpi sge, %157, %158 : vector<1x256xi32>
    %c1_i32_119 = arith.constant 1 : i32
    %160 = vector.broadcast %c1_i32_119 : i32 to vector<1x256xi32>
    %161 = arith.addi %39, %160 : vector<1x256xi32>
    %c16_i32_120 = arith.constant 16 : i32
    %162 = vector.broadcast %c16_i32_120 : i32 to vector<1x256xi32>
    %163 = arith.cmpi slt, %161, %162 : vector<1x256xi32>
    %164 = arith.andi %159, %163 : vector<1x256xi1>
    %c-1_i32_121 = arith.constant -1 : i32
    %165 = vector.broadcast %c-1_i32_121 : i32 to vector<1x256xi32>
    %166 = arith.addi %41, %165 : vector<1x256xi32>
    %c0_i32_122 = arith.constant 0 : i32
    %167 = vector.broadcast %c0_i32_122 : i32 to vector<1x256xi32>
    %168 = arith.cmpi sge, %166, %167 : vector<1x256xi32>
    %169 = arith.andi %164, %168 : vector<1x256xi1>
    %c-1_i32_123 = arith.constant -1 : i32
    %170 = vector.broadcast %c-1_i32_123 : i32 to vector<1x256xi32>
    %171 = arith.addi %41, %170 : vector<1x256xi32>
    %c16_i32_124 = arith.constant 16 : i32
    %172 = vector.broadcast %c16_i32_124 : i32 to vector<1x256xi32>
    %173 = arith.cmpi slt, %171, %172 : vector<1x256xi32>
    %174 = arith.andi %169, %173 : vector<1x256xi1>
    %c1_i32_125 = arith.constant 1 : i32
    %175 = vector.broadcast %c1_i32_125 : i32 to vector<1x256xi32>
    %176 = arith.addi %39, %175 : vector<1x256xi32>
    %c0_i32_126 = arith.constant 0 : i32
    %177 = vector.broadcast %c0_i32_126 : i32 to vector<1x256xi32>
    %178 = arith.cmpi sge, %176, %177 : vector<1x256xi32>
    %c1_i32_127 = arith.constant 1 : i32
    %179 = vector.broadcast %c1_i32_127 : i32 to vector<1x256xi32>
    %180 = arith.addi %39, %179 : vector<1x256xi32>
    %c16_i32_128 = arith.constant 16 : i32
    %181 = vector.broadcast %c16_i32_128 : i32 to vector<1x256xi32>
    %182 = arith.cmpi slt, %180, %181 : vector<1x256xi32>
    %183 = arith.andi %178, %182 : vector<1x256xi1>
    %c0_i32_129 = arith.constant 0 : i32
    %184 = vector.broadcast %c0_i32_129 : i32 to vector<1x256xi32>
    %185 = arith.addi %41, %184 : vector<1x256xi32>
    %c0_i32_130 = arith.constant 0 : i32
    %186 = vector.broadcast %c0_i32_130 : i32 to vector<1x256xi32>
    %187 = arith.cmpi sge, %185, %186 : vector<1x256xi32>
    %188 = arith.andi %183, %187 : vector<1x256xi1>
    %c0_i32_131 = arith.constant 0 : i32
    %189 = vector.broadcast %c0_i32_131 : i32 to vector<1x256xi32>
    %190 = arith.addi %41, %189 : vector<1x256xi32>
    %c16_i32_132 = arith.constant 16 : i32
    %191 = vector.broadcast %c16_i32_132 : i32 to vector<1x256xi32>
    %192 = arith.cmpi slt, %190, %191 : vector<1x256xi32>
    %193 = arith.andi %188, %192 : vector<1x256xi1>
    %c1_i32_133 = arith.constant 1 : i32
    %194 = vector.broadcast %c1_i32_133 : i32 to vector<1x256xi32>
    %195 = arith.addi %39, %194 : vector<1x256xi32>
    %c0_i32_134 = arith.constant 0 : i32
    %196 = vector.broadcast %c0_i32_134 : i32 to vector<1x256xi32>
    %197 = arith.cmpi sge, %195, %196 : vector<1x256xi32>
    %c1_i32_135 = arith.constant 1 : i32
    %198 = vector.broadcast %c1_i32_135 : i32 to vector<1x256xi32>
    %199 = arith.addi %39, %198 : vector<1x256xi32>
    %c16_i32_136 = arith.constant 16 : i32
    %200 = vector.broadcast %c16_i32_136 : i32 to vector<1x256xi32>
    %201 = arith.cmpi slt, %199, %200 : vector<1x256xi32>
    %202 = arith.andi %197, %201 : vector<1x256xi1>
    %c1_i32_137 = arith.constant 1 : i32
    %203 = vector.broadcast %c1_i32_137 : i32 to vector<1x256xi32>
    %204 = arith.addi %41, %203 : vector<1x256xi32>
    %c0_i32_138 = arith.constant 0 : i32
    %205 = vector.broadcast %c0_i32_138 : i32 to vector<1x256xi32>
    %206 = arith.cmpi sge, %204, %205 : vector<1x256xi32>
    %207 = arith.andi %202, %206 : vector<1x256xi1>
    %c1_i32_139 = arith.constant 1 : i32
    %208 = vector.broadcast %c1_i32_139 : i32 to vector<1x256xi32>
    %209 = arith.addi %41, %208 : vector<1x256xi32>
    %c16_i32_140 = arith.constant 16 : i32
    %210 = vector.broadcast %c16_i32_140 : i32 to vector<1x256xi32>
    %211 = arith.cmpi slt, %209, %210 : vector<1x256xi32>
    %212 = arith.andi %207, %211 : vector<1x256xi1>
    %c-2_i32 = arith.constant -2 : i32
    %213 = vector.broadcast %c-2_i32 : i32 to vector<1x256xi32>
    %214 = arith.addi %39, %213 : vector<1x256xi32>
    %c0_i32_141 = arith.constant 0 : i32
    %215 = vector.broadcast %c0_i32_141 : i32 to vector<1x256xi32>
    %216 = arith.cmpi sge, %214, %215 : vector<1x256xi32>
    %c-2_i32_142 = arith.constant -2 : i32
    %217 = vector.broadcast %c-2_i32_142 : i32 to vector<1x256xi32>
    %218 = arith.addi %39, %217 : vector<1x256xi32>
    %c16_i32_143 = arith.constant 16 : i32
    %219 = vector.broadcast %c16_i32_143 : i32 to vector<1x256xi32>
    %220 = arith.cmpi slt, %218, %219 : vector<1x256xi32>
    %221 = arith.andi %216, %220 : vector<1x256xi1>
    %c-2_i32_144 = arith.constant -2 : i32
    %222 = vector.broadcast %c-2_i32_144 : i32 to vector<1x256xi32>
    %223 = arith.addi %41, %222 : vector<1x256xi32>
    %c0_i32_145 = arith.constant 0 : i32
    %224 = vector.broadcast %c0_i32_145 : i32 to vector<1x256xi32>
    %225 = arith.cmpi sge, %223, %224 : vector<1x256xi32>
    %226 = arith.andi %221, %225 : vector<1x256xi1>
    %c-2_i32_146 = arith.constant -2 : i32
    %227 = vector.broadcast %c-2_i32_146 : i32 to vector<1x256xi32>
    %228 = arith.addi %41, %227 : vector<1x256xi32>
    %c16_i32_147 = arith.constant 16 : i32
    %229 = vector.broadcast %c16_i32_147 : i32 to vector<1x256xi32>
    %230 = arith.cmpi slt, %228, %229 : vector<1x256xi32>
    %231 = arith.andi %226, %230 : vector<1x256xi1>
    %c-2_i32_148 = arith.constant -2 : i32
    %232 = vector.broadcast %c-2_i32_148 : i32 to vector<1x256xi32>
    %233 = arith.addi %39, %232 : vector<1x256xi32>
    %c0_i32_149 = arith.constant 0 : i32
    %234 = vector.broadcast %c0_i32_149 : i32 to vector<1x256xi32>
    %235 = arith.cmpi sge, %233, %234 : vector<1x256xi32>
    %c-2_i32_150 = arith.constant -2 : i32
    %236 = vector.broadcast %c-2_i32_150 : i32 to vector<1x256xi32>
    %237 = arith.addi %39, %236 : vector<1x256xi32>
    %c16_i32_151 = arith.constant 16 : i32
    %238 = vector.broadcast %c16_i32_151 : i32 to vector<1x256xi32>
    %239 = arith.cmpi slt, %237, %238 : vector<1x256xi32>
    %240 = arith.andi %235, %239 : vector<1x256xi1>
    %c0_i32_152 = arith.constant 0 : i32
    %241 = vector.broadcast %c0_i32_152 : i32 to vector<1x256xi32>
    %242 = arith.addi %41, %241 : vector<1x256xi32>
    %c0_i32_153 = arith.constant 0 : i32
    %243 = vector.broadcast %c0_i32_153 : i32 to vector<1x256xi32>
    %244 = arith.cmpi sge, %242, %243 : vector<1x256xi32>
    %245 = arith.andi %240, %244 : vector<1x256xi1>
    %c0_i32_154 = arith.constant 0 : i32
    %246 = vector.broadcast %c0_i32_154 : i32 to vector<1x256xi32>
    %247 = arith.addi %41, %246 : vector<1x256xi32>
    %c16_i32_155 = arith.constant 16 : i32
    %248 = vector.broadcast %c16_i32_155 : i32 to vector<1x256xi32>
    %249 = arith.cmpi slt, %247, %248 : vector<1x256xi32>
    %250 = arith.andi %245, %249 : vector<1x256xi1>
    %c-2_i32_156 = arith.constant -2 : i32
    %251 = vector.broadcast %c-2_i32_156 : i32 to vector<1x256xi32>
    %252 = arith.addi %39, %251 : vector<1x256xi32>
    %c0_i32_157 = arith.constant 0 : i32
    %253 = vector.broadcast %c0_i32_157 : i32 to vector<1x256xi32>
    %254 = arith.cmpi sge, %252, %253 : vector<1x256xi32>
    %c-2_i32_158 = arith.constant -2 : i32
    %255 = vector.broadcast %c-2_i32_158 : i32 to vector<1x256xi32>
    %256 = arith.addi %39, %255 : vector<1x256xi32>
    %c16_i32_159 = arith.constant 16 : i32
    %257 = vector.broadcast %c16_i32_159 : i32 to vector<1x256xi32>
    %258 = arith.cmpi slt, %256, %257 : vector<1x256xi32>
    %259 = arith.andi %254, %258 : vector<1x256xi1>
    %c2_i32 = arith.constant 2 : i32
    %260 = vector.broadcast %c2_i32 : i32 to vector<1x256xi32>
    %261 = arith.addi %41, %260 : vector<1x256xi32>
    %c0_i32_160 = arith.constant 0 : i32
    %262 = vector.broadcast %c0_i32_160 : i32 to vector<1x256xi32>
    %263 = arith.cmpi sge, %261, %262 : vector<1x256xi32>
    %264 = arith.andi %259, %263 : vector<1x256xi1>
    %c2_i32_161 = arith.constant 2 : i32
    %265 = vector.broadcast %c2_i32_161 : i32 to vector<1x256xi32>
    %266 = arith.addi %41, %265 : vector<1x256xi32>
    %c16_i32_162 = arith.constant 16 : i32
    %267 = vector.broadcast %c16_i32_162 : i32 to vector<1x256xi32>
    %268 = arith.cmpi slt, %266, %267 : vector<1x256xi32>
    %269 = arith.andi %264, %268 : vector<1x256xi1>
    %c0_i32_163 = arith.constant 0 : i32
    %270 = vector.broadcast %c0_i32_163 : i32 to vector<1x256xi32>
    %271 = arith.addi %39, %270 : vector<1x256xi32>
    %c0_i32_164 = arith.constant 0 : i32
    %272 = vector.broadcast %c0_i32_164 : i32 to vector<1x256xi32>
    %273 = arith.cmpi sge, %271, %272 : vector<1x256xi32>
    %c0_i32_165 = arith.constant 0 : i32
    %274 = vector.broadcast %c0_i32_165 : i32 to vector<1x256xi32>
    %275 = arith.addi %39, %274 : vector<1x256xi32>
    %c16_i32_166 = arith.constant 16 : i32
    %276 = vector.broadcast %c16_i32_166 : i32 to vector<1x256xi32>
    %277 = arith.cmpi slt, %275, %276 : vector<1x256xi32>
    %278 = arith.andi %273, %277 : vector<1x256xi1>
    %c-2_i32_167 = arith.constant -2 : i32
    %279 = vector.broadcast %c-2_i32_167 : i32 to vector<1x256xi32>
    %280 = arith.addi %41, %279 : vector<1x256xi32>
    %c0_i32_168 = arith.constant 0 : i32
    %281 = vector.broadcast %c0_i32_168 : i32 to vector<1x256xi32>
    %282 = arith.cmpi sge, %280, %281 : vector<1x256xi32>
    %283 = arith.andi %278, %282 : vector<1x256xi1>
    %c-2_i32_169 = arith.constant -2 : i32
    %284 = vector.broadcast %c-2_i32_169 : i32 to vector<1x256xi32>
    %285 = arith.addi %41, %284 : vector<1x256xi32>
    %c16_i32_170 = arith.constant 16 : i32
    %286 = vector.broadcast %c16_i32_170 : i32 to vector<1x256xi32>
    %287 = arith.cmpi slt, %285, %286 : vector<1x256xi32>
    %288 = arith.andi %283, %287 : vector<1x256xi1>
    %c0_i32_171 = arith.constant 0 : i32
    %289 = vector.broadcast %c0_i32_171 : i32 to vector<1x256xi32>
    %290 = arith.addi %39, %289 : vector<1x256xi32>
    %c0_i32_172 = arith.constant 0 : i32
    %291 = vector.broadcast %c0_i32_172 : i32 to vector<1x256xi32>
    %292 = arith.cmpi sge, %290, %291 : vector<1x256xi32>
    %c0_i32_173 = arith.constant 0 : i32
    %293 = vector.broadcast %c0_i32_173 : i32 to vector<1x256xi32>
    %294 = arith.addi %39, %293 : vector<1x256xi32>
    %c16_i32_174 = arith.constant 16 : i32
    %295 = vector.broadcast %c16_i32_174 : i32 to vector<1x256xi32>
    %296 = arith.cmpi slt, %294, %295 : vector<1x256xi32>
    %297 = arith.andi %292, %296 : vector<1x256xi1>
    %c0_i32_175 = arith.constant 0 : i32
    %298 = vector.broadcast %c0_i32_175 : i32 to vector<1x256xi32>
    %299 = arith.addi %41, %298 : vector<1x256xi32>
    %c0_i32_176 = arith.constant 0 : i32
    %300 = vector.broadcast %c0_i32_176 : i32 to vector<1x256xi32>
    %301 = arith.cmpi sge, %299, %300 : vector<1x256xi32>
    %302 = arith.andi %297, %301 : vector<1x256xi1>
    %c0_i32_177 = arith.constant 0 : i32
    %303 = vector.broadcast %c0_i32_177 : i32 to vector<1x256xi32>
    %304 = arith.addi %41, %303 : vector<1x256xi32>
    %c16_i32_178 = arith.constant 16 : i32
    %305 = vector.broadcast %c16_i32_178 : i32 to vector<1x256xi32>
    %306 = arith.cmpi slt, %304, %305 : vector<1x256xi32>
    %307 = arith.andi %302, %306 : vector<1x256xi1>
    %c0_i32_179 = arith.constant 0 : i32
    %308 = vector.broadcast %c0_i32_179 : i32 to vector<1x256xi32>
    %309 = arith.addi %39, %308 : vector<1x256xi32>
    %c0_i32_180 = arith.constant 0 : i32
    %310 = vector.broadcast %c0_i32_180 : i32 to vector<1x256xi32>
    %311 = arith.cmpi sge, %309, %310 : vector<1x256xi32>
    %c0_i32_181 = arith.constant 0 : i32
    %312 = vector.broadcast %c0_i32_181 : i32 to vector<1x256xi32>
    %313 = arith.addi %39, %312 : vector<1x256xi32>
    %c16_i32_182 = arith.constant 16 : i32
    %314 = vector.broadcast %c16_i32_182 : i32 to vector<1x256xi32>
    %315 = arith.cmpi slt, %313, %314 : vector<1x256xi32>
    %316 = arith.andi %311, %315 : vector<1x256xi1>
    %c2_i32_183 = arith.constant 2 : i32
    %317 = vector.broadcast %c2_i32_183 : i32 to vector<1x256xi32>
    %318 = arith.addi %41, %317 : vector<1x256xi32>
    %c0_i32_184 = arith.constant 0 : i32
    %319 = vector.broadcast %c0_i32_184 : i32 to vector<1x256xi32>
    %320 = arith.cmpi sge, %318, %319 : vector<1x256xi32>
    %321 = arith.andi %316, %320 : vector<1x256xi1>
    %c2_i32_185 = arith.constant 2 : i32
    %322 = vector.broadcast %c2_i32_185 : i32 to vector<1x256xi32>
    %323 = arith.addi %41, %322 : vector<1x256xi32>
    %c16_i32_186 = arith.constant 16 : i32
    %324 = vector.broadcast %c16_i32_186 : i32 to vector<1x256xi32>
    %325 = arith.cmpi slt, %323, %324 : vector<1x256xi32>
    %326 = arith.andi %321, %325 : vector<1x256xi1>
    %c2_i32_187 = arith.constant 2 : i32
    %327 = vector.broadcast %c2_i32_187 : i32 to vector<1x256xi32>
    %328 = arith.addi %39, %327 : vector<1x256xi32>
    %c0_i32_188 = arith.constant 0 : i32
    %329 = vector.broadcast %c0_i32_188 : i32 to vector<1x256xi32>
    %330 = arith.cmpi sge, %328, %329 : vector<1x256xi32>
    %c2_i32_189 = arith.constant 2 : i32
    %331 = vector.broadcast %c2_i32_189 : i32 to vector<1x256xi32>
    %332 = arith.addi %39, %331 : vector<1x256xi32>
    %c16_i32_190 = arith.constant 16 : i32
    %333 = vector.broadcast %c16_i32_190 : i32 to vector<1x256xi32>
    %334 = arith.cmpi slt, %332, %333 : vector<1x256xi32>
    %335 = arith.andi %330, %334 : vector<1x256xi1>
    %c-2_i32_191 = arith.constant -2 : i32
    %336 = vector.broadcast %c-2_i32_191 : i32 to vector<1x256xi32>
    %337 = arith.addi %41, %336 : vector<1x256xi32>
    %c0_i32_192 = arith.constant 0 : i32
    %338 = vector.broadcast %c0_i32_192 : i32 to vector<1x256xi32>
    %339 = arith.cmpi sge, %337, %338 : vector<1x256xi32>
    %340 = arith.andi %335, %339 : vector<1x256xi1>
    %c-2_i32_193 = arith.constant -2 : i32
    %341 = vector.broadcast %c-2_i32_193 : i32 to vector<1x256xi32>
    %342 = arith.addi %41, %341 : vector<1x256xi32>
    %c16_i32_194 = arith.constant 16 : i32
    %343 = vector.broadcast %c16_i32_194 : i32 to vector<1x256xi32>
    %344 = arith.cmpi slt, %342, %343 : vector<1x256xi32>
    %345 = arith.andi %340, %344 : vector<1x256xi1>
    %c2_i32_195 = arith.constant 2 : i32
    %346 = vector.broadcast %c2_i32_195 : i32 to vector<1x256xi32>
    %347 = arith.addi %39, %346 : vector<1x256xi32>
    %c0_i32_196 = arith.constant 0 : i32
    %348 = vector.broadcast %c0_i32_196 : i32 to vector<1x256xi32>
    %349 = arith.cmpi sge, %347, %348 : vector<1x256xi32>
    %c2_i32_197 = arith.constant 2 : i32
    %350 = vector.broadcast %c2_i32_197 : i32 to vector<1x256xi32>
    %351 = arith.addi %39, %350 : vector<1x256xi32>
    %c16_i32_198 = arith.constant 16 : i32
    %352 = vector.broadcast %c16_i32_198 : i32 to vector<1x256xi32>
    %353 = arith.cmpi slt, %351, %352 : vector<1x256xi32>
    %354 = arith.andi %349, %353 : vector<1x256xi1>
    %c0_i32_199 = arith.constant 0 : i32
    %355 = vector.broadcast %c0_i32_199 : i32 to vector<1x256xi32>
    %356 = arith.addi %41, %355 : vector<1x256xi32>
    %c0_i32_200 = arith.constant 0 : i32
    %357 = vector.broadcast %c0_i32_200 : i32 to vector<1x256xi32>
    %358 = arith.cmpi sge, %356, %357 : vector<1x256xi32>
    %359 = arith.andi %354, %358 : vector<1x256xi1>
    %c0_i32_201 = arith.constant 0 : i32
    %360 = vector.broadcast %c0_i32_201 : i32 to vector<1x256xi32>
    %361 = arith.addi %41, %360 : vector<1x256xi32>
    %c16_i32_202 = arith.constant 16 : i32
    %362 = vector.broadcast %c16_i32_202 : i32 to vector<1x256xi32>
    %363 = arith.cmpi slt, %361, %362 : vector<1x256xi32>
    %364 = arith.andi %359, %363 : vector<1x256xi1>
    %c2_i32_203 = arith.constant 2 : i32
    %365 = vector.broadcast %c2_i32_203 : i32 to vector<1x256xi32>
    %366 = arith.addi %39, %365 : vector<1x256xi32>
    %c0_i32_204 = arith.constant 0 : i32
    %367 = vector.broadcast %c0_i32_204 : i32 to vector<1x256xi32>
    %368 = arith.cmpi sge, %366, %367 : vector<1x256xi32>
    %c2_i32_205 = arith.constant 2 : i32
    %369 = vector.broadcast %c2_i32_205 : i32 to vector<1x256xi32>
    %370 = arith.addi %39, %369 : vector<1x256xi32>
    %c16_i32_206 = arith.constant 16 : i32
    %371 = vector.broadcast %c16_i32_206 : i32 to vector<1x256xi32>
    %372 = arith.cmpi slt, %370, %371 : vector<1x256xi32>
    %373 = arith.andi %368, %372 : vector<1x256xi1>
    %c2_i32_207 = arith.constant 2 : i32
    %374 = vector.broadcast %c2_i32_207 : i32 to vector<1x256xi32>
    %375 = arith.addi %41, %374 : vector<1x256xi32>
    %c0_i32_208 = arith.constant 0 : i32
    %376 = vector.broadcast %c0_i32_208 : i32 to vector<1x256xi32>
    %377 = arith.cmpi sge, %375, %376 : vector<1x256xi32>
    %378 = arith.andi %373, %377 : vector<1x256xi1>
    %c2_i32_209 = arith.constant 2 : i32
    %379 = vector.broadcast %c2_i32_209 : i32 to vector<1x256xi32>
    %380 = arith.addi %41, %379 : vector<1x256xi32>
    %c16_i32_210 = arith.constant 16 : i32
    %381 = vector.broadcast %c16_i32_210 : i32 to vector<1x256xi32>
    %382 = arith.cmpi slt, %380, %381 : vector<1x256xi32>
    %383 = arith.andi %378, %382 : vector<1x256xi1>
    %c0_211 = arith.constant 0 : index
    %c0_212 = arith.constant 0 : index
    %c0_213 = arith.constant 0 : index
    %384 = vector.load %arg1[%c0_211, %c0_212, %c0_213] : memref<1x8x256xf32, #tpu.memory_space<vmem>>, vector<1x8x256xf32>
    %385 = vector.shape_cast %384 : vector<1x8x256xf32> to vector<8x256xf32>
    %386 = vector.shape_cast %1 : vector<4x1xf32> to vector<4x1xf32>
    %387 = vector.broadcast %386 : vector<4x1xf32> to vector<4x256xf32>
    %388 = vector.extract_strided_slice %0 {offsets = [0, 0], sizes = [4, 1], strides = [1, 1]} : vector<4x8xf32> to vector<4x1xf32>
    %389 = vector.extract_strided_slice %385 {offsets = [0, 0], sizes = [1, 256], strides = [1, 1]} : vector<8x256xf32> to vector<1x256xf32>
    %390 = vector.broadcast %388 : vector<4x1xf32> to vector<4x256xf32>
    %391 = vector.broadcast %389 : vector<1x256xf32> to vector<4x256xf32>
    %392 = arith.mulf %390, %391 : vector<4x256xf32>
    %393 = arith.addf %387, %392 : vector<4x256xf32>
    %394 = vector.extract_strided_slice %0 {offsets = [0, 1], sizes = [4, 1], strides = [1, 1]} : vector<4x8xf32> to vector<4x1xf32>
    %395 = vector.extract_strided_slice %385 {offsets = [1, 0], sizes = [1, 256], strides = [1, 1]} : vector<8x256xf32> to vector<1x256xf32>
    %396 = vector.broadcast %394 : vector<4x1xf32> to vector<4x256xf32>
    %397 = vector.broadcast %395 : vector<1x256xf32> to vector<4x256xf32>
    %398 = arith.mulf %396, %397 : vector<4x256xf32>
    %399 = arith.addf %393, %398 : vector<4x256xf32>
    %400 = vector.extract_strided_slice %0 {offsets = [0, 2], sizes = [4, 1], strides = [1, 1]} : vector<4x8xf32> to vector<4x1xf32>
    %401 = vector.extract_strided_slice %385 {offsets = [2, 0], sizes = [1, 256], strides = [1, 1]} : vector<8x256xf32> to vector<1x256xf32>
    %402 = vector.broadcast %400 : vector<4x1xf32> to vector<4x256xf32>
    %403 = vector.broadcast %401 : vector<1x256xf32> to vector<4x256xf32>
    %404 = arith.mulf %402, %403 : vector<4x256xf32>
    %405 = arith.addf %399, %404 : vector<4x256xf32>
    %406 = vector.extract_strided_slice %0 {offsets = [0, 3], sizes = [4, 1], strides = [1, 1]} : vector<4x8xf32> to vector<4x1xf32>
    %407 = vector.extract_strided_slice %385 {offsets = [3, 0], sizes = [1, 256], strides = [1, 1]} : vector<8x256xf32> to vector<1x256xf32>
    %408 = vector.broadcast %406 : vector<4x1xf32> to vector<4x256xf32>
    %409 = vector.broadcast %407 : vector<1x256xf32> to vector<4x256xf32>
    %410 = arith.mulf %408, %409 : vector<4x256xf32>
    %411 = arith.addf %405, %410 : vector<4x256xf32>
    %412 = vector.extract_strided_slice %0 {offsets = [0, 4], sizes = [4, 1], strides = [1, 1]} : vector<4x8xf32> to vector<4x1xf32>
    %413 = vector.extract_strided_slice %385 {offsets = [4, 0], sizes = [1, 256], strides = [1, 1]} : vector<8x256xf32> to vector<1x256xf32>
    %414 = vector.broadcast %412 : vector<4x1xf32> to vector<4x256xf32>
    %415 = vector.broadcast %413 : vector<1x256xf32> to vector<4x256xf32>
    %416 = arith.mulf %414, %415 : vector<4x256xf32>
    %417 = arith.addf %411, %416 : vector<4x256xf32>
    %418 = vector.extract_strided_slice %0 {offsets = [0, 5], sizes = [4, 1], strides = [1, 1]} : vector<4x8xf32> to vector<4x1xf32>
    %419 = vector.extract_strided_slice %385 {offsets = [5, 0], sizes = [1, 256], strides = [1, 1]} : vector<8x256xf32> to vector<1x256xf32>
    %420 = vector.broadcast %418 : vector<4x1xf32> to vector<4x256xf32>
    %421 = vector.broadcast %419 : vector<1x256xf32> to vector<4x256xf32>
    %422 = arith.mulf %420, %421 : vector<4x256xf32>
    %423 = arith.addf %417, %422 : vector<4x256xf32>
    %424 = vector.extract_strided_slice %0 {offsets = [0, 6], sizes = [4, 1], strides = [1, 1]} : vector<4x8xf32> to vector<4x1xf32>
    %425 = vector.extract_strided_slice %385 {offsets = [6, 0], sizes = [1, 256], strides = [1, 1]} : vector<8x256xf32> to vector<1x256xf32>
    %426 = vector.broadcast %424 : vector<4x1xf32> to vector<4x256xf32>
    %427 = vector.broadcast %425 : vector<1x256xf32> to vector<4x256xf32>
    %428 = arith.mulf %426, %427 : vector<4x256xf32>
    %429 = arith.addf %423, %428 : vector<4x256xf32>
    %430 = vector.extract_strided_slice %0 {offsets = [0, 7], sizes = [4, 1], strides = [1, 1]} : vector<4x8xf32> to vector<4x1xf32>
    %431 = vector.extract_strided_slice %385 {offsets = [7, 0], sizes = [1, 256], strides = [1, 1]} : vector<8x256xf32> to vector<1x256xf32>
    %432 = vector.broadcast %430 : vector<4x1xf32> to vector<4x256xf32>
    %433 = vector.broadcast %431 : vector<1x256xf32> to vector<4x256xf32>
    %434 = arith.mulf %432, %433 : vector<4x256xf32>
    %435 = arith.addf %429, %434 : vector<4x256xf32>
    %cst = arith.constant 0.000000e+00 : f32
    %436 = vector.broadcast %cst : f32 to vector<4x256xf32>
    %437 = arith.cmpf ogt, %435, %436 : vector<4x256xf32>
    %cst_214 = arith.constant 0.00999999977 : f32
    %438 = vector.broadcast %cst_214 : f32 to vector<4x256xf32>
    %439 = arith.mulf %438, %435 : vector<4x256xf32>
    %440 = arith.select %437, %435, %439 : vector<4x256xi1>, vector<4x256xf32>
    %441 = vector.shape_cast %3 : vector<4x1xf32> to vector<4x1xf32>
    %442 = vector.broadcast %441 : vector<4x1xf32> to vector<4x256xf32>
    %c17_i32 = arith.constant 17 : i32
    %443 = tpu.dynamic_rotate %440 by %c17_i32 dim 1 : vector<4x256xf32>, i32 -> vector<4x256xf32>
    %cst_215 = arith.constant 0.000000e+00 : f32
    %444 = vector.shape_cast %60 : vector<1x256xi1> to vector<1x256xi1>
    %445 = vector.broadcast %444 : vector<1x256xi1> to vector<4x256xi1>
    %446 = vector.broadcast %cst_215 : f32 to vector<4x256xf32>
    %447 = arith.select %445, %443, %446 : vector<4x256xi1>, vector<4x256xf32>
    %448 = vector.extract_strided_slice %2 {offsets = [0, 0], sizes = [4, 1], strides = [1, 1]} : vector<4x9xf32> to vector<4x1xf32>
    %449 = vector.broadcast %448 : vector<4x1xf32> to vector<4x256xf32>
    %450 = arith.mulf %447, %449 : vector<4x256xf32>
    %451 = arith.addf %442, %450 : vector<4x256xf32>
    %c16_i32_216 = arith.constant 16 : i32
    %452 = tpu.dynamic_rotate %440 by %c16_i32_216 dim 1 : vector<4x256xf32>, i32 -> vector<4x256xf32>
    %cst_217 = arith.constant 0.000000e+00 : f32
    %453 = vector.shape_cast %79 : vector<1x256xi1> to vector<1x256xi1>
    %454 = vector.broadcast %453 : vector<1x256xi1> to vector<4x256xi1>
    %455 = vector.broadcast %cst_217 : f32 to vector<4x256xf32>
    %456 = arith.select %454, %452, %455 : vector<4x256xi1>, vector<4x256xf32>
    %457 = vector.extract_strided_slice %2 {offsets = [0, 1], sizes = [4, 1], strides = [1, 1]} : vector<4x9xf32> to vector<4x1xf32>
    %458 = vector.broadcast %457 : vector<4x1xf32> to vector<4x256xf32>
    %459 = arith.mulf %456, %458 : vector<4x256xf32>
    %460 = arith.addf %451, %459 : vector<4x256xf32>
    %c15_i32_218 = arith.constant 15 : i32
    %461 = tpu.dynamic_rotate %440 by %c15_i32_218 dim 1 : vector<4x256xf32>, i32 -> vector<4x256xf32>
    %cst_219 = arith.constant 0.000000e+00 : f32
    %462 = vector.shape_cast %98 : vector<1x256xi1> to vector<1x256xi1>
    %463 = vector.broadcast %462 : vector<1x256xi1> to vector<4x256xi1>
    %464 = vector.broadcast %cst_219 : f32 to vector<4x256xf32>
    %465 = arith.select %463, %461, %464 : vector<4x256xi1>, vector<4x256xf32>
    %466 = vector.extract_strided_slice %2 {offsets = [0, 2], sizes = [4, 1], strides = [1, 1]} : vector<4x9xf32> to vector<4x1xf32>
    %467 = vector.broadcast %466 : vector<4x1xf32> to vector<4x256xf32>
    %468 = arith.mulf %465, %467 : vector<4x256xf32>
    %469 = arith.addf %460, %468 : vector<4x256xf32>
    %c1_i32_220 = arith.constant 1 : i32
    %470 = tpu.dynamic_rotate %440 by %c1_i32_220 dim 1 : vector<4x256xf32>, i32 -> vector<4x256xf32>
    %cst_221 = arith.constant 0.000000e+00 : f32
    %471 = vector.shape_cast %117 : vector<1x256xi1> to vector<1x256xi1>
    %472 = vector.broadcast %471 : vector<1x256xi1> to vector<4x256xi1>
    %473 = vector.broadcast %cst_221 : f32 to vector<4x256xf32>
    %474 = arith.select %472, %470, %473 : vector<4x256xi1>, vector<4x256xf32>
    %475 = vector.extract_strided_slice %2 {offsets = [0, 3], sizes = [4, 1], strides = [1, 1]} : vector<4x9xf32> to vector<4x1xf32>
    %476 = vector.broadcast %475 : vector<4x1xf32> to vector<4x256xf32>
    %477 = arith.mulf %474, %476 : vector<4x256xf32>
    %478 = arith.addf %469, %477 : vector<4x256xf32>
    %cst_222 = arith.constant 0.000000e+00 : f32
    %479 = vector.shape_cast %136 : vector<1x256xi1> to vector<1x256xi1>
    %480 = vector.broadcast %479 : vector<1x256xi1> to vector<4x256xi1>
    %481 = vector.broadcast %cst_222 : f32 to vector<4x256xf32>
    %482 = arith.select %480, %440, %481 : vector<4x256xi1>, vector<4x256xf32>
    %483 = vector.extract_strided_slice %2 {offsets = [0, 4], sizes = [4, 1], strides = [1, 1]} : vector<4x9xf32> to vector<4x1xf32>
    %484 = vector.broadcast %483 : vector<4x1xf32> to vector<4x256xf32>
    %485 = arith.mulf %482, %484 : vector<4x256xf32>
    %486 = arith.addf %478, %485 : vector<4x256xf32>
    %c255_i32 = arith.constant 255 : i32
    %487 = tpu.dynamic_rotate %440 by %c255_i32 dim 1 : vector<4x256xf32>, i32 -> vector<4x256xf32>
    %cst_223 = arith.constant 0.000000e+00 : f32
    %488 = vector.shape_cast %155 : vector<1x256xi1> to vector<1x256xi1>
    %489 = vector.broadcast %488 : vector<1x256xi1> to vector<4x256xi1>
    %490 = vector.broadcast %cst_223 : f32 to vector<4x256xf32>
    %491 = arith.select %489, %487, %490 : vector<4x256xi1>, vector<4x256xf32>
    %492 = vector.extract_strided_slice %2 {offsets = [0, 5], sizes = [4, 1], strides = [1, 1]} : vector<4x9xf32> to vector<4x1xf32>
    %493 = vector.broadcast %492 : vector<4x1xf32> to vector<4x256xf32>
    %494 = arith.mulf %491, %493 : vector<4x256xf32>
    %495 = arith.addf %486, %494 : vector<4x256xf32>
    %c241_i32 = arith.constant 241 : i32
    %496 = tpu.dynamic_rotate %440 by %c241_i32 dim 1 : vector<4x256xf32>, i32 -> vector<4x256xf32>
    %cst_224 = arith.constant 0.000000e+00 : f32
    %497 = vector.shape_cast %174 : vector<1x256xi1> to vector<1x256xi1>
    %498 = vector.broadcast %497 : vector<1x256xi1> to vector<4x256xi1>
    %499 = vector.broadcast %cst_224 : f32 to vector<4x256xf32>
    %500 = arith.select %498, %496, %499 : vector<4x256xi1>, vector<4x256xf32>
    %501 = vector.extract_strided_slice %2 {offsets = [0, 6], sizes = [4, 1], strides = [1, 1]} : vector<4x9xf32> to vector<4x1xf32>
    %502 = vector.broadcast %501 : vector<4x1xf32> to vector<4x256xf32>
    %503 = arith.mulf %500, %502 : vector<4x256xf32>
    %504 = arith.addf %495, %503 : vector<4x256xf32>
    %c240_i32 = arith.constant 240 : i32
    %505 = tpu.dynamic_rotate %440 by %c240_i32 dim 1 : vector<4x256xf32>, i32 -> vector<4x256xf32>
    %cst_225 = arith.constant 0.000000e+00 : f32
    %506 = vector.shape_cast %193 : vector<1x256xi1> to vector<1x256xi1>
    %507 = vector.broadcast %506 : vector<1x256xi1> to vector<4x256xi1>
    %508 = vector.broadcast %cst_225 : f32 to vector<4x256xf32>
    %509 = arith.select %507, %505, %508 : vector<4x256xi1>, vector<4x256xf32>
    %510 = vector.extract_strided_slice %2 {offsets = [0, 7], sizes = [4, 1], strides = [1, 1]} : vector<4x9xf32> to vector<4x1xf32>
    %511 = vector.broadcast %510 : vector<4x1xf32> to vector<4x256xf32>
    %512 = arith.mulf %509, %511 : vector<4x256xf32>
    %513 = arith.addf %504, %512 : vector<4x256xf32>
    %c239_i32 = arith.constant 239 : i32
    %514 = tpu.dynamic_rotate %440 by %c239_i32 dim 1 : vector<4x256xf32>, i32 -> vector<4x256xf32>
    %cst_226 = arith.constant 0.000000e+00 : f32
    %515 = vector.shape_cast %212 : vector<1x256xi1> to vector<1x256xi1>
    %516 = vector.broadcast %515 : vector<1x256xi1> to vector<4x256xi1>
    %517 = vector.broadcast %cst_226 : f32 to vector<4x256xf32>
    %518 = arith.select %516, %514, %517 : vector<4x256xi1>, vector<4x256xf32>
    %519 = vector.extract_strided_slice %2 {offsets = [0, 8], sizes = [4, 1], strides = [1, 1]} : vector<4x9xf32> to vector<4x1xf32>
    %520 = vector.broadcast %519 : vector<4x1xf32> to vector<4x256xf32>
    %521 = arith.mulf %518, %520 : vector<4x256xf32>
    %522 = arith.addf %513, %521 : vector<4x256xf32>
    %cst_227 = arith.constant 0.000000e+00 : f32
    %523 = vector.broadcast %cst_227 : f32 to vector<4x256xf32>
    %524 = arith.cmpf ogt, %522, %523 : vector<4x256xf32>
    %cst_228 = arith.constant 0.00999999977 : f32
    %525 = vector.broadcast %cst_228 : f32 to vector<4x256xf32>
    %526 = arith.mulf %525, %522 : vector<4x256xf32>
    %527 = arith.select %524, %522, %526 : vector<4x256xi1>, vector<4x256xf32>
    %528 = vector.shape_cast %5 : vector<2x1xf32> to vector<2x1xf32>
    %529 = vector.broadcast %528 : vector<2x1xf32> to vector<2x256xf32>
    %530 = vector.extract_strided_slice %4 {offsets = [0, 0], sizes = [2, 1], strides = [1, 1]} : vector<2x4xf32> to vector<2x1xf32>
    %531 = vector.extract_strided_slice %527 {offsets = [0, 0], sizes = [1, 256], strides = [1, 1]} : vector<4x256xf32> to vector<1x256xf32>
    %532 = vector.broadcast %530 : vector<2x1xf32> to vector<2x256xf32>
    %533 = vector.broadcast %531 : vector<1x256xf32> to vector<2x256xf32>
    %534 = arith.mulf %532, %533 : vector<2x256xf32>
    %535 = arith.addf %529, %534 : vector<2x256xf32>
    %536 = vector.extract_strided_slice %4 {offsets = [0, 1], sizes = [2, 1], strides = [1, 1]} : vector<2x4xf32> to vector<2x1xf32>
    %537 = vector.extract_strided_slice %527 {offsets = [1, 0], sizes = [1, 256], strides = [1, 1]} : vector<4x256xf32> to vector<1x256xf32>
    %538 = vector.broadcast %536 : vector<2x1xf32> to vector<2x256xf32>
    %539 = vector.broadcast %537 : vector<1x256xf32> to vector<2x256xf32>
    %540 = arith.mulf %538, %539 : vector<2x256xf32>
    %541 = arith.addf %535, %540 : vector<2x256xf32>
    %542 = vector.extract_strided_slice %4 {offsets = [0, 2], sizes = [2, 1], strides = [1, 1]} : vector<2x4xf32> to vector<2x1xf32>
    %543 = vector.extract_strided_slice %527 {offsets = [2, 0], sizes = [1, 256], strides = [1, 1]} : vector<4x256xf32> to vector<1x256xf32>
    %544 = vector.broadcast %542 : vector<2x1xf32> to vector<2x256xf32>
    %545 = vector.broadcast %543 : vector<1x256xf32> to vector<2x256xf32>
    %546 = arith.mulf %544, %545 : vector<2x256xf32>
    %547 = arith.addf %541, %546 : vector<2x256xf32>
    %548 = vector.extract_strided_slice %4 {offsets = [0, 3], sizes = [2, 1], strides = [1, 1]} : vector<2x4xf32> to vector<2x1xf32>
    %549 = vector.extract_strided_slice %527 {offsets = [3, 0], sizes = [1, 256], strides = [1, 1]} : vector<4x256xf32> to vector<1x256xf32>
    %550 = vector.broadcast %548 : vector<2x1xf32> to vector<2x256xf32>
    %551 = vector.broadcast %549 : vector<1x256xf32> to vector<2x256xf32>
    %552 = arith.mulf %550, %551 : vector<2x256xf32>
    %553 = arith.addf %547, %552 : vector<2x256xf32>
    %cst_229 = arith.constant 0.000000e+00 : f32
    %554 = vector.broadcast %cst_229 : f32 to vector<2x256xf32>
    %555 = arith.cmpf ogt, %553, %554 : vector<2x256xf32>
    %cst_230 = arith.constant 0.00999999977 : f32
    %556 = vector.broadcast %cst_230 : f32 to vector<2x256xf32>
    %557 = arith.mulf %556, %553 : vector<2x256xf32>
    %558 = arith.select %555, %553, %557 : vector<2x256xi1>, vector<2x256xf32>
    %559 = vector.shape_cast %7 : vector<2x1xf32> to vector<2x1xf32>
    %560 = vector.broadcast %559 : vector<2x1xf32> to vector<2x256xf32>
    %c17_i32_231 = arith.constant 17 : i32
    %561 = tpu.dynamic_rotate %558 by %c17_i32_231 dim 1 : vector<2x256xf32>, i32 -> vector<2x256xf32>
    %cst_232 = arith.constant 0.000000e+00 : f32
    %562 = vector.shape_cast %60 : vector<1x256xi1> to vector<1x256xi1>
    %563 = vector.broadcast %562 : vector<1x256xi1> to vector<2x256xi1>
    %564 = vector.broadcast %cst_232 : f32 to vector<2x256xf32>
    %565 = arith.select %563, %561, %564 : vector<2x256xi1>, vector<2x256xf32>
    %566 = vector.extract_strided_slice %6 {offsets = [0, 0], sizes = [2, 1], strides = [1, 1]} : vector<2x9xf32> to vector<2x1xf32>
    %567 = vector.broadcast %566 : vector<2x1xf32> to vector<2x256xf32>
    %568 = arith.mulf %565, %567 : vector<2x256xf32>
    %569 = arith.addf %560, %568 : vector<2x256xf32>
    %c16_i32_233 = arith.constant 16 : i32
    %570 = tpu.dynamic_rotate %558 by %c16_i32_233 dim 1 : vector<2x256xf32>, i32 -> vector<2x256xf32>
    %cst_234 = arith.constant 0.000000e+00 : f32
    %571 = vector.shape_cast %79 : vector<1x256xi1> to vector<1x256xi1>
    %572 = vector.broadcast %571 : vector<1x256xi1> to vector<2x256xi1>
    %573 = vector.broadcast %cst_234 : f32 to vector<2x256xf32>
    %574 = arith.select %572, %570, %573 : vector<2x256xi1>, vector<2x256xf32>
    %575 = vector.extract_strided_slice %6 {offsets = [0, 1], sizes = [2, 1], strides = [1, 1]} : vector<2x9xf32> to vector<2x1xf32>
    %576 = vector.broadcast %575 : vector<2x1xf32> to vector<2x256xf32>
    %577 = arith.mulf %574, %576 : vector<2x256xf32>
    %578 = arith.addf %569, %577 : vector<2x256xf32>
    %c15_i32_235 = arith.constant 15 : i32
    %579 = tpu.dynamic_rotate %558 by %c15_i32_235 dim 1 : vector<2x256xf32>, i32 -> vector<2x256xf32>
    %cst_236 = arith.constant 0.000000e+00 : f32
    %580 = vector.shape_cast %98 : vector<1x256xi1> to vector<1x256xi1>
    %581 = vector.broadcast %580 : vector<1x256xi1> to vector<2x256xi1>
    %582 = vector.broadcast %cst_236 : f32 to vector<2x256xf32>
    %583 = arith.select %581, %579, %582 : vector<2x256xi1>, vector<2x256xf32>
    %584 = vector.extract_strided_slice %6 {offsets = [0, 2], sizes = [2, 1], strides = [1, 1]} : vector<2x9xf32> to vector<2x1xf32>
    %585 = vector.broadcast %584 : vector<2x1xf32> to vector<2x256xf32>
    %586 = arith.mulf %583, %585 : vector<2x256xf32>
    %587 = arith.addf %578, %586 : vector<2x256xf32>
    %c1_i32_237 = arith.constant 1 : i32
    %588 = tpu.dynamic_rotate %558 by %c1_i32_237 dim 1 : vector<2x256xf32>, i32 -> vector<2x256xf32>
    %cst_238 = arith.constant 0.000000e+00 : f32
    %589 = vector.shape_cast %117 : vector<1x256xi1> to vector<1x256xi1>
    %590 = vector.broadcast %589 : vector<1x256xi1> to vector<2x256xi1>
    %591 = vector.broadcast %cst_238 : f32 to vector<2x256xf32>
    %592 = arith.select %590, %588, %591 : vector<2x256xi1>, vector<2x256xf32>
    %593 = vector.extract_strided_slice %6 {offsets = [0, 3], sizes = [2, 1], strides = [1, 1]} : vector<2x9xf32> to vector<2x1xf32>
    %594 = vector.broadcast %593 : vector<2x1xf32> to vector<2x256xf32>
    %595 = arith.mulf %592, %594 : vector<2x256xf32>
    %596 = arith.addf %587, %595 : vector<2x256xf32>
    %cst_239 = arith.constant 0.000000e+00 : f32
    %597 = vector.shape_cast %136 : vector<1x256xi1> to vector<1x256xi1>
    %598 = vector.broadcast %597 : vector<1x256xi1> to vector<2x256xi1>
    %599 = vector.broadcast %cst_239 : f32 to vector<2x256xf32>
    %600 = arith.select %598, %558, %599 : vector<2x256xi1>, vector<2x256xf32>
    %601 = vector.extract_strided_slice %6 {offsets = [0, 4], sizes = [2, 1], strides = [1, 1]} : vector<2x9xf32> to vector<2x1xf32>
    %602 = vector.broadcast %601 : vector<2x1xf32> to vector<2x256xf32>
    %603 = arith.mulf %600, %602 : vector<2x256xf32>
    %604 = arith.addf %596, %603 : vector<2x256xf32>
    %c255_i32_240 = arith.constant 255 : i32
    %605 = tpu.dynamic_rotate %558 by %c255_i32_240 dim 1 : vector<2x256xf32>, i32 -> vector<2x256xf32>
    %cst_241 = arith.constant 0.000000e+00 : f32
    %606 = vector.shape_cast %155 : vector<1x256xi1> to vector<1x256xi1>
    %607 = vector.broadcast %606 : vector<1x256xi1> to vector<2x256xi1>
    %608 = vector.broadcast %cst_241 : f32 to vector<2x256xf32>
    %609 = arith.select %607, %605, %608 : vector<2x256xi1>, vector<2x256xf32>
    %610 = vector.extract_strided_slice %6 {offsets = [0, 5], sizes = [2, 1], strides = [1, 1]} : vector<2x9xf32> to vector<2x1xf32>
    %611 = vector.broadcast %610 : vector<2x1xf32> to vector<2x256xf32>
    %612 = arith.mulf %609, %611 : vector<2x256xf32>
    %613 = arith.addf %604, %612 : vector<2x256xf32>
    %c241_i32_242 = arith.constant 241 : i32
    %614 = tpu.dynamic_rotate %558 by %c241_i32_242 dim 1 : vector<2x256xf32>, i32 -> vector<2x256xf32>
    %cst_243 = arith.constant 0.000000e+00 : f32
    %615 = vector.shape_cast %174 : vector<1x256xi1> to vector<1x256xi1>
    %616 = vector.broadcast %615 : vector<1x256xi1> to vector<2x256xi1>
    %617 = vector.broadcast %cst_243 : f32 to vector<2x256xf32>
    %618 = arith.select %616, %614, %617 : vector<2x256xi1>, vector<2x256xf32>
    %619 = vector.extract_strided_slice %6 {offsets = [0, 6], sizes = [2, 1], strides = [1, 1]} : vector<2x9xf32> to vector<2x1xf32>
    %620 = vector.broadcast %619 : vector<2x1xf32> to vector<2x256xf32>
    %621 = arith.mulf %618, %620 : vector<2x256xf32>
    %622 = arith.addf %613, %621 : vector<2x256xf32>
    %c240_i32_244 = arith.constant 240 : i32
    %623 = tpu.dynamic_rotate %558 by %c240_i32_244 dim 1 : vector<2x256xf32>, i32 -> vector<2x256xf32>
    %cst_245 = arith.constant 0.000000e+00 : f32
    %624 = vector.shape_cast %193 : vector<1x256xi1> to vector<1x256xi1>
    %625 = vector.broadcast %624 : vector<1x256xi1> to vector<2x256xi1>
    %626 = vector.broadcast %cst_245 : f32 to vector<2x256xf32>
    %627 = arith.select %625, %623, %626 : vector<2x256xi1>, vector<2x256xf32>
    %628 = vector.extract_strided_slice %6 {offsets = [0, 7], sizes = [2, 1], strides = [1, 1]} : vector<2x9xf32> to vector<2x1xf32>
    %629 = vector.broadcast %628 : vector<2x1xf32> to vector<2x256xf32>
    %630 = arith.mulf %627, %629 : vector<2x256xf32>
    %631 = arith.addf %622, %630 : vector<2x256xf32>
    %c239_i32_246 = arith.constant 239 : i32
    %632 = tpu.dynamic_rotate %558 by %c239_i32_246 dim 1 : vector<2x256xf32>, i32 -> vector<2x256xf32>
    %cst_247 = arith.constant 0.000000e+00 : f32
    %633 = vector.shape_cast %212 : vector<1x256xi1> to vector<1x256xi1>
    %634 = vector.broadcast %633 : vector<1x256xi1> to vector<2x256xi1>
    %635 = vector.broadcast %cst_247 : f32 to vector<2x256xf32>
    %636 = arith.select %634, %632, %635 : vector<2x256xi1>, vector<2x256xf32>
    %637 = vector.extract_strided_slice %6 {offsets = [0, 8], sizes = [2, 1], strides = [1, 1]} : vector<2x9xf32> to vector<2x1xf32>
    %638 = vector.broadcast %637 : vector<2x1xf32> to vector<2x256xf32>
    %639 = arith.mulf %636, %638 : vector<2x256xf32>
    %640 = arith.addf %631, %639 : vector<2x256xf32>
    %cst_248 = arith.constant 0.000000e+00 : f32
    %641 = vector.broadcast %cst_248 : f32 to vector<2x256xf32>
    %642 = arith.cmpf ogt, %640, %641 : vector<2x256xf32>
    %cst_249 = arith.constant 0.00999999977 : f32
    %643 = vector.broadcast %cst_249 : f32 to vector<2x256xf32>
    %644 = arith.mulf %643, %640 : vector<2x256xf32>
    %645 = arith.select %642, %640, %644 : vector<2x256xi1>, vector<2x256xf32>
    %646 = vector.shape_cast %9 : vector<2x1xf32> to vector<2x1xf32>
    %647 = vector.broadcast %646 : vector<2x1xf32> to vector<2x256xf32>
    %648 = vector.extract_strided_slice %8 {offsets = [0, 0], sizes = [2, 1], strides = [1, 1]} : vector<2x2xf32> to vector<2x1xf32>
    %649 = vector.extract_strided_slice %645 {offsets = [0, 0], sizes = [1, 256], strides = [1, 1]} : vector<2x256xf32> to vector<1x256xf32>
    %650 = vector.broadcast %648 : vector<2x1xf32> to vector<2x256xf32>
    %651 = vector.broadcast %649 : vector<1x256xf32> to vector<2x256xf32>
    %652 = arith.mulf %650, %651 : vector<2x256xf32>
    %653 = arith.addf %647, %652 : vector<2x256xf32>
    %654 = vector.extract_strided_slice %8 {offsets = [0, 1], sizes = [2, 1], strides = [1, 1]} : vector<2x2xf32> to vector<2x1xf32>
    %655 = vector.extract_strided_slice %645 {offsets = [1, 0], sizes = [1, 256], strides = [1, 1]} : vector<2x256xf32> to vector<1x256xf32>
    %656 = vector.broadcast %654 : vector<2x1xf32> to vector<2x256xf32>
    %657 = vector.broadcast %655 : vector<1x256xf32> to vector<2x256xf32>
    %658 = arith.mulf %656, %657 : vector<2x256xf32>
    %659 = arith.addf %653, %658 : vector<2x256xf32>
    %cst_250 = arith.constant 0.000000e+00 : f32
    %660 = vector.broadcast %cst_250 : f32 to vector<2x256xf32>
    %661 = arith.cmpf ogt, %659, %660 : vector<2x256xf32>
    %cst_251 = arith.constant 0.00999999977 : f32
    %662 = vector.broadcast %cst_251 : f32 to vector<2x256xf32>
    %663 = arith.mulf %662, %659 : vector<2x256xf32>
    %664 = arith.select %661, %659, %663 : vector<2x256xi1>, vector<2x256xf32>
    %665 = vector.shape_cast %19 : vector<4x1xf32> to vector<4x1xf32>
    %666 = vector.broadcast %665 : vector<4x1xf32> to vector<4x256xf32>
    %c34_i32 = arith.constant 34 : i32
    %667 = tpu.dynamic_rotate %440 by %c34_i32 dim 1 : vector<4x256xf32>, i32 -> vector<4x256xf32>
    %cst_252 = arith.constant 0.000000e+00 : f32
    %668 = vector.shape_cast %231 : vector<1x256xi1> to vector<1x256xi1>
    %669 = vector.broadcast %668 : vector<1x256xi1> to vector<4x256xi1>
    %670 = vector.broadcast %cst_252 : f32 to vector<4x256xf32>
    %671 = arith.select %669, %667, %670 : vector<4x256xi1>, vector<4x256xf32>
    %672 = vector.extract_strided_slice %18 {offsets = [0, 0], sizes = [4, 1], strides = [1, 1]} : vector<4x9xf32> to vector<4x1xf32>
    %673 = vector.broadcast %672 : vector<4x1xf32> to vector<4x256xf32>
    %674 = arith.mulf %671, %673 : vector<4x256xf32>
    %675 = arith.addf %666, %674 : vector<4x256xf32>
    %c32_i32 = arith.constant 32 : i32
    %676 = tpu.dynamic_rotate %440 by %c32_i32 dim 1 : vector<4x256xf32>, i32 -> vector<4x256xf32>
    %cst_253 = arith.constant 0.000000e+00 : f32
    %677 = vector.shape_cast %250 : vector<1x256xi1> to vector<1x256xi1>
    %678 = vector.broadcast %677 : vector<1x256xi1> to vector<4x256xi1>
    %679 = vector.broadcast %cst_253 : f32 to vector<4x256xf32>
    %680 = arith.select %678, %676, %679 : vector<4x256xi1>, vector<4x256xf32>
    %681 = vector.extract_strided_slice %18 {offsets = [0, 1], sizes = [4, 1], strides = [1, 1]} : vector<4x9xf32> to vector<4x1xf32>
    %682 = vector.broadcast %681 : vector<4x1xf32> to vector<4x256xf32>
    %683 = arith.mulf %680, %682 : vector<4x256xf32>
    %684 = arith.addf %675, %683 : vector<4x256xf32>
    %c30_i32 = arith.constant 30 : i32
    %685 = tpu.dynamic_rotate %440 by %c30_i32 dim 1 : vector<4x256xf32>, i32 -> vector<4x256xf32>
    %cst_254 = arith.constant 0.000000e+00 : f32
    %686 = vector.shape_cast %269 : vector<1x256xi1> to vector<1x256xi1>
    %687 = vector.broadcast %686 : vector<1x256xi1> to vector<4x256xi1>
    %688 = vector.broadcast %cst_254 : f32 to vector<4x256xf32>
    %689 = arith.select %687, %685, %688 : vector<4x256xi1>, vector<4x256xf32>
    %690 = vector.extract_strided_slice %18 {offsets = [0, 2], sizes = [4, 1], strides = [1, 1]} : vector<4x9xf32> to vector<4x1xf32>
    %691 = vector.broadcast %690 : vector<4x1xf32> to vector<4x256xf32>
    %692 = arith.mulf %689, %691 : vector<4x256xf32>
    %693 = arith.addf %684, %692 : vector<4x256xf32>
    %c2_i32_255 = arith.constant 2 : i32
    %694 = tpu.dynamic_rotate %440 by %c2_i32_255 dim 1 : vector<4x256xf32>, i32 -> vector<4x256xf32>
    %cst_256 = arith.constant 0.000000e+00 : f32
    %695 = vector.shape_cast %288 : vector<1x256xi1> to vector<1x256xi1>
    %696 = vector.broadcast %695 : vector<1x256xi1> to vector<4x256xi1>
    %697 = vector.broadcast %cst_256 : f32 to vector<4x256xf32>
    %698 = arith.select %696, %694, %697 : vector<4x256xi1>, vector<4x256xf32>
    %699 = vector.extract_strided_slice %18 {offsets = [0, 3], sizes = [4, 1], strides = [1, 1]} : vector<4x9xf32> to vector<4x1xf32>
    %700 = vector.broadcast %699 : vector<4x1xf32> to vector<4x256xf32>
    %701 = arith.mulf %698, %700 : vector<4x256xf32>
    %702 = arith.addf %693, %701 : vector<4x256xf32>
    %cst_257 = arith.constant 0.000000e+00 : f32
    %703 = vector.shape_cast %307 : vector<1x256xi1> to vector<1x256xi1>
    %704 = vector.broadcast %703 : vector<1x256xi1> to vector<4x256xi1>
    %705 = vector.broadcast %cst_257 : f32 to vector<4x256xf32>
    %706 = arith.select %704, %440, %705 : vector<4x256xi1>, vector<4x256xf32>
    %707 = vector.extract_strided_slice %18 {offsets = [0, 4], sizes = [4, 1], strides = [1, 1]} : vector<4x9xf32> to vector<4x1xf32>
    %708 = vector.broadcast %707 : vector<4x1xf32> to vector<4x256xf32>
    %709 = arith.mulf %706, %708 : vector<4x256xf32>
    %710 = arith.addf %702, %709 : vector<4x256xf32>
    %c254_i32 = arith.constant 254 : i32
    %711 = tpu.dynamic_rotate %440 by %c254_i32 dim 1 : vector<4x256xf32>, i32 -> vector<4x256xf32>
    %cst_258 = arith.constant 0.000000e+00 : f32
    %712 = vector.shape_cast %326 : vector<1x256xi1> to vector<1x256xi1>
    %713 = vector.broadcast %712 : vector<1x256xi1> to vector<4x256xi1>
    %714 = vector.broadcast %cst_258 : f32 to vector<4x256xf32>
    %715 = arith.select %713, %711, %714 : vector<4x256xi1>, vector<4x256xf32>
    %716 = vector.extract_strided_slice %18 {offsets = [0, 5], sizes = [4, 1], strides = [1, 1]} : vector<4x9xf32> to vector<4x1xf32>
    %717 = vector.broadcast %716 : vector<4x1xf32> to vector<4x256xf32>
    %718 = arith.mulf %715, %717 : vector<4x256xf32>
    %719 = arith.addf %710, %718 : vector<4x256xf32>
    %c226_i32 = arith.constant 226 : i32
    %720 = tpu.dynamic_rotate %440 by %c226_i32 dim 1 : vector<4x256xf32>, i32 -> vector<4x256xf32>
    %cst_259 = arith.constant 0.000000e+00 : f32
    %721 = vector.shape_cast %345 : vector<1x256xi1> to vector<1x256xi1>
    %722 = vector.broadcast %721 : vector<1x256xi1> to vector<4x256xi1>
    %723 = vector.broadcast %cst_259 : f32 to vector<4x256xf32>
    %724 = arith.select %722, %720, %723 : vector<4x256xi1>, vector<4x256xf32>
    %725 = vector.extract_strided_slice %18 {offsets = [0, 6], sizes = [4, 1], strides = [1, 1]} : vector<4x9xf32> to vector<4x1xf32>
    %726 = vector.broadcast %725 : vector<4x1xf32> to vector<4x256xf32>
    %727 = arith.mulf %724, %726 : vector<4x256xf32>
    %728 = arith.addf %719, %727 : vector<4x256xf32>
    %c224_i32 = arith.constant 224 : i32
    %729 = tpu.dynamic_rotate %440 by %c224_i32 dim 1 : vector<4x256xf32>, i32 -> vector<4x256xf32>
    %cst_260 = arith.constant 0.000000e+00 : f32
    %730 = vector.shape_cast %364 : vector<1x256xi1> to vector<1x256xi1>
    %731 = vector.broadcast %730 : vector<1x256xi1> to vector<4x256xi1>
    %732 = vector.broadcast %cst_260 : f32 to vector<4x256xf32>
    %733 = arith.select %731, %729, %732 : vector<4x256xi1>, vector<4x256xf32>
    %734 = vector.extract_strided_slice %18 {offsets = [0, 7], sizes = [4, 1], strides = [1, 1]} : vector<4x9xf32> to vector<4x1xf32>
    %735 = vector.broadcast %734 : vector<4x1xf32> to vector<4x256xf32>
    %736 = arith.mulf %733, %735 : vector<4x256xf32>
    %737 = arith.addf %728, %736 : vector<4x256xf32>
    %c222_i32 = arith.constant 222 : i32
    %738 = tpu.dynamic_rotate %440 by %c222_i32 dim 1 : vector<4x256xf32>, i32 -> vector<4x256xf32>
    %cst_261 = arith.constant 0.000000e+00 : f32
    %739 = vector.shape_cast %383 : vector<1x256xi1> to vector<1x256xi1>
    %740 = vector.broadcast %739 : vector<1x256xi1> to vector<4x256xi1>
    %741 = vector.broadcast %cst_261 : f32 to vector<4x256xf32>
    %742 = arith.select %740, %738, %741 : vector<4x256xi1>, vector<4x256xf32>
    %743 = vector.extract_strided_slice %18 {offsets = [0, 8], sizes = [4, 1], strides = [1, 1]} : vector<4x9xf32> to vector<4x1xf32>
    %744 = vector.broadcast %743 : vector<4x1xf32> to vector<4x256xf32>
    %745 = arith.mulf %742, %744 : vector<4x256xf32>
    %746 = arith.addf %737, %745 : vector<4x256xf32>
    %cst_262 = arith.constant 0.000000e+00 : f32
    %747 = vector.broadcast %cst_262 : f32 to vector<4x256xf32>
    %748 = arith.cmpf ogt, %746, %747 : vector<4x256xf32>
    %cst_263 = arith.constant 0.00999999977 : f32
    %749 = vector.broadcast %cst_263 : f32 to vector<4x256xf32>
    %750 = arith.mulf %749, %746 : vector<4x256xf32>
    %751 = arith.select %748, %746, %750 : vector<4x256xi1>, vector<4x256xf32>
    %752 = vector.shape_cast %21 : vector<2x1xf32> to vector<2x1xf32>
    %753 = vector.broadcast %752 : vector<2x1xf32> to vector<2x256xf32>
    %754 = vector.extract_strided_slice %20 {offsets = [0, 0], sizes = [2, 1], strides = [1, 1]} : vector<2x4xf32> to vector<2x1xf32>
    %755 = vector.extract_strided_slice %751 {offsets = [0, 0], sizes = [1, 256], strides = [1, 1]} : vector<4x256xf32> to vector<1x256xf32>
    %756 = vector.broadcast %754 : vector<2x1xf32> to vector<2x256xf32>
    %757 = vector.broadcast %755 : vector<1x256xf32> to vector<2x256xf32>
    %758 = arith.mulf %756, %757 : vector<2x256xf32>
    %759 = arith.addf %753, %758 : vector<2x256xf32>
    %760 = vector.extract_strided_slice %20 {offsets = [0, 1], sizes = [2, 1], strides = [1, 1]} : vector<2x4xf32> to vector<2x1xf32>
    %761 = vector.extract_strided_slice %751 {offsets = [1, 0], sizes = [1, 256], strides = [1, 1]} : vector<4x256xf32> to vector<1x256xf32>
    %762 = vector.broadcast %760 : vector<2x1xf32> to vector<2x256xf32>
    %763 = vector.broadcast %761 : vector<1x256xf32> to vector<2x256xf32>
    %764 = arith.mulf %762, %763 : vector<2x256xf32>
    %765 = arith.addf %759, %764 : vector<2x256xf32>
    %766 = vector.extract_strided_slice %20 {offsets = [0, 2], sizes = [2, 1], strides = [1, 1]} : vector<2x4xf32> to vector<2x1xf32>
    %767 = vector.extract_strided_slice %751 {offsets = [2, 0], sizes = [1, 256], strides = [1, 1]} : vector<4x256xf32> to vector<1x256xf32>
    %768 = vector.broadcast %766 : vector<2x1xf32> to vector<2x256xf32>
    %769 = vector.broadcast %767 : vector<1x256xf32> to vector<2x256xf32>
    %770 = arith.mulf %768, %769 : vector<2x256xf32>
    %771 = arith.addf %765, %770 : vector<2x256xf32>
    %772 = vector.extract_strided_slice %20 {offsets = [0, 3], sizes = [2, 1], strides = [1, 1]} : vector<2x4xf32> to vector<2x1xf32>
    %773 = vector.extract_strided_slice %751 {offsets = [3, 0], sizes = [1, 256], strides = [1, 1]} : vector<4x256xf32> to vector<1x256xf32>
    %774 = vector.broadcast %772 : vector<2x1xf32> to vector<2x256xf32>
    %775 = vector.broadcast %773 : vector<1x256xf32> to vector<2x256xf32>
    %776 = arith.mulf %774, %775 : vector<2x256xf32>
    %777 = arith.addf %771, %776 : vector<2x256xf32>
    %cst_264 = arith.constant 0.000000e+00 : f32
    %778 = vector.broadcast %cst_264 : f32 to vector<2x256xf32>
    %779 = arith.cmpf ogt, %777, %778 : vector<2x256xf32>
    %cst_265 = arith.constant 0.00999999977 : f32
    %780 = vector.broadcast %cst_265 : f32 to vector<2x256xf32>
    %781 = arith.mulf %780, %777 : vector<2x256xf32>
    %782 = arith.select %779, %777, %781 : vector<2x256xi1>, vector<2x256xf32>
    %783 = vector.shape_cast %23 : vector<2x1xf32> to vector<2x1xf32>
    %784 = vector.broadcast %783 : vector<2x1xf32> to vector<2x256xf32>
    %c17_i32_266 = arith.constant 17 : i32
    %785 = tpu.dynamic_rotate %782 by %c17_i32_266 dim 1 : vector<2x256xf32>, i32 -> vector<2x256xf32>
    %cst_267 = arith.constant 0.000000e+00 : f32
    %786 = vector.shape_cast %60 : vector<1x256xi1> to vector<1x256xi1>
    %787 = vector.broadcast %786 : vector<1x256xi1> to vector<2x256xi1>
    %788 = vector.broadcast %cst_267 : f32 to vector<2x256xf32>
    %789 = arith.select %787, %785, %788 : vector<2x256xi1>, vector<2x256xf32>
    %790 = vector.extract_strided_slice %22 {offsets = [0, 0], sizes = [2, 1], strides = [1, 1]} : vector<2x9xf32> to vector<2x1xf32>
    %791 = vector.broadcast %790 : vector<2x1xf32> to vector<2x256xf32>
    %792 = arith.mulf %789, %791 : vector<2x256xf32>
    %793 = arith.addf %784, %792 : vector<2x256xf32>
    %c16_i32_268 = arith.constant 16 : i32
    %794 = tpu.dynamic_rotate %782 by %c16_i32_268 dim 1 : vector<2x256xf32>, i32 -> vector<2x256xf32>
    %cst_269 = arith.constant 0.000000e+00 : f32
    %795 = vector.shape_cast %79 : vector<1x256xi1> to vector<1x256xi1>
    %796 = vector.broadcast %795 : vector<1x256xi1> to vector<2x256xi1>
    %797 = vector.broadcast %cst_269 : f32 to vector<2x256xf32>
    %798 = arith.select %796, %794, %797 : vector<2x256xi1>, vector<2x256xf32>
    %799 = vector.extract_strided_slice %22 {offsets = [0, 1], sizes = [2, 1], strides = [1, 1]} : vector<2x9xf32> to vector<2x1xf32>
    %800 = vector.broadcast %799 : vector<2x1xf32> to vector<2x256xf32>
    %801 = arith.mulf %798, %800 : vector<2x256xf32>
    %802 = arith.addf %793, %801 : vector<2x256xf32>
    %c15_i32_270 = arith.constant 15 : i32
    %803 = tpu.dynamic_rotate %782 by %c15_i32_270 dim 1 : vector<2x256xf32>, i32 -> vector<2x256xf32>
    %cst_271 = arith.constant 0.000000e+00 : f32
    %804 = vector.shape_cast %98 : vector<1x256xi1> to vector<1x256xi1>
    %805 = vector.broadcast %804 : vector<1x256xi1> to vector<2x256xi1>
    %806 = vector.broadcast %cst_271 : f32 to vector<2x256xf32>
    %807 = arith.select %805, %803, %806 : vector<2x256xi1>, vector<2x256xf32>
    %808 = vector.extract_strided_slice %22 {offsets = [0, 2], sizes = [2, 1], strides = [1, 1]} : vector<2x9xf32> to vector<2x1xf32>
    %809 = vector.broadcast %808 : vector<2x1xf32> to vector<2x256xf32>
    %810 = arith.mulf %807, %809 : vector<2x256xf32>
    %811 = arith.addf %802, %810 : vector<2x256xf32>
    %c1_i32_272 = arith.constant 1 : i32
    %812 = tpu.dynamic_rotate %782 by %c1_i32_272 dim 1 : vector<2x256xf32>, i32 -> vector<2x256xf32>
    %cst_273 = arith.constant 0.000000e+00 : f32
    %813 = vector.shape_cast %117 : vector<1x256xi1> to vector<1x256xi1>
    %814 = vector.broadcast %813 : vector<1x256xi1> to vector<2x256xi1>
    %815 = vector.broadcast %cst_273 : f32 to vector<2x256xf32>
    %816 = arith.select %814, %812, %815 : vector<2x256xi1>, vector<2x256xf32>
    %817 = vector.extract_strided_slice %22 {offsets = [0, 3], sizes = [2, 1], strides = [1, 1]} : vector<2x9xf32> to vector<2x1xf32>
    %818 = vector.broadcast %817 : vector<2x1xf32> to vector<2x256xf32>
    %819 = arith.mulf %816, %818 : vector<2x256xf32>
    %820 = arith.addf %811, %819 : vector<2x256xf32>
    %cst_274 = arith.constant 0.000000e+00 : f32
    %821 = vector.shape_cast %136 : vector<1x256xi1> to vector<1x256xi1>
    %822 = vector.broadcast %821 : vector<1x256xi1> to vector<2x256xi1>
    %823 = vector.broadcast %cst_274 : f32 to vector<2x256xf32>
    %824 = arith.select %822, %782, %823 : vector<2x256xi1>, vector<2x256xf32>
    %825 = vector.extract_strided_slice %22 {offsets = [0, 4], sizes = [2, 1], strides = [1, 1]} : vector<2x9xf32> to vector<2x1xf32>
    %826 = vector.broadcast %825 : vector<2x1xf32> to vector<2x256xf32>
    %827 = arith.mulf %824, %826 : vector<2x256xf32>
    %828 = arith.addf %820, %827 : vector<2x256xf32>
    %c255_i32_275 = arith.constant 255 : i32
    %829 = tpu.dynamic_rotate %782 by %c255_i32_275 dim 1 : vector<2x256xf32>, i32 -> vector<2x256xf32>
    %cst_276 = arith.constant 0.000000e+00 : f32
    %830 = vector.shape_cast %155 : vector<1x256xi1> to vector<1x256xi1>
    %831 = vector.broadcast %830 : vector<1x256xi1> to vector<2x256xi1>
    %832 = vector.broadcast %cst_276 : f32 to vector<2x256xf32>
    %833 = arith.select %831, %829, %832 : vector<2x256xi1>, vector<2x256xf32>
    %834 = vector.extract_strided_slice %22 {offsets = [0, 5], sizes = [2, 1], strides = [1, 1]} : vector<2x9xf32> to vector<2x1xf32>
    %835 = vector.broadcast %834 : vector<2x1xf32> to vector<2x256xf32>
    %836 = arith.mulf %833, %835 : vector<2x256xf32>
    %837 = arith.addf %828, %836 : vector<2x256xf32>
    %c241_i32_277 = arith.constant 241 : i32
    %838 = tpu.dynamic_rotate %782 by %c241_i32_277 dim 1 : vector<2x256xf32>, i32 -> vector<2x256xf32>
    %cst_278 = arith.constant 0.000000e+00 : f32
    %839 = vector.shape_cast %174 : vector<1x256xi1> to vector<1x256xi1>
    %840 = vector.broadcast %839 : vector<1x256xi1> to vector<2x256xi1>
    %841 = vector.broadcast %cst_278 : f32 to vector<2x256xf32>
    %842 = arith.select %840, %838, %841 : vector<2x256xi1>, vector<2x256xf32>
    %843 = vector.extract_strided_slice %22 {offsets = [0, 6], sizes = [2, 1], strides = [1, 1]} : vector<2x9xf32> to vector<2x1xf32>
    %844 = vector.broadcast %843 : vector<2x1xf32> to vector<2x256xf32>
    %845 = arith.mulf %842, %844 : vector<2x256xf32>
    %846 = arith.addf %837, %845 : vector<2x256xf32>
    %c240_i32_279 = arith.constant 240 : i32
    %847 = tpu.dynamic_rotate %782 by %c240_i32_279 dim 1 : vector<2x256xf32>, i32 -> vector<2x256xf32>
    %cst_280 = arith.constant 0.000000e+00 : f32
    %848 = vector.shape_cast %193 : vector<1x256xi1> to vector<1x256xi1>
    %849 = vector.broadcast %848 : vector<1x256xi1> to vector<2x256xi1>
    %850 = vector.broadcast %cst_280 : f32 to vector<2x256xf32>
    %851 = arith.select %849, %847, %850 : vector<2x256xi1>, vector<2x256xf32>
    %852 = vector.extract_strided_slice %22 {offsets = [0, 7], sizes = [2, 1], strides = [1, 1]} : vector<2x9xf32> to vector<2x1xf32>
    %853 = vector.broadcast %852 : vector<2x1xf32> to vector<2x256xf32>
    %854 = arith.mulf %851, %853 : vector<2x256xf32>
    %855 = arith.addf %846, %854 : vector<2x256xf32>
    %c239_i32_281 = arith.constant 239 : i32
    %856 = tpu.dynamic_rotate %782 by %c239_i32_281 dim 1 : vector<2x256xf32>, i32 -> vector<2x256xf32>
    %cst_282 = arith.constant 0.000000e+00 : f32
    %857 = vector.shape_cast %212 : vector<1x256xi1> to vector<1x256xi1>
    %858 = vector.broadcast %857 : vector<1x256xi1> to vector<2x256xi1>
    %859 = vector.broadcast %cst_282 : f32 to vector<2x256xf32>
    %860 = arith.select %858, %856, %859 : vector<2x256xi1>, vector<2x256xf32>
    %861 = vector.extract_strided_slice %22 {offsets = [0, 8], sizes = [2, 1], strides = [1, 1]} : vector<2x9xf32> to vector<2x1xf32>
    %862 = vector.broadcast %861 : vector<2x1xf32> to vector<2x256xf32>
    %863 = arith.mulf %860, %862 : vector<2x256xf32>
    %864 = arith.addf %855, %863 : vector<2x256xf32>
    %cst_283 = arith.constant 0.000000e+00 : f32
    %865 = vector.broadcast %cst_283 : f32 to vector<2x256xf32>
    %866 = arith.cmpf ogt, %864, %865 : vector<2x256xf32>
    %cst_284 = arith.constant 0.00999999977 : f32
    %867 = vector.broadcast %cst_284 : f32 to vector<2x256xf32>
    %868 = arith.mulf %867, %864 : vector<2x256xf32>
    %869 = arith.select %866, %864, %868 : vector<2x256xi1>, vector<2x256xf32>
    %870 = vector.shape_cast %25 : vector<2x1xf32> to vector<2x1xf32>
    %871 = vector.broadcast %870 : vector<2x1xf32> to vector<2x256xf32>
    %872 = vector.extract_strided_slice %24 {offsets = [0, 0], sizes = [2, 1], strides = [1, 1]} : vector<2x2xf32> to vector<2x1xf32>
    %873 = vector.extract_strided_slice %869 {offsets = [0, 0], sizes = [1, 256], strides = [1, 1]} : vector<2x256xf32> to vector<1x256xf32>
    %874 = vector.broadcast %872 : vector<2x1xf32> to vector<2x256xf32>
    %875 = vector.broadcast %873 : vector<1x256xf32> to vector<2x256xf32>
    %876 = arith.mulf %874, %875 : vector<2x256xf32>
    %877 = arith.addf %871, %876 : vector<2x256xf32>
    %878 = vector.extract_strided_slice %24 {offsets = [0, 1], sizes = [2, 1], strides = [1, 1]} : vector<2x2xf32> to vector<2x1xf32>
    %879 = vector.extract_strided_slice %869 {offsets = [1, 0], sizes = [1, 256], strides = [1, 1]} : vector<2x256xf32> to vector<1x256xf32>
    %880 = vector.broadcast %878 : vector<2x1xf32> to vector<2x256xf32>
    %881 = vector.broadcast %879 : vector<1x256xf32> to vector<2x256xf32>
    %882 = arith.mulf %880, %881 : vector<2x256xf32>
    %883 = arith.addf %877, %882 : vector<2x256xf32>
    %cst_285 = arith.constant 0.000000e+00 : f32
    %884 = vector.broadcast %cst_285 : f32 to vector<2x256xf32>
    %885 = arith.cmpf ogt, %883, %884 : vector<2x256xf32>
    %cst_286 = arith.constant 0.00999999977 : f32
    %886 = vector.broadcast %cst_286 : f32 to vector<2x256xf32>
    %887 = arith.mulf %886, %883 : vector<2x256xf32>
    %888 = arith.select %885, %883, %887 : vector<2x256xi1>, vector<2x256xf32>
    %c0_287 = arith.constant 0 : index
    %c0_288 = arith.constant 0 : index
    %889 = vector.load %arg40[%c0_287, %c0_288] : memref<8x256xf32, #tpu.memory_space<vmem>>, vector<2x256xf32>
    tpu.vector_store %arg40[%c0_287, %c0_288], %664 {strides = array<i32>} : memref<8x256xf32, #tpu.memory_space<vmem>>, vector<2x256xf32>,
    %c2 = arith.constant 2 : index
    %c0_289 = arith.constant 0 : index
    %890 = vector.load %arg40[%c2, %c0_289] : memref<8x256xf32, #tpu.memory_space<vmem>>, vector<2x256xf32>
    tpu.vector_store %arg40[%c2, %c0_289], %888 {strides = array<i32>} : memref<8x256xf32, #tpu.memory_space<vmem>>, vector<2x256xf32>,
    %c0_290 = arith.constant 0 : index
    %c0_291 = arith.constant 0 : index
    %891 = vector.load %arg40[%c0_290, %c0_291] : memref<8x256xf32, #tpu.memory_space<vmem>>, vector<4x256xf32>
    %892 = vector.shape_cast %11 : vector<4x1xf32> to vector<4x1xf32>
    %893 = vector.broadcast %892 : vector<4x1xf32> to vector<4x256xf32>
    %c17_i32_292 = arith.constant 17 : i32
    %894 = tpu.dynamic_rotate %891 by %c17_i32_292 dim 1 : vector<4x256xf32>, i32 -> vector<4x256xf32>
    %cst_293 = arith.constant 0.000000e+00 : f32
    %895 = vector.shape_cast %60 : vector<1x256xi1> to vector<1x256xi1>
    %896 = vector.broadcast %895 : vector<1x256xi1> to vector<4x256xi1>
    %897 = vector.broadcast %cst_293 : f32 to vector<4x256xf32>
    %898 = arith.select %896, %894, %897 : vector<4x256xi1>, vector<4x256xf32>
    %899 = vector.extract_strided_slice %10 {offsets = [0, 0], sizes = [4, 1], strides = [1, 1]} : vector<4x9xf32> to vector<4x1xf32>
    %900 = vector.broadcast %899 : vector<4x1xf32> to vector<4x256xf32>
    %901 = arith.mulf %898, %900 : vector<4x256xf32>
    %902 = arith.addf %893, %901 : vector<4x256xf32>
    %c16_i32_294 = arith.constant 16 : i32
    %903 = tpu.dynamic_rotate %891 by %c16_i32_294 dim 1 : vector<4x256xf32>, i32 -> vector<4x256xf32>
    %cst_295 = arith.constant 0.000000e+00 : f32
    %904 = vector.shape_cast %79 : vector<1x256xi1> to vector<1x256xi1>
    %905 = vector.broadcast %904 : vector<1x256xi1> to vector<4x256xi1>
    %906 = vector.broadcast %cst_295 : f32 to vector<4x256xf32>
    %907 = arith.select %905, %903, %906 : vector<4x256xi1>, vector<4x256xf32>
    %908 = vector.extract_strided_slice %10 {offsets = [0, 1], sizes = [4, 1], strides = [1, 1]} : vector<4x9xf32> to vector<4x1xf32>
    %909 = vector.broadcast %908 : vector<4x1xf32> to vector<4x256xf32>
    %910 = arith.mulf %907, %909 : vector<4x256xf32>
    %911 = arith.addf %902, %910 : vector<4x256xf32>
    %c15_i32_296 = arith.constant 15 : i32
    %912 = tpu.dynamic_rotate %891 by %c15_i32_296 dim 1 : vector<4x256xf32>, i32 -> vector<4x256xf32>
    %cst_297 = arith.constant 0.000000e+00 : f32
    %913 = vector.shape_cast %98 : vector<1x256xi1> to vector<1x256xi1>
    %914 = vector.broadcast %913 : vector<1x256xi1> to vector<4x256xi1>
    %915 = vector.broadcast %cst_297 : f32 to vector<4x256xf32>
    %916 = arith.select %914, %912, %915 : vector<4x256xi1>, vector<4x256xf32>
    %917 = vector.extract_strided_slice %10 {offsets = [0, 2], sizes = [4, 1], strides = [1, 1]} : vector<4x9xf32> to vector<4x1xf32>
    %918 = vector.broadcast %917 : vector<4x1xf32> to vector<4x256xf32>
    %919 = arith.mulf %916, %918 : vector<4x256xf32>
    %920 = arith.addf %911, %919 : vector<4x256xf32>
    %c1_i32_298 = arith.constant 1 : i32
    %921 = tpu.dynamic_rotate %891 by %c1_i32_298 dim 1 : vector<4x256xf32>, i32 -> vector<4x256xf32>
    %cst_299 = arith.constant 0.000000e+00 : f32
    %922 = vector.shape_cast %117 : vector<1x256xi1> to vector<1x256xi1>
    %923 = vector.broadcast %922 : vector<1x256xi1> to vector<4x256xi1>
    %924 = vector.broadcast %cst_299 : f32 to vector<4x256xf32>
    %925 = arith.select %923, %921, %924 : vector<4x256xi1>, vector<4x256xf32>
    %926 = vector.extract_strided_slice %10 {offsets = [0, 3], sizes = [4, 1], strides = [1, 1]} : vector<4x9xf32> to vector<4x1xf32>
    %927 = vector.broadcast %926 : vector<4x1xf32> to vector<4x256xf32>
    %928 = arith.mulf %925, %927 : vector<4x256xf32>
    %929 = arith.addf %920, %928 : vector<4x256xf32>
    %cst_300 = arith.constant 0.000000e+00 : f32
    %930 = vector.shape_cast %136 : vector<1x256xi1> to vector<1x256xi1>
    %931 = vector.broadcast %930 : vector<1x256xi1> to vector<4x256xi1>
    %932 = vector.broadcast %cst_300 : f32 to vector<4x256xf32>
    %933 = arith.select %931, %891, %932 : vector<4x256xi1>, vector<4x256xf32>
    %934 = vector.extract_strided_slice %10 {offsets = [0, 4], sizes = [4, 1], strides = [1, 1]} : vector<4x9xf32> to vector<4x1xf32>
    %935 = vector.broadcast %934 : vector<4x1xf32> to vector<4x256xf32>
    %936 = arith.mulf %933, %935 : vector<4x256xf32>
    %937 = arith.addf %929, %936 : vector<4x256xf32>
    %c255_i32_301 = arith.constant 255 : i32
    %938 = tpu.dynamic_rotate %891 by %c255_i32_301 dim 1 : vector<4x256xf32>, i32 -> vector<4x256xf32>
    %cst_302 = arith.constant 0.000000e+00 : f32
    %939 = vector.shape_cast %155 : vector<1x256xi1> to vector<1x256xi1>
    %940 = vector.broadcast %939 : vector<1x256xi1> to vector<4x256xi1>
    %941 = vector.broadcast %cst_302 : f32 to vector<4x256xf32>
    %942 = arith.select %940, %938, %941 : vector<4x256xi1>, vector<4x256xf32>
    %943 = vector.extract_strided_slice %10 {offsets = [0, 5], sizes = [4, 1], strides = [1, 1]} : vector<4x9xf32> to vector<4x1xf32>
    %944 = vector.broadcast %943 : vector<4x1xf32> to vector<4x256xf32>
    %945 = arith.mulf %942, %944 : vector<4x256xf32>
    %946 = arith.addf %937, %945 : vector<4x256xf32>
    %c241_i32_303 = arith.constant 241 : i32
    %947 = tpu.dynamic_rotate %891 by %c241_i32_303 dim 1 : vector<4x256xf32>, i32 -> vector<4x256xf32>
    %cst_304 = arith.constant 0.000000e+00 : f32
    %948 = vector.shape_cast %174 : vector<1x256xi1> to vector<1x256xi1>
    %949 = vector.broadcast %948 : vector<1x256xi1> to vector<4x256xi1>
    %950 = vector.broadcast %cst_304 : f32 to vector<4x256xf32>
    %951 = arith.select %949, %947, %950 : vector<4x256xi1>, vector<4x256xf32>
    %952 = vector.extract_strided_slice %10 {offsets = [0, 6], sizes = [4, 1], strides = [1, 1]} : vector<4x9xf32> to vector<4x1xf32>
    %953 = vector.broadcast %952 : vector<4x1xf32> to vector<4x256xf32>
    %954 = arith.mulf %951, %953 : vector<4x256xf32>
    %955 = arith.addf %946, %954 : vector<4x256xf32>
    %c240_i32_305 = arith.constant 240 : i32
    %956 = tpu.dynamic_rotate %891 by %c240_i32_305 dim 1 : vector<4x256xf32>, i32 -> vector<4x256xf32>
    %cst_306 = arith.constant 0.000000e+00 : f32
    %957 = vector.shape_cast %193 : vector<1x256xi1> to vector<1x256xi1>
    %958 = vector.broadcast %957 : vector<1x256xi1> to vector<4x256xi1>
    %959 = vector.broadcast %cst_306 : f32 to vector<4x256xf32>
    %960 = arith.select %958, %956, %959 : vector<4x256xi1>, vector<4x256xf32>
    %961 = vector.extract_strided_slice %10 {offsets = [0, 7], sizes = [4, 1], strides = [1, 1]} : vector<4x9xf32> to vector<4x1xf32>
    %962 = vector.broadcast %961 : vector<4x1xf32> to vector<4x256xf32>
    %963 = arith.mulf %960, %962 : vector<4x256xf32>
    %964 = arith.addf %955, %963 : vector<4x256xf32>
    %c239_i32_307 = arith.constant 239 : i32
    %965 = tpu.dynamic_rotate %891 by %c239_i32_307 dim 1 : vector<4x256xf32>, i32 -> vector<4x256xf32>
    %cst_308 = arith.constant 0.000000e+00 : f32
    %966 = vector.shape_cast %212 : vector<1x256xi1> to vector<1x256xi1>
    %967 = vector.broadcast %966 : vector<1x256xi1> to vector<4x256xi1>
    %968 = vector.broadcast %cst_308 : f32 to vector<4x256xf32>
    %969 = arith.select %967, %965, %968 : vector<4x256xi1>, vector<4x256xf32>
    %970 = vector.extract_strided_slice %10 {offsets = [0, 8], sizes = [4, 1], strides = [1, 1]} : vector<4x9xf32> to vector<4x1xf32>
    %971 = vector.broadcast %970 : vector<4x1xf32> to vector<4x256xf32>
    %972 = arith.mulf %969, %971 : vector<4x256xf32>
    %973 = arith.addf %964, %972 : vector<4x256xf32>
    %cst_309 = arith.constant 0.000000e+00 : f32
    %974 = vector.broadcast %cst_309 : f32 to vector<4x256xf32>
    %975 = arith.cmpf ogt, %973, %974 : vector<4x256xf32>
    %cst_310 = arith.constant 0.00999999977 : f32
    %976 = vector.broadcast %cst_310 : f32 to vector<4x256xf32>
    %977 = arith.mulf %976, %973 : vector<4x256xf32>
    %978 = arith.select %975, %973, %977 : vector<4x256xi1>, vector<4x256xf32>
    %979 = vector.shape_cast %13 : vector<4x1xf32> to vector<4x1xf32>
    %980 = vector.broadcast %979 : vector<4x1xf32> to vector<4x256xf32>
    %981 = vector.extract_strided_slice %12 {offsets = [0, 0], sizes = [4, 1], strides = [1, 1]} : vector<4x4xf32> to vector<4x1xf32>
    %982 = vector.extract_strided_slice %978 {offsets = [0, 0], sizes = [1, 256], strides = [1, 1]} : vector<4x256xf32> to vector<1x256xf32>
    %983 = vector.broadcast %981 : vector<4x1xf32> to vector<4x256xf32>
    %984 = vector.broadcast %982 : vector<1x256xf32> to vector<4x256xf32>
    %985 = arith.mulf %983, %984 : vector<4x256xf32>
    %986 = arith.addf %980, %985 : vector<4x256xf32>
    %987 = vector.extract_strided_slice %12 {offsets = [0, 1], sizes = [4, 1], strides = [1, 1]} : vector<4x4xf32> to vector<4x1xf32>
    %988 = vector.extract_strided_slice %978 {offsets = [1, 0], sizes = [1, 256], strides = [1, 1]} : vector<4x256xf32> to vector<1x256xf32>
    %989 = vector.broadcast %987 : vector<4x1xf32> to vector<4x256xf32>
    %990 = vector.broadcast %988 : vector<1x256xf32> to vector<4x256xf32>
    %991 = arith.mulf %989, %990 : vector<4x256xf32>
    %992 = arith.addf %986, %991 : vector<4x256xf32>
    %993 = vector.extract_strided_slice %12 {offsets = [0, 2], sizes = [4, 1], strides = [1, 1]} : vector<4x4xf32> to vector<4x1xf32>
    %994 = vector.extract_strided_slice %978 {offsets = [2, 0], sizes = [1, 256], strides = [1, 1]} : vector<4x256xf32> to vector<1x256xf32>
    %995 = vector.broadcast %993 : vector<4x1xf32> to vector<4x256xf32>
    %996 = vector.broadcast %994 : vector<1x256xf32> to vector<4x256xf32>
    %997 = arith.mulf %995, %996 : vector<4x256xf32>
    %998 = arith.addf %992, %997 : vector<4x256xf32>
    %999 = vector.extract_strided_slice %12 {offsets = [0, 3], sizes = [4, 1], strides = [1, 1]} : vector<4x4xf32> to vector<4x1xf32>
    %1000 = vector.extract_strided_slice %978 {offsets = [3, 0], sizes = [1, 256], strides = [1, 1]} : vector<4x256xf32> to vector<1x256xf32>
    %1001 = vector.broadcast %999 : vector<4x1xf32> to vector<4x256xf32>
    %1002 = vector.broadcast %1000 : vector<1x256xf32> to vector<4x256xf32>
    %1003 = arith.mulf %1001, %1002 : vector<4x256xf32>
    %1004 = arith.addf %998, %1003 : vector<4x256xf32>
    %cst_311 = arith.constant 0.000000e+00 : f32
    %1005 = vector.broadcast %cst_311 : f32 to vector<4x256xf32>
    %1006 = arith.cmpf ogt, %1004, %1005 : vector<4x256xf32>
    %cst_312 = arith.constant 0.00999999977 : f32
    %1007 = vector.broadcast %cst_312 : f32 to vector<4x256xf32>
    %1008 = arith.mulf %1007, %1004 : vector<4x256xf32>
    %1009 = arith.select %1006, %1004, %1008 : vector<4x256xi1>, vector<4x256xf32>
    %1010 = vector.shape_cast %15 : vector<4x1xf32> to vector<4x1xf32>
    %1011 = vector.broadcast %1010 : vector<4x1xf32> to vector<4x256xf32>
    %c17_i32_313 = arith.constant 17 : i32
    %1012 = tpu.dynamic_rotate %1009 by %c17_i32_313 dim 1 : vector<4x256xf32>, i32 -> vector<4x256xf32>
    %cst_314 = arith.constant 0.000000e+00 : f32
    %1013 = vector.shape_cast %60 : vector<1x256xi1> to vector<1x256xi1>
    %1014 = vector.broadcast %1013 : vector<1x256xi1> to vector<4x256xi1>
    %1015 = vector.broadcast %cst_314 : f32 to vector<4x256xf32>
    %1016 = arith.select %1014, %1012, %1015 : vector<4x256xi1>, vector<4x256xf32>
    %1017 = vector.extract_strided_slice %14 {offsets = [0, 0], sizes = [4, 1], strides = [1, 1]} : vector<4x9xf32> to vector<4x1xf32>
    %1018 = vector.broadcast %1017 : vector<4x1xf32> to vector<4x256xf32>
    %1019 = arith.mulf %1016, %1018 : vector<4x256xf32>
    %1020 = arith.addf %1011, %1019 : vector<4x256xf32>
    %c16_i32_315 = arith.constant 16 : i32
    %1021 = tpu.dynamic_rotate %1009 by %c16_i32_315 dim 1 : vector<4x256xf32>, i32 -> vector<4x256xf32>
    %cst_316 = arith.constant 0.000000e+00 : f32
    %1022 = vector.shape_cast %79 : vector<1x256xi1> to vector<1x256xi1>
    %1023 = vector.broadcast %1022 : vector<1x256xi1> to vector<4x256xi1>
    %1024 = vector.broadcast %cst_316 : f32 to vector<4x256xf32>
    %1025 = arith.select %1023, %1021, %1024 : vector<4x256xi1>, vector<4x256xf32>
    %1026 = vector.extract_strided_slice %14 {offsets = [0, 1], sizes = [4, 1], strides = [1, 1]} : vector<4x9xf32> to vector<4x1xf32>
    %1027 = vector.broadcast %1026 : vector<4x1xf32> to vector<4x256xf32>
    %1028 = arith.mulf %1025, %1027 : vector<4x256xf32>
    %1029 = arith.addf %1020, %1028 : vector<4x256xf32>
    %c15_i32_317 = arith.constant 15 : i32
    %1030 = tpu.dynamic_rotate %1009 by %c15_i32_317 dim 1 : vector<4x256xf32>, i32 -> vector<4x256xf32>
    %cst_318 = arith.constant 0.000000e+00 : f32
    %1031 = vector.shape_cast %98 : vector<1x256xi1> to vector<1x256xi1>
    %1032 = vector.broadcast %1031 : vector<1x256xi1> to vector<4x256xi1>
    %1033 = vector.broadcast %cst_318 : f32 to vector<4x256xf32>
    %1034 = arith.select %1032, %1030, %1033 : vector<4x256xi1>, vector<4x256xf32>
    %1035 = vector.extract_strided_slice %14 {offsets = [0, 2], sizes = [4, 1], strides = [1, 1]} : vector<4x9xf32> to vector<4x1xf32>
    %1036 = vector.broadcast %1035 : vector<4x1xf32> to vector<4x256xf32>
    %1037 = arith.mulf %1034, %1036 : vector<4x256xf32>
    %1038 = arith.addf %1029, %1037 : vector<4x256xf32>
    %c1_i32_319 = arith.constant 1 : i32
    %1039 = tpu.dynamic_rotate %1009 by %c1_i32_319 dim 1 : vector<4x256xf32>, i32 -> vector<4x256xf32>
    %cst_320 = arith.constant 0.000000e+00 : f32
    %1040 = vector.shape_cast %117 : vector<1x256xi1> to vector<1x256xi1>
    %1041 = vector.broadcast %1040 : vector<1x256xi1> to vector<4x256xi1>
    %1042 = vector.broadcast %cst_320 : f32 to vector<4x256xf32>
    %1043 = arith.select %1041, %1039, %1042 : vector<4x256xi1>, vector<4x256xf32>
    %1044 = vector.extract_strided_slice %14 {offsets = [0, 3], sizes = [4, 1], strides = [1, 1]} : vector<4x9xf32> to vector<4x1xf32>
    %1045 = vector.broadcast %1044 : vector<4x1xf32> to vector<4x256xf32>
    %1046 = arith.mulf %1043, %1045 : vector<4x256xf32>
    %1047 = arith.addf %1038, %1046 : vector<4x256xf32>
    %cst_321 = arith.constant 0.000000e+00 : f32
    %1048 = vector.shape_cast %136 : vector<1x256xi1> to vector<1x256xi1>
    %1049 = vector.broadcast %1048 : vector<1x256xi1> to vector<4x256xi1>
    %1050 = vector.broadcast %cst_321 : f32 to vector<4x256xf32>
    %1051 = arith.select %1049, %1009, %1050 : vector<4x256xi1>, vector<4x256xf32>
    %1052 = vector.extract_strided_slice %14 {offsets = [0, 4], sizes = [4, 1], strides = [1, 1]} : vector<4x9xf32> to vector<4x1xf32>
    %1053 = vector.broadcast %1052 : vector<4x1xf32> to vector<4x256xf32>
    %1054 = arith.mulf %1051, %1053 : vector<4x256xf32>
    %1055 = arith.addf %1047, %1054 : vector<4x256xf32>
    %c255_i32_322 = arith.constant 255 : i32
    %1056 = tpu.dynamic_rotate %1009 by %c255_i32_322 dim 1 : vector<4x256xf32>, i32 -> vector<4x256xf32>
    %cst_323 = arith.constant 0.000000e+00 : f32
    %1057 = vector.shape_cast %155 : vector<1x256xi1> to vector<1x256xi1>
    %1058 = vector.broadcast %1057 : vector<1x256xi1> to vector<4x256xi1>
    %1059 = vector.broadcast %cst_323 : f32 to vector<4x256xf32>
    %1060 = arith.select %1058, %1056, %1059 : vector<4x256xi1>, vector<4x256xf32>
    %1061 = vector.extract_strided_slice %14 {offsets = [0, 5], sizes = [4, 1], strides = [1, 1]} : vector<4x9xf32> to vector<4x1xf32>
    %1062 = vector.broadcast %1061 : vector<4x1xf32> to vector<4x256xf32>
    %1063 = arith.mulf %1060, %1062 : vector<4x256xf32>
    %1064 = arith.addf %1055, %1063 : vector<4x256xf32>
    %c241_i32_324 = arith.constant 241 : i32
    %1065 = tpu.dynamic_rotate %1009 by %c241_i32_324 dim 1 : vector<4x256xf32>, i32 -> vector<4x256xf32>
    %cst_325 = arith.constant 0.000000e+00 : f32
    %1066 = vector.shape_cast %174 : vector<1x256xi1> to vector<1x256xi1>
    %1067 = vector.broadcast %1066 : vector<1x256xi1> to vector<4x256xi1>
    %1068 = vector.broadcast %cst_325 : f32 to vector<4x256xf32>
    %1069 = arith.select %1067, %1065, %1068 : vector<4x256xi1>, vector<4x256xf32>
    %1070 = vector.extract_strided_slice %14 {offsets = [0, 6], sizes = [4, 1], strides = [1, 1]} : vector<4x9xf32> to vector<4x1xf32>
    %1071 = vector.broadcast %1070 : vector<4x1xf32> to vector<4x256xf32>
    %1072 = arith.mulf %1069, %1071 : vector<4x256xf32>
    %1073 = arith.addf %1064, %1072 : vector<4x256xf32>
    %c240_i32_326 = arith.constant 240 : i32
    %1074 = tpu.dynamic_rotate %1009 by %c240_i32_326 dim 1 : vector<4x256xf32>, i32 -> vector<4x256xf32>
    %cst_327 = arith.constant 0.000000e+00 : f32
    %1075 = vector.shape_cast %193 : vector<1x256xi1> to vector<1x256xi1>
    %1076 = vector.broadcast %1075 : vector<1x256xi1> to vector<4x256xi1>
    %1077 = vector.broadcast %cst_327 : f32 to vector<4x256xf32>
    %1078 = arith.select %1076, %1074, %1077 : vector<4x256xi1>, vector<4x256xf32>
    %1079 = vector.extract_strided_slice %14 {offsets = [0, 7], sizes = [4, 1], strides = [1, 1]} : vector<4x9xf32> to vector<4x1xf32>
    %1080 = vector.broadcast %1079 : vector<4x1xf32> to vector<4x256xf32>
    %1081 = arith.mulf %1078, %1080 : vector<4x256xf32>
    %1082 = arith.addf %1073, %1081 : vector<4x256xf32>
    %c239_i32_328 = arith.constant 239 : i32
    %1083 = tpu.dynamic_rotate %1009 by %c239_i32_328 dim 1 : vector<4x256xf32>, i32 -> vector<4x256xf32>
    %cst_329 = arith.constant 0.000000e+00 : f32
    %1084 = vector.shape_cast %212 : vector<1x256xi1> to vector<1x256xi1>
    %1085 = vector.broadcast %1084 : vector<1x256xi1> to vector<4x256xi1>
    %1086 = vector.broadcast %cst_329 : f32 to vector<4x256xf32>
    %1087 = arith.select %1085, %1083, %1086 : vector<4x256xi1>, vector<4x256xf32>
    %1088 = vector.extract_strided_slice %14 {offsets = [0, 8], sizes = [4, 1], strides = [1, 1]} : vector<4x9xf32> to vector<4x1xf32>
    %1089 = vector.broadcast %1088 : vector<4x1xf32> to vector<4x256xf32>
    %1090 = arith.mulf %1087, %1089 : vector<4x256xf32>
    %1091 = arith.addf %1082, %1090 : vector<4x256xf32>
    %cst_330 = arith.constant 0.000000e+00 : f32
    %1092 = vector.broadcast %cst_330 : f32 to vector<4x256xf32>
    %1093 = arith.cmpf ogt, %1091, %1092 : vector<4x256xf32>
    %cst_331 = arith.constant 0.00999999977 : f32
    %1094 = vector.broadcast %cst_331 : f32 to vector<4x256xf32>
    %1095 = arith.mulf %1094, %1091 : vector<4x256xf32>
    %1096 = arith.select %1093, %1091, %1095 : vector<4x256xi1>, vector<4x256xf32>
    %1097 = vector.shape_cast %17 : vector<4x1xf32> to vector<4x1xf32>
    %1098 = vector.broadcast %1097 : vector<4x1xf32> to vector<4x256xf32>
    %1099 = vector.extract_strided_slice %16 {offsets = [0, 0], sizes = [4, 1], strides = [1, 1]} : vector<4x4xf32> to vector<4x1xf32>
    %1100 = vector.extract_strided_slice %1096 {offsets = [0, 0], sizes = [1, 256], strides = [1, 1]} : vector<4x256xf32> to vector<1x256xf32>
    %1101 = vector.broadcast %1099 : vector<4x1xf32> to vector<4x256xf32>
    %1102 = vector.broadcast %1100 : vector<1x256xf32> to vector<4x256xf32>
    %1103 = arith.mulf %1101, %1102 : vector<4x256xf32>
    %1104 = arith.addf %1098, %1103 : vector<4x256xf32>
    %1105 = vector.extract_strided_slice %16 {offsets = [0, 1], sizes = [4, 1], strides = [1, 1]} : vector<4x4xf32> to vector<4x1xf32>
    %1106 = vector.extract_strided_slice %1096 {offsets = [1, 0], sizes = [1, 256], strides = [1, 1]} : vector<4x256xf32> to vector<1x256xf32>
    %1107 = vector.broadcast %1105 : vector<4x1xf32> to vector<4x256xf32>
    %1108 = vector.broadcast %1106 : vector<1x256xf32> to vector<4x256xf32>
    %1109 = arith.mulf %1107, %1108 : vector<4x256xf32>
    %1110 = arith.addf %1104, %1109 : vector<4x256xf32>
    %1111 = vector.extract_strided_slice %16 {offsets = [0, 2], sizes = [4, 1], strides = [1, 1]} : vector<4x4xf32> to vector<4x1xf32>
    %1112 = vector.extract_strided_slice %1096 {offsets = [2, 0], sizes = [1, 256], strides = [1, 1]} : vector<4x256xf32> to vector<1x256xf32>
    %1113 = vector.broadcast %1111 : vector<4x1xf32> to vector<4x256xf32>
    %1114 = vector.broadcast %1112 : vector<1x256xf32> to vector<4x256xf32>
    %1115 = arith.mulf %1113, %1114 : vector<4x256xf32>
    %1116 = arith.addf %1110, %1115 : vector<4x256xf32>
    %1117 = vector.extract_strided_slice %16 {offsets = [0, 3], sizes = [4, 1], strides = [1, 1]} : vector<4x4xf32> to vector<4x1xf32>
    %1118 = vector.extract_strided_slice %1096 {offsets = [3, 0], sizes = [1, 256], strides = [1, 1]} : vector<4x256xf32> to vector<1x256xf32>
    %1119 = vector.broadcast %1117 : vector<4x1xf32> to vector<4x256xf32>
    %1120 = vector.broadcast %1118 : vector<1x256xf32> to vector<4x256xf32>
    %1121 = arith.mulf %1119, %1120 : vector<4x256xf32>
    %1122 = arith.addf %1116, %1121 : vector<4x256xf32>
    %cst_332 = arith.constant 0.000000e+00 : f32
    %1123 = vector.broadcast %cst_332 : f32 to vector<4x256xf32>
    %1124 = arith.cmpf ogt, %1122, %1123 : vector<4x256xf32>
    %cst_333 = arith.constant 0.00999999977 : f32
    %1125 = vector.broadcast %cst_333 : f32 to vector<4x256xf32>
    %1126 = arith.mulf %1125, %1122 : vector<4x256xf32>
    %1127 = arith.select %1124, %1122, %1126 : vector<4x256xi1>, vector<4x256xf32>
    %1128 = vector.shape_cast %27 : vector<4x1xf32> to vector<4x1xf32>
    %1129 = vector.broadcast %1128 : vector<4x1xf32> to vector<4x256xf32>
    %c34_i32_334 = arith.constant 34 : i32
    %1130 = tpu.dynamic_rotate %891 by %c34_i32_334 dim 1 : vector<4x256xf32>, i32 -> vector<4x256xf32>
    %cst_335 = arith.constant 0.000000e+00 : f32
    %1131 = vector.shape_cast %231 : vector<1x256xi1> to vector<1x256xi1>
    %1132 = vector.broadcast %1131 : vector<1x256xi1> to vector<4x256xi1>
    %1133 = vector.broadcast %cst_335 : f32 to vector<4x256xf32>
    %1134 = arith.select %1132, %1130, %1133 : vector<4x256xi1>, vector<4x256xf32>
    %1135 = vector.extract_strided_slice %26 {offsets = [0, 0], sizes = [4, 1], strides = [1, 1]} : vector<4x9xf32> to vector<4x1xf32>
    %1136 = vector.broadcast %1135 : vector<4x1xf32> to vector<4x256xf32>
    %1137 = arith.mulf %1134, %1136 : vector<4x256xf32>
    %1138 = arith.addf %1129, %1137 : vector<4x256xf32>
    %c32_i32_336 = arith.constant 32 : i32
    %1139 = tpu.dynamic_rotate %891 by %c32_i32_336 dim 1 : vector<4x256xf32>, i32 -> vector<4x256xf32>
    %cst_337 = arith.constant 0.000000e+00 : f32
    %1140 = vector.shape_cast %250 : vector<1x256xi1> to vector<1x256xi1>
    %1141 = vector.broadcast %1140 : vector<1x256xi1> to vector<4x256xi1>
    %1142 = vector.broadcast %cst_337 : f32 to vector<4x256xf32>
    %1143 = arith.select %1141, %1139, %1142 : vector<4x256xi1>, vector<4x256xf32>
    %1144 = vector.extract_strided_slice %26 {offsets = [0, 1], sizes = [4, 1], strides = [1, 1]} : vector<4x9xf32> to vector<4x1xf32>
    %1145 = vector.broadcast %1144 : vector<4x1xf32> to vector<4x256xf32>
    %1146 = arith.mulf %1143, %1145 : vector<4x256xf32>
    %1147 = arith.addf %1138, %1146 : vector<4x256xf32>
    %c30_i32_338 = arith.constant 30 : i32
    %1148 = tpu.dynamic_rotate %891 by %c30_i32_338 dim 1 : vector<4x256xf32>, i32 -> vector<4x256xf32>
    %cst_339 = arith.constant 0.000000e+00 : f32
    %1149 = vector.shape_cast %269 : vector<1x256xi1> to vector<1x256xi1>
    %1150 = vector.broadcast %1149 : vector<1x256xi1> to vector<4x256xi1>
    %1151 = vector.broadcast %cst_339 : f32 to vector<4x256xf32>
    %1152 = arith.select %1150, %1148, %1151 : vector<4x256xi1>, vector<4x256xf32>
    %1153 = vector.extract_strided_slice %26 {offsets = [0, 2], sizes = [4, 1], strides = [1, 1]} : vector<4x9xf32> to vector<4x1xf32>
    %1154 = vector.broadcast %1153 : vector<4x1xf32> to vector<4x256xf32>
    %1155 = arith.mulf %1152, %1154 : vector<4x256xf32>
    %1156 = arith.addf %1147, %1155 : vector<4x256xf32>
    %c2_i32_340 = arith.constant 2 : i32
    %1157 = tpu.dynamic_rotate %891 by %c2_i32_340 dim 1 : vector<4x256xf32>, i32 -> vector<4x256xf32>
    %cst_341 = arith.constant 0.000000e+00 : f32
    %1158 = vector.shape_cast %288 : vector<1x256xi1> to vector<1x256xi1>
    %1159 = vector.broadcast %1158 : vector<1x256xi1> to vector<4x256xi1>
    %1160 = vector.broadcast %cst_341 : f32 to vector<4x256xf32>
    %1161 = arith.select %1159, %1157, %1160 : vector<4x256xi1>, vector<4x256xf32>
    %1162 = vector.extract_strided_slice %26 {offsets = [0, 3], sizes = [4, 1], strides = [1, 1]} : vector<4x9xf32> to vector<4x1xf32>
    %1163 = vector.broadcast %1162 : vector<4x1xf32> to vector<4x256xf32>
    %1164 = arith.mulf %1161, %1163 : vector<4x256xf32>
    %1165 = arith.addf %1156, %1164 : vector<4x256xf32>
    %cst_342 = arith.constant 0.000000e+00 : f32
    %1166 = vector.shape_cast %307 : vector<1x256xi1> to vector<1x256xi1>
    %1167 = vector.broadcast %1166 : vector<1x256xi1> to vector<4x256xi1>
    %1168 = vector.broadcast %cst_342 : f32 to vector<4x256xf32>
    %1169 = arith.select %1167, %891, %1168 : vector<4x256xi1>, vector<4x256xf32>
    %1170 = vector.extract_strided_slice %26 {offsets = [0, 4], sizes = [4, 1], strides = [1, 1]} : vector<4x9xf32> to vector<4x1xf32>
    %1171 = vector.broadcast %1170 : vector<4x1xf32> to vector<4x256xf32>
    %1172 = arith.mulf %1169, %1171 : vector<4x256xf32>
    %1173 = arith.addf %1165, %1172 : vector<4x256xf32>
    %c254_i32_343 = arith.constant 254 : i32
    %1174 = tpu.dynamic_rotate %891 by %c254_i32_343 dim 1 : vector<4x256xf32>, i32 -> vector<4x256xf32>
    %cst_344 = arith.constant 0.000000e+00 : f32
    %1175 = vector.shape_cast %326 : vector<1x256xi1> to vector<1x256xi1>
    %1176 = vector.broadcast %1175 : vector<1x256xi1> to vector<4x256xi1>
    %1177 = vector.broadcast %cst_344 : f32 to vector<4x256xf32>
    %1178 = arith.select %1176, %1174, %1177 : vector<4x256xi1>, vector<4x256xf32>
    %1179 = vector.extract_strided_slice %26 {offsets = [0, 5], sizes = [4, 1], strides = [1, 1]} : vector<4x9xf32> to vector<4x1xf32>
    %1180 = vector.broadcast %1179 : vector<4x1xf32> to vector<4x256xf32>
    %1181 = arith.mulf %1178, %1180 : vector<4x256xf32>
    %1182 = arith.addf %1173, %1181 : vector<4x256xf32>
    %c226_i32_345 = arith.constant 226 : i32
    %1183 = tpu.dynamic_rotate %891 by %c226_i32_345 dim 1 : vector<4x256xf32>, i32 -> vector<4x256xf32>
    %cst_346 = arith.constant 0.000000e+00 : f32
    %1184 = vector.shape_cast %345 : vector<1x256xi1> to vector<1x256xi1>
    %1185 = vector.broadcast %1184 : vector<1x256xi1> to vector<4x256xi1>
    %1186 = vector.broadcast %cst_346 : f32 to vector<4x256xf32>
    %1187 = arith.select %1185, %1183, %1186 : vector<4x256xi1>, vector<4x256xf32>
    %1188 = vector.extract_strided_slice %26 {offsets = [0, 6], sizes = [4, 1], strides = [1, 1]} : vector<4x9xf32> to vector<4x1xf32>
    %1189 = vector.broadcast %1188 : vector<4x1xf32> to vector<4x256xf32>
    %1190 = arith.mulf %1187, %1189 : vector<4x256xf32>
    %1191 = arith.addf %1182, %1190 : vector<4x256xf32>
    %c224_i32_347 = arith.constant 224 : i32
    %1192 = tpu.dynamic_rotate %891 by %c224_i32_347 dim 1 : vector<4x256xf32>, i32 -> vector<4x256xf32>
    %cst_348 = arith.constant 0.000000e+00 : f32
    %1193 = vector.shape_cast %364 : vector<1x256xi1> to vector<1x256xi1>
    %1194 = vector.broadcast %1193 : vector<1x256xi1> to vector<4x256xi1>
    %1195 = vector.broadcast %cst_348 : f32 to vector<4x256xf32>
    %1196 = arith.select %1194, %1192, %1195 : vector<4x256xi1>, vector<4x256xf32>
    %1197 = vector.extract_strided_slice %26 {offsets = [0, 7], sizes = [4, 1], strides = [1, 1]} : vector<4x9xf32> to vector<4x1xf32>
    %1198 = vector.broadcast %1197 : vector<4x1xf32> to vector<4x256xf32>
    %1199 = arith.mulf %1196, %1198 : vector<4x256xf32>
    %1200 = arith.addf %1191, %1199 : vector<4x256xf32>
    %c222_i32_349 = arith.constant 222 : i32
    %1201 = tpu.dynamic_rotate %891 by %c222_i32_349 dim 1 : vector<4x256xf32>, i32 -> vector<4x256xf32>
    %cst_350 = arith.constant 0.000000e+00 : f32
    %1202 = vector.shape_cast %383 : vector<1x256xi1> to vector<1x256xi1>
    %1203 = vector.broadcast %1202 : vector<1x256xi1> to vector<4x256xi1>
    %1204 = vector.broadcast %cst_350 : f32 to vector<4x256xf32>
    %1205 = arith.select %1203, %1201, %1204 : vector<4x256xi1>, vector<4x256xf32>
    %1206 = vector.extract_strided_slice %26 {offsets = [0, 8], sizes = [4, 1], strides = [1, 1]} : vector<4x9xf32> to vector<4x1xf32>
    %1207 = vector.broadcast %1206 : vector<4x1xf32> to vector<4x256xf32>
    %1208 = arith.mulf %1205, %1207 : vector<4x256xf32>
    %1209 = arith.addf %1200, %1208 : vector<4x256xf32>
    %cst_351 = arith.constant 0.000000e+00 : f32
    %1210 = vector.broadcast %cst_351 : f32 to vector<4x256xf32>
    %1211 = arith.cmpf ogt, %1209, %1210 : vector<4x256xf32>
    %cst_352 = arith.constant 0.00999999977 : f32
    %1212 = vector.broadcast %cst_352 : f32 to vector<4x256xf32>
    %1213 = arith.mulf %1212, %1209 : vector<4x256xf32>
    %1214 = arith.select %1211, %1209, %1213 : vector<4x256xi1>, vector<4x256xf32>
    %1215 = vector.shape_cast %29 : vector<4x1xf32> to vector<4x1xf32>
    %1216 = vector.broadcast %1215 : vector<4x1xf32> to vector<4x256xf32>
    %1217 = vector.extract_strided_slice %28 {offsets = [0, 0], sizes = [4, 1], strides = [1, 1]} : vector<4x4xf32> to vector<4x1xf32>
    %1218 = vector.extract_strided_slice %1214 {offsets = [0, 0], sizes = [1, 256], strides = [1, 1]} : vector<4x256xf32> to vector<1x256xf32>
    %1219 = vector.broadcast %1217 : vector<4x1xf32> to vector<4x256xf32>
    %1220 = vector.broadcast %1218 : vector<1x256xf32> to vector<4x256xf32>
    %1221 = arith.mulf %1219, %1220 : vector<4x256xf32>
    %1222 = arith.addf %1216, %1221 : vector<4x256xf32>
    %1223 = vector.extract_strided_slice %28 {offsets = [0, 1], sizes = [4, 1], strides = [1, 1]} : vector<4x4xf32> to vector<4x1xf32>
    %1224 = vector.extract_strided_slice %1214 {offsets = [1, 0], sizes = [1, 256], strides = [1, 1]} : vector<4x256xf32> to vector<1x256xf32>
    %1225 = vector.broadcast %1223 : vector<4x1xf32> to vector<4x256xf32>
    %1226 = vector.broadcast %1224 : vector<1x256xf32> to vector<4x256xf32>
    %1227 = arith.mulf %1225, %1226 : vector<4x256xf32>
    %1228 = arith.addf %1222, %1227 : vector<4x256xf32>
    %1229 = vector.extract_strided_slice %28 {offsets = [0, 2], sizes = [4, 1], strides = [1, 1]} : vector<4x4xf32> to vector<4x1xf32>
    %1230 = vector.extract_strided_slice %1214 {offsets = [2, 0], sizes = [1, 256], strides = [1, 1]} : vector<4x256xf32> to vector<1x256xf32>
    %1231 = vector.broadcast %1229 : vector<4x1xf32> to vector<4x256xf32>
    %1232 = vector.broadcast %1230 : vector<1x256xf32> to vector<4x256xf32>
    %1233 = arith.mulf %1231, %1232 : vector<4x256xf32>
    %1234 = arith.addf %1228, %1233 : vector<4x256xf32>
    %1235 = vector.extract_strided_slice %28 {offsets = [0, 3], sizes = [4, 1], strides = [1, 1]} : vector<4x4xf32> to vector<4x1xf32>
    %1236 = vector.extract_strided_slice %1214 {offsets = [3, 0], sizes = [1, 256], strides = [1, 1]} : vector<4x256xf32> to vector<1x256xf32>
    %1237 = vector.broadcast %1235 : vector<4x1xf32> to vector<4x256xf32>
    %1238 = vector.broadcast %1236 : vector<1x256xf32> to vector<4x256xf32>
    %1239 = arith.mulf %1237, %1238 : vector<4x256xf32>
    %1240 = arith.addf %1234, %1239 : vector<4x256xf32>
    %cst_353 = arith.constant 0.000000e+00 : f32
    %1241 = vector.broadcast %cst_353 : f32 to vector<4x256xf32>
    %1242 = arith.cmpf ogt, %1240, %1241 : vector<4x256xf32>
    %cst_354 = arith.constant 0.00999999977 : f32
    %1243 = vector.broadcast %cst_354 : f32 to vector<4x256xf32>
    %1244 = arith.mulf %1243, %1240 : vector<4x256xf32>
    %1245 = arith.select %1242, %1240, %1244 : vector<4x256xi1>, vector<4x256xf32>
    %1246 = vector.shape_cast %31 : vector<4x1xf32> to vector<4x1xf32>
    %1247 = vector.broadcast %1246 : vector<4x1xf32> to vector<4x256xf32>
    %c17_i32_355 = arith.constant 17 : i32
    %1248 = tpu.dynamic_rotate %1245 by %c17_i32_355 dim 1 : vector<4x256xf32>, i32 -> vector<4x256xf32>
    %cst_356 = arith.constant 0.000000e+00 : f32
    %1249 = vector.shape_cast %60 : vector<1x256xi1> to vector<1x256xi1>
    %1250 = vector.broadcast %1249 : vector<1x256xi1> to vector<4x256xi1>
    %1251 = vector.broadcast %cst_356 : f32 to vector<4x256xf32>
    %1252 = arith.select %1250, %1248, %1251 : vector<4x256xi1>, vector<4x256xf32>
    %1253 = vector.extract_strided_slice %30 {offsets = [0, 0], sizes = [4, 1], strides = [1, 1]} : vector<4x9xf32> to vector<4x1xf32>
    %1254 = vector.broadcast %1253 : vector<4x1xf32> to vector<4x256xf32>
    %1255 = arith.mulf %1252, %1254 : vector<4x256xf32>
    %1256 = arith.addf %1247, %1255 : vector<4x256xf32>
    %c16_i32_357 = arith.constant 16 : i32
    %1257 = tpu.dynamic_rotate %1245 by %c16_i32_357 dim 1 : vector<4x256xf32>, i32 -> vector<4x256xf32>
    %cst_358 = arith.constant 0.000000e+00 : f32
    %1258 = vector.shape_cast %79 : vector<1x256xi1> to vector<1x256xi1>
    %1259 = vector.broadcast %1258 : vector<1x256xi1> to vector<4x256xi1>
    %1260 = vector.broadcast %cst_358 : f32 to vector<4x256xf32>
    %1261 = arith.select %1259, %1257, %1260 : vector<4x256xi1>, vector<4x256xf32>
    %1262 = vector.extract_strided_slice %30 {offsets = [0, 1], sizes = [4, 1], strides = [1, 1]} : vector<4x9xf32> to vector<4x1xf32>
    %1263 = vector.broadcast %1262 : vector<4x1xf32> to vector<4x256xf32>
    %1264 = arith.mulf %1261, %1263 : vector<4x256xf32>
    %1265 = arith.addf %1256, %1264 : vector<4x256xf32>
    %c15_i32_359 = arith.constant 15 : i32
    %1266 = tpu.dynamic_rotate %1245 by %c15_i32_359 dim 1 : vector<4x256xf32>, i32 -> vector<4x256xf32>
    %cst_360 = arith.constant 0.000000e+00 : f32
    %1267 = vector.shape_cast %98 : vector<1x256xi1> to vector<1x256xi1>
    %1268 = vector.broadcast %1267 : vector<1x256xi1> to vector<4x256xi1>
    %1269 = vector.broadcast %cst_360 : f32 to vector<4x256xf32>
    %1270 = arith.select %1268, %1266, %1269 : vector<4x256xi1>, vector<4x256xf32>
    %1271 = vector.extract_strided_slice %30 {offsets = [0, 2], sizes = [4, 1], strides = [1, 1]} : vector<4x9xf32> to vector<4x1xf32>
    %1272 = vector.broadcast %1271 : vector<4x1xf32> to vector<4x256xf32>
    %1273 = arith.mulf %1270, %1272 : vector<4x256xf32>
    %1274 = arith.addf %1265, %1273 : vector<4x256xf32>
    %c1_i32_361 = arith.constant 1 : i32
    %1275 = tpu.dynamic_rotate %1245 by %c1_i32_361 dim 1 : vector<4x256xf32>, i32 -> vector<4x256xf32>
    %cst_362 = arith.constant 0.000000e+00 : f32
    %1276 = vector.shape_cast %117 : vector<1x256xi1> to vector<1x256xi1>
    %1277 = vector.broadcast %1276 : vector<1x256xi1> to vector<4x256xi1>
    %1278 = vector.broadcast %cst_362 : f32 to vector<4x256xf32>
    %1279 = arith.select %1277, %1275, %1278 : vector<4x256xi1>, vector<4x256xf32>
    %1280 = vector.extract_strided_slice %30 {offsets = [0, 3], sizes = [4, 1], strides = [1, 1]} : vector<4x9xf32> to vector<4x1xf32>
    %1281 = vector.broadcast %1280 : vector<4x1xf32> to vector<4x256xf32>
    %1282 = arith.mulf %1279, %1281 : vector<4x256xf32>
    %1283 = arith.addf %1274, %1282 : vector<4x256xf32>
    %cst_363 = arith.constant 0.000000e+00 : f32
    %1284 = vector.shape_cast %136 : vector<1x256xi1> to vector<1x256xi1>
    %1285 = vector.broadcast %1284 : vector<1x256xi1> to vector<4x256xi1>
    %1286 = vector.broadcast %cst_363 : f32 to vector<4x256xf32>
    %1287 = arith.select %1285, %1245, %1286 : vector<4x256xi1>, vector<4x256xf32>
    %1288 = vector.extract_strided_slice %30 {offsets = [0, 4], sizes = [4, 1], strides = [1, 1]} : vector<4x9xf32> to vector<4x1xf32>
    %1289 = vector.broadcast %1288 : vector<4x1xf32> to vector<4x256xf32>
    %1290 = arith.mulf %1287, %1289 : vector<4x256xf32>
    %1291 = arith.addf %1283, %1290 : vector<4x256xf32>
    %c255_i32_364 = arith.constant 255 : i32
    %1292 = tpu.dynamic_rotate %1245 by %c255_i32_364 dim 1 : vector<4x256xf32>, i32 -> vector<4x256xf32>
    %cst_365 = arith.constant 0.000000e+00 : f32
    %1293 = vector.shape_cast %155 : vector<1x256xi1> to vector<1x256xi1>
    %1294 = vector.broadcast %1293 : vector<1x256xi1> to vector<4x256xi1>
    %1295 = vector.broadcast %cst_365 : f32 to vector<4x256xf32>
    %1296 = arith.select %1294, %1292, %1295 : vector<4x256xi1>, vector<4x256xf32>
    %1297 = vector.extract_strided_slice %30 {offsets = [0, 5], sizes = [4, 1], strides = [1, 1]} : vector<4x9xf32> to vector<4x1xf32>
    %1298 = vector.broadcast %1297 : vector<4x1xf32> to vector<4x256xf32>
    %1299 = arith.mulf %1296, %1298 : vector<4x256xf32>
    %1300 = arith.addf %1291, %1299 : vector<4x256xf32>
    %c241_i32_366 = arith.constant 241 : i32
    %1301 = tpu.dynamic_rotate %1245 by %c241_i32_366 dim 1 : vector<4x256xf32>, i32 -> vector<4x256xf32>
    %cst_367 = arith.constant 0.000000e+00 : f32
    %1302 = vector.shape_cast %174 : vector<1x256xi1> to vector<1x256xi1>
    %1303 = vector.broadcast %1302 : vector<1x256xi1> to vector<4x256xi1>
    %1304 = vector.broadcast %cst_367 : f32 to vector<4x256xf32>
    %1305 = arith.select %1303, %1301, %1304 : vector<4x256xi1>, vector<4x256xf32>
    %1306 = vector.extract_strided_slice %30 {offsets = [0, 6], sizes = [4, 1], strides = [1, 1]} : vector<4x9xf32> to vector<4x1xf32>
    %1307 = vector.broadcast %1306 : vector<4x1xf32> to vector<4x256xf32>
    %1308 = arith.mulf %1305, %1307 : vector<4x256xf32>
    %1309 = arith.addf %1300, %1308 : vector<4x256xf32>
    %c240_i32_368 = arith.constant 240 : i32
    %1310 = tpu.dynamic_rotate %1245 by %c240_i32_368 dim 1 : vector<4x256xf32>, i32 -> vector<4x256xf32>
    %cst_369 = arith.constant 0.000000e+00 : f32
    %1311 = vector.shape_cast %193 : vector<1x256xi1> to vector<1x256xi1>
    %1312 = vector.broadcast %1311 : vector<1x256xi1> to vector<4x256xi1>
    %1313 = vector.broadcast %cst_369 : f32 to vector<4x256xf32>
    %1314 = arith.select %1312, %1310, %1313 : vector<4x256xi1>, vector<4x256xf32>
    %1315 = vector.extract_strided_slice %30 {offsets = [0, 7], sizes = [4, 1], strides = [1, 1]} : vector<4x9xf32> to vector<4x1xf32>
    %1316 = vector.broadcast %1315 : vector<4x1xf32> to vector<4x256xf32>
    %1317 = arith.mulf %1314, %1316 : vector<4x256xf32>
    %1318 = arith.addf %1309, %1317 : vector<4x256xf32>
    %c239_i32_370 = arith.constant 239 : i32
    %1319 = tpu.dynamic_rotate %1245 by %c239_i32_370 dim 1 : vector<4x256xf32>, i32 -> vector<4x256xf32>
    %cst_371 = arith.constant 0.000000e+00 : f32
    %1320 = vector.shape_cast %212 : vector<1x256xi1> to vector<1x256xi1>
    %1321 = vector.broadcast %1320 : vector<1x256xi1> to vector<4x256xi1>
    %1322 = vector.broadcast %cst_371 : f32 to vector<4x256xf32>
    %1323 = arith.select %1321, %1319, %1322 : vector<4x256xi1>, vector<4x256xf32>
    %1324 = vector.extract_strided_slice %30 {offsets = [0, 8], sizes = [4, 1], strides = [1, 1]} : vector<4x9xf32> to vector<4x1xf32>
    %1325 = vector.broadcast %1324 : vector<4x1xf32> to vector<4x256xf32>
    %1326 = arith.mulf %1323, %1325 : vector<4x256xf32>
    %1327 = arith.addf %1318, %1326 : vector<4x256xf32>
    %cst_372 = arith.constant 0.000000e+00 : f32
    %1328 = vector.broadcast %cst_372 : f32 to vector<4x256xf32>
    %1329 = arith.cmpf ogt, %1327, %1328 : vector<4x256xf32>
    %cst_373 = arith.constant 0.00999999977 : f32
    %1330 = vector.broadcast %cst_373 : f32 to vector<4x256xf32>
    %1331 = arith.mulf %1330, %1327 : vector<4x256xf32>
    %1332 = arith.select %1329, %1327, %1331 : vector<4x256xi1>, vector<4x256xf32>
    %1333 = vector.shape_cast %33 : vector<4x1xf32> to vector<4x1xf32>
    %1334 = vector.broadcast %1333 : vector<4x1xf32> to vector<4x256xf32>
    %1335 = vector.extract_strided_slice %32 {offsets = [0, 0], sizes = [4, 1], strides = [1, 1]} : vector<4x4xf32> to vector<4x1xf32>
    %1336 = vector.extract_strided_slice %1332 {offsets = [0, 0], sizes = [1, 256], strides = [1, 1]} : vector<4x256xf32> to vector<1x256xf32>
    %1337 = vector.broadcast %1335 : vector<4x1xf32> to vector<4x256xf32>
    %1338 = vector.broadcast %1336 : vector<1x256xf32> to vector<4x256xf32>
    %1339 = arith.mulf %1337, %1338 : vector<4x256xf32>
    %1340 = arith.addf %1334, %1339 : vector<4x256xf32>
    %1341 = vector.extract_strided_slice %32 {offsets = [0, 1], sizes = [4, 1], strides = [1, 1]} : vector<4x4xf32> to vector<4x1xf32>
    %1342 = vector.extract_strided_slice %1332 {offsets = [1, 0], sizes = [1, 256], strides = [1, 1]} : vector<4x256xf32> to vector<1x256xf32>
    %1343 = vector.broadcast %1341 : vector<4x1xf32> to vector<4x256xf32>
    %1344 = vector.broadcast %1342 : vector<1x256xf32> to vector<4x256xf32>
    %1345 = arith.mulf %1343, %1344 : vector<4x256xf32>
    %1346 = arith.addf %1340, %1345 : vector<4x256xf32>
    %1347 = vector.extract_strided_slice %32 {offsets = [0, 2], sizes = [4, 1], strides = [1, 1]} : vector<4x4xf32> to vector<4x1xf32>
    %1348 = vector.extract_strided_slice %1332 {offsets = [2, 0], sizes = [1, 256], strides = [1, 1]} : vector<4x256xf32> to vector<1x256xf32>
    %1349 = vector.broadcast %1347 : vector<4x1xf32> to vector<4x256xf32>
    %1350 = vector.broadcast %1348 : vector<1x256xf32> to vector<4x256xf32>
    %1351 = arith.mulf %1349, %1350 : vector<4x256xf32>
    %1352 = arith.addf %1346, %1351 : vector<4x256xf32>
    %1353 = vector.extract_strided_slice %32 {offsets = [0, 3], sizes = [4, 1], strides = [1, 1]} : vector<4x4xf32> to vector<4x1xf32>
    %1354 = vector.extract_strided_slice %1332 {offsets = [3, 0], sizes = [1, 256], strides = [1, 1]} : vector<4x256xf32> to vector<1x256xf32>
    %1355 = vector.broadcast %1353 : vector<4x1xf32> to vector<4x256xf32>
    %1356 = vector.broadcast %1354 : vector<1x256xf32> to vector<4x256xf32>
    %1357 = arith.mulf %1355, %1356 : vector<4x256xf32>
    %1358 = arith.addf %1352, %1357 : vector<4x256xf32>
    %cst_374 = arith.constant 0.000000e+00 : f32
    %1359 = vector.broadcast %cst_374 : f32 to vector<4x256xf32>
    %1360 = arith.cmpf ogt, %1358, %1359 : vector<4x256xf32>
    %cst_375 = arith.constant 0.00999999977 : f32
    %1361 = vector.broadcast %cst_375 : f32 to vector<4x256xf32>
    %1362 = arith.mulf %1361, %1358 : vector<4x256xf32>
    %1363 = arith.select %1360, %1358, %1362 : vector<4x256xi1>, vector<4x256xf32>
    %c0_376 = arith.constant 0 : index
    %c0_377 = arith.constant 0 : index
    %1364 = vector.load %arg40[%c0_376, %c0_377] : memref<8x256xf32, #tpu.memory_space<vmem>>, vector<4x256xf32>
    tpu.vector_store %arg40[%c0_376, %c0_377], %1127 {strides = array<i32>} : memref<8x256xf32, #tpu.memory_space<vmem>>, vector<4x256xf32>,
    %c4 = arith.constant 4 : index
    %c0_378 = arith.constant 0 : index
    %1365 = vector.load %arg40[%c4, %c0_378] : memref<8x256xf32, #tpu.memory_space<vmem>>, vector<4x256xf32>
    tpu.vector_store %arg40[%c4, %c0_378], %1363 {strides = array<i32>} : memref<8x256xf32, #tpu.memory_space<vmem>>, vector<4x256xf32>,
    %c0_379 = arith.constant 0 : index
    %c0_380 = arith.constant 0 : index
    %1366 = vector.load %arg40[%c0_379, %c0_380] : memref<8x256xf32, #tpu.memory_space<vmem>>, vector<8x256xf32>
    %1367 = arith.addf %1366, %385 : vector<8x256xf32>
    %1368 = vector.shape_cast %35 : vector<8x1xf32> to vector<8x1xf32>
    %1369 = vector.broadcast %1368 : vector<8x1xf32> to vector<8x256xf32>
    %1370 = vector.extract_strided_slice %34 {offsets = [0, 0], sizes = [8, 1], strides = [1, 1]} : vector<8x8xf32> to vector<8x1xf32>
    %1371 = vector.extract_strided_slice %1367 {offsets = [0, 0], sizes = [1, 256], strides = [1, 1]} : vector<8x256xf32> to vector<1x256xf32>
    %1372 = vector.broadcast %1370 : vector<8x1xf32> to vector<8x256xf32>
    %1373 = vector.broadcast %1371 : vector<1x256xf32> to vector<8x256xf32>
    %1374 = arith.mulf %1372, %1373 : vector<8x256xf32>
    %1375 = arith.addf %1369, %1374 : vector<8x256xf32>
    %1376 = vector.extract_strided_slice %34 {offsets = [0, 1], sizes = [8, 1], strides = [1, 1]} : vector<8x8xf32> to vector<8x1xf32>
    %1377 = vector.extract_strided_slice %1367 {offsets = [1, 0], sizes = [1, 256], strides = [1, 1]} : vector<8x256xf32> to vector<1x256xf32>
    %1378 = vector.broadcast %1376 : vector<8x1xf32> to vector<8x256xf32>
    %1379 = vector.broadcast %1377 : vector<1x256xf32> to vector<8x256xf32>
    %1380 = arith.mulf %1378, %1379 : vector<8x256xf32>
    %1381 = arith.addf %1375, %1380 : vector<8x256xf32>
    %1382 = vector.extract_strided_slice %34 {offsets = [0, 2], sizes = [8, 1], strides = [1, 1]} : vector<8x8xf32> to vector<8x1xf32>
    %1383 = vector.extract_strided_slice %1367 {offsets = [2, 0], sizes = [1, 256], strides = [1, 1]} : vector<8x256xf32> to vector<1x256xf32>
    %1384 = vector.broadcast %1382 : vector<8x1xf32> to vector<8x256xf32>
    %1385 = vector.broadcast %1383 : vector<1x256xf32> to vector<8x256xf32>
    %1386 = arith.mulf %1384, %1385 : vector<8x256xf32>
    %1387 = arith.addf %1381, %1386 : vector<8x256xf32>
    %1388 = vector.extract_strided_slice %34 {offsets = [0, 3], sizes = [8, 1], strides = [1, 1]} : vector<8x8xf32> to vector<8x1xf32>
    %1389 = vector.extract_strided_slice %1367 {offsets = [3, 0], sizes = [1, 256], strides = [1, 1]} : vector<8x256xf32> to vector<1x256xf32>
    %1390 = vector.broadcast %1388 : vector<8x1xf32> to vector<8x256xf32>
    %1391 = vector.broadcast %1389 : vector<1x256xf32> to vector<8x256xf32>
    %1392 = arith.mulf %1390, %1391 : vector<8x256xf32>
    %1393 = arith.addf %1387, %1392 : vector<8x256xf32>
    %1394 = vector.extract_strided_slice %34 {offsets = [0, 4], sizes = [8, 1], strides = [1, 1]} : vector<8x8xf32> to vector<8x1xf32>
    %1395 = vector.extract_strided_slice %1367 {offsets = [4, 0], sizes = [1, 256], strides = [1, 1]} : vector<8x256xf32> to vector<1x256xf32>
    %1396 = vector.broadcast %1394 : vector<8x1xf32> to vector<8x256xf32>
    %1397 = vector.broadcast %1395 : vector<1x256xf32> to vector<8x256xf32>
    %1398 = arith.mulf %1396, %1397 : vector<8x256xf32>
    %1399 = arith.addf %1393, %1398 : vector<8x256xf32>
    %1400 = vector.extract_strided_slice %34 {offsets = [0, 5], sizes = [8, 1], strides = [1, 1]} : vector<8x8xf32> to vector<8x1xf32>
    %1401 = vector.extract_strided_slice %1367 {offsets = [5, 0], sizes = [1, 256], strides = [1, 1]} : vector<8x256xf32> to vector<1x256xf32>
    %1402 = vector.broadcast %1400 : vector<8x1xf32> to vector<8x256xf32>
    %1403 = vector.broadcast %1401 : vector<1x256xf32> to vector<8x256xf32>
    %1404 = arith.mulf %1402, %1403 : vector<8x256xf32>
    %1405 = arith.addf %1399, %1404 : vector<8x256xf32>
    %1406 = vector.extract_strided_slice %34 {offsets = [0, 6], sizes = [8, 1], strides = [1, 1]} : vector<8x8xf32> to vector<8x1xf32>
    %1407 = vector.extract_strided_slice %1367 {offsets = [6, 0], sizes = [1, 256], strides = [1, 1]} : vector<8x256xf32> to vector<1x256xf32>
    %1408 = vector.broadcast %1406 : vector<8x1xf32> to vector<8x256xf32>
    %1409 = vector.broadcast %1407 : vector<1x256xf32> to vector<8x256xf32>
    %1410 = arith.mulf %1408, %1409 : vector<8x256xf32>
    %1411 = arith.addf %1405, %1410 : vector<8x256xf32>
    %1412 = vector.extract_strided_slice %34 {offsets = [0, 7], sizes = [8, 1], strides = [1, 1]} : vector<8x8xf32> to vector<8x1xf32>
    %1413 = vector.extract_strided_slice %1367 {offsets = [7, 0], sizes = [1, 256], strides = [1, 1]} : vector<8x256xf32> to vector<1x256xf32>
    %1414 = vector.broadcast %1412 : vector<8x1xf32> to vector<8x256xf32>
    %1415 = vector.broadcast %1413 : vector<1x256xf32> to vector<8x256xf32>
    %1416 = arith.mulf %1414, %1415 : vector<8x256xf32>
    %1417 = arith.addf %1411, %1416 : vector<8x256xf32>
    %cst_381 = arith.constant 0.000000e+00 : f32
    %1418 = vector.broadcast %cst_381 : f32 to vector<8x256xf32>
    %1419 = arith.cmpf ogt, %1417, %1418 : vector<8x256xf32>
    %cst_382 = arith.constant 0.00999999977 : f32
    %1420 = vector.broadcast %cst_382 : f32 to vector<8x256xf32>
    %1421 = arith.mulf %1420, %1417 : vector<8x256xf32>
    %1422 = arith.select %1419, %1417, %1421 : vector<8x256xi1>, vector<8x256xf32>
    %cst_383 = arith.constant dense<0.000000e+00> : vector<8xf32>
    %1423 = vector.multi_reduction <add>, %1422, %cst_383 [1] : vector<8x256xf32> to vector<8xf32>
    %1424 = vector.shape_cast %1423 : vector<8xf32> to vector<8x1xf32>
    %cst_384 = arith.constant 2.560000e+02 : f32
    %1425 = vector.broadcast %cst_384 : f32 to vector<8x1xf32>
    %1426 = arith.divf %1424, %1425 : vector<8x1xf32>
    %cst_385 = arith.constant 0.000000e+00 : f32
    %1427 = vector.broadcast %cst_385 : f32 to vector<8x1xf32>
    %1428 = vector.extract_strided_slice %36 {offsets = [0, 0], sizes = [8, 1], strides = [1, 1]} : vector<8x8xf32> to vector<8x1xf32>
    %1429 = vector.extract_strided_slice %1426 {offsets = [0, 0], sizes = [1, 1], strides = [1, 1]} : vector<8x1xf32> to vector<1x1xf32>
    %1430 = vector.broadcast %1429 : vector<1x1xf32> to vector<8x1xf32>
    %1431 = arith.mulf %1428, %1430 : vector<8x1xf32>
    %1432 = arith.addf %1427, %1431 : vector<8x1xf32>
    %1433 = vector.extract_strided_slice %36 {offsets = [0, 1], sizes = [8, 1], strides = [1, 1]} : vector<8x8xf32> to vector<8x1xf32>
    %1434 = vector.extract_strided_slice %1426 {offsets = [1, 0], sizes = [1, 1], strides = [1, 1]} : vector<8x1xf32> to vector<1x1xf32>
    %1435 = vector.broadcast %1434 : vector<1x1xf32> to vector<8x1xf32>
    %1436 = arith.mulf %1433, %1435 : vector<8x1xf32>
    %1437 = arith.addf %1432, %1436 : vector<8x1xf32>
    %1438 = vector.extract_strided_slice %36 {offsets = [0, 2], sizes = [8, 1], strides = [1, 1]} : vector<8x8xf32> to vector<8x1xf32>
    %1439 = vector.extract_strided_slice %1426 {offsets = [2, 0], sizes = [1, 1], strides = [1, 1]} : vector<8x1xf32> to vector<1x1xf32>
    %1440 = vector.broadcast %1439 : vector<1x1xf32> to vector<8x1xf32>
    %1441 = arith.mulf %1438, %1440 : vector<8x1xf32>
    %1442 = arith.addf %1437, %1441 : vector<8x1xf32>
    %1443 = vector.extract_strided_slice %36 {offsets = [0, 3], sizes = [8, 1], strides = [1, 1]} : vector<8x8xf32> to vector<8x1xf32>
    %1444 = vector.extract_strided_slice %1426 {offsets = [3, 0], sizes = [1, 1], strides = [1, 1]} : vector<8x1xf32> to vector<1x1xf32>
    %1445 = vector.broadcast %1444 : vector<1x1xf32> to vector<8x1xf32>
    %1446 = arith.mulf %1443, %1445 : vector<8x1xf32>
    %1447 = arith.addf %1442, %1446 : vector<8x1xf32>
    %1448 = vector.extract_strided_slice %36 {offsets = [0, 4], sizes = [8, 1], strides = [1, 1]} : vector<8x8xf32> to vector<8x1xf32>
    %1449 = vector.extract_strided_slice %1426 {offsets = [4, 0], sizes = [1, 1], strides = [1, 1]} : vector<8x1xf32> to vector<1x1xf32>
    %1450 = vector.broadcast %1449 : vector<1x1xf32> to vector<8x1xf32>
    %1451 = arith.mulf %1448, %1450 : vector<8x1xf32>
    %1452 = arith.addf %1447, %1451 : vector<8x1xf32>
    %1453 = vector.extract_strided_slice %36 {offsets = [0, 5], sizes = [8, 1], strides = [1, 1]} : vector<8x8xf32> to vector<8x1xf32>
    %1454 = vector.extract_strided_slice %1426 {offsets = [5, 0], sizes = [1, 1], strides = [1, 1]} : vector<8x1xf32> to vector<1x1xf32>
    %1455 = vector.broadcast %1454 : vector<1x1xf32> to vector<8x1xf32>
    %1456 = arith.mulf %1453, %1455 : vector<8x1xf32>
    %1457 = arith.addf %1452, %1456 : vector<8x1xf32>
    %1458 = vector.extract_strided_slice %36 {offsets = [0, 6], sizes = [8, 1], strides = [1, 1]} : vector<8x8xf32> to vector<8x1xf32>
    %1459 = vector.extract_strided_slice %1426 {offsets = [6, 0], sizes = [1, 1], strides = [1, 1]} : vector<8x1xf32> to vector<1x1xf32>
    %1460 = vector.broadcast %1459 : vector<1x1xf32> to vector<8x1xf32>
    %1461 = arith.mulf %1458, %1460 : vector<8x1xf32>
    %1462 = arith.addf %1457, %1461 : vector<8x1xf32>
    %1463 = vector.extract_strided_slice %36 {offsets = [0, 7], sizes = [8, 1], strides = [1, 1]} : vector<8x8xf32> to vector<8x1xf32>
    %1464 = vector.extract_strided_slice %1426 {offsets = [7, 0], sizes = [1, 1], strides = [1, 1]} : vector<8x1xf32> to vector<1x1xf32>
    %1465 = vector.broadcast %1464 : vector<1x1xf32> to vector<8x1xf32>
    %1466 = arith.mulf %1463, %1465 : vector<8x1xf32>
    %1467 = arith.addf %1462, %1466 : vector<8x1xf32>
    %cst_386 = arith.constant 0.000000e+00 : f32
    %1468 = vector.broadcast %cst_386 : f32 to vector<8x1xf32>
    %1469 = arith.subf %1468, %1467 : vector<8x1xf32>
    %1470 = math.exp %1469 : vector<8x1xf32>
    %cst_387 = arith.constant 1.000000e+00 : f32
    %1471 = vector.broadcast %cst_387 : f32 to vector<8x1xf32>
    %1472 = arith.addf %1471, %1470 : vector<8x1xf32>
    %1473 = tpu.reciprocal %1472 {approx = true} : vector<8x1xf32> -> vector<8x1xf32>
    %1474 = vector.broadcast %1473 : vector<8x1xf32> to vector<8x256xf32>
    %1475 = arith.mulf %1422, %1474 : vector<8x256xf32>
    %c0_388 = arith.constant 0 : index
    %c0_389 = arith.constant 0 : index
    %c0_390 = arith.constant 0 : index
    %1476 = vector.load %arg39[%c0_388, %c0_389, %c0_390] : memref<1x8x256xf32, #tpu.memory_space<vmem>>, vector<1x8x256xf32>
    %1477 = vector.shape_cast %1476 : vector<1x8x256xf32> to vector<8x256xf32>
    %1478 = vector.shape_cast %1475 : vector<8x256xf32> to vector<1x8x256xf32>
    tpu.vector_store %arg39[%c0_388, %c0_389, %c0_390], %1478 {strides = array<i32>} : memref<1x8x256xf32, #tpu.memory_space<vmem>>, vector<1x8x256xf32>,
    return
  }
  func.func @transform_0(%arg0: i32) -> (i32, i32, i32) {
    %c0_i32 = arith.constant 0 : i32
    %c0_i32_0 = arith.constant 0 : i32
    %c0_i32_1 = arith.constant 0 : i32
    return %arg0, %c0_i32, %c0_i32_0 : i32, i32, i32
  }
  func.func @transform_1(%arg0: i32) -> (i32, i32) {
    %c0_i32 = arith.constant 0 : i32
    %c0_i32_0 = arith.constant 0 : i32
    %c0_i32_1 = arith.constant 0 : i32
    return %c0_i32, %c0_i32_0 : i32, i32
  }
  func.func @transform_2(%arg0: i32) -> (i32, i32) {
    %c0_i32 = arith.constant 0 : i32
    %c0_i32_0 = arith.constant 0 : i32
    %c0_i32_1 = arith.constant 0 : i32
    return %c0_i32, %c0_i32_0 : i32, i32
  }
  func.func @transform_3(%arg0: i32) -> (i32, i32) {
    %c0_i32 = arith.constant 0 : i32
    %c0_i32_0 = arith.constant 0 : i32
    %c0_i32_1 = arith.constant 0 : i32
    return %c0_i32, %c0_i32_0 : i32, i32
  }
  func.func @transform_4(%arg0: i32) -> (i32, i32) {
    %c0_i32 = arith.constant 0 : i32
    %c0_i32_0 = arith.constant 0 : i32
    %c0_i32_1 = arith.constant 0 : i32
    return %c0_i32, %c0_i32_0 : i32, i32
  }
  func.func @transform_5(%arg0: i32) -> (i32, i32) {
    %c0_i32 = arith.constant 0 : i32
    %c0_i32_0 = arith.constant 0 : i32
    %c0_i32_1 = arith.constant 0 : i32
    return %c0_i32, %c0_i32_0 : i32, i32
  }
  func.func @transform_6(%arg0: i32) -> (i32, i32) {
    %c0_i32 = arith.constant 0 : i32
    %c0_i32_0 = arith.constant 0 : i32
    %c0_i32_1 = arith.constant 0 : i32
    return %c0_i32, %c0_i32_0 : i32, i32
  }
  func.func @transform_7(%arg0: i32) -> (i32, i32) {
    %c0_i32 = arith.constant 0 : i32
    %c0_i32_0 = arith.constant 0 : i32
    %c0_i32_1 = arith.constant 0 : i32
    return %c0_i32, %c0_i32_0 : i32, i32
  }
  func.func @transform_8(%arg0: i32) -> (i32, i32) {
    %c0_i32 = arith.constant 0 : i32
    %c0_i32_0 = arith.constant 0 : i32
    %c0_i32_1 = arith.constant 0 : i32
    return %c0_i32, %c0_i32_0 : i32, i32
  }
  func.func @transform_9(%arg0: i32) -> (i32, i32) {
    %c0_i32 = arith.constant 0 : i32
    %c0_i32_0 = arith.constant 0 : i32
    %c0_i32_1 = arith.constant 0 : i32
    return %c0_i32, %c0_i32_0 : i32, i32
  }
  func.func @transform_10(%arg0: i32) -> (i32, i32) {
    %c0_i32 = arith.constant 0 : i32
    %c0_i32_0 = arith.constant 0 : i32
    %c0_i32_1 = arith.constant 0 : i32
    return %c0_i32, %c0_i32_0 : i32, i32
  }
  func.func @transform_11(%arg0: i32) -> (i32, i32) {
    %c0_i32 = arith.constant 0 : i32
    %c0_i32_0 = arith.constant 0 : i32
    %c0_i32_1 = arith.constant 0 : i32
    return %c0_i32, %c0_i32_0 : i32, i32
  }
  func.func @transform_12(%arg0: i32) -> (i32, i32) {
    %c0_i32 = arith.constant 0 : i32
    %c0_i32_0 = arith.constant 0 : i32
    %c0_i32_1 = arith.constant 0 : i32
    return %c0_i32, %c0_i32_0 : i32, i32
  }
  func.func @transform_13(%arg0: i32) -> (i32, i32) {
    %c0_i32 = arith.constant 0 : i32
    %c0_i32_0 = arith.constant 0 : i32
    %c0_i32_1 = arith.constant 0 : i32
    return %c0_i32, %c0_i32_0 : i32, i32
  }
  func.func @transform_14(%arg0: i32) -> (i32, i32) {
    %c0_i32 = arith.constant 0 : i32
    %c0_i32_0 = arith.constant 0 : i32
    %c0_i32_1 = arith.constant 0 : i32
    return %c0_i32, %c0_i32_0 : i32, i32
  }
  func.func @transform_15(%arg0: i32) -> (i32, i32) {
    %c0_i32 = arith.constant 0 : i32
    %c0_i32_0 = arith.constant 0 : i32
    %c0_i32_1 = arith.constant 0 : i32
    return %c0_i32, %c0_i32_0 : i32, i32
  }
  func.func @transform_16(%arg0: i32) -> (i32, i32) {
    %c0_i32 = arith.constant 0 : i32
    %c0_i32_0 = arith.constant 0 : i32
    %c0_i32_1 = arith.constant 0 : i32
    return %c0_i32, %c0_i32_0 : i32, i32
  }
  func.func @transform_17(%arg0: i32) -> (i32, i32) {
    %c0_i32 = arith.constant 0 : i32
    %c0_i32_0 = arith.constant 0 : i32
    %c0_i32_1 = arith.constant 0 : i32
    return %c0_i32, %c0_i32_0 : i32, i32
  }
  func.func @transform_18(%arg0: i32) -> (i32, i32) {
    %c0_i32 = arith.constant 0 : i32
    %c0_i32_0 = arith.constant 0 : i32
    %c0_i32_1 = arith.constant 0 : i32
    return %c0_i32, %c0_i32_0 : i32, i32
  }
  func.func @transform_19(%arg0: i32) -> (i32, i32) {
    %c0_i32 = arith.constant 0 : i32
    %c0_i32_0 = arith.constant 0 : i32
    %c0_i32_1 = arith.constant 0 : i32
    return %c0_i32, %c0_i32_0 : i32, i32
  }
  func.func @transform_20(%arg0: i32) -> (i32, i32) {
    %c0_i32 = arith.constant 0 : i32
    %c0_i32_0 = arith.constant 0 : i32
    %c0_i32_1 = arith.constant 0 : i32
    return %c0_i32, %c0_i32_0 : i32, i32
  }
  func.func @transform_21(%arg0: i32) -> (i32, i32) {
    %c0_i32 = arith.constant 0 : i32
    %c0_i32_0 = arith.constant 0 : i32
    %c0_i32_1 = arith.constant 0 : i32
    return %c0_i32, %c0_i32_0 : i32, i32
  }
  func.func @transform_22(%arg0: i32) -> (i32, i32) {
    %c0_i32 = arith.constant 0 : i32
    %c0_i32_0 = arith.constant 0 : i32
    %c0_i32_1 = arith.constant 0 : i32
    return %c0_i32, %c0_i32_0 : i32, i32
  }
  func.func @transform_23(%arg0: i32) -> (i32, i32) {
    %c0_i32 = arith.constant 0 : i32
    %c0_i32_0 = arith.constant 0 : i32
    %c0_i32_1 = arith.constant 0 : i32
    return %c0_i32, %c0_i32_0 : i32, i32
  }
  func.func @transform_24(%arg0: i32) -> (i32, i32) {
    %c0_i32 = arith.constant 0 : i32
    %c0_i32_0 = arith.constant 0 : i32
    %c0_i32_1 = arith.constant 0 : i32
    return %c0_i32, %c0_i32_0 : i32, i32
  }
  func.func @transform_25(%arg0: i32) -> (i32, i32) {
    %c0_i32 = arith.constant 0 : i32
    %c0_i32_0 = arith.constant 0 : i32
    %c0_i32_1 = arith.constant 0 : i32
    return %c0_i32, %c0_i32_0 : i32, i32
  }
  func.func @transform_26(%arg0: i32) -> (i32, i32) {
    %c0_i32 = arith.constant 0 : i32
    %c0_i32_0 = arith.constant 0 : i32
    %c0_i32_1 = arith.constant 0 : i32
    return %c0_i32, %c0_i32_0 : i32, i32
  }
  func.func @transform_27(%arg0: i32) -> (i32, i32) {
    %c0_i32 = arith.constant 0 : i32
    %c0_i32_0 = arith.constant 0 : i32
    %c0_i32_1 = arith.constant 0 : i32
    return %c0_i32, %c0_i32_0 : i32, i32
  }
  func.func @transform_28(%arg0: i32) -> (i32, i32) {
    %c0_i32 = arith.constant 0 : i32
    %c0_i32_0 = arith.constant 0 : i32
    %c0_i32_1 = arith.constant 0 : i32
    return %c0_i32, %c0_i32_0 : i32, i32
  }
  func.func @transform_29(%arg0: i32) -> (i32, i32) {
    %c0_i32 = arith.constant 0 : i32
    %c0_i32_0 = arith.constant 0 : i32
    %c0_i32_1 = arith.constant 0 : i32
    return %c0_i32, %c0_i32_0 : i32, i32
  }
  func.func @transform_30(%arg0: i32) -> (i32, i32) {
    %c0_i32 = arith.constant 0 : i32
    %c0_i32_0 = arith.constant 0 : i32
    %c0_i32_1 = arith.constant 0 : i32
    return %c0_i32, %c0_i32_0 : i32, i32
  }
  func.func @transform_31(%arg0: i32) -> (i32, i32) {
    %c0_i32 = arith.constant 0 : i32
    %c0_i32_0 = arith.constant 0 : i32
    %c0_i32_1 = arith.constant 0 : i32
    return %c0_i32, %c0_i32_0 : i32, i32
  }
  func.func @transform_32(%arg0: i32) -> (i32, i32) {
    %c0_i32 = arith.constant 0 : i32
    %c0_i32_0 = arith.constant 0 : i32
    %c0_i32_1 = arith.constant 0 : i32
    return %c0_i32, %c0_i32_0 : i32, i32
  }
  func.func @transform_33(%arg0: i32) -> (i32, i32) {
    %c0_i32 = arith.constant 0 : i32
    %c0_i32_0 = arith.constant 0 : i32
    %c0_i32_1 = arith.constant 0 : i32
    return %c0_i32, %c0_i32_0 : i32, i32
  }
  func.func @transform_34(%arg0: i32) -> (i32, i32) {
    %c0_i32 = arith.constant 0 : i32
    %c0_i32_0 = arith.constant 0 : i32
    %c0_i32_1 = arith.constant 0 : i32
    return %c0_i32, %c0_i32_0 : i32, i32
  }
  func.func @transform_35(%arg0: i32) -> (i32, i32) {
    %c0_i32 = arith.constant 0 : i32
    %c0_i32_0 = arith.constant 0 : i32
    %c0_i32_1 = arith.constant 0 : i32
    return %c0_i32, %c0_i32_0 : i32, i32
  }
  func.func @transform_36(%arg0: i32) -> (i32, i32) {
    %c0_i32 = arith.constant 0 : i32
    %c0_i32_0 = arith.constant 0 : i32
    %c0_i32_1 = arith.constant 0 : i32
    return %c0_i32, %c0_i32_0 : i32, i32
  }
  func.func @transform_37(%arg0: i32) -> (i32, i32) {
    %c0_i32 = arith.constant 0 : i32
    %c0_i32_0 = arith.constant 0 : i32
    %c0_i32_1 = arith.constant 0 : i32
    return %c0_i32, %c0_i32_0 : i32, i32
  }
  func.func @transform_38(%arg0: i32) -> (i32, i32, i32) {
    %c0_i32 = arith.constant 0 : i32
    %c0_i32_0 = arith.constant 0 : i32
    %c0_i32_1 = arith.constant 0 : i32
    return %arg0, %c0_i32, %c0_i32_0 : i32, i32, i32
  }
}

</mosaic_0001>

<bundles_post_ra>
// kernel: msab_forward.1
= control target key start
LH: loop header
LB: loop body
LE: loop exit
PB: predicated region body
PF: predicated region fallthrough
CT: control target
= control target key end

     0   :  { %s3840_s6 = smov 1   ;;  %s3841_s10 = smov 2   ;;  %s6310_s0 = inlined_call_operand.smem [shape: u32[39], index: -1, kind: input, shape index: {}] }
   0x1   :  { %s3916_s5 = sld [smem:[%s6310_s0]]   ;;  %s3842_s14 = smov 3  }
   0x2   :  { %s3921_s9 = sld [smem:[%s6310_s0 + %s3840_s6]]   ;;  %s3843_s18 = smov 4  }
   0x3   :  { %s3926_s13 = sld [smem:[%s6310_s0 + %s3841_s10]]   ;;  %s3844_s22 = smov 5  }
   0x4   :  { %s3931_s17 = sld [smem:[%s6310_s0 + %s3842_s14]]   ;;  %s3845_s26 = smov 6  }
   0x5   :  { %s3936_s21 = sld [smem:[%s6310_s0 + %s3843_s18]]   ;;  %s3846_s30 = smov 7  }
   0x6   :  { %s3941_s25 = sld [smem:[%s6310_s0 + %s3844_s22]]   ;;  %s3847_s4 = smov 8  }
   0x7   :  { %s3946_s29 = sld [smem:[%s6310_s0 + %s3845_s26]]   ;;  %s3848_s10 = smov 9  }
   0x8   :  { %s3951_s3 = sld [smem:[%s6310_s0 + %s3846_s30]]   ;;  %s3849_s15 = smov 10  }
   0x9   :  { %s3956_s8 = sld [smem:[%s6310_s0 + %s3847_s4]]   ;;  %s3850_s20 = smov 11  }
   0xa   :  { %s3961_s14 = sld [smem:[%s6310_s0 + %s3848_s10]]   ;;  %s3851_s26 = smov 12  }
   0xb   :  { %s3966_s19 = sld [smem:[%s6310_s0 + %s3849_s15]]   ;;  %s3852_s1 = smov 13  }
   0xc   :  { %s3971_s24 = sld [smem:[%s6310_s0 + %s3850_s20]]   ;;  %s3853_s7 = smov 14  }
   0xd   :  { %s3976_s30 = sld [smem:[%s6310_s0 + %s3851_s26]]   ;;  %s3854_s15 = smov 15  }
   0xe   :  { %6557 = sst [smem:[#allocation3_spill]] %s3951_s3  ;;  %s3855_s22 = smov 16  }
   0xf   :  { %s3981_s6 = sld [smem:[%s6310_s0 + %s3852_s1]]   ;;  %s3856_s28 = smov 17  }
  0x10   :  { %6558 = sst [smem:[#allocation4_spill]] %s3961_s14 }
  0x11   :  { %6559 = sst [smem:[#allocation5_spill]] %s3966_s19 }
  0x12   :  { %6560 = sst [smem:[#allocation6_spill]] %s3971_s24 }
  0x13   :  { %6561 = sst [smem:[#allocation7_spill]] %s3976_s30 }
  0x14   :  { %s3986_s12 = sld [smem:[%s6310_s0 + %s3853_s7]]   ;;  %s3857_s7 = smov 18  }
  0x15   :  { %6562 = sst [smem:[#allocation8_spill]] %s3981_s6 }
  0x16   :  { %s3991_s20 = sld [smem:[%s6310_s0 + %s3854_s15]]   ;;  %s3858_s15 = smov 19  }
  0x17   :  { %s3996_s27 = sld [smem:[%s6310_s0 + %s3855_s22]]   ;;  %s3859_s22 = smov 20  }
  0x18   :  { %s4001_s4 = sld [smem:[%s6310_s0 + %s3856_s28]]   ;;  %s3860_s28 = smov 21  }
  0x1a   :  { %6563 = sst [smem:[#allocation9_spill]] %s3986_s12 }
  0x1b   :  { %s4006_s12 = sld [smem:[%s6310_s0 + %s3857_s7]]   ;;  %s3861_s7 = smov 22  }
  0x1c   :  { %6564 = sst [smem:[#allocation10_spill]] %s3991_s20 }
  0x1d   :  { %6565 = sst [smem:[#allocation11_spill]] %s3996_s27 }
  0x1e   :  { %6566 = sst [smem:[#allocation12_spill]] %s4001_s4 }
  0x1f   :  { %s4011_s20 = sld [smem:[%s6310_s0 + %s3858_s15]]   ;;  %s3862_s15 = smov 23  }
  0x20   :  { %s4016_s27 = sld [smem:[%s6310_s0 + %s3859_s22]]   ;;  %s3863_s22 = smov 24  }
  0x21   :  { %6567 = sst [smem:[#allocation13_spill]] %s4006_s12 }
  0x22   :  { %s4021_s4 = sld [smem:[%s6310_s0 + %s3860_s28]]   ;;  %s3864_s28 = smov 25  }
  0x23   :  { %s4026_s12 = sld [smem:[%s6310_s0 + %s3861_s7]]   ;;  %s3865_s7 = smov 26  }
  0x24   :  { %s4031_s6 = sld [smem:[%s6310_s0 + %s3862_s15]]   ;;  %s3866_s15 = smov 27  }
  0x25   :  { %s4036_s30 = sld [smem:[%s6310_s0 + %s3863_s22]]   ;;  %s3867_s22 = smov 28  }
  0x26   :  { %s4041_s24 = sld [smem:[%s6310_s0 + %s3864_s28]]   ;;  %s3868_s28 = smov 29  }
  0x27   :  { %s4046_s19 = sld [smem:[%s6310_s0 + %s3865_s7]]   ;;  %s3869_s7 = smov 30  }
  0x28   :  { %6568 = sst [smem:[#allocation14_spill]] %s4021_s4 }
  0x29   :  { %6569 = sst [smem:[#allocation15_spill]] %s4026_s12 }
  0x2a   :  { %s4051_s14 = sld [smem:[%s6310_s0 + %s3866_s15]]   ;;  %s3870_s15 = smov 31  }
  0x2b   :  { %s4056_s12 = sld [smem:[%s6310_s0 + %s3867_s22]]   ;;  %s3871_s22 = smov 32  }
  0x2c   :  { %6570 = sst [smem:[#allocation16_spill]] %s4041_s24 }
  0x2d   :  { %6571 = sst [smem:[#allocation17_spill]] %s4046_s19 }
  0x2e   :  { %s4061_s24 = sld [smem:[%s6310_s0 + %s3868_s28]]   ;;  %s3872_s28 = smov 33  }
  0x2f   :  { %s4066_s19 = sld [smem:[%s6310_s0 + %s3869_s7]]   ;;  %s3873_s7 = smov 34  }
  0x30   :  { %6572 = sst [smem:[#allocation18_spill]] %s4051_s14 }
  0x31   :  { %6573 = sst [smem:[#allocation19_spill]] %s4056_s12 }
  0x32   :  { %s4071_s14 = sld [smem:[%s6310_s0 + %s3870_s15]]   ;;  %s3874_s15 = smov 35  }
  0x33   :  { %s4076_s12 = sld [smem:[%s6310_s0 + %s3871_s22]]   ;;  %s3875_s22 = smov 36  }
  0x34   :  { %6574 = sst [smem:[#allocation20_spill]] %s4061_s24 }
  0x35   :  { %6575 = sst [smem:[#allocation21_spill]] %s4066_s19 }
  0x36   :  { %s4081_s24 = sld [smem:[%s6310_s0 + %s3872_s28]]   ;;  %s3876_s28 = smov 37  }
  0x37   :  { %s4086_s19 = sld [smem:[%s6310_s0 + %s3873_s7]]   ;;  %s3877_s7 = smov 38  }
  0x38   :  { %6576 = sst [smem:[#allocation22_spill]] %s4071_s14 }
  0x39   :  { %6577 = sst [smem:[#allocation23_spill]] %s4076_s12 }
  0x3a   :  { %s4091_s14 = sld [smem:[%s6310_s0 + %s3874_s15]]   ;;  %s4108_s15 = smov 0  }
  0x3b   :  { %s4096_s12 = sld [smem:[%s6310_s0 + %s3875_s22]]  }
  0x3c   :  { %6578 = sst [smem:[#allocation24_spill]] %s4081_s24 }
  0x3d   :  { %6579 = sst [smem:[#allocation25_spill]] %s4086_s19 }
  0x3e   :  { %s4101_s24 = sld [smem:[%s6310_s0 + %s3876_s28]]  }
  0x3f   :  { %s4106_s19 = sld [smem:[%s6310_s0 + %s3877_s7]]  }
  0x40 LB: > { %s6580_s3 = sld [smem:[#allocation3_spill]]  ;;  %s3653_s16 = sadd.s32 4294967295, %s3838_s15   ;;  %s3838_s15 = sphi %s4108_s15, %s87_s15  }
  0x41   : > { %p3657_p0 = scmp.ge.s32.totalorder %s3838_s15, 1  ;;  %p1051_p1 = scmp.lt.s32.totalorder %s3838_s15, 3 }
  0x43   : > { %p1052_p2 = pnand %p3657_p0, %p1051_p1 }
  0x45   : > { %1055 = sbr.rel (%p1052_p2) target bundleno = 1660 (0x67c), region = 172 }
  0x4c   : > { %v1156_v0 = vld [vmem:[%s3926_s13] sm:$0xf]  ;;  %v6352_v2 = vmov 1   ;;  %v6344_v3 = vmov 0   ;;  %v6332_v4 = vmov 2   ;;  %v6336_v5 = vmov 3  }
  0x4d   : > { %v1155_v1 = vld [vmem:[%s3921_s9] sm:$0xf]  ;;  %3743 = vset.pattern.permute.xlu1 %v6352_v2  ;;  %3742 = vset.pattern.permute.xlu0 %v6344_v3  ;;  %v6334_v6 = vmov 4   ;;  %v6338_v8 = vmov 8   ;;  %v6342_v9 = vmov 5   ;;  %v6330_v11 = vmov 7  }
  0x4e   : > { %1337 = vperm.xlu0 %3742, %v1156_v0   ;;  %1358 = vperm.xlu1 %3743, %v1155_v1   ;;  %v4124_v7 = vld [vmem:[%s3931_s17] sm:$0xf]  ;;  %v6340_v13 = vmov 6   ;;  %p1145_p3 = scmp.lt.s32.totalorder %s3653_s16, 1  ;;  %v1192_v17 = vlaneseq  ;;  %s6508_s22 = smov 17  }
  0x4f   : > { %v4130_v10 = vld [vmem:[%s4011_s20] sm:$0xf]  ;;  %s6454_s23 = smov 16   ;;  %s6314_s26 = smov 127  }
  0x50   : > { %v1158_v12 = vld [vmem:[%s3936_s21] sm:$0xf]  ;;  %s7140_s16 = smov (!%p1145_p3, %s3653_s16), 1  ;;  %v1346_v18 = vshrl.u32 %v1192_v17, 7  ;;  %s6316_s28 = smov 113  }
  0x51   : > { %v1160_v14 = vld [vmem:[%s3946_s29] sm:$0x3]  ;;  %s6311_s0 = sshll.u32 %s7140_s16, 4  ;;  %s6591_s4 = sld [smem:[#allocation14_spill]] }
  0x52   : > { %3744 = vset.pattern.permute.xlu1 %v6332_v4  ;;  %1342 = vperm.xlu0 %3742, %v1155_v1   ;;  %v4149_v15 = vld [vmem:[%s3941_s25] sm:$0x3]  ;;  %s4180_s18 = scalar_lea.vmem %s3916_s5, %s6311_s0  ;;  %v4182_v19 = vsub.s32 1, %v1346_v18  ;;  %v4184_v20 = vsub.s32 0, %v1346_v18  ;;  %v4188_v25 = vsub.s32 2, %v1346_v18  ;;  %v4196_v33 = vsub.s32 3, %v1346_v18 }
  0x53   : > { %1374 = vperm.xlu1 %3744, %v1155_v1   ;;  %v4158_v16 = vld [vmem:[%s6580_s3] sm:$0x3]  ;;  %v1334_v22 = vld [vmem:[%s4180_s18 + $0x8] sm:$0xff]  ;;  %v4198_v41 = vsub.s32 4, %v1346_v18  ;;  %v4204_v52 = vsub.s32 5, %v1346_v18  ;;  %s6312_s1 = smov 15  }
  0x54   : > { %6581 = vst [vmem:[#allocation26_spill] sm:$0xff] %v4182_v19  ;;  %6582 = vst [vmem:[#allocation27_spill] sm:$0xff] %v4184_v20  ;;  %v1333_v21 = vld [vmem:[%s4180_s18] sm:$0xff]  ;;  %v1368_v27 = vrot.slane %v1334_v22, %v4182_v19  ;;  %v1352_v29 = vrot.slane %v1334_v22, %v4184_v20  ;;  %v1384_v32 = vrot.slane %v1334_v22, %v4188_v25  ;;  %s6448_s2 = smov 126   ;;  %s6446_s7 = smov 98  }
  0x55   : > { %6583 = vst [vmem:[#allocation28_spill] sm:$0xff] %v4188_v25  ;;  %v1364_v26 = vrot.slane %v1333_v21, %v4182_v19  ;;  %v1348_v28 = vrot.slane %v1333_v21, %v4184_v20  ;;  %v1380_v31 = vrot.slane %v1333_v21, %v4188_v25  ;;  %6584 = vst [vmem:[#allocation29_spill] sm:$0xff] %v4196_v33  ;;  %s6452_s10 = smov 1   ;;  %s6444_s11 = smov 96   ;;  %v6640_v20 = vmov 0 }
  0x56   : > { %3745 = vset.pattern.permute.xlu0 %v6336_v5  ;;  %6585 = vst [vmem:[#allocation30_spill] sm:$0xff] %v4198_v41  ;;  %v1396_v44 = vrot.slane %v1333_v21, %v4196_v33  ;;  %v1400_v45 = vrot.slane %v1334_v22, %v4196_v33  ;;  %v1412_v50 = vrot.slane %v1333_v21, %v4198_v41  ;;  %6586 = vst [vmem:[#allocation31_spill] sm:$0xff] %v4204_v52  ;;  %s6328_s0 = smov 94  }
  0x57   : > { %3746 = vset.pattern.permute.xlu1 %v6334_v6  ;;  %1390 = vperm.xlu0 %3745, %v1155_v1   ;;  %v1416_v51 = vrot.slane %v1334_v22, %v4198_v41  ;;  %v1428_v58 = vrot.slane %v1333_v21, %v4204_v52  ;;  %v1432_v59 = vrot.slane %v1334_v22, %v4204_v52 }
  0x58   : > { %1406 = vperm.xlu1 %3746, %v1155_v1  }
  0x5b   : > { %3752 = vset.pattern.permute.xlu0 %v6338_v8 }
  0x5c   : > { %3747 = vset.pattern.permute.xlu1 %v6342_v9  ;;  %1656 = vperm.xlu0 %3752, %v4124_v7  }
  0x5d   : > { %1422 = vperm.xlu1 %3747, %v1155_v1  }
  0x60   : > { %3759 = vset.pattern.permute.xlu0 %v6342_v9 }
  0x61   : > { %2051 = vperm.xlu0 %3759, %v4130_v10   ;;  %3748 = vset.pattern.permute.xlu1 %v6330_v11 }
  0x62   : > { %1454 = vperm.xlu1 %3748, %v1155_v1  }
  0x65   : > { %3760 = vset.pattern.permute.xlu0 %v6340_v13 }
  0x66   : > { %1438 = vperm.xlu0 %3760, %v1155_v1   ;;  %3749 = vset.pattern.permute.xlu1 %v6344_v3  ;;  %v4210_v1 = vsub.s32 6, %v1346_v18 }
  0x67   : > { %1477 = vperm.xlu1 %3749, %v1158_v12   ;;  %v4212_v12 = vsub.s32 7, %v1346_v18 }
  0x68   : > { %6588 = vst [vmem:[#allocation33_spill] sm:$0xff] %v4210_v1 }
  0x69   : > { %6589 = vst [vmem:[#allocation34_spill] sm:$0xff] %v4212_v12 }
  0x6a   : > { %1614 = vperm.xlu0 %3760, %v4124_v7  }
  0x6b   : > { %3750 = vset.pattern.permute.xlu1 %v6334_v6 }
  0x6c   : > { %1572 = vperm.xlu1 %3750, %v4124_v7  }
  0x6e   : > { %2072 = vperm.xlu0 %3760, %v4130_v10  }
  0x70   : > { %3751 = vset.pattern.permute.xlu1 %v6342_v9 }
  0x71   : > { %1593 = vperm.xlu1 %3751, %v4124_v7  }
  0x72   : > { %3761 = vset.pattern.permute.xlu0 %v6332_v4 }
  0x73   : > { %1537 = vperm.xlu0 %3761, %v4124_v7  }
  0x75   : > { %3753 = vset.pattern.permute.xlu1 %v6344_v3 }
  0x76   : > { %1671 = vperm.xlu1 %3753, %v1160_v14  }
  0x77   : > { %2001 = vperm.xlu0 %3761, %v4130_v10  }
  0x7a   : > { %1676 = vperm.xlu1 %3753, %v4149_v15  }
  0x7e   : > { %3754 = vset.pattern.permute.xlu1 %v6332_v4 }
  0x7f   : > { %1708 = vperm.xlu1 %3754, %v4149_v15  }
  0x83   : > { %3755 = vset.pattern.permute.xlu1 %v6336_v5 }
  0x84   : > { %1724 = vperm.xlu1 %3755, %v4149_v15  }
  0x88   : > { %3756 = vset.pattern.permute.xlu1 %v6352_v2 }
  0x89   : > { %1776 = vperm.xlu1 %3756, %v4158_v16  }
  0x8d   : > { %3757 = vset.pattern.permute.xlu1 %v6344_v3 }
  0x8e   : > { %1959 = vperm.xlu1 %3757, %v4130_v10  }
  0x92   : > { %3758 = vset.pattern.permute.xlu1 %v6352_v2 }
  0x93   : > { %1980 = vperm.xlu1 %3758, %v4130_v10  }
  0x97   : > { %3762 = vset.pattern.permute.xlu1 %v6330_v11 }
  0x98   : > { %2093 = vperm.xlu1 %3762, %v4130_v10  }
  0x9c   : > { %3763 = vset.pattern.permute.xlu1 %v6338_v8 }
  0xcd   : > { %v1338_v23 = vpop.permute.xlu0 %1337  ;;  %v1359_v24 = vpop.permute.xlu1 %1358 }
  0xce   : > { %v1369_v34 = vmul.f32 %v1364_v26, %v1359_v24  ;;  %v1370_v35 = vmul.f32 %v1368_v27, %v1359_v24 }
  0xd1   : > { %v1343_v30 = vpop.permute.xlu0 %1342 }
  0xd2   : > { %v1353_v36 = vmul.f32 %v1348_v28, %v1343_v30  ;;  %v1354_v37 = vmul.f32 %v1352_v29, %v1343_v30  ;;  %v1375_v38 = vpop.permute.xlu1 %1374  ;;  %v1444_v28 = vrot.slane %v1333_v21, %v4210_v1  ;;  %v1448_v29 = vrot.slane %v1334_v22, %v4210_v1 }
  0xd3   : > { %v1385_v42 = vmul.f32 %v1380_v31, %v1375_v38  ;;  %v1386_v43 = vmul.f32 %v1384_v32, %v1375_v38  ;;  %v1460_v30 = vrot.slane %v1333_v21, %v4212_v12  ;;  %v1464_v31 = vrot.slane %v1334_v22, %v4212_v12  ;;  %v4253_v22 = vld [vmem:[%s6591_s4] sm:$0x3]  ;;  %s6930_s4 = smov 94  }
  0xd4   : > { %v1355_v39 = vadd.f32 %v1353_v36, %v1338_v23  ;;  %v1356_v40 = vadd.f32 %v1354_v37, %v1338_v23  ;;  %v6618_v1 = vmov 0  }
  0xd6   : > { %v1371_v46 = vadd.f32 %v1369_v34, %v1355_v39  ;;  %v1372_v47 = vadd.f32 %v1370_v35, %v1356_v40  ;;  %v1391_v48 = vpop.permute.xlu0 %1390 }
  0xd7   : > { %v1407_v49 = vpop.permute.xlu1 %1406  ;;  %v1401_v55 = vmul.f32 %v1396_v44, %v1391_v48  ;;  %v1402_v56 = vmul.f32 %v1400_v45, %v1391_v48  ;;  %v1162_v48 = vld [vmem:[%s3956_s8] sm:$0x3] }
  0xd8   : > { %v1387_v53 = vadd.f32 %v1385_v42, %v1371_v46  ;;  %v1388_v54 = vadd.f32 %v1386_v43, %v1372_v47  ;;  %v1417_v62 = vmul.f32 %v1412_v50, %v1407_v49  ;;  %v1418_v63 = vmul.f32 %v1416_v51, %v1407_v49  ;;  %v1174_v49 = vld [vmem:[%s4016_s27] sm:$0xf] }
  0xd9   : > { %v1178_v51 = vld [vmem:[%s4036_s30] sm:$0x3] }
  0xda   : > { %v1403_v60 = vadd.f32 %v1401_v55, %v1387_v53  ;;  %v1404_v61 = vadd.f32 %v1402_v56, %v1388_v54  ;;  %v4296_v56 = vld [vmem:[%s4031_s6] sm:$0x3] }
  0xdb   : > { %v4206_v57 = vpop.permute.xlu0 %1656  ;;  %6594 = vst [vmem:[#allocation38_spill] sm:$0xff] %v4296_v56 }
  0xdc   : > { %6587 = vst [vmem:[#allocation32_spill] sm:$0xff] %v4206_v57  ;;  %v1423_v0 = vpop.permute.xlu1 %1422  ;;  %v1419_v23 = vadd.f32 %v1417_v62, %v1403_v60  ;;  %v1420_v24 = vadd.f32 %v1418_v63, %v1404_v61 }
  0xdd   : > { %v1433_v26 = vmul.f32 %v1428_v58, %v1423_v0  ;;  %v1434_v27 = vmul.f32 %v1432_v59, %v1423_v0 }
  0xdf   : > { %v1435_v34 = vadd.f32 %v1433_v26, %v1419_v23  ;;  %v1436_v35 = vadd.f32 %v1434_v27, %v1420_v24 }
  0xe0   : > { %v4214_v14 = vpop.permute.xlu0 %2051 }
  0xe1   : > { %6590 = vst [vmem:[#allocation35_spill] sm:$0xff] %v4214_v14  ;;  %v1455_v32 = vpop.permute.xlu1 %1454  ;;  %v6675_v14 = vmov 0 }
  0xe2   : > { %v1465_v38 = vmul.f32 %v1460_v30, %v1455_v32  ;;  %v1466_v39 = vmul.f32 %v1464_v31, %v1455_v32 }
  0xe5   : > { %v1439_v36 = vpop.permute.xlu0 %1438 }
  0xe6   : > { %v1449_v18 = vmul.f32 %v1444_v28, %v1439_v36  ;;  %v1450_v37 = vmul.f32 %v1448_v29, %v1439_v36  ;;  %v4274_v50 = vpop.permute.xlu1 %1477 }
  0xe7   : > { %6592 = vst [vmem:[#allocation36_spill] sm:$0xff] %v4274_v50 }
  0xe8   : > { %v1451_v40 = vadd.f32 %v1449_v18, %v1435_v34  ;;  %v1452_v42 = vadd.f32 %v1450_v37, %v1436_v35 }
  0xe9   : > { %v4327_v62 = vpop.permute.xlu0 %1614 }
  0xea   : > { %v1467_v43 = vadd.f32 %v1465_v38, %v1451_v40  ;;  %v1468_v44 = vadd.f32 %v1466_v39, %v1452_v42  ;;  %6601 = vst [vmem:[#allocation43_spill] sm:$0xff] %v4327_v62 }
  0xeb   : > { %v4280_v53 = vpop.permute.xlu1 %1572 }
  0xec   : > { %vm1469_vm0 = vcmp.gt.f32.partialorder %v1467_v43, 0.0  ;;  %vm1470_vm1 = vcmp.gt.f32.partialorder %v1468_v44, 0.0  ;;  %v1471_v45 = vmul.f32 0.01, %v1467_v43  ;;  %v1472_v46 = vmul.f32 0.01, %v1468_v44 }
  0xee   : > { %v4220_v47 = vsel %vm1469_vm0, %v1467_v43, %v1471_v45  ;;  %v4222_v21 = vsel %vm1470_vm1, %v1468_v44, %v1472_v46 }
  0xef   : > { %1482 = vrot.lane.b32.xlu1 %v4222_v21, %s6508_s22  ;;  %1480 = vrot.lane.b32.xlu0 %v4220_v47, %s6508_s22 }
  0xf0   : > { %v4286_v54 = vpop.permute.xlu1 %1593 }
  0xf3   : > { %1502 = vrot.lane.b32.xlu1 %v4220_v47, %s6454_s23  ;;  %1581 = vrot.lane.b32.xlu0 %v4222_v21, %s6314_s26 }
  0xf5   : > { %v4293_v55 = vpop.permute.xlu1 %1671 }
  0xf6   : > { %6593 = vst [vmem:[#allocation37_spill] sm:$0xff] %v4293_v55  ;;  %v6634_v55 = vmov 0 }
  0xf7   : > { %1504 = vrot.lane.b32.xlu1 %v4222_v21, %s6454_s23  ;;  %1600 = vrot.lane.b32.xlu0 %v4220_v47, %s6316_s28 }
  0xf9   : > { %v4303_v58 = vpop.permute.xlu1 %1676 }
  0xfa   : > { %6595 = vst [vmem:[#allocation39_spill] sm:$0xff] %v4303_v58 }
  0xfb   : > { %1523 = vrot.lane.b32.xlu1 %v4220_v47, %s6312_s1  ;;  %2039 = vrot.lane.b32.xlu0 %v4222_v21, %s6448_s2 }
  0xfe   : > { %v4309_v59 = vpop.permute.xlu1 %1708 }
  0xff   : > { %1525 = vrot.lane.b32.xlu1 %v4222_v21, %s6312_s1  ;;  %2058 = vrot.lane.b32.xlu0 %v4220_v47, %s6446_s7  ;;  %s6318_s1 = smov 112   ;;  %6596 = vst [vmem:[#allocation40_spill] sm:$0xff] %v4309_v59 }
 0x103   : > { %1544 = vrot.lane.b32.xlu1 %v4220_v47, %s6452_s10  ;;  %2079 = vrot.lane.b32.xlu0 %v4220_v47, %s6444_s11  ;;  %v4317_v60 = vpop.permute.xlu1 %1724 }
 0x104   : > { %6597 = vst [vmem:[#allocation41_spill] sm:$0xff] %v4317_v60 }
 0x107   : > { %1546 = vrot.lane.b32.xlu1 %v4222_v21, %s6452_s10  ;;  %2100 = vrot.lane.b32.xlu0 %v4220_v47, %s6328_s0 }
 0x108   : > { %v4322_v61 = vpop.permute.xlu1 %1776 }
 0x109   : > { %6600 = vst [vmem:[#allocation42_spill] sm:$0xff] %v4322_v61 }
 0x10b   : > { %1579 = vrot.lane.b32.xlu1 %v4220_v47, %s6314_s26  ;;  %2166 = vperm.xlu0 %3761, %v4253_v22   ;;  %s6326_s26 = smov 111  }
 0x10d   : > { %v4333_v63 = vpop.permute.xlu1 %1959 }
 0x10f   : > { %1602 = vrot.lane.b32.xlu1 %v4222_v21, %s6316_s28  ;;  %1792 = vperm.xlu0 %3761, %v4158_v16   ;;  %s6320_s28 = smov 34  }
 0x112   : > { %v4345_v24 = vpop.permute.xlu1 %1980 }
 0x113   : > { %1621 = vrot.lane.b32.xlu1 %v4220_v47, %s6318_s1  ;;  %3767 = vset.pattern.permute.xlu0 %v6344_v3 }
 0x114   : > { %1495 = vperm.xlu0 %3767, %v4124_v7  }
 0x117   : > { %1623 = vrot.lane.b32.xlu1 %v4222_v21, %s6318_s1  ;;  %s6322_s1 = smov 32  }
 0x118   : > { %1747 = vperm.xlu0 %3767, %v1162_v48  }
 0x11b   : > { %1642 = vrot.lane.b32.xlu1 %v4220_v47, %s6326_s26 }
 0x11c   : > { %1760 = vperm.xlu0 %3767, %v4158_v16  }
 0x11f   : > { %1644 = vrot.lane.b32.xlu1 %v4222_v21, %s6326_s26  ;;  %s6599_s26 = sld [smem:[#allocation16_spill]] }
 0x120   : > { %1941 = vperm.xlu0 %3767, %v1174_v49  }
 0x123   : > { %1944 = vrot.lane.b32.xlu1 %v4220_v47, %s6320_s28 }
 0x124   : > { %2134 = vperm.xlu0 %3767, %v4253_v22  }
 0x125   : > { %v4343_v23 = vld [vmem:[%s6599_s26] sm:$0x3]  ;;  %s6605_s26 = sld [smem:[#allocation4_spill]] }
 0x126   : > { %6603 = vst [vmem:[#allocation45_spill] sm:$0xff] %v4343_v23 }
 0x127   : > { %1946 = vrot.lane.b32.xlu1 %v4222_v21, %s6320_s28  ;;  %s6324_s28 = smov 30  }
 0x128   : > { %2205 = vperm.xlu0 %3767, %v1178_v51  }
 0x12b   : > { %1966 = vrot.lane.b32.xlu1 %v4220_v47, %s6322_s1  ;;  %v1163_v49 = vld [vmem:[%s6605_s26] sm:$0x3]  ;;  %s6822_s26 = smov 127  }
 0x12c   : > { %3769 = vset.pattern.permute.xlu0 %v6336_v5 }
 0x12d   : > { %1558 = vperm.xlu0 %3769, %v4124_v7  }
 0x12f   : > { %1968 = vrot.lane.b32.xlu1 %v4222_v21, %s6322_s1  ;;  %s6450_s1 = smov 2  }
 0x131   : > { %2022 = vperm.xlu0 %3769, %v4130_v10  }
 0x133   : > { %1987 = vrot.lane.b32.xlu1 %v4220_v47, %s6324_s28 }
 0x135   : > { %2266 = vperm.xlu0 %3769, %v4296_v56  }
 0x137   : > { %1989 = vrot.lane.b32.xlu1 %v4222_v21, %s6324_s28  ;;  %s6598_s28 = sld [smem:[#allocation15_spill]] }
 0x139   : > { %1808 = vperm.xlu0 %3769, %v4158_v16  }
 0x13b   : > { %2008 = vrot.lane.b32.xlu1 %v4220_v47, %s6450_s1 }
 0x13d   : > { %3772 = vset.pattern.permute.xlu0 %v6334_v6  ;;  %v1176_v0 = vld [vmem:[%s6598_s28] sm:$0x3]  ;;  %s6607_s28 = sld [smem:[#allocation17_spill]] }
 0x13e   : > { %2030 = vperm.xlu0 %3772, %v4130_v10  }
 0x13f   : > { %2010 = vrot.lane.b32.xlu1 %v4222_v21, %s6450_s1  ;;  %s6827_s1 = smov 111  }
 0x142   : > { %1818 = vperm.xlu0 %3772, %v4158_v16  }
 0x143   : > { %2037 = vrot.lane.b32.xlu1 %v4220_v47, %s6448_s2  ;;  %s6826_s2 = sld [smem:[#allocation6_spill]] }
 0x146   : > { %3774 = vset.pattern.permute.xlu0 %v6330_v11 }
 0x147   : > { %2114 = vperm.xlu1 %3763, %v4130_v10   ;;  %1635 = vperm.xlu0 %3774, %v4124_v7   ;;  %v4336_v10 = vpop.permute.xlu0 %2072 }
 0x148   : > { %6602 = vst [vmem:[#allocation44_spill] sm:$0xff] %v4336_v10 }
 0x14b   : > { %2060 = vrot.lane.b32.xlu1 %v4222_v21, %s6446_s7  ;;  %1866 = vperm.xlu0 %3774, %v4158_v16   ;;  %v4347_v26 = vpop.permute.xlu0 %1537  ;;  %s6825_s7 = smov 112  }
 0x14c   : > { %3764 = vset.pattern.permute.xlu1 %v6344_v3 }
 0x14f   : > { %2081 = vrot.lane.b32.xlu1 %v4222_v21, %s6444_s11  ;;  %3777 = vset.pattern.permute.xlu0 %v6352_v2  ;;  %v4354_v27 = vpop.permute.xlu0 %2001  ;;  %s6824_s11 = smov 113  }
 0x150   : > { %1516 = vperm.xlu0 %3777, %v4124_v7   ;;  %v4351_v7 = vpop.permute.xlu1 %2093 }
 0x151   : > { %6604 = vst [vmem:[#allocation46_spill] sm:$0xff] %v4351_v7 }
 0x153   : > { %2102 = vrot.lane.b32.xlu1 %v4222_v21, %s6328_s0  ;;  %s6610_s0 = sld [smem:[#allocation5_spill]] }
 0x154   : > { %1692 = vperm.xlu0 %3777, %v4149_v15  }
 0x157   : > { %2129 = vperm.xlu1 %3764, %v1176_v0   ;;  %v1180_v0 = vld [vmem:[%s6607_s28] sm:$0x3]  ;;  %s6823_s28 = sld [smem:[#allocation18_spill]] }
 0x158   : > { %2376 = vperm.xlu0 %3777, %v4343_v23  }
 0x15b   : > { %3765 = vset.pattern.permute.xlu1 %v6352_v2 }
 0x15c   : > { %2150 = vperm.xlu1 %3765, %v4253_v22  }
 0x160   : > { %3766 = vset.pattern.permute.xlu1 %v6336_v5 }
 0x161   : > { %v4357_v15 = vpop.permute.xlu1 %1482  ;;  %2182 = vperm.xlu1 %3766, %v4253_v22   ;;  %v4360_v28 = vpop.permute.xlu0 %1480 }
 0x165   : > { %3768 = vset.pattern.permute.xlu1 %v6344_v3  ;;  %v4363_v29 = vpop.permute.xlu1 %1502  ;;  %v4366_v30 = vpop.permute.xlu0 %1581 }
 0x166   : > { %2218 = vperm.xlu1 %3768, %v4296_v56  }
 0x169   : > { %v4368_v31 = vpop.permute.xlu1 %1504  ;;  %v4374_v34 = vpop.permute.xlu0 %1600 }
 0x16a   : > { %3770 = vset.pattern.permute.xlu1 %v6352_v2 }
 0x16b   : > { %2234 = vperm.xlu1 %3770, %v4296_v56  }
 0x16d   : > { %v4372_v32 = vpop.permute.xlu1 %1523  ;;  %v4380_v36 = vpop.permute.xlu0 %2039 }
 0x16f   : > { %3771 = vset.pattern.permute.xlu1 %v6332_v4 }
 0x170   : > { %2250 = vperm.xlu1 %3771, %v4296_v56  }
 0x171   : > { %v4378_v35 = vpop.permute.xlu1 %1525  ;;  %v4389_v38 = vpop.permute.xlu0 %2058 }
 0x174   : > { %3773 = vset.pattern.permute.xlu1 %v6334_v6  ;;  %v1164_v6 = vld [vmem:[%s6610_s0] sm:$0x3]  ;;  %s6821_s0 = smov 15  }
 0x175   : > { %2276 = vperm.xlu1 %3773, %v4296_v56   ;;  %v4384_v18 = vpop.permute.xlu1 %1544  ;;  %v4395_v40 = vpop.permute.xlu0 %2079 }
 0x176   : > { %6606 = vst [vmem:[#allocation47_spill] sm:$0xff] %v4395_v40  ;;  %v6664_v40 = vmov 0 }
 0x179   : > { %v4386_v37 = vpop.permute.xlu1 %1546  ;;  %3775 = vset.pattern.permute.xlu1 %v6342_v9  ;;  %v4403_v44 = vpop.permute.xlu0 %2100 }
 0x17a   : > { %2292 = vperm.xlu1 %3775, %v4296_v56   ;;  %6609 = vst [vmem:[#allocation49_spill] sm:$0xff] %v4403_v44  ;;  %v6657_v44 = vmov 0 }
 0x17d   : > { %v4392_v39 = vpop.permute.xlu1 %1579 }
 0x17e   : > { %1834 = vperm.xlu1 %3775, %v4158_v16  }
 0x181   : > { %v4397_v42 = vpop.permute.xlu1 %1602 }
 0x182   : > { %3776 = vset.pattern.permute.xlu1 %v6330_v11 }
 0x183   : > { %2324 = vperm.xlu1 %3776, %v4296_v56  }
 0x185   : > { %v4401_v43 = vpop.permute.xlu1 %1621 }
 0x186   : > { %6608 = vst [vmem:[#allocation48_spill] sm:$0xff] %v4401_v43 }
 0x187   : > { %3778 = vset.pattern.permute.xlu1 %v6338_v8 }
 0x188   : > { %2340 = vperm.xlu1 %3778, %v4296_v56  }
 0x189   : > { %v4407_v45 = vpop.permute.xlu1 %1623 }
 0x18a   : > { %6611 = vst [vmem:[#allocation50_spill] sm:$0xff] %v4407_v45  ;;  %v4409_v46 = vpop.permute.xlu0 %2166 }
 0x18b   : > { %6612 = vst [vmem:[#allocation51_spill] sm:$0xff] %v4409_v46 }
 0x18c   : > { %1882 = vperm.xlu1 %3778, %v4158_v16  }
 0x18d   : > { %v4412_v22 = vpop.permute.xlu1 %1642 }
 0x18e   : > { %6613 = vst [vmem:[#allocation52_spill] sm:$0xff] %v4412_v22  ;;  %v4414_v48 = vpop.permute.xlu0 %1792 }
 0x18f   : > { %6614 = vst [vmem:[#allocation53_spill] sm:$0xff] %v4414_v48 }
 0x190   : > { %3779 = vset.pattern.permute.xlu1 %v6344_v3  ;;  %v4438_v3 = vand.u32 127, %v1192_v17 }
 0x191   : > { %v4418_v51 = vpop.permute.xlu1 %1644  ;;  %1902 = vperm.xlu1 %3779, %v1163_v49  }
 0x192   : > { %6615 = vst [vmem:[#allocation54_spill] sm:$0xff] %v4418_v51  ;;  %v1194_v12 = vadd.s32 128, %v4438_v3  ;;  %v6646_v51 = vmov 0 }
 0x193   : > { %v4421_v11 = vpop.permute.xlu0 %1495 }
 0x194   : > { %v4451_v41 = vshra.s32 %v1194_v12, 4  ;;  %v1198_v17 = vand.u32 15, %v1194_v12 }
 0x195   : > { %v4423_v4 = vpop.permute.xlu1 %1944  ;;  %2355 = vperm.xlu1 %3779, %v1180_v0  }
 0x196   : > { %vm1236_vm4 = vcmp.ge.s32.totalorder %v4451_v41, 0  ;;  %vm1238_vm5 = vcmp.lt.s32.totalorder %v4451_v41, 16  ;;  %v4474_v12 = vadd.s32 4294967295, %v1198_v17  ;;  %v4487_v33 = vadd.s32 1, %v1198_v17 }
 0x197   : > { %v4426_v5 = vpop.permute.xlu0 %1747  ;;  %vm4470_vm7 = vmand %vm1236_vm4, %vm1238_vm5  ;;  %v4514_v58 = vadd.s32 1, %v4451_v41  ;;  %v1274_v57 = vadd.s32 4294967294, %v4451_v41  ;;  %v4559_v43 = vadd.s32 2, %v1198_v17 }
 0x198   : > { %6616 = vst [vmem:[#allocation55_spill] sm:$0xff] %v4426_v5  ;;  %v1200_v5 = vadd.s32 4294967295, %v4451_v41  ;;  %6629 = vst [vmem:[#allocation63_spill] sm:$0xff] %v4487_v33  ;;  %vm6381_vm0 = vcmp.ge.s32.totalorder %v4474_v12, 0 }
 0x199   : > { %v4428_v16 = vpop.permute.xlu1 %1946  ;;  %1897 = vperm.xlu1 %3779, %v1164_v6   ;;  %v4447_v6 = vshra.s32 %v4438_v3, 4 }
 0x19a   : > { %vm1202_vm10 = vcmp.ge.s32.totalorder %v1200_v5, 0  ;;  %vm1204_vm11 = vcmp.lt.s32.totalorder %v1200_v5, 16  ;;  %v6631_v5 = vmov 0 }
 0x19b   : > { %v4430_v8 = vpop.permute.xlu0 %1760  ;;  %vm1235_vm2 = vcmp.ge.s32.totalorder %v4447_v6, 0  ;;  %vm1237_vm3 = vcmp.lt.s32.totalorder %v4447_v6, 16  ;;  %v1199_v61 = vadd.s32 4294967295, %v4447_v6  ;;  %vm4500_vm15 = vmand %vm1202_vm10, %vm1204_vm11  ;;  %v1273_v25 = vadd.s32 4294967294, %v4447_v6 }
 0x19c   : > { %6617 = vst [vmem:[#allocation56_spill] sm:$0xff] %v4430_v8  ;;  %vm4464_vm6 = vmand %vm1235_vm2, %vm1237_vm3  ;;  %v6622_v8 = vmov 0  ;;  %v6635_v55 = vsel %vm4500_vm15, 4294967295, %v6634_v55  ;;  %vm6390_vm3 = vcmp.lt.s32.totalorder %v4487_v33, 16 }
 0x19d   : > { %3780 = vset.pattern.permute.xlu1 %v6352_v2  ;;  %v4433_v13 = vpop.permute.xlu1 %1966  ;;  %v6623_v8 = vsel %vm4464_vm6, 4294967295, %v6622_v8  ;;  %vm1201_vm8 = vcmp.ge.s32.totalorder %v1199_v61, 0  ;;  %vm1203_vm9 = vcmp.lt.s32.totalorder %v1199_v61, 16  ;;  %v4485_v59 = vsel %vm4464_vm6, %v4220_v47, 0.0  ;;  %6636 = vst [vmem:[#allocation66_spill] sm:$0xff] %v6635_v55  ;;  %vm4565_vm5 = vmand %vm4500_vm15, %vm6390_vm3 }
 0x19e   : > { %1918 = vperm.xlu1 %3780, %v1163_v49   ;;  %v1197_v49 = vand.u32 15, %v4438_v3  ;;  %6624 = vst [vmem:[#allocation60_spill] sm:$0xff] %v6623_v8  ;;  %v4492_v61 = vsel %vm4470_vm7, %v4222_v21, 0.0  ;;  %vm4494_vm12 = vmand %vm1201_vm8, %vm1203_vm9  ;;  %v1253_v47 = vadd.s32 1, %v4447_v6  ;;  %v4509_v21 = vmul.f32 %v4280_v53, %v4485_v59 }
 0x19f   : > { %v4435_v9 = vpop.permute.xlu0 %1941  ;;  %6630 = vst [vmem:[#allocation64_spill] sm:$0xff] %v4492_v61  ;;  %v6632_v5 = vsel %vm4494_vm12, 4294967295, %v6631_v5  ;;  %vm4540_vm9 = vmand %vm4500_vm15, %vm6381_vm0  ;;  %vm1275_vm1 = vcmp.ge.s32.totalorder %v1273_v25, 0  ;;  %vm1277_vm0 = vcmp.lt.s32.totalorder %v1273_v25, 16  ;;  %vm1276_vm8 = vcmp.ge.s32.totalorder %v1274_v57, 0 }
 0x1a0   : > { %v4468_v23 = vadd.s32 4294967295, %v1197_v49  ;;  %v4476_v56 = vadd.s32 1, %v1197_v49  ;;  %6633 = vst [vmem:[#allocation65_spill] sm:$0xff] %v6632_v5  ;;  %6637 = vst [vmem:[#allocation67_spill] sm:$0xff] %v4509_v21  ;;  %v4532_v21 = vadd.s32 4294967294, %v1197_v49  ;;  %v6654_v25 = vmov 0 }
 0x1a1   : > { %v4444_v52 = vpop.permute.xlu1 %1968 }
 0x1a2   : > { %3781 = vset.pattern.permute.xlu1 %v6618_v1  ;;  %v6625_v1 = vmov 0  ;;  %6628 = vst [vmem:[#allocation62_spill] sm:$0xff] %v4476_v56  ;;  %vm6384_vm13 = vcmp.ge.s32.totalorder %v4468_v23, 0  ;;  %vm6383_vm2 = vcmp.lt.s32.totalorder %v4476_v56, 16 }
 0x1a3   : > { %v4441_v0 = vpop.permute.xlu0 %2134  ;;  %v6626_v1 = vsel %vm4470_vm7, 4294967295, %v6625_v1  ;;  %vm4527_vm4 = vmand %vm4494_vm12, %vm6384_vm13  ;;  %vm6663_vm13 = vcmp.lt.s32.totalorder %v4476_v56, 16 }
 0x1a4   : > { %6619 = vst [vmem:[#allocation57_spill] sm:$0xff] %v4441_v0  ;;  %6627 = vst [vmem:[#allocation61_spill] sm:$0xff] %v6626_v1  ;;  %v4520_v0 = vmul.f32 %v4280_v53, %v4492_v61  ;;  %v6641_v20 = vsel %vm4527_vm4, 4294967295, %v6640_v20  ;;  %v6643_v53 = vmov 0  ;;  %vm6653_vm4 = vcmp.ge.s32.totalorder %v4468_v23, 0 }
 0x1a5   : > { %v4454_v48 = vpop.permute.xlu1 %1987  ;;  %6642 = vst [vmem:[#allocation70_spill] sm:$0xff] %v6641_v20  ;;  %v6644_v53 = vsel %vm4540_vm9, 4294967295, %v6643_v53  ;;  %vm4554_vm10 = vmand %vm4494_vm12, %vm6383_vm2  ;;  %vm1278_vm12 = vcmp.lt.s32.totalorder %v1274_v57, 16 }
 0x1a6   : > { %6639 = vst [vmem:[#allocation69_spill] sm:$0xff] %v4520_v0  ;;  %6645 = vst [vmem:[#allocation71_spill] sm:$0xff] %v6644_v53  ;;  %v4546_v0 = vadd.s32 2, %v1197_v49  ;;  %v6647_v51 = vsel %vm4554_vm10, 4294967295, %v6646_v51  ;;  %v6649_v49 = vmov 0 }
 0x1a7   : > { %v4449_v2 = vpop.permute.xlu0 %2205  ;;  %6648 = vst [vmem:[#allocation72_spill] sm:$0xff] %v6647_v51  ;;  %v6650_v49 = vsel %vm4565_vm5, 4294967295, %v6649_v49  ;;  %vm4579_vm3 = vmand %vm4464_vm6, %vm6653_vm4  ;;  %vm6660_vm4 = vcmp.lt.s32.totalorder %v4438_v3, 17 }
 0x1a8   : > { %6620 = vst [vmem:[#allocation58_spill] sm:$0xff] %v4449_v2  ;;  %6651 = vst [vmem:[#allocation73_spill] sm:$0xff] %v6650_v49  ;;  %v6655_v25 = vsel %vm4579_vm3, 4294967295, %v6654_v25  ;;  %v6697_v49 = vmov 0 }
 0x1a9   : > { %v4478_v46 = vpop.permute.xlu1 %1989  ;;  %6656 = vst [vmem:[#allocation75_spill] sm:$0xff] %v6655_v25  ;;  %vm4586_vm2 = vmand %vm1275_vm1, %vm1277_vm0  ;;  %vm6662_vm1 = vcmp.lt.s32.totalorder %v4438_v3, 15 }
 0x1aa   : > { %v6658_v44 = vsel %vm4586_vm2, 4294967295, %v6657_v44  ;;  %vm6661_vm0 = vmmov %vm6660_vm4  ;;  %v1529_v7 = vsel %vm6662_vm1, %v4378_v35, %v4372_v32  ;;  %vm6669_vm1 = vcmp.ge.s32.totalorder %v4474_v12, 0 }
 0x1ab   : > { %6659 = vst [vmem:[#allocation76_spill] sm:$0xff] %v6658_v44  ;;  %vm4614_vm9 = vmand %vm4464_vm6, %vm6663_vm13  ;;  %vm6672_vm13 = vcmp.lt.s32.totalorder %v4438_v3, 16 }
 0x1ac   : > { %v4462_v2 = vpop.permute.xlu0 %1558  ;;  %v6665_v40 = vsel %vm4614_vm9, 4294967295, %v6664_v40  ;;  %vm4631_vm14 = vmand %vm4470_vm7, %vm6669_vm1  ;;  %vm6685_vm9 = vcmp.ge.s32.totalorder %v1253_v47, 0 }
 0x1ad   : > { %6621 = vst [vmem:[#allocation59_spill] sm:$0xff] %v4462_v2  ;;  %v4548_v22 = vpop.permute.xlu1 %2008  ;;  %v4659_v2 = vadd.s32 2, %v4451_v41 }
 0x1b0   : > { %v4480_v60 = vpop.permute.xlu0 %2022 }
 0x1b1   : > { %v2011_v61 = vpop.permute.xlu1 %2010 }
 0x1b4   : > { %v4516_v19 = vpop.permute.xlu0 %2266 }
 0x1b5   : > { %6638 = vst [vmem:[#allocation68_spill] sm:$0xff] %v4516_v19  ;;  %v4544_v19 = vadd.s32 4294967294, %v1198_v17  ;;  %v4584_v17 = vadd.s32 2, %v4447_v6  ;;  %v4604_v6 = vsel %vm6661_vm0, %v4357_v15, %v4360_v28  ;;  %vm6674_vm0 = vcmp.lt.s32.totalorder %v4438_v3, 15 }
 0x1b6   : > { %v1528_v10 = vsel %vm6674_vm0, %v4372_v32, %v4378_v35  ;;  %vm6682_vm0 = vcmp.lt.s32.totalorder %v4438_v3, 34  ;;  %v1534_v32 = vsel %vm4554_vm10, %v1529_v7, 0.0  ;;  %vm6694_vm10 = vcmp.lt.s32.totalorder %v4438_v3, 30 }
 0x1b7   : > { %v1950_v57 = vsel %vm6682_vm0, %v4428_v16, %v4423_v4  ;;  %vm6688_vm0 = vnez %v6641_v20  ;;  %v1535_v7 = vsel %vm4565_vm5, %v1528_v10, 0.0  ;;  %vm6696_vm1 = vcmp.ge.s32.totalorder %v4544_v19, 0 }
 0x1b8   : > { %v4572_v45 = vpop.permute.xlu0 %1808  ;;  %v1491_v50 = vsel %vm6688_vm0, %v4604_v6, 0.0  ;;  %vm6701_vm5 = vcmp.lt.s32.totalorder %v4438_v3, 32  ;;  %v4741_v20 = vmul.f32 %v4347_v26, %v1534_v32 }
 0x1b9   : > { %6652 = vst [vmem:[#allocation74_spill] sm:$0xff] %v4572_v45  ;;  %v4598_v45 = vsel %vm6660_vm4, %v4360_v28, %v4357_v15  ;;  %vm6666_vm4 = vcmp.lt.s32.totalorder %v4487_v33, 16  ;;  %v6667_v15 = vmov 0  ;;  %v6670_v28 = vmov 0 }
 0x1ba   : > { %vm4622_vm11 = vmand %vm4470_vm7, %vm6666_vm4  ;;  %v6671_v28 = vsel %vm4631_vm14, 4294967295, %v6670_v28  ;;  %v4639_v33 = vsel %vm6672_vm13, %v4363_v29, %v4368_v31  ;;  %v1971_v10 = vsel %vm6701_vm5, %v4433_v13, %v4444_v52 }
 0x1bb   : > { %v6668_v15 = vsel %vm4622_vm11, 4294967295, %v6667_v15  ;;  %vm6673_vm4 = vmmov %vm6672_vm13  ;;  %vm6678_vm13 = vcmp.ge.s32.totalorder %v4532_v21, 0 }
 0x1bc   : > { %v4645_v56 = vsel %vm6673_vm4, %v4368_v31, %v4363_v29  ;;  %vm4654_vm11 = vmand %vm1276_vm8, %vm1278_vm12  ;;  %v6679_v29 = vmov 0  ;;  %vm6683_vm12 = vcmp.lt.s32.totalorder %v4438_v3, 32  ;;  %vm6695_vm8 = vnez %v6632_v5 }
 0x1bd   : > { %v6676_v14 = vsel %vm4654_vm11, 4294967295, %v6675_v14  ;;  %vm4665_vm4 = vmand %vm4586_vm2, %vm6678_vm13  ;;  %v1972_v31 = vsel %vm6683_vm12, %v4444_v52, %v4433_v13  ;;  %v4678_v41 = vpop.permute.xlu0 %2030  ;;  %vm6684_vm13 = vcmp.lt.s32.totalorder %v1253_v47, 16  ;;  %vm6689_vm12 = vnez %v6644_v53 }
 0x1be   : > { %6677 = vst [vmem:[#allocation77_spill] sm:$0xff] %v6676_v14  ;;  %v6680_v29 = vsel %vm4665_vm4, 4294967295, %v6679_v29  ;;  %vm4685_vm14 = vmand %vm6685_vm9, %vm6684_vm13  ;;  %v1492_v62 = vsel %vm6689_vm12, %v4598_v45, 0.0  ;;  %vm6690_vm9 = vcmp.lt.s32.totalorder %v4546_v0, 16  ;;  %v6691_v47 = vmov 0 }
 0x1bf   : > { %6681 = vst [vmem:[#allocation78_spill] sm:$0xff] %v6680_v29  ;;  %vm4703_vm13 = vmand %vm4586_vm2, %vm6690_vm9  ;;  %v1993_v45 = vsel %vm6694_vm10, %v4478_v46, %v4454_v48  ;;  %vm6700_vm10 = vcmp.lt.s32.totalorder %v4438_v3, 34  ;;  %v1955_v6 = vsel %vm4665_vm4, %v1950_v57, 0.0  ;;  %v1977_v53 = vsel %vm4586_vm2, %v1972_v31, 0.0  ;;  %v2038_v29 = vpop.permute.xlu1 %2037 }
 0x1c0   : > { %v6692_v47 = vsel %vm4703_vm13, 4294967295, %v6691_v47  ;;  %vm4721_vm9 = vmand %vm4654_vm11, %vm6696_vm1  ;;  %v1949_v51 = vsel %vm6700_vm10, %v4423_v4, %v4428_v16  ;;  %vm6702_vm10 = vcmp.lt.s32.totalorder %v4438_v3, 1  ;;  %vm6704_vm1 = vcmp.ge.s32.totalorder %v4532_v21, 0 }
 0x1c1   : > { %6693 = vst [vmem:[#allocation79_spill] sm:$0xff] %v6692_v47  ;;  %v6698_v49 = vsel %vm4721_vm9, 4294967295, %v6697_v49  ;;  %v4747_v4 = vsel %vm6702_vm10, %v4384_v18, %v4386_v37  ;;  %vm6703_vm5 = vmmov %vm6702_vm10  ;;  %v6705_v52 = vmov 0  ;;  %vm6708_vm12 = vcmp.lt.s32.totalorder %v4438_v3, 2  ;;  %v4766_v57 = vpop.permute.xlu0 %1818 }
 0x1c2   : > { %6699 = vst [vmem:[#allocation80_spill] sm:$0xff] %v6698_v49  ;;  %v4753_v13 = vsel %vm6703_vm5, %v4386_v37, %v4384_v18  ;;  %vm4759_vm0 = vmand %vm4464_vm6, %vm6704_vm1  ;;  %v2014_v16 = vsel %vm6708_vm12, %v2011_v61, %v4548_v22  ;;  %vm6710_vm10 = vcmp.lt.s32.totalorder %v4438_v3, 127  ;;  %vm6712_vm1 = vcmp.lt.s32.totalorder %v4559_v43, 16 }
 0x1c3   : > { %v6706_v52 = vsel %vm4759_vm0, 4294967295, %v6705_v52  ;;  %6709 = vst [vmem:[#allocation82_spill] sm:$0xff] %v4766_v57  ;;  %v1584_v18 = vsel %vm6710_vm10, %v4392_v39, %v4366_v30  ;;  %vm6711_vm5 = vmmov %vm6710_vm10  ;;  %v6713_v31 = vmov 0  ;;  %vm6716_vm12 = vcmp.lt.s32.totalorder %v4438_v3, 30 }
 0x1c4   : > { %6707 = vst [vmem:[#allocation81_spill] sm:$0xff] %v6706_v52  ;;  %v1585_v37 = vsel %vm6711_vm5, %v4366_v30, %v4392_v39  ;;  %vm4780_vm2 = vmand %vm4654_vm11, %vm6712_vm1  ;;  %v1992_v32 = vsel %vm6716_vm12, %v4454_v48, %v4478_v46  ;;  %v1998_v44 = vsel %vm4703_vm13, %v1993_v45, 0.0  ;;  %vm6717_vm10 = vcmp.lt.s32.totalorder %v4514_v58, 16 }
 0x1c5   : > { %v6714_v31 = vsel %vm4780_vm2, 4294967295, %v6713_v31  ;;  %vm6718_vm5 = vcmp.ge.s32.totalorder %v4514_v58, 0  ;;  %v1956_v39 = vsel %vm4721_vm9, %v1949_v51, 0.0  ;;  %v1962_v57 = vmul.f32 %v4333_v63, %v1955_v6 }
 0x1c6   : > { %6715 = vst [vmem:[#allocation83_spill] sm:$0xff] %v6714_v31  ;;  %vm4794_vm4 = vmand %vm6718_vm5, %vm6717_vm10  ;;  %v1978_v46 = vsel %vm4654_vm11, %v1971_v10, 0.0  ;;  %v1983_v48 = vmul.f32 %v4345_v24, %v1977_v53  ;;  %v4805_v45 = vmul.f32 %v4347_v26, %v1535_v7  ;;  %v1555_v58 = vsel %vm4579_vm3, %v4753_v13, 0.0  ;;  %v4847_v31 = vpop.permute.xlu0 %1635 }
 0x1c7   : > { %vm6721_vm1 = vcmp.ge.s32.totalorder %v4544_v19, 0  ;;  %v6722_v51 = vmov 0  ;;  %vm6725_vm10 = vcmp.lt.s32.totalorder %v4438_v3, 2  ;;  %v2019_v26 = vsel %vm4759_vm0, %v2014_v16, 0.0 }
 0x1c8   : > { %vm4814_vm12 = vmand %vm4470_vm7, %vm6721_vm1  ;;  %v2013_v6 = vsel %vm6725_vm10, %v4548_v22, %v2011_v61  ;;  %vm6726_vm13 = vcmp.ge.s32.totalorder %v4468_v23, 0  ;;  %v6727_v53 = vmov 0  ;;  %v1964_v7 = vadd.f32 %v1962_v57, %v4435_v9  ;;  %v4845_v57 = vpop.permute.xlu1 %2114 }
 0x1c9   : > { %v6723_v51 = vsel %vm4814_vm12, 4294967295, %v6722_v51  ;;  %vm4828_vm11 = vmand %vm4685_vm14, %vm6726_vm13  ;;  %v1999_v10 = vsel %vm4780_vm2, %v1992_v32, 0.0  ;;  %v2004_v22 = vmul.f32 %v4354_v27, %v1998_v44  ;;  %vm6729_vm1 = vnez %v6671_v28 }
 0x1ca   : > { %6724 = vst [vmem:[#allocation84_spill] sm:$0xff] %v6723_v51  ;;  %v6728_v53 = vsel %vm4828_vm11, 4294967295, %v6727_v53  ;;  %v1556_v61 = vsel %vm6729_vm1, %v4747_v4, 0.0  ;;  %vm6730_vm10 = vnez %v6665_v40  ;;  %vm6731_vm5 = vnez %v6668_v15 }
 0x1cb   : > { %v1590_v23 = vsel %vm6730_vm10, %v1584_v18, 0.0  ;;  %v1591_v13 = vsel %vm6731_vm5, %v1585_v37, 0.0  ;;  %v1963_v16 = vmul.f32 %v4333_v63, %v1956_v39  ;;  %v1984_v52 = vmul.f32 %v4345_v24, %v1978_v46 }
 0x1cc   : > { %vm6732_vm13 = vcmp.lt.s32.totalorder %v4584_v17, 16  ;;  %vm6733_vm0 = vcmp.ge.s32.totalorder %v4584_v17, 0  ;;  %v6734_v44 = vmov 0  ;;  %vm6737_vm9 = vcmp.ge.s32.totalorder %v4474_v12, 0 }
 0x1cd   : > { %vm4853_vm2 = vmand %vm6733_vm0, %vm6732_vm13  ;;  %v6738_v63 = vmov 0  ;;  %vm6740_vm10 = vcmp.lt.s32.totalorder %v4438_v3, 113  ;;  %v1985_v4 = vadd.f32 %v1983_v48, %v1964_v7  ;;  %v2020_v17 = vsel %vm4814_vm12, %v2013_v6, 0.0  ;;  %v6766_v7 = vld [vmem:[#allocation64_spill] sm:$0xff] }
 0x1ce   : > { %v6735_v44 = vsel %vm4853_vm2, 4294967295, %v6734_v44  ;;  %vm4861_vm5 = vmand %vm4794_vm4, %vm6737_vm9  ;;  %v1605_v24 = vsel %vm6740_vm10, %v4374_v34, %v4397_v42  ;;  %v2025_v18 = vmul.f32 %v4480_v60, %v2019_v26  ;;  %v1498_v37 = vmul.f32 %v4421_v11, %v1491_v50  ;;  %v4911_v26 = vpop.permute.xlu0 %1866 }
 0x1cf   : > { %6736 = vst [vmem:[#allocation85_spill] sm:$0xff] %v6735_v44  ;;  %v6739_v63 = vsel %vm4861_vm5, 4294967295, %v6738_v63  ;;  %vm6741_vm0 = vmmov %vm6740_vm10  ;;  %v1965_v32 = vadd.f32 %v1963_v16, %v4435_v9  ;;  %v2005_v39 = vmul.f32 %v4354_v27, %v1999_v10  ;;  %vm6742_vm9 = vcmp.lt.s32.totalorder %v4546_v0, 16  ;;  %v6763_v16 = vld [vmem:[#allocation43_spill] sm:$0xff] }
 0x1d0   : > { %v4876_v12 = vsel %vm6741_vm0, %v4397_v42, %v4374_v34  ;;  %vm4885_vm10 = vmand %vm4464_vm6, %vm6742_vm9  ;;  %v6743_v46 = vmov 0  ;;  %v1499_v48 = vmul.f32 %v4421_v11, %v1492_v62  ;;  %v2006_v34 = vadd.f32 %v2004_v22, %v1985_v4  ;;  %6751 = vst [vmem:[#allocation88_spill] sm:$0xff] %v4911_v26  ;;  %v6764_v4 = vld [vmem:[#allocation36_spill] sm:$0xff] }
 0x1d1   : > { %v6744_v46 = vsel %vm4885_vm10, 4294967295, %v6743_v46  ;;  %vm6746_vm0 = vcmp.lt.s32.totalorder %v4438_v3, 126  ;;  %v2033_v9 = vmul.f32 %v4678_v41, %v4485_v59  ;;  %vm6747_vm12 = vcmp.ge.s32.totalorder %v4532_v21, 0  ;;  %v2061_v59 = vpop.permute.xlu1 %2060 }
 0x1d2   : > { %6745 = vst [vmem:[#allocation86_spill] sm:$0xff] %v6744_v46  ;;  %v2042_v50 = vsel %vm6746_vm0, %v2038_v29, %v4380_v36  ;;  %vm4900_vm9 = vmand %vm4853_vm2, %vm6747_vm12  ;;  %v6748_v27 = vmov 0  ;;  %v4905_v42 = vmul.f32 %v4286_v54, %v1590_v23  ;;  %v1611_v11 = vsel %vm4828_vm11, %v1605_v24, 0.0 }
 0x1d3   : > { %v6749_v27 = vsel %vm4900_vm9, 4294967295, %v6748_v27  ;;  %v1986_v62 = vadd.f32 %v1984_v52, %v1965_v32  ;;  %v2026_v6 = vmul.f32 %v4480_v60, %v2020_v17  ;;  %v4914_v21 = vmul.f32 %v4286_v54, %v1591_v13 }
 0x1d4   : > { %6750 = vst [vmem:[#allocation87_spill] sm:$0xff] %v6749_v27  ;;  %v2027_v10 = vadd.f32 %v2025_v18, %v2006_v34  ;;  %vm6752_vm12 = vcmp.lt.s32.totalorder %v4659_v2, 16  ;;  %vm6753_vm0 = vcmp.ge.s32.totalorder %v4659_v2, 0  ;;  %v6754_v22 = vmov 0 }
 0x1d5   : > { %vm4923_vm11 = vmand %vm6753_vm0, %vm6752_vm12  ;;  %vm6757_vm13 = vcmp.lt.s32.totalorder %v4438_v3, 98  ;;  %v2007_v54 = vadd.f32 %v2005_v39, %v1986_v62  ;;  %vm6758_vm3 = vcmp.lt.s32.totalorder %v4559_v43, 16  ;;  %v6759_v52 = vmov 0  ;;  %v6765_v39 = vld [vmem:[#allocation59_spill] sm:$0xff] }
 0x1d6   : > { %v6755_v22 = vsel %vm4923_vm11, 4294967295, %v6754_v22  ;;  %v2063_v60 = vsel %vm6757_vm13, %v4389_v38, %v2061_v59  ;;  %vm4935_vm6 = vmand %vm4470_vm7, %vm6758_vm3  ;;  %vm6762_vm12 = vcmp.lt.s32.totalorder %v4438_v3, 126  ;;  %v2048_v23 = vsel %vm4885_vm10, %v2042_v50, 0.0  ;;  %v6772_v50 = vld [vmem:[#allocation35_spill] sm:$0xff] }
 0x1d7   : > { %6756 = vst [vmem:[#allocation89_spill] sm:$0xff] %v6755_v22  ;;  %v6760_v52 = vsel %vm4935_vm6, 4294967295, %v6759_v52  ;;  %v2043_v2 = vsel %vm6762_vm12, %v4380_v36, %v2038_v29  ;;  %v2069_v13 = vsel %vm4900_vm9, %v2063_v60, 0.0  ;;  %v4947_v24 = vmul.f32 %v6763_v16, %v1611_v11  ;;  %v6773_v11 = vld [vmem:[#allocation44_spill] sm:$0xff] }
 0x1d8   : > { %6761 = vst [vmem:[#allocation90_spill] sm:$0xff] %v6760_v52  ;;  %v1500_v17 = vadd.f32 %v1498_v37, %v6764_v4  ;;  %v1501_v18 = vadd.f32 %v1499_v48, %v6764_v4  ;;  %v2035_v32 = vadd.f32 %v2033_v9, %v2027_v10  ;;  %v1561_v34 = vmul.f32 %v6765_v39, %v1555_v58  ;;  %v2082_v48 = vpop.permute.xlu1 %2081 }
 0x1d9   : > { %v2028_v62 = vadd.f32 %v2026_v6, %v2007_v54  ;;  %v2034_v36 = vmul.f32 %v4678_v41, %v6766_v7  ;;  %vm6767_vm3 = vcmp.ge.s32.totalorder %v4544_v19, 0  ;;  %v6768_v29 = vmov 0  ;;  %v6774_v6 = vld [vmem:[#allocation47_spill] sm:$0xff]  ;;  %v1517_v7 = vpop.permute.xlu0 %1516 }
 0x1da   : > { %vm4958_vm13 = vmand %vm4923_vm11, %vm6767_vm3  ;;  %vm6771_vm0 = vcmp.lt.s32.totalorder %v4438_v3, 98  ;;  %v2049_v58 = vsel %vm4935_vm6, %v2043_v2, 0.0  ;;  %v2054_v9 = vmul.f32 %v6772_v50, %v2048_v23  ;;  %v2075_v41 = vmul.f32 %v6773_v11, %v2069_v13 }
 0x1db   : > { %v6769_v29 = vsel %vm4958_vm13, 4294967295, %v6768_v29  ;;  %v2064_v37 = vsel %vm6771_vm0, %v2061_v59, %v4389_v38  ;;  %vm6775_vm12 = vcmp.lt.s32.totalorder %v4438_v3, 96  ;;  %v6777_v59 = vsel %vm6695_vm8, %v4645_v56, 0.0 }
 0x1dc   : > { %6770 = vst [vmem:[#allocation43_spill] sm:$0xff] %v6769_v29  ;;  %v2084_v19 = vsel %vm6775_vm12, %v6774_v6, %v2082_v48  ;;  %vm6776_vm3 = vmmov %vm6775_vm12  ;;  %v1519_v60 = vmul.f32 %v1517_v7, %v6777_v59  ;;  %v6778_v54 = vsel %vm4500_vm15, %v4639_v33, 0.0  ;;  %v1562_v23 = vmul.f32 %v6765_v39, %v1556_v61 }
 0x1dd   : > { %v2085_v10 = vsel %vm6776_vm3, %v2082_v48, %v6774_v6  ;;  %v2090_v38 = vsel %vm4853_vm2, %v2084_v19, 0.0  ;;  %v1520_v2 = vmul.f32 %v1517_v7, %v6778_v54  ;;  %v2056_v13 = vadd.f32 %v2054_v9, %v2035_v32  ;;  %v6779_v48 = vld [vmem:[#allocation46_spill] sm:$0xff]  ;;  %v6792_v9 = vld [vmem:[#allocation48_spill] sm:$0xff] }
 0x1de   : > { %v2070_v4 = vsel %vm4958_vm13, %v2064_v37, 0.0  ;;  %v2096_v6 = vmul.f32 %v6779_v48, %v2090_v38  ;;  %vm6780_vm0 = vcmp.lt.s32.totalorder %v4546_v0, 16  ;;  %v6781_v56 = vmov 0  ;;  %v2103_v0 = vpop.permute.xlu1 %2102  ;;  %v6788_v37 = vld [vmem:[#allocation49_spill] sm:$0xff] }
 0x1df   : > { %vm4993_vm12 = vmand %vm4853_vm2, %vm6780_vm0  ;;  %v2055_v19 = vmul.f32 %v6772_v50, %v2049_v58  ;;  %v2036_v33 = vadd.f32 %v2034_v36, %v2028_v62  ;;  %v1521_v7 = vadd.f32 %v1519_v60, %v1500_v17  ;;  %v1522_v59 = vadd.f32 %v1520_v2, %v1501_v18  ;;  %v6791_v50 = vld [vmem:[#allocation50_spill] sm:$0xff] }
 0x1e0   : > { %v6782_v56 = vsel %vm4993_vm12, 4294967295, %v6781_v56  ;;  %vm6784_vm3 = vcmp.lt.s32.totalorder %v4559_v43, 16  ;;  %v6785_v61 = vmov 0  ;;  %v2077_v32 = vadd.f32 %v2075_v41, %v2056_v13  ;;  %v6795_v13 = vld [vmem:[#allocation62_spill] sm:$0xff] }
 0x1e1   : > { %6783 = vst [vmem:[#allocation36_spill] sm:$0xff] %v6782_v56  ;;  %vm5002_vm1 = vmand %vm4923_vm11, %vm6784_vm3  ;;  %v2091_v39 = vsel %vm4923_vm11, %v2085_v10, 0.0  ;;  %vm6789_vm0 = vcmp.lt.s32.totalorder %v4438_v3, 94  ;;  %v2076_v43 = vmul.f32 %v6773_v11, %v2070_v4  ;;  %v1542_v18 = vadd.f32 %v4741_v20, %v1521_v7  ;;  %v6800_v7 = vld [vmem:[#allocation52_spill] sm:$0xff]  ;;  %v6819_v56 = vld [vmem:[#allocation41_spill] sm:$0xff] }
 0x1e2   : > { %v6786_v61 = vsel %vm5002_vm1, 4294967295, %v6785_v61  ;;  %v2105_v58 = vsel %vm6789_vm0, %v6788_v37, %v2103_v0  ;;  %vm6790_vm2 = vmmov %vm6789_vm0  ;;  %v1543_v62 = vadd.f32 %v4805_v45, %v1522_v59  ;;  %vm6793_vm3 = vcmp.lt.s32.totalorder %v4438_v3, 112 }
 0x1e3   : > { %6787 = vst [vmem:[#allocation59_spill] sm:$0xff] %v6786_v61  ;;  %v2106_v17 = vsel %vm6790_vm2, %v2103_v0, %v6788_v37  ;;  %v2111_v36 = vsel %vm4993_vm12, %v2105_v58, 0.0  ;;  %v1626_v41 = vsel %vm6793_vm3, %v6792_v9, %v6791_v50  ;;  %v2098_v10 = vadd.f32 %v2096_v6, %v2077_v32  ;;  %vm6794_vm2 = vmmov %vm6793_vm3  ;;  %v6799_v6 = vld [vmem:[#allocation54_spill] sm:$0xff]  ;;  %v6807_v0 = vld [vmem:[#allocation67_spill] sm:$0xff] }
 0x1e4   : > { %v2112_v38 = vsel %vm5002_vm1, %v2106_v17, 0.0  ;;  %v2117_v60 = vmul.f32 %v4845_v57, %v2111_v36  ;;  %v2057_v54 = vadd.f32 %v2055_v19, %v2036_v33  ;;  %v2097_v11 = vmul.f32 %v6779_v48, %v2091_v39  ;;  %v6803_v19 = vld [vmem:[#allocation63_spill] sm:$0xff]  ;;  %v6808_v39 = vld [vmem:[#allocation69_spill] sm:$0xff] }
 0x1e5   : > { %v1563_v20 = vadd.f32 %v1561_v34, %v1542_v18  ;;  %v1564_v2 = vadd.f32 %v1562_v23, %v1543_v62  ;;  %v1627_v45 = vsel %vm6794_vm2, %v6791_v50, %v6792_v9  ;;  %vm6796_vm0 = vcmp.lt.s32.totalorder %v6795_v13, 16  ;;  %v6811_v13 = vld [vmem:[#allocation27_spill] sm:$0xff] }
 0x1e6   : > { %vm5035_vm3 = vmand %vm4685_vm14, %vm6796_vm0  ;;  %vm6801_vm1 = vcmp.lt.s32.totalorder %v4438_v3, 111  ;;  %v2119_v23 = vadd.f32 %v2117_v60, %v2098_v10  ;;  %vm6804_vm2 = vcmp.lt.s32.totalorder %v6803_v19, 16  ;;  %v2078_v59 = vadd.f32 %v2076_v43, %v2057_v54  ;;  %v2130_v19 = vpop.permute.xlu1 %2129 }
 0x1e7   : > { %v1647_v48 = vsel %vm6801_vm1, %v6800_v7, %v6799_v6  ;;  %vm6802_vm12 = vmmov %vm6801_vm1  ;;  %v1577_v32 = vadd.f32 %v6807_v0, %v1563_v20  ;;  %v1578_v37 = vadd.f32 %v6808_v39, %v1564_v2  ;;  %v2118_v58 = vmul.f32 %v4845_v57, %v2112_v38 }
 0x1e8   : > { %v1648_v34 = vsel %vm6802_vm12, %v6799_v6, %v6800_v7  ;;  %vm5051_vm11 = vmand %vm4794_vm4, %vm6804_vm2  ;;  %v6809_v17 = vsel %vm4861_vm5, %v4876_v12, 0.0  ;;  %v1632_v62 = vsel %vm4685_vm14, %v1626_v41, 0.0  ;;  %vm2121_vm1 = vcmp.gt.f32.partialorder %v2119_v23, 0.0 }
 0x1e9   : > { %v1618_v18 = vmul.f32 %v6763_v16, %v6809_v17  ;;  %v2123_v36 = vmul.f32 0.01, %v2119_v23  ;;  %v1633_v43 = vsel %vm4794_vm4, %v1627_v45, 0.0  ;;  %v2099_v50 = vadd.f32 %v2097_v11, %v2078_v59  ;;  %v6810_v11 = vld [vmem:[#allocation32_spill] sm:$0xff] }
 0x1ea   : > { %v1598_v9 = vadd.f32 %v4905_v42, %v1577_v32  ;;  %v1599_v10 = vadd.f32 %v4914_v21, %v1578_v37  ;;  %v1653_v57 = vsel %vm5035_vm3, %v1647_v48, 0.0  ;;  %v1654_v12 = vsel %vm5051_vm11, %v1648_v34, 0.0 }
 0x1eb   : > { %v1638_v16 = vmul.f32 %v4847_v31, %v1632_v62  ;;  %v1639_v41 = vmul.f32 %v4847_v31, %v1633_v43  ;;  %v2120_v54 = vadd.f32 %v2118_v58, %v2099_v50  ;;  %v5076_v20 = vsel %vm2121_vm1, %v2119_v23, %v2123_v36  ;;  %v6812_v23 = vld [vmem:[#allocation57_spill] sm:$0xff]  ;;  %v6813_v58 = vld [vmem:[#allocation26_spill] sm:$0xff]  ;;  %v2151_v43 = vpop.permute.xlu1 %2150  ;;  %v6814_v50 = vld [vmem:[#allocation39_spill] sm:$0xff] }
 0x1ec   : > { %v1619_v38 = vadd.f32 %v4947_v24, %v1598_v9  ;;  %v1620_v60 = vadd.f32 %v1618_v18, %v1599_v10  ;;  %v1659_v42 = vmul.f32 %v6810_v11, %v1653_v57  ;;  %v1660_v21 = vmul.f32 %v6810_v11, %v1654_v12  ;;  %v6815_v10 = vld [vmem:[#allocation28_spill] sm:$0xff]  ;;  %v6816_v11 = vld [vmem:[#allocation37_spill] sm:$0xff] }
 0x1ed   : > { %v2140_v6 = vrot.slane %v5076_v20, %v6811_v13  ;;  %v2124_v7 = vmul.f32 0.01, %v2120_v54  ;;  %vm2122_vm12 = vcmp.gt.f32.partialorder %v2120_v54, 0.0  ;;  %v2156_v18 = vrot.slane %v5076_v20, %v6813_v58 }
 0x1ee   : > { %v1641_v2 = vadd.f32 %v1639_v41, %v1620_v60  ;;  %v1640_v45 = vadd.f32 %v1638_v16, %v1619_v38  ;;  %v1693_v41 = vpop.permute.xlu0 %1692  ;;  %vm6865_vm13 = vcmp.lt.s32.totalorder %v4438_v3, 16  ;;  %vm6867_vm6 = vnez %v6623_v8 }
 0x1ef   : > { %v2145_v59 = vmul.f32 %v2140_v6, %v6812_v23  ;;  %v2126_v39 = vsel %vm2122_vm12, %v2120_v54, %v2124_v7  ;;  %v2172_v54 = vrot.slane %v5076_v20, %v6815_v10  ;;  %v2161_v6 = vmul.f32 %v2156_v18, %v2151_v43  ;;  %vm6866_vm9 = vmmov %vm6865_vm13 }
 0x1f0   : > { %v1662_v48 = vadd.f32 %v1660_v21, %v1641_v2  ;;  %v1661_v34 = vadd.f32 %v1659_v42, %v1640_v45  ;;  %v2144_v12 = vrot.slane %v2126_v39, %v6811_v13  ;;  %v6817_v21 = vld [vmem:[#allocation29_spill] sm:$0xff] }
 0x1f1   : > { %v2147_v16 = vadd.f32 %v2145_v59, %v2130_v19 }
 0x1f2   : > { %vm1664_vm0 = vcmp.gt.f32.partialorder %v1662_v48, 0.0  ;;  %v1666_v31 = vmul.f32 0.01, %v1662_v48  ;;  %vm1663_vm2 = vcmp.gt.f32.partialorder %v1661_v34, 0.0  ;;  %v1665_v24 = vmul.f32 0.01, %v1661_v34 }
 0x1f4   : > { %v1668_v0 = vsel %vm1664_vm0, %v1662_v48, %v1666_v31  ;;  %v1667_v32 = vsel %vm1663_vm2, %v1661_v34, %v1665_v24  ;;  %v6818_v31 = vld [vmem:[#allocation40_spill] sm:$0xff] }
 0x1f5   : > { %v1686_v37 = vrot.slane %v1668_v0, %v6811_v13  ;;  %v1702_v17 = vrot.slane %v1668_v0, %v6813_v58  ;;  %v1682_v62 = vrot.slane %v1667_v32, %v6811_v13  ;;  %v1698_v36 = vrot.slane %v1667_v32, %v6813_v58 }
 0x1f6   : > { %v1718_v57 = vrot.slane %v1668_v0, %v6815_v10  ;;  %v1714_v60 = vrot.slane %v1667_v32, %v6815_v10  ;;  %v1734_v2 = vrot.slane %v1668_v0, %v6817_v21  ;;  %v1730_v34 = vrot.slane %v1667_v32, %v6817_v21  ;;  %v2183_v32 = vpop.permute.xlu1 %2182 }
 0x1f7   : > { %v1688_v9 = vmul.f32 %v1686_v37, %v6814_v50  ;;  %v1687_v38 = vmul.f32 %v1682_v62, %v6814_v50  ;;  %v1704_v45 = vmul.f32 %v1702_v17, %v1693_v41  ;;  %v1703_v48 = vmul.f32 %v1698_v36, %v1693_v41  ;;  %v6820_v17 = vld [vmem:[#allocation51_spill] sm:$0xff] }
 0x1f8   : > { %v1720_v24 = vmul.f32 %v1718_v57, %v6818_v31  ;;  %v2146_v37 = vmul.f32 %v2144_v12, %v6812_v23  ;;  %v2163_v62 = vadd.f32 %v2161_v6, %v2147_v16  ;;  %v1719_v61 = vmul.f32 %v1714_v60, %v6818_v31 }
 0x1f9   : > { %v1690_v42 = vadd.f32 %v1688_v9, %v6816_v11  ;;  %v1689_v7 = vadd.f32 %v1687_v38, %v6816_v11  ;;  %v1736_v9 = vmul.f32 %v1734_v2, %v6819_v56  ;;  %v2160_v0 = vrot.slane %v2126_v39, %v6813_v58  ;;  %v6861_v58 = vld [vmem:[#allocation71_spill] sm:$0xff] }
 0x1fa   : > { %v2177_v18 = vmul.f32 %v2172_v54, %v6820_v17  ;;  %v1735_v36 = vmul.f32 %v1730_v34, %v6819_v56  ;;  %v2148_v57 = vadd.f32 %v2146_v37, %v2130_v19  ;;  %v2188_v23 = vrot.slane %v5076_v20, %v6817_v21  ;;  %v1181_v37 = vld [vmem:[%s6823_s28] sm:$0xf]  ;;  %s6831_s28 = sld [smem:[#allocation7_spill]] }
 0x1fb   : > { %v1706_v59 = vadd.f32 %v1704_v45, %v1690_v42  ;;  %v1705_v50 = vadd.f32 %v1703_v48, %v1689_v7  ;;  %v2176_v16 = vrot.slane %v2126_v39, %v6815_v10  ;;  %v2162_v42 = vmul.f32 %v2160_v0, %v2151_v43  ;;  %v1165_v0 = vld [vmem:[%s6826_s2] sm:$0xf]  ;;  %s6834_s2 = sld [smem:[#allocation8_spill]] }
 0x1fc   : > { %v2179_v11 = vadd.f32 %v2177_v18, %v2163_v62  ;;  %v2193_v2 = vmul.f32 %v2188_v23, %v2183_v32  ;;  %v2192_v19 = vrot.slane %v2126_v39, %v6817_v21  ;;  %v6830_v18 = vmov 6  }
 0x1fd   : > { %v1722_v22 = vadd.f32 %v1720_v24, %v1706_v59  ;;  %v1721_v38 = vadd.f32 %v1719_v61, %v1705_v50  ;;  %v2164_v61 = vadd.f32 %v2162_v42, %v2148_v57  ;;  %v5160_v24 = vpop.permute.xlu1 %2218  ;;  %v6828_v50 = vmov 5   ;;  %v6839_v42 = vld [vmem:[#allocation45_spill] sm:$0xff] }
 0x1fe   : > { %v2195_v56 = vadd.f32 %v2193_v2, %v2179_v11  ;;  %v2194_v7 = vmul.f32 %v2192_v19, %v2183_v32  ;;  %v3829_v32 = vld [vmem:[%s6580_s3] sm:$0x3]  ;;  %v6833_v57 = vmov 8   ;;  %v6840_v2 = vmov 1   ;;  %s6925_s3 = smov 2  }
 0x1ff   : > { %v1738_v41 = vadd.f32 %v1736_v9, %v1722_v22  ;;  %v1737_v12 = vadd.f32 %v1735_v36, %v1721_v38  ;;  %v2178_v22 = vmul.f32 %v2176_v16, %v6820_v17  ;;  %v6832_v38 = vld [vmem:[#allocation38_spill] sm:$0xff]  ;;  %v6845_v19 = vmov 4  }
 0x200   : > { %v2199_v43 = vmul.f32 0.01, %v2195_v56  ;;  %vm2197_vm0 = vcmp.gt.f32.partialorder %v2195_v56, 0.0 }
 0x201   : > { %vm1740_vm1 = vcmp.gt.f32.partialorder %v1738_v41, 0.0  ;;  %v1742_v60 = vmul.f32 0.01, %v1738_v41  ;;  %vm1739_vm12 = vcmp.gt.f32.partialorder %v1737_v12, 0.0  ;;  %v1741_v45 = vmul.f32 0.01, %v1737_v12  ;;  %v5168_v59 = vpop.permute.xlu1 %2234 }
 0x202   : > { %v2180_v20 = vadd.f32 %v2178_v22, %v2164_v61  ;;  %v5124_v34 = vsel %vm2197_vm0, %v2195_v56, %v2199_v43  ;;  %v1167_v61 = vld [vmem:[%s6834_s2] sm:$0xf]  ;;  %v6842_v56 = vmov 3   ;;  %s6853_s2 = sld [smem:[#allocation10_spill]] }
 0x203   : > { %v5110_v54 = vsel %vm1740_vm1, %v1738_v41, %v1742_v60  ;;  %v5112_v6 = vsel %vm1739_vm12, %v1737_v12, %v1741_v45  ;;  %v1166_v12 = vld [vmem:[%s6831_s28] sm:$0xf]  ;;  %v6838_v60 = vmov 0   ;;  %s6852_s28 = sld [smem:[#allocation22_spill]]  ;;  %vm6857_vm1 = vcmp.lt.s32.totalorder %v4438_v3, 17 }
 0x204   : > { %1769 = vrot.lane.b32.xlu0 %v5110_v54, %s6454_s23  ;;  %1750 = vrot.lane.b32.xlu1 %v5112_v6, %s6508_s22  ;;  %v2196_v48 = vadd.f32 %v2194_v7, %v2180_v20  ;;  %v6847_v7 = vmov 2   ;;  %vm6858_vm12 = vmmov %vm6857_vm1 }
 0x205   : > { %v5177_v62 = vpop.permute.xlu1 %2250 }
 0x206   : > { %v2200_v31 = vmul.f32 0.01, %v2196_v48  ;;  %vm2198_vm2 = vcmp.gt.f32.partialorder %v2196_v48, 0.0 }
 0x208   : > { %1783 = vrot.lane.b32.xlu0 %v5112_v6, %s6821_s0  ;;  %1752 = vrot.lane.b32.xlu1 %v5110_v54, %s6508_s22  ;;  %v5134_v39 = vsel %vm2198_vm2, %v2196_v48, %v2200_v31  ;;  %v5228_v31 = vpop.permute.xlu0 %2376  ;;  %vm6862_vm2 = vnez %v6861_v58 }
 0x209   : > { %v5182_v9 = vpop.permute.xlu1 %2276  ;;  %6849 = vst [vmem:[#allocation50_spill] sm:$0xff] %v5228_v31 }
 0x20c   : > { %2208 = vrot.lane.b32.xlu0 %v5124_v34, %s6508_s22  ;;  %1767 = vrot.lane.b32.xlu1 %v5112_v6, %s6454_s23 }
 0x20d   : > { %v5189_v17 = vpop.permute.xlu1 %2292 }
 0x210   : > { %2241 = vrot.lane.b32.xlu0 %v5124_v34, %s6821_s0  ;;  %1785 = vrot.lane.b32.xlu1 %v5110_v54, %s6821_s0 }
 0x211   : > { %v5195_v36 = vpop.permute.xlu1 %1834 }
 0x214   : > { %2259 = vrot.lane.b32.xlu0 %v5134_v39, %s6452_s10  ;;  %2210 = vrot.lane.b32.xlu1 %v5134_v39, %s6508_s22 }
 0x215   : > { %v5202_v41 = vpop.permute.xlu1 %2324 }
 0x218   : > { %2283 = vrot.lane.b32.xlu0 %v5124_v34, %s6822_s26  ;;  %2225 = vrot.lane.b32.xlu1 %v5124_v34, %s6454_s23 }
 0x219   : > { %v5206_v23 = vpop.permute.xlu1 %2340 }
 0x21a   : > { %6835 = vst [vmem:[#allocation64_spill] sm:$0xff] %v5206_v23 }
 0x21c   : > { %1827 = vrot.lane.b32.xlu0 %v5110_v54, %s6822_s26  ;;  %2227 = vrot.lane.b32.xlu1 %v5134_v39, %s6454_s23  ;;  %s6836_s23 = sld [smem:[#allocation9_spill]] }
 0x21d   : > { %v5209_v16 = vpop.permute.xlu1 %1882 }
 0x21e   : > { %6837 = vst [vmem:[#allocation35_spill] sm:$0xff] %v5209_v16 }
 0x220   : > { %2301 = vrot.lane.b32.xlu0 %v5134_v39, %s6824_s11  ;;  %2243 = vrot.lane.b32.xlu1 %v5134_v39, %s6821_s0 }
 0x221   : > { %v5214_v45 = vpop.permute.xlu1 %1902 }
 0x222   : > { %6841 = vst [vmem:[#allocation44_spill] sm:$0xff] %v5214_v45  ;;  %v1168_v22 = vld [vmem:[%s6836_s23] sm:$0xf]  ;;  %s6851_s23 = sld [smem:[#allocation21_spill]] }
 0x224   : > { %1841 = vrot.lane.b32.xlu0 %v5112_v6, %s6824_s11  ;;  %2257 = vrot.lane.b32.xlu1 %v5124_v34, %s6452_s10 }
 0x225   : > { %v5219_v20 = vpop.permute.xlu1 %2355 }
 0x226   : > { %6844 = vst [vmem:[#allocation47_spill] sm:$0xff] %v5219_v20 }
 0x228   : > { %2315 = vrot.lane.b32.xlu0 %v5124_v34, %s6825_s7  ;;  %1799 = vrot.lane.b32.xlu1 %v5112_v6, %s6452_s10  ;;  %v1184_v44 = vld [vmem:[%s6851_s23] sm:$0xf]  ;;  %s6921_s23 = smov 34  }
 0x229   : > { %v5222_v43 = vpop.permute.xlu1 %1897 }
 0x22a   : > { %6846 = vst [vmem:[#allocation46_spill] sm:$0xff] %v5222_v43 }
 0x22c   : > { %1857 = vrot.lane.b32.xlu0 %v5112_v6, %s6825_s7  ;;  %1801 = vrot.lane.b32.xlu1 %v5110_v54, %s6452_s10  ;;  %s6829_s10 = sld [smem:[#allocation19_spill]] }
 0x22d   : > { %v5226_v48 = vpop.permute.xlu1 %1918 }
 0x22e   : > { %6848 = vst [vmem:[#allocation49_spill] sm:$0xff] %v5226_v48 }
 0x230   : > { %2331 = vrot.lane.b32.xlu0 %v5124_v34, %s6827_s1  ;;  %2285 = vrot.lane.b32.xlu1 %v5134_v39, %s6822_s26 }
 0x232   : > { %v1182_v11 = vld [vmem:[%s6829_s10] sm:$0xf]  ;;  %s6843_s10 = sld [smem:[#allocation20_spill]] }
 0x234   : > { %1873 = vrot.lane.b32.xlu0 %v5112_v6, %s6827_s1  ;;  %1825 = vrot.lane.b32.xlu1 %v5112_v6, %s6822_s26 }
 0x238   : > { %2892 = vperm.xlu0 %3777, %v1181_v37   ;;  %2299 = vrot.lane.b32.xlu1 %v5124_v34, %s6824_s11 }
 0x23c   : > { %3785 = vset.pattern.permute.xlu0 %v6828_v50  ;;  %1843 = vrot.lane.b32.xlu1 %v5110_v54, %s6824_s11 }
 0x23d   : > { %2948 = vperm.xlu0 %3785, %v1181_v37  }
 0x240   : > { %2317 = vrot.lane.b32.xlu1 %v5134_v39, %s6825_s7 }
 0x241   : > { %2498 = vperm.xlu0 %3785, %v1165_v0  }
 0x244   : > { %1859 = vrot.lane.b32.xlu1 %v5110_v54, %s6825_s7 }
 0x245   : > { %3786 = vset.pattern.permute.xlu0 %v6830_v18 }
 0x246   : > { %2308 = vperm.xlu0 %3786, %v6832_v38   ;;  %v1183_v38 = vld [vmem:[%s6843_s10] sm:$0xf]  ;;  %s6854_s10 = sld [smem:[#allocation11_spill]] }
 0x248   : > { %2333 = vrot.lane.b32.xlu1 %v5134_v39, %s6827_s1 }
 0x24a   : > { %1850 = vperm.xlu0 %3786, %v3829_v32   ;;  %v6850_v32 = vmov 7  }
 0x24c   : > { %1875 = vrot.lane.b32.xlu1 %v5110_v54, %s6827_s1  ;;  %v1170_v20 = vld [vmem:[%s6854_s10] sm:$0xf]  ;;  %s6924_s10 = smov 30  }
 0x24e   : > { %2514 = vperm.xlu0 %3786, %v1165_v0  }
 0x250   : > { %2424 = vperm.xlu1 %3781, %v1165_v0  }
 0x252   : > { %3789 = vset.pattern.permute.xlu0 %v6833_v57  ;;  %v5251_v57 = vld [vmem:[%s6852_s28] sm:$0xf]  ;;  %s6922_s28 = smov 32  }
 0x253   : > { %2996 = vperm.xlu0 %3789, %v1181_v37   ;;  %6855 = vst [vmem:[#allocation48_spill] sm:$0xff] %v5251_v57 }
 0x254   : > { %2863 = vperm.xlu1 %3781, %v1182_v11  }
 0x257   : > { %2546 = vperm.xlu0 %3789, %v1165_v0  }
 0x258   : > { %2411 = vperm.xlu1 %3781, %v1166_v12  }
 0x25b   : > { %3790 = vset.pattern.permute.xlu0 %v6838_v60 }
 0x25c   : > { %2360 = vperm.xlu0 %3790, %v6839_v42   ;;  %3782 = vset.pattern.permute.xlu1 %v6840_v2 }
 0x25d   : > { %2440 = vperm.xlu1 %3782, %v1165_v0  }
 0x260   : > { %2876 = vperm.xlu0 %3790, %v1181_v37  }
 0x261   : > { %3783 = vset.pattern.permute.xlu1 %v6842_v56 }
 0x262   : > { %2924 = vperm.xlu1 %3783, %v1181_v37  }
 0x264   : > { %2566 = vperm.xlu0 %3790, %v1167_v61  }
 0x266   : > { %3784 = vset.pattern.permute.xlu1 %v6845_v19 }
 0x267   : > { %2932 = vperm.xlu1 %3784, %v1181_v37  }
 0x268   : > { %2561 = vperm.xlu0 %3790, %v1168_v22  }
 0x26b   : > { %2482 = vperm.xlu1 %3784, %v1165_v0  }
 0x26c   : > { %3793 = vset.pattern.permute.xlu0 %v6847_v7 }
 0x26d   : > { %2908 = vperm.xlu0 %3793, %v1181_v37  }
 0x26f   : > { %3787 = vset.pattern.permute.xlu1 %v6830_v18  ;;  %v5258_v18 = vld [vmem:[%s6853_s2] sm:$0xf]  ;;  %s6923_s2 = smov 16  }
 0x270   : > { %2964 = vperm.xlu1 %3787, %v1181_v37   ;;  %6856 = vst [vmem:[#allocation62_spill] sm:$0xff] %v5258_v18 }
 0x271   : > { %2456 = vperm.xlu0 %3793, %v1165_v0  }
 0x274   : > { %3788 = vset.pattern.permute.xlu1 %v6850_v32 }
 0x275   : > { %3048 = vperm.xlu0 %3793, %v1183_v38   ;;  %2980 = vperm.xlu1 %3788, %v1181_v37  }
 0x276   : > { %v1770_v11 = vpop.permute.xlu0 %1769  ;;  %v1751_v12 = vpop.permute.xlu1 %1750 }
 0x279   : > { %3794 = vset.pattern.permute.xlu0 %v6842_v56  ;;  %2530 = vperm.xlu1 %3788, %v1165_v0  }
 0x27a   : > { %v5233_v42 = vpop.permute.xlu0 %1783  ;;  %2472 = vperm.xlu0 %3794, %v1165_v0   ;;  %v1753_v22 = vpop.permute.xlu1 %1752 }
 0x27b   : > { %v1755_v31 = vsel %vm6858_vm12, %v1753_v22, %v1751_v12  ;;  %vm6864_vm12 = vmmov %vm6857_vm1 }
 0x27d   : > { %3791 = vset.pattern.permute.xlu1 %v6838_v60 }
 0x27e   : > { %v2209_v21 = vpop.permute.xlu0 %2208  ;;  %2614 = vperm.xlu0 %3794, %v1167_v61   ;;  %v1768_v10 = vpop.permute.xlu1 %1767  ;;  %3016 = vperm.xlu1 %3791, %v1183_v38  }
 0x282   : > { %v5237_v29 = vpop.permute.xlu0 %2241  ;;  %v1786_v27 = vpop.permute.xlu1 %1785  ;;  %3011 = vperm.xlu1 %3791, %v1184_v44  }
 0x286   : > { %v5239_v37 = vpop.permute.xlu0 %2259  ;;  %v2211_v52 = vpop.permute.xlu1 %2210  ;;  %3792 = vset.pattern.permute.xlu1 %v6840_v2 }
 0x287   : > { %3032 = vperm.xlu1 %3792, %v1183_v38  }
 0x28a   : > { %v5242_v0 = vpop.permute.xlu0 %2283  ;;  %v2226_v46 = vpop.permute.xlu1 %2225 }
 0x28b   : > { %2582 = vperm.xlu1 %3792, %v1167_v61  }
 0x28e   : > { %v5244_v51 = vpop.permute.xlu0 %1827  ;;  %v2228_v47 = vpop.permute.xlu1 %2227 }
 0x28f   : > { %3795 = vset.pattern.permute.xlu1 %v6847_v7 }
 0x290   : > { %2598 = vperm.xlu1 %3795, %v1167_v61  }
 0x292   : > { %v2244_v14 = vpop.permute.xlu1 %2243  ;;  %v5247_v44 = vpop.permute.xlu0 %2301 }
 0x294   : > { %3796 = vset.pattern.permute.xlu1 %v6842_v56 }
 0x295   : > { %3064 = vperm.xlu1 %3796, %v1183_v38   ;;  %v1754_v38 = vsel %vm6857_vm1, %v1751_v12, %v1753_v22  ;;  %v2212_v12 = vsel %vm6857_vm1, %v2209_v21, %v2211_v52  ;;  %v2213_v22 = vsel %vm6864_vm12, %v2211_v52, %v2209_v21  ;;  %vm6870_vm1 = vcmp.lt.s32.totalorder %v4438_v3, 15 }
 0x296   : > { %v2258_v49 = vpop.permute.xlu1 %2257  ;;  %v5254_v50 = vpop.permute.xlu0 %1841  ;;  %v1757_v13 = vsel %vm6862_vm2, %v1754_v38, 0.0  ;;  %v1772_v38 = vsel %vm6866_vm9, %v1770_v11, %v1768_v10  ;;  %v2215_v21 = vsel %vm6862_vm2, %v2212_v12, 0.0  ;;  %v1787_v12 = vsel %vm6870_vm1, %v5233_v42, %v1786_v27  ;;  %vm6871_vm12 = vmmov %vm6870_vm1 }
 0x299   : > { %3797 = vset.pattern.permute.xlu1 %v6838_v60 }
 0x29a   : > { %v1800_v32 = vpop.permute.xlu1 %1799  ;;  %3100 = vperm.xlu1 %3797, %v5251_v57   ;;  %v5261_v19 = vpop.permute.xlu0 %2315 }
 0x29e   : > { %v1802_v61 = vpop.permute.xlu1 %1801  ;;  %2650 = vperm.xlu1 %3797, %v5258_v18   ;;  %v5272_v48 = vpop.permute.xlu0 %1857  ;;  %v6859_v18 = vld [vmem:[#allocation70_spill] sm:$0xff] }
 0x29f   : > { %vm6860_vm0 = vnez %v6859_v18  ;;  %v6874_v18 = vld [vmem:[#allocation42_spill] sm:$0xff] }
 0x2a0   : > { %v1756_v45 = vsel %vm6860_vm0, %v1755_v31, 0.0  ;;  %v1771_v31 = vsel %vm6865_vm13, %v1768_v10, %v1770_v11  ;;  %v2214_v52 = vsel %vm6860_vm0, %v2213_v22, 0.0  ;;  %v2229_v10 = vsel %vm6866_vm9, %v2226_v46, %v2228_v47  ;;  %vm6868_vm13 = vmmov %vm6866_vm9  ;;  %v6869_v11 = vld [vmem:[#allocation55_spill] sm:$0xff] }
 0x2a1   : > { %v1774_v22 = vsel %vm4500_vm15, %v1771_v31, 0.0  ;;  %vm6872_vm9 = vmmov %vm6870_vm1  ;;  %v2222_v31 = vmul.f32 %v5160_v24, %v2215_v21 }
 0x2a2   : > { %v5263_v56 = vpop.permute.xlu1 %2285  ;;  %3798 = vset.pattern.permute.xlu1 %v6840_v2  ;;  %v6863_v2 = vld [vmem:[#allocation56_spill] sm:$0xff] }
 0x2a3   : > { %3116 = vperm.xlu1 %3798, %v5251_v57   ;;  %v1763_v16 = vmul.f32 %v6863_v2, %v1756_v45  ;;  %v1764_v23 = vmul.f32 %v6863_v2, %v1757_v13  ;;  %v5299_v2 = vpop.permute.xlu0 %2331 }
 0x2a5   : > { %v1765_v13 = vadd.f32 %v1763_v16, %v6869_v11  ;;  %v1766_v45 = vadd.f32 %v1764_v23, %v6869_v11  ;;  %v2221_v16 = vmul.f32 %v5160_v24, %v2214_v52  ;;  %v2232_v11 = vsel %vm4500_vm15, %v2229_v10, 0.0  ;;  %v6879_v52 = vld [vmem:[#allocation73_spill] sm:$0xff] }
 0x2a6   : > { %v5274_v43 = vpop.permute.xlu1 %1825 }
 0x2a7   : > { %3799 = vset.pattern.permute.xlu1 %v6838_v60 }
 0x2a8   : > { %2637 = vperm.xlu1 %3799, %v1170_v20   ;;  %v2230_v20 = vsel %vm6868_vm13, %v2228_v47, %v2226_v46  ;;  %v1788_v47 = vsel %vm6871_vm12, %v1786_v27, %v5233_v42  ;;  %v2245_v46 = vsel %vm6872_vm9, %v5237_v29, %v2244_v14  ;;  %vm6873_vm13 = vmmov %vm6870_vm1  ;;  %v1780_v42 = vmul.f32 %v6874_v18, %v1774_v22 }
 0x2a9   : > { %v2246_v23 = vsel %vm6873_vm13, %v2244_v14, %v5237_v29  ;;  %vm6875_vm1 = vcmp.lt.s32.totalorder %v4438_v3, 1  ;;  %v6877_v29 = vld [vmem:[#allocation72_spill] sm:$0xff]  ;;  %vm6880_vm13 = vnez %v6879_v52 }
 0x2aa   : > { %v5287_v26 = vpop.permute.xlu1 %2299  ;;  %v2261_v60 = vsel %vm6875_vm1, %v2258_v49, %v5239_v37  ;;  %vm6876_vm12 = vmmov %vm6875_vm1  ;;  %vm6878_vm9 = vnez %v6877_v29  ;;  %v2248_v21 = vsel %vm6880_vm13, %v2245_v46, 0.0  ;;  %v6883_v46 = vld [vmem:[#allocation58_spill] sm:$0xff] }
 0x2ab   : > { %v2262_v14 = vsel %vm6876_vm12, %v5239_v37, %v2258_v49  ;;  %v2247_v24 = vsel %vm6878_vm9, %v2246_v23, 0.0  ;;  %vm6881_vm10 = vmmov %vm6875_vm1  ;;  %v1789_v22 = vsel %vm6878_vm9, %v1788_v47, 0.0  ;;  %v1790_v49 = vsel %vm6880_vm13, %v1787_v12, 0.0 }
 0x2ac   : > { %3800 = vset.pattern.permute.xlu1 %v6847_v7  ;;  %v1773_v7 = vsel %vm6695_vm8, %v1772_v38, 0.0  ;;  %v2231_v38 = vsel %vm6695_vm8, %v2230_v20, 0.0  ;;  %v1803_v10 = vsel %vm6881_vm10, %v1800_v32, %v1802_v61  ;;  %vm6882_vm15 = vmmov %vm6875_vm1  ;;  %v2238_v23 = vmul.f32 %v5168_v59, %v2232_v11  ;;  %v6886_v11 = vld [vmem:[#allocation53_spill] sm:$0xff] }
 0x2ad   : > { %3132 = vperm.xlu1 %3800, %v5251_v57   ;;  %v1779_v27 = vmul.f32 %v6874_v18, %v1773_v7  ;;  %v1804_v18 = vsel %vm6882_vm15, %v1802_v61, %v1800_v32  ;;  %v5353_v7 = vpop.permute.xlu0 %1873  ;;  %v2237_v37 = vmul.f32 %v5168_v59, %v2231_v38  ;;  %v2223_v55 = vadd.f32 %v2221_v16, %v6883_v46  ;;  %v6887_v57 = vld [vmem:[#allocation68_spill] sm:$0xff] }
 0x2ae   : > { %v5317_v58 = vpop.permute.xlu1 %1843  ;;  %v2224_v5 = vadd.f32 %v2222_v31, %v6883_v46  ;;  %vm6884_vm10 = vnez %v6655_v25  ;;  %vm6885_vm15 = vnez %v6671_v28  ;;  %v2253_v29 = vmul.f32 %v5177_v62, %v2247_v24 }
 0x2af   : > { %v2263_v32 = vsel %vm6884_vm10, %v2262_v14, 0.0  ;;  %v2264_v61 = vsel %vm6885_vm15, %v2261_v60, 0.0  ;;  %v2254_v47 = vmul.f32 %v5177_v62, %v2248_v21  ;;  %v1805_v12 = vsel %vm6884_vm10, %v1804_v18, 0.0  ;;  %v6888_v21 = vld [vmem:[#allocation74_spill] sm:$0xff] }
 0x2b0   : > { %v1806_v59 = vsel %vm6885_vm15, %v1803_v10, 0.0  ;;  %v1781_v38 = vadd.f32 %v1779_v27, %v1765_v13  ;;  %v1782_v16 = vadd.f32 %v1780_v42, %v1766_v45  ;;  %v1795_v31 = vmul.f32 %v6886_v11, %v1789_v22 }
 0x2b1   : > { %v1796_v46 = vmul.f32 %v6886_v11, %v1790_v49  ;;  %v2239_v52 = vadd.f32 %v2237_v37, %v2223_v55  ;;  %v2240_v60 = vadd.f32 %v2238_v23, %v2224_v5  ;;  %v2269_v24 = vmul.f32 %v6887_v57, %v2263_v32 }
 0x2b2   : > { %v2318_v20 = vpop.permute.xlu1 %2317  ;;  %v2270_v62 = vmul.f32 %v6887_v57, %v2264_v61  ;;  %v1811_v25 = vmul.f32 %v6888_v21, %v1805_v12  ;;  %v1812_v18 = vmul.f32 %v6888_v21, %v1806_v59  ;;  %vm6889_vm1 = vcmp.lt.s32.totalorder %v4438_v3, 127 }
 0x2b3   : > { %v2287_v45 = vsel %vm6889_vm1, %v5242_v0, %v5263_v56  ;;  %vm6890_vm12 = vmmov %vm6889_vm1  ;;  %v2255_v5 = vadd.f32 %v2253_v29, %v2239_v52  ;;  %v2256_v27 = vadd.f32 %v2254_v47, %v2240_v60  ;;  %v1797_v10 = vadd.f32 %v1795_v31, %v1781_v38 }
 0x2b4   : > { %v2288_v13 = vsel %vm6890_vm12, %v5263_v56, %v5242_v0  ;;  %vm6891_vm15 = vmmov %vm6889_vm1  ;;  %v1798_v22 = vadd.f32 %v1796_v46, %v1782_v16  ;;  %v1816_v49 = vsel %vm4470_vm7, %v5110_v54, 0.0  ;;  %v1815_v56 = vsel %vm6867_vm6, %v5112_v6, 0.0  ;;  %v6897_v16 = vld [vmem:[#allocation82_spill] sm:$0xff] }
 0x2b5   : > { %v1829_v57 = vsel %vm6891_vm15, %v5274_v43, %v5244_v51  ;;  %vm6892_vm10 = vmmov %vm6889_vm1  ;;  %v2271_v0 = vadd.f32 %v2269_v24, %v2255_v5  ;;  %v2272_v29 = vadd.f32 %v2270_v62, %v2256_v27  ;;  %vm6893_vm1 = vnez %v6665_v40 }
 0x2b6   : > { %v1860_v55 = vpop.permute.xlu1 %1859  ;;  %v1830_v42 = vsel %vm6892_vm10, %v5244_v51, %v5274_v43  ;;  %v2289_v52 = vsel %vm6893_vm1, %v2287_v45, 0.0  ;;  %vm6894_vm15 = vnez %v6668_v15  ;;  %v1813_v51 = vadd.f32 %v1811_v25, %v1797_v10 }
 0x2b7   : > { %v5375_v14 = vpop.permute.xlu0 %2892  ;;  %v2290_v37 = vsel %vm6894_vm15, %v2288_v13, 0.0  ;;  %v1814_v43 = vadd.f32 %v1812_v18, %v1798_v22  ;;  %v1831_v32 = vsel %vm6893_vm1, %v1829_v57, 0.0  ;;  %v1832_v54 = vsel %vm6894_vm15, %v1830_v42, 0.0 }
 0x2b8   : > { %v6895_v6 = vsel %vm6867_vm6, %v5124_v34, 0.0  ;;  %v6896_v47 = vsel %vm4470_vm7, %v5134_v39, 0.0  ;;  %v2295_v25 = vmul.f32 %v5189_v17, %v2289_v52  ;;  %v2296_v59 = vmul.f32 %v5189_v17, %v2290_v37 }
 0x2b9   : > { %v2279_v61 = vmul.f32 %v5182_v9, %v6895_v6  ;;  %v2280_v12 = vmul.f32 %v5182_v9, %v6896_v47  ;;  %v1822_v11 = vmul.f32 %v6897_v16, %v1816_v49  ;;  %v1821_v31 = vmul.f32 %v6897_v16, %v1815_v56 }
 0x2ba   : > { %v2334_v38 = vpop.permute.xlu1 %2333  ;;  %v1837_v46 = vmul.f32 %v5195_v36, %v1831_v32  ;;  %v1838_v34 = vmul.f32 %v5195_v36, %v1832_v54  ;;  %vm6898_vm10 = vcmp.lt.s32.totalorder %v4438_v3, 113  ;;  %vm6900_vm15 = vcmp.lt.s32.totalorder %v4438_v3, 112 }
 0x2bb   : > { %v2281_v24 = vadd.f32 %v2279_v61, %v2271_v0  ;;  %v2282_v62 = vadd.f32 %v2280_v12, %v2272_v29  ;;  %v1823_v39 = vadd.f32 %v1821_v31, %v1813_v51  ;;  %v1824_v21 = vadd.f32 %v1822_v11, %v1814_v43  ;;  %vm6899_vm12 = vmmov %vm6898_vm10  ;;  %v6910_v11 = vld [vmem:[#allocation88_spill] sm:$0xff] }
 0x2bc   : > { %v5407_v23 = vpop.permute.xlu0 %2948  ;;  %v2303_v9 = vsel %vm6898_vm10, %v5287_v26, %v5247_v44  ;;  %v2304_v17 = vsel %vm6899_vm12, %v5247_v44, %v5287_v26  ;;  %v2319_v36 = vsel %vm6900_vm15, %v5261_v19, %v2318_v20  ;;  %vm6901_vm1 = vmmov %vm6900_vm15  ;;  %v1846_v26 = vsel %vm6898_vm10, %v5317_v58, %v5254_v50 }
 0x2bd   : > { %v2320_v18 = vsel %vm6901_vm1, %v2318_v20, %v5261_v19  ;;  %v2297_v45 = vadd.f32 %v2295_v25, %v2281_v24  ;;  %v2298_v13 = vadd.f32 %v2296_v59, %v2282_v62  ;;  %vm6902_vm13 = vmmov %vm6898_vm10  ;;  %v1839_v44 = vadd.f32 %v1837_v46, %v1823_v39  ;;  %v6911_v62 = vld [vmem:[#allocation64_spill] sm:$0xff] }
 0x2be   : > { %v1845_v5 = vsel %vm6902_vm13, %v5254_v50, %v5317_v58  ;;  %v1840_v27 = vadd.f32 %v1838_v34, %v1824_v21  ;;  %v2321_v57 = vsel %vm4685_vm14, %v2319_v36, 0.0  ;;  %v2322_v19 = vsel %vm4794_vm4, %v2320_v18, 0.0  ;;  %v1876_v20 = vpop.permute.xlu1 %1875  ;;  %vm6904_vm13 = vmmov %vm6900_vm15 }
 0x2bf   : > { %vm6903_vm1 = vnez %v6728_v53  ;;  %v2306_v22 = vsel %vm4861_vm5, %v2304_v17, 0.0  ;;  %v1861_v58 = vsel %vm6904_vm13, %v5272_v48, %v1860_v55  ;;  %vm6905_vm15 = vmmov %vm6904_vm13  ;;  %vm6906_vm12 = vcmp.lt.s32.totalorder %v4438_v3, 111  ;;  %v6912_v17 = vld [vmem:[#allocation35_spill] sm:$0xff] }
 0x2c0   : > { %v5429_v60 = vpop.permute.xlu0 %2498  ;;  %v2305_v10 = vsel %vm6903_vm1, %v2303_v9, 0.0  ;;  %v1862_v50 = vsel %vm6905_vm15, %v1860_v55, %v5272_v48  ;;  %v2335_v0 = vsel %vm6906_vm12, %v5299_v2, %v2334_v38  ;;  %vm6907_vm10 = vmmov %vm6906_vm12  ;;  %v1847_v52 = vsel %vm6903_vm1, %v1845_v5, 0.0 }
 0x2c1   : > { %v2336_v29 = vsel %vm6907_vm10, %v2334_v38, %v5299_v2  ;;  %v1848_v37 = vsel %vm4861_vm5, %v1846_v26, 0.0  ;;  %vm6908_vm13 = vmmov %vm6907_vm10  ;;  %v2327_v32 = vmul.f32 %v5202_v41, %v2321_v57  ;;  %v2328_v2 = vmul.f32 %v5202_v41, %v2322_v19 }
 0x2c2   : > { %v1877_v48 = vsel %vm6908_vm13, %v5353_v7, %v1876_v20  ;;  %vm6909_vm15 = vmmov %vm6907_vm10  ;;  %v1863_v54 = vsel %vm4685_vm14, %v1861_v58, 0.0  ;;  %v1864_v6 = vsel %vm4794_vm4, %v1862_v50, 0.0  ;;  %v2337_v47 = vsel %vm5035_vm3, %v2335_v0, 0.0  ;;  %v6913_v50 = vld [vmem:[#allocation27_spill] sm:$0xff]  ;;  %v6914_v0 = vld [vmem:[#allocation26_spill] sm:$0xff] }
 0x2c3   : > { %v1878_v55 = vsel %vm6909_vm15, %v1876_v20, %v5353_v7  ;;  %v2338_v12 = vsel %vm5051_vm11, %v2336_v29, 0.0  ;;  %v1879_v59 = vsel %vm5035_vm3, %v1877_v48, 0.0  ;;  %v1869_v31 = vmul.f32 %v6910_v11, %v1863_v54  ;;  %v6916_v48 = vld [vmem:[#allocation44_spill] sm:$0xff] }
 0x2c4   : > { %v1880_v41 = vsel %vm5051_vm11, %v1878_v55, 0.0  ;;  %v1870_v46 = vmul.f32 %v6910_v11, %v1864_v6  ;;  %v2343_v39 = vmul.f32 %v6911_v62, %v2337_v47  ;;  %v2344_v21 = vmul.f32 %v6911_v62, %v2338_v12  ;;  %v6919_v62 = vld [vmem:[#allocation47_spill] sm:$0xff] }
 0x2c5   : > { %v2309_v42 = vpop.permute.xlu0 %2308  ;;  %v1885_v36 = vmul.f32 %v6912_v17, %v1879_v59  ;;  %v1886_v18 = vmul.f32 %v6912_v17, %v1880_v41  ;;  %v6920_v17 = vld [vmem:[#allocation50_spill] sm:$0xff] }
 0x2c6   : > { %v2311_v49 = vmul.f32 %v2309_v42, %v2305_v10  ;;  %v2312_v56 = vmul.f32 %v2309_v42, %v2306_v22 }
 0x2c8   : > { %v2313_v51 = vadd.f32 %v2311_v49, %v2297_v45  ;;  %v2314_v43 = vadd.f32 %v2312_v56, %v2298_v13 }
 0x2c9   : > { %v1851_v61 = vpop.permute.xlu0 %1850 }
 0x2ca   : > { %v1853_v7 = vmul.f32 %v1851_v61, %v1847_v52  ;;  %v1854_v25 = vmul.f32 %v1851_v61, %v1848_v37  ;;  %v2329_v38 = vadd.f32 %v2327_v32, %v2313_v51  ;;  %v2330_v16 = vadd.f32 %v2328_v2, %v2314_v43  ;;  %v6917_v2 = vld [vmem:[#allocation46_spill] sm:$0xff]  ;;  %v6918_v61 = vld [vmem:[#allocation49_spill] sm:$0xff] }
 0x2cc   : > { %v1855_v34 = vadd.f32 %v1853_v7, %v1839_v44  ;;  %v1856_v24 = vadd.f32 %v1854_v25, %v1840_v27  ;;  %v2345_v5 = vadd.f32 %v2343_v39, %v2329_v38  ;;  %v2346_v26 = vadd.f32 %v2344_v21, %v2330_v16 }
 0x2cd   : > { %v5501_v9 = vpop.permute.xlu0 %2514 }
 0x2ce   : > { %v1871_v45 = vadd.f32 %v1869_v31, %v1855_v34  ;;  %v1872_v13 = vadd.f32 %v1870_v46, %v1856_v24  ;;  %v2349_v42 = vmul.f32 0.01, %v2345_v5  ;;  %v2350_v10 = vmul.f32 0.01, %v2346_v26 }
 0x2cf   : > { %vm2347_vm13 = vcmp.gt.f32.partialorder %v2345_v5, 0.0  ;;  %vm2348_vm15 = vcmp.gt.f32.partialorder %v2346_v26, 0.0 }
 0x2d0   : > { %v1887_v57 = vadd.f32 %v1885_v36, %v1871_v45  ;;  %v1888_v19 = vadd.f32 %v1886_v18, %v1872_v13  ;;  %v2351_v43 = vsel %vm2347_vm13, %v2345_v5, %v2349_v42  ;;  %v2352_v32 = vsel %vm2348_vm15, %v2346_v26, %v2350_v10 }
 0x2d1   : > { %v2366_v7 = vrot.slane %v2351_v43, %v6913_v50  ;;  %v2370_v25 = vrot.slane %v2352_v32, %v6913_v50  ;;  %v2382_v59 = vrot.slane %v2351_v43, %v6914_v0  ;;  %v2386_v41 = vrot.slane %v2352_v32, %v6914_v0 }
 0x2d2   : > { %vm1889_vm12 = vcmp.gt.f32.partialorder %v1887_v57, 0.0  ;;  %vm1890_vm10 = vcmp.gt.f32.partialorder %v1888_v19, 0.0  ;;  %v1891_v44 = vmul.f32 0.01, %v1887_v57  ;;  %v1892_v27 = vmul.f32 0.01, %v1888_v19  ;;  %v5505_v20 = vpop.permute.xlu0 %2996 }
 0x2d3   : > { %v2387_v36 = vmul.f32 %v2382_v59, %v6920_v17  ;;  %v2388_v18 = vmul.f32 %v2386_v41, %v6920_v17 }
 0x2d4   : > { %v1893_v22 = vsel %vm1889_vm12, %v1887_v57, %v1891_v44  ;;  %v1894_v58 = vsel %vm1890_vm10, %v1888_v19, %v1892_v27 }
 0x2d5   : > { %v1908_v49 = vrot.slane %v1893_v22, %v6913_v50  ;;  %v1912_v56 = vrot.slane %v1894_v58, %v6913_v50  ;;  %v1924_v29 = vrot.slane %v1893_v22, %v6914_v0  ;;  %v1928_v52 = vrot.slane %v1894_v58, %v6914_v0  ;;  %v5527_v22 = vpop.permute.xlu1 %2424 }
 0x2d6   : > { %v5511_v37 = vpop.permute.xlu0 %2546 }
 0x2d7   : > { %6915 = vst [vmem:[#allocation54_spill] sm:$0xff] %v5511_v37  ;;  %v1913_v55 = vmul.f32 %v1908_v49, %v6916_v48  ;;  %v1914_v51 = vmul.f32 %v1912_v56, %v6916_v48  ;;  %v1929_v47 = vmul.f32 %v1924_v29, %v6918_v61  ;;  %v1930_v12 = vmul.f32 %v1928_v52, %v6918_v61 }
 0x2d9   : > { %v1915_v54 = vadd.f32 %v1913_v55, %v6917_v2  ;;  %v1916_v6 = vadd.f32 %v1914_v51, %v6917_v2  ;;  %v5531_v49 = vpop.permute.xlu1 %2863 }
 0x2db   : > { %v1931_v38 = vadd.f32 %v1929_v47, %v1915_v54  ;;  %v1932_v16 = vadd.f32 %v1930_v12, %v1916_v6  ;;  %v2361_v11 = vpop.permute.xlu0 %2360  ;;  %v6932_v54 = vld [vmem:[#allocation48_spill] sm:$0xff]  ;;  %v6933_v6 = vld [vmem:[#allocation62_spill] sm:$0xff]  ;;  %v6935_v47 = vmov 4  }
 0x2dc   : > { %v2371_v31 = vmul.f32 %v2366_v7, %v2361_v11  ;;  %v2372_v46 = vmul.f32 %v2370_v25, %v2361_v11  ;;  %v6939_v25 = vmov 6  }
 0x2dd   : > { %vm1933_vm12 = vcmp.gt.f32.partialorder %v1931_v38, 0.0  ;;  %vm1934_vm10 = vcmp.gt.f32.partialorder %v1932_v16, 0.0  ;;  %v1935_v34 = vmul.f32 0.01, %v1931_v38  ;;  %v1936_v24 = vmul.f32 0.01, %v1932_v16  ;;  %v5543_v29 = vpop.permute.xlu1 %2411 }
 0x2de   : > { %v2373_v39 = vadd.f32 %v2371_v31, %v6919_v62  ;;  %v2374_v21 = vadd.f32 %v2372_v46, %v6919_v62  ;;  %v6945_v46 = vmov 0  }
 0x2df   : > { %v1937_v45 = vsel %vm1933_vm12, %v1931_v38, %v1935_v34  ;;  %v1938_v13 = vsel %vm1934_vm10, %v1932_v16, %v1936_v24  ;;  %v5623_v59 = vpop.permute.xlu0 %2876  ;;  %v6942_v38 = vmov 7   ;;  %vm6964_vm12 = vcmp.lt.s32.totalorder %v4438_v3, 34 }
 0x2e0   : > { %2397 = vst [vmem:[#allocation2] sm:$0x3] %v1937_v45  ;;  %2398 = vst [vmem:[#allocation2 + $0x8] sm:$0x3] %v1938_v13  ;;  %v2389_v5 = vadd.f32 %v2387_v36, %v2373_v39  ;;  %v2390_v26 = vadd.f32 %v2388_v18, %v2374_v21  ;;  %v6949_v21 = vmov 5   ;;  %v6951_v36 = vmov 1  }
 0x2e1   : > { %v5549_v52 = vpop.permute.xlu1 %2440  ;;  %vm6965_vm10 = vmmov %vm6964_vm12 }
 0x2e2   : > { %vm2391_vm13 = vcmp.gt.f32.partialorder %v2389_v5, 0.0  ;;  %vm2392_vm15 = vcmp.gt.f32.partialorder %v2390_v26, 0.0  ;;  %v2393_v57 = vmul.f32 0.01, %v2389_v5  ;;  %v2394_v19 = vmul.f32 0.01, %v2390_v26 }
 0x2e3   : > { %v5633_v16 = vpop.permute.xlu0 %2566 }
 0x2e4   : > { %v2395_v44 = vsel %vm2391_vm13, %v2389_v5, %v2393_v57  ;;  %v2396_v27 = vsel %vm2392_vm15, %v2390_v26, %v2394_v19  ;;  %6943 = vst [vmem:[#allocation57_spill] sm:$0xff] %v5633_v16  ;;  %v6957_v26 = vmov 2   ;;  %v6959_v57 = vmov 8  }
 0x2e5   : > { %v2401_v42 = vrot.slane %v2395_v44, 6  ;;  %v2402_v10 = vrot.slane %v2396_v27, 6  ;;  %v5559_v48 = vpop.permute.xlu1 %2924  ;;  %vm6966_vm13 = vcmp.lt.s32.totalorder %v4438_v3, 17 }
 0x2e6   : > { %vm6967_vm15 = vmmov %vm6966_vm13 }
 0x2e7   : > { %2405 = vst [vmem:[#allocation2] sm:$0xc] %v2401_v42  ;;  %2406 = vst [vmem:[#allocation2 + $0x8] sm:$0xc] %v2402_v10  ;;  %v5641_v34 = vpop.permute.xlu0 %2561 }
 0x2e8   : > { %6946 = vst [vmem:[#allocation37_spill] sm:$0xff] %v5641_v34 }
 0x2e9   : > { %v5565_v55 = vpop.permute.xlu1 %2932 }
 0x2ec   : > { %v5651_v39 = vpop.permute.xlu0 %2908 }
 0x2ed   : > { %v5575_v51 = vpop.permute.xlu1 %2482 }
 0x2ee   : > { %v5529_v58 = vld [vmem:[#allocation2] sm:$0xf]  ;;  %v5537_v56 = vld [vmem:[#allocation2 + $0x8] sm:$0xf] }
 0x2ef   : > { %2414 = vrot.lane.b32.xlu0 %v5529_v58, %s6508_s22  ;;  %2866 = vrot.lane.b32.xlu1 %v5529_v58, %s6921_s23 }
 0x2f0   : > { %v5659_v18 = vpop.permute.xlu0 %2456 }
 0x2f1   : > { %v5581_v43 = vpop.permute.xlu1 %2964 }
 0x2f3   : > { %2883 = vrot.lane.b32.xlu0 %v5529_v58, %s6922_s28  ;;  %2868 = vrot.lane.b32.xlu1 %v5537_v56, %s6921_s23  ;;  %s6926_s23 = smov 1  }
 0x2f4   : > { %v5669_v5 = vpop.permute.xlu0 %3048 }
 0x2f5   : > { %v5591_v32 = vpop.permute.xlu1 %2980  ;;  %6956 = vst [vmem:[#allocation56_spill] sm:$0xff] %v5669_v5  ;;  %v5712_v5 = vsel %vm4470_vm7, %v5537_v56, 0.0  ;;  %vm6976_vm7 = vcmp.lt.s32.totalorder %v4438_v3, 16 }
 0x2f7   : > { %2433 = vrot.lane.b32.xlu0 %v5537_v56, %s6923_s2  ;;  %2416 = vrot.lane.b32.xlu1 %v5537_v56, %s6508_s22  ;;  %s6927_s22 = smov 126  }
 0x2f9   : > { %v5597_v2 = vpop.permute.xlu1 %2530  ;;  %v5676_v44 = vpop.permute.xlu0 %2472 }
 0x2fa   : > { %6931 = vst [vmem:[#allocation52_spill] sm:$0xff] %v5597_v2 }
 0x2fb   : > { %2901 = vrot.lane.b32.xlu0 %v5537_v56, %s6924_s10  ;;  %2885 = vrot.lane.b32.xlu1 %v5537_v56, %s6922_s28  ;;  %s6928_s28 = smov 98  }
 0x2fd   : > { %v5605_v61 = vpop.permute.xlu1 %3016  ;;  %v5682_v42 = vpop.permute.xlu0 %2614 }
 0x2fe   : > { %6934 = vst [vmem:[#allocation63_spill] sm:$0xff] %v5605_v61  ;;  %6962 = vst [vmem:[#allocation58_spill] sm:$0xff] %v5682_v42 }
 0x2ff   : > { %2915 = vrot.lane.b32.xlu0 %v5529_v58, %s6925_s3  ;;  %2431 = vrot.lane.b32.xlu1 %v5529_v58, %s6923_s2 }
 0x301   : > { %v5612_v12 = vpop.permute.xlu1 %3011 }
 0x302   : > { %6936 = vst [vmem:[#allocation67_spill] sm:$0xff] %v5612_v12  ;;  %v5717_v12 = vsel %vm6867_vm6, %v5529_v58, 0.0 }
 0x303   : > { %2463 = vrot.lane.b32.xlu0 %v5529_v58, %s6926_s23  ;;  %2899 = vrot.lane.b32.xlu1 %v5529_v58, %s6924_s10  ;;  %s6929_s10 = smov 96  }
 0x306   : > { %v5619_v7 = vpop.permute.xlu1 %3032 }
 0x307   : > { %2941 = vrot.lane.b32.xlu0 %v5537_v56, %s6927_s22  ;;  %2447 = vrot.lane.b32.xlu1 %v5529_v58, %s6821_s0  ;;  %6938 = vst [vmem:[#allocation69_spill] sm:$0xff] %v5619_v7 }
 0x30a   : > { %v5628_v41 = vpop.permute.xlu1 %2582 }
 0x30b   : > { %2955 = vrot.lane.b32.xlu0 %v5529_v58, %s6928_s28  ;;  %2449 = vrot.lane.b32.xlu1 %v5537_v56, %s6821_s0  ;;  %6941 = vst [vmem:[#allocation32_spill] sm:$0xff] %v5628_v41 }
 0x30f   : > { %2507 = vrot.lane.b32.xlu0 %v5537_v56, %s6824_s11  ;;  %2917 = vrot.lane.b32.xlu1 %v5537_v56, %s6925_s3  ;;  %s6937_s3 = sld [smem:[#allocation23_spill]]  ;;  %v5635_v11 = vpop.permute.xlu1 %2598 }
 0x310   : > { %6944 = vst [vmem:[#allocation39_spill] sm:$0xff] %v5635_v11 }
 0x313   : > { %2973 = vrot.lane.b32.xlu0 %v5537_v56, %s6929_s10  ;;  %2465 = vrot.lane.b32.xlu1 %v5537_v56, %s6926_s23 }
 0x314   : > { %v5644_v24 = vpop.permute.xlu1 %3064 }
 0x315   : > { %v1186_v31 = vld [vmem:[%s6937_s3] sm:$0xf]  ;;  %6947 = vst [vmem:[#allocation40_spill] sm:$0xff] %v5644_v24  ;;  %s6958_s3 = sld [smem:[#allocation13_spill]] }
 0x317   : > { %2523 = vrot.lane.b32.xlu0 %v5537_v56, %s6825_s7  ;;  %2939 = vrot.lane.b32.xlu1 %v5529_v58, %s6927_s22 }
 0x319   : > { %v5654_v17 = vpop.permute.xlu1 %3100 }
 0x31a   : > { %6950 = vst [vmem:[#allocation51_spill] sm:$0xff] %v5654_v17 }
 0x31b   : > { %2989 = vrot.lane.b32.xlu0 %v5537_v56, %s6930_s4  ;;  %2489 = vrot.lane.b32.xlu1 %v5529_v58, %s6822_s26 }
 0x31d   : > { %v5662_v45 = vpop.permute.xlu1 %2650 }
 0x31e   : > { %6953 = vst [vmem:[#allocation38_spill] sm:$0xff] %v5662_v45 }
 0x31f   : > { %3148 = vperm.xlu0 %3794, %v6932_v54   ;;  %2491 = vrot.lane.b32.xlu1 %v5537_v56, %s6822_s26 }
 0x322   : > { %v5667_v13 = vpop.permute.xlu1 %3116 }
 0x323   : > { %2698 = vperm.xlu0 %3794, %v6933_v6   ;;  %2957 = vrot.lane.b32.xlu1 %v5537_v56, %s6928_s28  ;;  %s6940_s28 = sld [smem:[#allocation24_spill]]  ;;  %6955 = vst [vmem:[#allocation45_spill] sm:$0xff] %v5667_v13  ;;  %v1172_v13 = vld [vmem:[%s6958_s3] sm:$0xf] }
 0x327   : > { %2539 = vrot.lane.b32.xlu0 %v5537_v56, %s6827_s1  ;;  %2505 = vrot.lane.b32.xlu1 %v5529_v58, %s6824_s11  ;;  %v5674_v19 = vpop.permute.xlu1 %2637 }
 0x328   : > { %3802 = vset.pattern.permute.xlu0 %v6935_v47  ;;  %6960 = vst [vmem:[#allocation55_spill] sm:$0xff] %v5674_v19 }
 0x329   : > { %v5647_v62 = vld [vmem:[%s6940_s28] sm:$0xf]  ;;  %s7057_s28 = smov 17  }
 0x32a   : > { %6948 = vst [vmem:[#allocation41_spill] sm:$0xff] %v5647_v62 }
 0x32b   : > { %2971 = vrot.lane.b32.xlu1 %v5529_v58, %s6929_s10  ;;  %2708 = vperm.xlu0 %3802, %v6933_v6   ;;  %s6954_s10 = sld [smem:[#allocation25_spill]] }
 0x32c   : > { %v5684_v10 = vpop.permute.xlu1 %3132 }
 0x32d   : > { %6963 = vst [vmem:[#allocation53_spill] sm:$0xff] %v5684_v10 }
 0x32f   : > { %2521 = vrot.lane.b32.xlu1 %v5529_v58, %s6825_s7  ;;  %3804 = vset.pattern.permute.xlu0 %v6939_v25 }
 0x330   : > { %3190 = vperm.xlu0 %3804, %v6932_v54  }
 0x333   : > { %2987 = vrot.lane.b32.xlu1 %v5529_v58, %s6930_s4  ;;  %s6952_s4 = sld [smem:[#allocation12_spill]] }
 0x334   : > { %2740 = vperm.xlu0 %3804, %v6933_v6  }
 0x337   : > { %2537 = vrot.lane.b32.xlu1 %v5529_v58, %s6827_s1 }
 0x338   : > { %3806 = vset.pattern.permute.xlu0 %v6942_v38 }
 0x339   : > { %2756 = vperm.xlu0 %3806, %v6933_v6   ;;  %v5680_v27 = vld [vmem:[%s6952_s4] sm:$0xf] }
 0x33a   : > { %6961 = vst [vmem:[#allocation42_spill] sm:$0xff] %v5680_v27 }
 0x33b   : > { %2682 = vperm.xlu1 %3800, %v6933_v6  }
 0x33d   : > { %3807 = vset.pattern.permute.xlu0 %v6945_v46 }
 0x33e   : > { %3087 = vperm.xlu0 %3807, %v1186_v31   ;;  %v1188_v31 = vld [vmem:[%s6954_s10] sm:$0xf] }
 0x33f   : > { %3801 = vset.pattern.permute.xlu1 %v6935_v47 }
 0x340   : > { %3158 = vperm.xlu1 %3801, %v6932_v54  }
 0x342   : > { %3242 = vperm.xlu0 %3807, %v5647_v62  }
 0x344   : > { %3803 = vset.pattern.permute.xlu1 %v6949_v21 }
 0x345   : > { %3174 = vperm.xlu1 %3803, %v6932_v54  }
 0x346   : > { %3809 = vset.pattern.permute.xlu0 %v6951_v36 }
 0x347   : > { %2666 = vperm.xlu0 %3809, %v6933_v6  }
 0x349   : > { %2724 = vperm.xlu1 %3803, %v6933_v6  }
 0x34b   : > { %3258 = vperm.xlu0 %3809, %v5647_v62  }
 0x34d   : > { %3805 = vset.pattern.permute.xlu1 %v6942_v38 }
 0x34e   : > { %3206 = vperm.xlu1 %3805, %v6932_v54  }
 0x34f   : > { %3812 = vset.pattern.permute.xlu0 %v6957_v26 }
 0x352   : > { %3808 = vset.pattern.permute.xlu1 %v6959_v57 }
 0x353   : > { %3222 = vperm.xlu1 %3808, %v6932_v54  }
 0x357   : > { %2772 = vperm.xlu1 %3808, %v6933_v6  }
 0x35b   : > { %3810 = vset.pattern.permute.xlu1 %v6945_v46 }
 0x35c   : > { %2792 = vperm.xlu1 %3810, %v5680_v27  }
 0x360   : > { %3237 = vperm.xlu1 %3810, %v1188_v31  }
 0x361   : > { %v2415_v57 = vpop.permute.xlu0 %2414  ;;  %v2867_v54 = vpop.permute.xlu1 %2866 }
 0x364   : > { %2787 = vperm.xlu1 %3810, %v1172_v13  }
 0x365   : > { %v2884_v19 = vpop.permute.xlu0 %2883  ;;  %v2869_v45 = vpop.permute.xlu1 %2868 }
 0x368   : > { %3811 = vset.pattern.permute.xlu1 %v6951_v36 }
 0x369   : > { %v2434_v6 = vpop.permute.xlu0 %2433  ;;  %v2417_v17 = vpop.permute.xlu1 %2416  ;;  %2808 = vperm.xlu1 %3811, %v5680_v27   ;;  %v2870_v27 = vsel %vm6964_vm12, %v2867_v54, %v2869_v45  ;;  %vm6968_vm12 = vcmp.lt.s32.totalorder %v4438_v3, 32 }
 0x36a   : > { %v2418_v16 = vsel %vm6966_vm13, %v2415_v57, %v2417_v17  ;;  %v2419_v24 = vsel %vm6967_vm15, %v2417_v17, %v2415_v57  ;;  %v6972_v17 = vld [vmem:[#allocation80_spill] sm:$0xff] }
 0x36b   : > { %vm6973_vm15 = vnez %v6972_v17  ;;  %v2420_v0 = vsel %vm6860_vm0, %v2419_v24, 0.0  ;;  %v2421_v58 = vsel %vm6862_vm2, %v2418_v16, 0.0  ;;  %v6978_v24 = vld [vmem:[#allocation76_spill] sm:$0xff]  ;;  %v6980_v16 = vld [vmem:[#allocation77_spill] sm:$0xff] }
 0x36c   : > { %v2873_v57 = vsel %vm6973_vm15, %v2870_v27, 0.0  ;;  %v5745_v27 = vmul.f32 %v5565_v55, %v5712_v5  ;;  %v2427_v37 = vmul.f32 %v5527_v22, %v2420_v0 }
 0x36d   : > { %v2902_v25 = vpop.permute.xlu0 %2901  ;;  %v2886_v10 = vpop.permute.xlu1 %2885  ;;  %3813 = vset.pattern.permute.xlu1 %v6957_v26  ;;  %v2871_v26 = vsel %vm6965_vm10, %v2869_v45, %v2867_v54  ;;  %vm6969_vm10 = vmmov %vm6968_vm12  ;;  %v6970_v54 = vld [vmem:[#allocation78_spill] sm:$0xff] }
 0x36e   : > { %v2887_v7 = vsel %vm6968_vm12, %v2884_v19, %v2886_v10  ;;  %v2888_v45 = vsel %vm6969_vm10, %v2886_v10, %v2884_v19  ;;  %vm6971_vm13 = vnez %v6970_v54  ;;  %vm6977_vm12 = vmmov %vm6976_vm7  ;;  %vm6979_vm10 = vnez %v6978_v24  ;;  %v6985_v24 = vld [vmem:[#allocation66_spill] sm:$0xff] }
 0x36f   : > { %v2872_v61 = vsel %vm6971_vm13, %v2871_v26, 0.0  ;;  %v5741_v26 = vmul.f32 %v5565_v55, %v5717_v12  ;;  %v2889_v54 = vsel %vm6979_vm10, %v2888_v45, 0.0  ;;  %vm6981_vm13 = vnez %v6980_v16 }
 0x370   : > { %v2890_v17 = vsel %vm6981_vm13, %v2887_v7, 0.0  ;;  %v2879_v8 = vmul.f32 %v5623_v59, %v2872_v61  ;;  %v2428_v55 = vmul.f32 %v5527_v22, %v2421_v58  ;;  %v2895_v61 = vmul.f32 %v5375_v14, %v2889_v54 }
 0x371   : > { %v2916_v21 = vpop.permute.xlu0 %2915  ;;  %v2432_v46 = vpop.permute.xlu1 %2431  ;;  %vm6987_vm10 = vcmp.lt.s32.totalorder %v4438_v3, 2 }
 0x372   : > { %v2435_v50 = vsel %vm6976_vm7, %v2432_v46, %v2434_v6  ;;  %v2436_v19 = vsel %vm6977_vm12, %v2434_v6, %v2432_v46  ;;  %v2880_v46 = vmul.f32 %v5623_v59, %v2873_v57  ;;  %vm6982_vm7 = vcmp.lt.s32.totalorder %v4438_v3, 30  ;;  %vm6988_vm13 = vmmov %vm6987_vm10 }
 0x373   : > { %vm6983_vm15 = vmmov %vm6982_vm7  ;;  %v2437_v45 = vsel %vm6695_vm8, %v2436_v19, 0.0  ;;  %vm6986_vm12 = vnez %v6985_v24  ;;  %v2896_v59 = vmul.f32 %v5375_v14, %v2890_v17  ;;  %v2881_v14 = vadd.f32 %v2879_v8, %v5531_v49 }
 0x374   : > { %v2438_v7 = vsel %vm6986_vm12, %v2435_v50, 0.0  ;;  %vm6993_vm12 = vcmp.lt.s32.totalorder %v4438_v3, 15  ;;  %v2882_v54 = vadd.f32 %v2880_v46, %v5531_v49  ;;  %v2443_v17 = vmul.f32 %v5549_v52, %v2437_v45  ;;  %v7002_v45 = vld [vmem:[#allocation73_spill] sm:$0xff] }
 0x375   : > { %v2900_v38 = vpop.permute.xlu1 %2899  ;;  %v2464_v31 = vpop.permute.xlu0 %2463  ;;  %vm6994_vm8 = vmmov %vm6993_vm12 }
 0x376   : > { %v2903_v6 = vsel %vm6982_vm7, %v2900_v38, %v2902_v25  ;;  %v2904_v56 = vsel %vm6983_vm15, %v2902_v25, %v2900_v38  ;;  %v6989_v25 = vld [vmem:[#allocation79_spill] sm:$0xff] }
 0x377   : > { %vm6990_vm7 = vnez %v6989_v25  ;;  %v6991_v38 = vld [vmem:[#allocation83_spill] sm:$0xff] }
 0x378   : > { %v2905_v22 = vsel %vm6990_vm7, %v2904_v56, 0.0  ;;  %vm6992_vm15 = vnez %v6991_v38  ;;  %v6995_v56 = vld [vmem:[#allocation81_spill] sm:$0xff]  ;;  %vm7003_vm7 = vnez %v7002_v45 }
 0x379   : > { %v2448_v47 = vpop.permute.xlu1 %2447  ;;  %v5693_v62 = vpop.permute.xlu0 %2941  ;;  %v2906_v58 = vsel %vm6992_vm15, %v2903_v6, 0.0  ;;  %v6997_v6 = vld [vmem:[#allocation84_spill] sm:$0xff]  ;;  %v2911_v49 = vmul.f32 %v5651_v39, %v2905_v22 }
 0x37d   : > { %v2450_v13 = vpop.permute.xlu1 %2449  ;;  %v5695_v11 = vpop.permute.xlu0 %2955 }
 0x37e   : > { %v2451_v50 = vsel %vm6993_vm12, %v2448_v47, %v2450_v13  ;;  %v2452_v19 = vsel %vm6994_vm8, %v2450_v13, %v2448_v47  ;;  %vm6999_vm12 = vcmp.lt.s32.totalorder %v4438_v3, 1  ;;  %v2912_v13 = vmul.f32 %v5651_v39, %v2906_v58 }
 0x37f   : > { %vm7000_vm8 = vmmov %vm6999_vm12  ;;  %v2453_v46 = vsel %vm6878_vm9, %v2452_v19, 0.0 }
 0x380   : > { %v2459_v58 = vmul.f32 %v5659_v18, %v2453_v46 }
 0x381   : > { %v2918_v42 = vpop.permute.xlu1 %2917  ;;  %v5697_v34 = vpop.permute.xlu0 %2507 }
 0x382   : > { %v2919_v57 = vsel %vm6987_vm10, %v2916_v21, %v2918_v42  ;;  %v2920_v0 = vsel %vm6988_vm13, %v2918_v42, %v2916_v21  ;;  %v2444_v21 = vmul.f32 %v5549_v52, %v2438_v7  ;;  %vm6996_vm10 = vnez %v6995_v56 }
 0x383   : > { %v2921_v25 = vsel %vm6996_vm10, %v2920_v0, 0.0  ;;  %vm6998_vm13 = vnez %v6997_v6  ;;  %v2454_v7 = vsel %vm7003_vm7, %v2451_v50, 0.0  ;;  %v2429_v0 = vadd.f32 %v2427_v37, %v5543_v29 }
 0x384   : > { %v2922_v38 = vsel %vm6998_vm13, %v2919_v57, 0.0  ;;  %v2430_v57 = vadd.f32 %v2428_v55, %v5543_v29  ;;  %v2897_v56 = vadd.f32 %v2895_v61, %v2881_v14  ;;  %v2898_v6 = vadd.f32 %v2896_v59, %v2882_v54 }
 0x385   : > { %v2466_v36 = vpop.permute.xlu1 %2465  ;;  %v5737_v10 = vpop.permute.xlu0 %2973  ;;  %v2927_v2 = vmul.f32 %v5559_v48, %v2921_v25  ;;  %vm7006_vm10 = vnez %v6671_v28  ;;  %v2460_v50 = vmul.f32 %v5659_v18, %v2454_v7  ;;  %vm7007_vm13 = vcmp.lt.s32.totalorder %v4438_v3, 126 }
 0x386   : > { %v2467_v24 = vsel %vm6999_vm12, %v2464_v31, %v2466_v36  ;;  %v2468_v8 = vsel %vm7000_vm8, %v2466_v36, %v2464_v31  ;;  %v2928_v36 = vmul.f32 %v5559_v48, %v2922_v38  ;;  %v7004_v31 = vld [vmem:[#allocation75_spill] sm:$0xff]  ;;  %vm7008_vm12 = vmmov %vm7007_vm13  ;;  %v2445_v55 = vadd.f32 %v2443_v17, %v2429_v0 }
 0x387   : > { %vm7005_vm15 = vnez %v7004_v31  ;;  %v2470_v39 = vsel %vm7006_vm10, %v2467_v24, 0.0  ;;  %v2446_v61 = vadd.f32 %v2444_v21, %v2430_v57  ;;  %v2913_v59 = vadd.f32 %v2911_v49, %v2897_v56  ;;  %v7013_v21 = vld [vmem:[#allocation90_spill] sm:$0xff]  ;;  %v7015_v0 = vld [vmem:[#allocation87_spill] sm:$0xff] }
 0x388   : > { %v2469_v22 = vsel %vm7005_vm15, %v2468_v8, 0.0  ;;  %v2914_v19 = vadd.f32 %v2912_v13, %v2898_v6  ;;  %v2476_v18 = vmul.f32 %v5676_v44, %v2470_v39  ;;  %vm7009_vm8 = vcmp.lt.s32.totalorder %v4438_v3, 98 }
 0x389   : > { %v5699_v41 = vpop.permute.xlu1 %2939  ;;  %v5783_v42 = vpop.permute.xlu0 %2523  ;;  %v2475_v14 = vmul.f32 %v5676_v44, %v2469_v22  ;;  %v2929_v38 = vadd.f32 %v2927_v2, %v2913_v59  ;;  %vm7014_vm10 = vnez %v7013_v21  ;;  %v2485_v49 = vmul.f32 %v5575_v51, %v5717_v12  ;;  %v7017_v2 = vld [vmem:[#allocation43_spill] sm:$0xff] }
 0x38a   : > { %v2943_v37 = vsel %vm7007_vm13, %v5699_v41, %v5693_v62  ;;  %v2944_v29 = vsel %vm7008_vm12, %v5693_v62, %v5699_v41  ;;  %vm7010_vm13 = vmmov %vm7009_vm8  ;;  %v2930_v41 = vadd.f32 %v2928_v36, %v2914_v19  ;;  %v7011_v62 = vld [vmem:[#allocation86_spill] sm:$0xff]  ;;  %v2486_v44 = vmul.f32 %v5575_v51, %v5712_v5 }
 0x38b   : > { %vm7012_vm12 = vnez %v7011_v62  ;;  %v2946_v8 = vsel %vm7014_vm10, %v2944_v29, 0.0  ;;  %v2461_v13 = vadd.f32 %v2459_v58, %v2445_v55  ;;  %v2462_v46 = vadd.f32 %v2460_v50, %v2446_v61  ;;  %v7023_v29 = vld [vmem:[#allocation85_spill] sm:$0xff] }
 0x38c   : > { %v2945_v17 = vsel %vm7012_vm12, %v2943_v37, 0.0  ;;  %vm7019_vm12 = vcmp.lt.s32.totalorder %v4438_v3, 96  ;;  %v2952_v36 = vmul.f32 %v5407_v23, %v2946_v8  ;;  %v2938_v22 = vadd.f32 %v5745_v27, %v2930_v41  ;;  %v7025_v27 = vld [vmem:[#allocation89_spill] sm:$0xff] }
 0x38d   : > { %v5727_v1 = vpop.permute.xlu1 %2489  ;;  %v2990_v24 = vpop.permute.xlu0 %2989  ;;  %vm7020_vm10 = vmmov %vm7019_vm12  ;;  %v2477_v51 = vadd.f32 %v2475_v14, %v2461_v13  ;;  %v2478_v5 = vadd.f32 %v2476_v18, %v2462_v46  ;;  %v2951_v6 = vmul.f32 %v5407_v23, %v2945_v17  ;;  %v2937_v39 = vadd.f32 %v5741_v26, %v2929_v38  ;;  %v7035_v46 = vld [vmem:[#allocation36_spill] sm:$0xff] }
 0x38e   : > { %vm7027_vm15 = vcmp.lt.s32.totalorder %v4438_v3, 113 }
 0x38f   : > { %v2488_v19 = vadd.f32 %v2486_v44, %v2478_v5  ;;  %v2487_v14 = vadd.f32 %v2485_v49, %v2477_v51 }
 0x391   : > { %v5763_v16 = vpop.permute.xlu1 %2491 }
 0x395   : > { %v2958_v47 = vpop.permute.xlu1 %2957 }
 0x396   : > { %v2959_v54 = vsel %vm7009_vm8, %v5695_v11, %v2958_v47  ;;  %v2960_v25 = vsel %vm7010_vm13, %v2958_v47, %v5695_v11  ;;  %vm7016_vm8 = vnez %v7015_v0  ;;  %vm7018_vm13 = vnez %v7017_v2  ;;  %v7037_v0 = vld [vmem:[#allocation59_spill] sm:$0xff] }
 0x397   : > { %v2961_v11 = vsel %vm7016_vm8, %v2959_v54, 0.0  ;;  %v2962_v47 = vsel %vm7018_vm13, %v2960_v25, 0.0  ;;  %vm7021_vm8 = vcmp.lt.s32.totalorder %v4438_v3, 127 }
 0x398   : > { %v2493_v58 = vsel %vm7021_vm8, %v5727_v1, %v5763_v16  ;;  %vm7022_vm13 = vmmov %vm7021_vm8  ;;  %v2967_v50 = vmul.f32 %v5581_v43, %v2961_v11  ;;  %v2968_v37 = vmul.f32 %v5581_v43, %v2962_v47 }
 0x399   : > { %v2506_v48 = vpop.permute.xlu1 %2505  ;;  %vm7028_vm8 = vmmov %vm7027_vm15 }
 0x39a   : > { %v2509_v61 = vsel %vm7027_vm15, %v2506_v48, %v5697_v34  ;;  %v2510_v59 = vsel %vm7028_vm8, %v5697_v34, %v2506_v48  ;;  %vm7031_vm15 = vcmp.lt.s32.totalorder %v4438_v3, 112  ;;  %vm7033_vm8 = vcmp.lt.s32.totalorder %v4438_v3, 94 }
 0x39b   : > { %v2511_v34 = vsel %vm6903_vm1, %v2509_v61, 0.0  ;;  %v2512_v48 = vsel %vm4861_vm5, %v2510_v59, 0.0  ;;  %vm7036_vm5 = vnez %v7035_v46  ;;  %vm7038_vm1 = vnez %v7037_v0  ;;  %v7048_v0 = vld [vmem:[#allocation29_spill] sm:$0xff] }
 0x39d   : > { %v2972_v7 = vpop.permute.xlu1 %2971 }
 0x39e   : > { %v2975_v57 = vsel %vm7019_vm12, %v2972_v7, %v5737_v10  ;;  %v2976_v12 = vsel %vm7020_vm10, %v5737_v10, %v2972_v7  ;;  %v5843_v56 = vpop.permute.xlu0 %3148  ;;  %v2494_v10 = vsel %vm7022_vm13, %v5763_v16, %v5727_v1  ;;  %vm7024_vm12 = vnez %v7023_v29 }
 0x39f   : > { %v2977_v23 = vsel %vm7024_vm12, %v2975_v57, 0.0  ;;  %vm7026_vm10 = vnez %v7025_v27  ;;  %v2953_v1 = vadd.f32 %v2951_v6, %v2937_v39  ;;  %v2954_v16 = vadd.f32 %v2952_v36, %v2938_v22 }
 0x3a0   : > { %v2978_v26 = vsel %vm7026_vm10, %v2976_v12, 0.0  ;;  %vm7029_vm13 = vnez %v6665_v40  ;;  %vm7030_vm12 = vnez %v6668_v15  ;;  %v2983_v25 = vmul.f32 %v5591_v32, %v2977_v23  ;;  %vm7032_vm10 = vmmov %vm7031_vm15 }
 0x3a1   : > { %v2522_v55 = vpop.permute.xlu1 %2521  ;;  %v2495_v18 = vsel %vm7029_vm13, %v2493_v58, 0.0  ;;  %v2496_v54 = vsel %vm7030_vm12, %v2494_v10, 0.0  ;;  %v2984_v38 = vmul.f32 %v5591_v32, %v2978_v26  ;;  %v2969_v41 = vadd.f32 %v2967_v50, %v2953_v1  ;;  %vm7034_vm12 = vmmov %vm7033_vm8  ;;  %v7041_v26 = vld [vmem:[#allocation52_spill] sm:$0xff] }
 0x3a2   : > { %v5869_v43 = vpop.permute.xlu0 %2698  ;;  %v2970_v62 = vadd.f32 %v2968_v37, %v2954_v16  ;;  %v2525_v21 = vsel %vm7031_vm15, %v2522_v55, %v5783_v42  ;;  %v2526_v8 = vsel %vm7032_vm10, %v5783_v42, %v2522_v55  ;;  %v2501_v44 = vmul.f32 %v5429_v60, %v2495_v18  ;;  %v7042_v16 = vld [vmem:[#allocation54_spill] sm:$0xff]  ;;  %v7043_v18 = vld [vmem:[#allocation27_spill] sm:$0xff] }
 0x3a3   : > { %v2502_v13 = vmul.f32 %v5429_v60, %v2496_v54  ;;  %v2985_v2 = vadd.f32 %v2983_v25, %v2969_v41  ;;  %v2517_v12 = vmul.f32 %v5501_v9, %v2511_v34  ;;  %v2527_v51 = vsel %vm4685_vm14, %v2525_v21, 0.0  ;;  %v7045_v34 = vld [vmem:[#allocation28_spill] sm:$0xff] }
 0x3a4   : > { %v2986_v47 = vadd.f32 %v2984_v38, %v2970_v62  ;;  %v2528_v60 = vsel %vm4794_vm4, %v2526_v8, 0.0  ;;  %v2503_v58 = vadd.f32 %v2501_v44, %v2487_v14  ;;  %v2533_v55 = vmul.f32 %v7041_v26, %v2527_v51  ;;  %v7044_v38 = vld [vmem:[#allocation26_spill] sm:$0xff]  ;;  %v7050_v51 = vld [vmem:[#allocation56_spill] sm:$0xff] }
 0x3a5   : > { %v2988_v17 = vpop.permute.xlu1 %2987  ;;  %v2504_v10 = vadd.f32 %v2502_v13, %v2488_v19  ;;  %v2534_v61 = vmul.f32 %v7041_v26, %v2528_v60  ;;  %v7047_v13 = vld [vmem:[#allocation69_spill] sm:$0xff] }
 0x3a6   : > { %v2991_v32 = vsel %vm7033_vm8, %v2988_v17, %v2990_v24  ;;  %v2992_v49 = vsel %vm7034_vm12, %v2990_v24, %v2988_v17  ;;  %v2518_v24 = vmul.f32 %v5501_v9, %v2512_v48  ;;  %v2540_v5 = vpop.permute.xlu0 %2539  ;;  %v2519_v23 = vadd.f32 %v2517_v12, %v2503_v58 }
 0x3a7   : > { %v2993_v7 = vsel %vm7036_vm5, %v2991_v32, 0.0  ;;  %v2994_v11 = vsel %vm7038_vm1, %v2992_v49, 0.0  ;;  %vm7039_vm5 = vcmp.lt.s32.totalorder %v4438_v3, 111  ;;  %v7046_v32 = vld [vmem:[#allocation63_spill] sm:$0xff] }
 0x3a8   : > { %v2999_v42 = vmul.f32 %v5505_v20, %v2993_v7  ;;  %v3000_v57 = vmul.f32 %v5505_v20, %v2994_v11  ;;  %vm7040_vm1 = vmmov %vm7039_vm5  ;;  %v2520_v27 = vadd.f32 %v2518_v24, %v2504_v10  ;;  %v2535_v21 = vadd.f32 %v2533_v55, %v2519_v23  ;;  %v7051_v10 = vld [vmem:[#allocation40_spill] sm:$0xff] }
 0x3a9   : > { %v2538_v6 = vpop.permute.xlu1 %2537 }
 0x3aa   : > { %v3001_v36 = vadd.f32 %v2999_v42, %v2985_v2  ;;  %v3002_v22 = vadd.f32 %v3000_v57, %v2986_v47  ;;  %v2541_v39 = vsel %vm7039_vm5, %v2538_v6, %v2540_v5  ;;  %v2542_v20 = vsel %vm7040_vm1, %v2540_v5, %v2538_v6  ;;  %v7049_v47 = vld [vmem:[#allocation67_spill] sm:$0xff] }
 0x3ab   : > { %v2543_v9 = vsel %vm5035_vm3, %v2541_v39, 0.0  ;;  %v2544_v50 = vsel %vm5051_vm11, %v2542_v20, 0.0  ;;  %v2536_v8 = vadd.f32 %v2534_v61, %v2520_v27 }
 0x3ac   : > { %vm3003_vm12 = vcmp.gt.f32.partialorder %v3001_v36, 0.0  ;;  %vm3004_vm15 = vcmp.gt.f32.partialorder %v3002_v22, 0.0  ;;  %v3005_v37 = vmul.f32 0.01, %v3001_v36  ;;  %v3006_v29 = vmul.f32 0.01, %v3002_v22 }
 0x3ad   : > { %v2549_v19 = vmul.f32 %v7042_v16, %v2543_v9  ;;  %v2550_v14 = vmul.f32 %v7042_v16, %v2544_v50  ;;  %v7052_v16 = vld [vmem:[#allocation57_spill] sm:$0xff] }
 0x3ae   : > { %v3007_v59 = vsel %vm3003_vm12, %v3001_v36, %v3005_v37  ;;  %v3008_v1 = vsel %vm3004_vm15, %v3002_v22, %v3006_v29 }
 0x3af   : > { %v3022_v54 = vrot.slane %v3007_v59, %v7043_v18  ;;  %v3026_v25 = vrot.slane %v3008_v1, %v7043_v18  ;;  %v3038_v41 = vrot.slane %v3007_v59, %v7044_v38  ;;  %v3042_v62 = vrot.slane %v3008_v1, %v7044_v38 }
 0x3b0   : > { %v3054_v48 = vrot.slane %v3007_v59, %v7045_v34  ;;  %v3058_v17 = vrot.slane %v3008_v1, %v7045_v34  ;;  %v3070_v11 = vrot.slane %v3007_v59, %v7048_v0  ;;  %v3074_v2 = vrot.slane %v3008_v1, %v7048_v0 }
 0x3b1   : > { %v3027_v49 = vmul.f32 %v3022_v54, %v7046_v32  ;;  %v3028_v44 = vmul.f32 %v3026_v25, %v7046_v32  ;;  %v3043_v46 = vmul.f32 %v3038_v41, %v7047_v13  ;;  %v3044_v7 = vmul.f32 %v3042_v62, %v7047_v13 }
 0x3b2   : > { %v2551_v12 = vadd.f32 %v2549_v19, %v2535_v21  ;;  %v2552_v24 = vadd.f32 %v2550_v14, %v2536_v8  ;;  %v3059_v60 = vmul.f32 %v3054_v48, %v7050_v51  ;;  %v3060_v5 = vmul.f32 %v3058_v17, %v7050_v51  ;;  %v7053_v48 = vld [vmem:[#allocation32_spill] sm:$0xff]  ;;  %v7054_v8 = vld [vmem:[#allocation37_spill] sm:$0xff] }
 0x3b3   : > { %v3029_v42 = vadd.f32 %v3027_v49, %v7049_v47  ;;  %v3030_v57 = vadd.f32 %v3028_v44, %v7049_v47  ;;  %v3075_v9 = vmul.f32 %v3070_v11, %v7051_v10  ;;  %v3076_v50 = vmul.f32 %v3074_v2, %v7051_v10  ;;  %v7055_v11 = vld [vmem:[#allocation39_spill] sm:$0xff] }
 0x3b4   : > { %vm2553_vm10 = vcmp.gt.f32.partialorder %v2551_v12, 0.0  ;;  %vm2554_vm8 = vcmp.gt.f32.partialorder %v2552_v24, 0.0  ;;  %v2555_v22 = vmul.f32 0.01, %v2551_v12  ;;  %v2556_v39 = vmul.f32 0.01, %v2552_v24 }
 0x3b5   : > { %v3045_v6 = vadd.f32 %v3043_v46, %v3029_v42  ;;  %v3046_v36 = vadd.f32 %v3044_v7, %v3030_v57  ;;  %v7056_v57 = vld [vmem:[#allocation58_spill] sm:$0xff] }
 0x3b6   : > { %v2557_v37 = vsel %vm2553_vm10, %v2551_v12, %v2555_v22  ;;  %v2558_v29 = vsel %vm2554_vm8, %v2552_v24, %v2556_v39 }
 0x3b7   : > { %v3061_v20 = vadd.f32 %v3059_v60, %v3045_v6  ;;  %v3062_v58 = vadd.f32 %v3060_v5, %v3046_v36  ;;  %v2572_v26 = vrot.slane %v2557_v37, %v7043_v18  ;;  %v2576_v55 = vrot.slane %v2558_v29, %v7043_v18 }
 0x3b8   : > { %v2588_v61 = vrot.slane %v2557_v37, %v7044_v38  ;;  %v2592_v59 = vrot.slane %v2558_v29, %v7044_v38  ;;  %v2604_v54 = vrot.slane %v2557_v37, %v7045_v34  ;;  %v2608_v25 = vrot.slane %v2558_v29, %v7045_v34 }
 0x3b9   : > { %v3077_v23 = vadd.f32 %v3075_v9, %v3061_v20  ;;  %v3078_v27 = vadd.f32 %v3076_v50, %v3062_v58  ;;  %v2577_v19 = vmul.f32 %v2572_v26, %v7052_v16  ;;  %v2578_v14 = vmul.f32 %v2576_v55, %v7052_v16  ;;  %v2709_v50 = vpop.permute.xlu0 %2708 }
 0x3ba   : > { %v5939_v1 = vpop.permute.xlu1 %2682  ;;  %v2593_v17 = vmul.f32 %v2588_v61, %v7053_v48  ;;  %v2594_v21 = vmul.f32 %v2592_v59, %v7053_v48  ;;  %v2620_v44 = vrot.slane %v2557_v37, %v7048_v0  ;;  %v2624_v13 = vrot.slane %v2558_v29, %v7048_v0  ;;  %v7061_v59 = vld [vmem:[#allocation41_spill] sm:$0xff] }
 0x3bb   : > { %v3081_v41 = vmul.f32 0.01, %v3077_v23  ;;  %v3082_v62 = vmul.f32 0.01, %v3078_v27  ;;  %v2579_v32 = vadd.f32 %v2577_v19, %v7054_v8  ;;  %v2580_v49 = vadd.f32 %v2578_v14, %v7054_v8  ;;  %v7063_v19 = vld [vmem:[#allocation42_spill] sm:$0xff] }
 0x3bc   : > { %vm3080_vm5 = vcmp.gt.f32.partialorder %v3078_v27, 0.0  ;;  %vm3079_vm1 = vcmp.gt.f32.partialorder %v3077_v23, 0.0  ;;  %v2609_v2 = vmul.f32 %v2604_v54, %v7055_v11  ;;  %v2610_v47 = vmul.f32 %v2608_v25, %v7055_v11  ;;  %v1189_v54 = vld [vmem:[%s4091_s14] sm:$0xff] }
 0x3bd   : > { %v2595_v46 = vadd.f32 %v2593_v17, %v2579_v32  ;;  %v2596_v7 = vadd.f32 %v2594_v21, %v2580_v49  ;;  %v2625_v12 = vmul.f32 %v2620_v44, %v7056_v57  ;;  %v5956_v24 = vsel %vm3080_vm5, %v3078_v27, %v3082_v62  ;;  %v7059_v27 = vld [vmem:[#allocation61_spill] sm:$0xff]  ;;  %v6022_v48 = vpop.permute.xlu0 %3190 }
 0x3be   : > { %v3083_v51 = vsel %vm3079_vm1, %v3077_v23, %v3081_v41  ;;  %v2626_v6 = vmul.f32 %v2624_v13, %v7056_v57  ;;  %3092 = vrot.lane.b32.xlu0 %v5956_v24, %s7057_s28  ;;  %vm7060_vm10 = vnez %v7059_v27  ;;  %v7062_v16 = vmov 3   ;;  %v1190_v13 = vld [vmem:[%s4096_s12] sm:$0xff] }
 0x3bf   : > { %v5953_v42 = vpop.permute.xlu1 %3158  ;;  %v2611_v60 = vadd.f32 %v2609_v2, %v2595_v46  ;;  %v2612_v5 = vadd.f32 %v2610_v47, %v2596_v7  ;;  %3090 = vrot.lane.b32.xlu1 %v3083_v51, %s7057_s28  ;;  %v3155_v22 = vsel %vm6867_vm6, %v3083_v51, 0.0  ;;  %v7064_v25 = vmov 1  }
 0x3c0   : > { %v5965_v39 = vmul.f32 %v5953_v42, %v3155_v22  ;;  %v7065_v62 = vmov 4   ;;  %v7066_v21 = vmov 7   ;;  %v7067_v32 = vmov 0  }
 0x3c1   : > { %v2627_v20 = vadd.f32 %v2625_v12, %v2611_v60  ;;  %v2628_v58 = vadd.f32 %v2626_v6, %v2612_v5  ;;  %v6028_v8 = vpop.permute.xlu0 %2740  ;;  %v7068_v11 = vmov 2   ;;  %v7074_v5 = vmov 6  }
 0x3c2   : > { %3107 = vrot.lane.b32.xlu0 %v3083_v51, %s6923_s2 }
 0x3c3   : > { %vm2629_vm12 = vcmp.gt.f32.partialorder %v2627_v20, 0.0  ;;  %vm2630_vm15 = vcmp.gt.f32.partialorder %v2628_v58, 0.0  ;;  %v2631_v10 = vmul.f32 0.01, %v2627_v20  ;;  %v2632_v9 = vmul.f32 0.01, %v2628_v58 }
 0x3c4   : > { %v6012_v14 = vpop.permute.xlu1 %3174 }
 0x3c5   : > { %v2633_v37 = vsel %vm2629_vm12, %v2627_v20, %v2631_v10  ;;  %v2634_v29 = vsel %vm2630_vm15, %v2628_v58, %v2632_v9  ;;  %v6036_v44 = vpop.permute.xlu0 %2756  ;;  %vm7084_vm12 = vcmp.lt.s32.totalorder %v4438_v3, 16 }
 0x3c6   : > { %v2705_v23 = vsel %vm6867_vm6, %v2633_v37, 0.0  ;;  %v2706_v26 = vsel %vm7060_vm10, %v2634_v29, 0.0  ;;  %2640 = vrot.lane.b32.xlu1 %v2633_v37, %s7057_s28  ;;  %2657 = vrot.lane.b32.xlu0 %v2633_v37, %s6923_s2  ;;  %vm7077_vm6 = vcmp.lt.s32.totalorder %v4438_v3, 17  ;;  %vm7085_vm15 = vmmov %vm7084_vm12 }
 0x3c7   : > { %v5973_v55 = vmul.f32 %v2709_v50, %v2705_v23  ;;  %v5975_v61 = vmul.f32 %v2709_v50, %v2706_v26  ;;  %vm7078_vm8 = vmmov %vm7077_vm6 }
 0x3c8   : > { %v6018_v41 = vpop.permute.xlu1 %2724  ;;  %vm7081_vm5 = vmmov %vm7077_vm6 }
 0x3c9   : > { %v3088_v7 = vpop.permute.xlu0 %3087  ;;  %vm7082_vm1 = vmmov %vm7081_vm5 }
 0x3ca   : > { %2642 = vrot.lane.b32.xlu1 %v2634_v29, %s7057_s28  ;;  %3123 = vrot.lane.b32.xlu0 %v3083_v51, %s6821_s0 }
 0x3cd   : > { %v6025_v17 = vpop.permute.xlu1 %3206  ;;  %v6044_v47 = vpop.permute.xlu0 %3242 }
 0x3ce   : > { %3109 = vrot.lane.b32.xlu1 %v5956_v24, %s6923_s2  ;;  %2675 = vrot.lane.b32.xlu0 %v2634_v29, %s6821_s0  ;;  %7070 = vst [vmem:[#allocation74_spill] sm:$0xff] %v6044_v47  ;;  %v7088_v47 = vld [vmem:[#allocation65_spill] sm:$0xff] }
 0x3d1   : > { %v6049_v12 = vpop.permute.xlu0 %2666 }
 0x3d2   : > { %2659 = vrot.lane.b32.xlu1 %v2634_v29, %s6923_s2  ;;  %3141 = vrot.lane.b32.xlu0 %v5956_v24, %s6926_s23  ;;  %v6033_v49 = vpop.permute.xlu1 %3222 }
 0x3d5   : > { %v6055_v6 = vpop.permute.xlu0 %3258  ;;  %v7125_v33 = vld [vmem:[#allocation74_spill] sm:$0xff] }
 0x3d6   : > { %3125 = vrot.lane.b32.xlu1 %v5956_v24, %s6821_s0  ;;  %3165 = vrot.lane.b32.xlu0 %v3083_v51, %s6822_s26  ;;  %v6039_v46 = vpop.permute.xlu1 %2772  ;;  %7075 = vst [vmem:[#allocation64_spill] sm:$0xff] %v6055_v6 }
 0x3da   : > { %2673 = vrot.lane.b32.xlu1 %v2633_v37, %s6821_s0  ;;  %2717 = vrot.lane.b32.xlu0 %v2634_v29, %s6822_s26  ;;  %s7138_s0 = sshll.u32 %s7140_s16, 4 }
 0x3db   : > { %v6042_v2 = vpop.permute.xlu1 %2792 }
 0x3dc   : > { %7069 = vst [vmem:[#allocation68_spill] sm:$0xff] %v6042_v2 }
 0x3de   : > { %3139 = vrot.lane.b32.xlu1 %v3083_v51, %s6926_s23  ;;  %3183 = vrot.lane.b32.xlu0 %v5956_v24, %s6824_s11 }
 0x3df   : > { %v6047_v57 = vpop.permute.xlu1 %3237 }
 0x3e0   : > { %7071 = vst [vmem:[#allocation82_spill] sm:$0xff] %v6047_v57 }
 0x3e2   : > { %2689 = vrot.lane.b32.xlu1 %v2633_v37, %s6926_s23  ;;  %2731 = vrot.lane.b32.xlu0 %v2633_v37, %s6824_s11 }
 0x3e3   : > { %v6052_v60 = vpop.permute.xlu1 %2787 }
 0x3e4   : > { %7073 = vst [vmem:[#allocation88_spill] sm:$0xff] %v6052_v60 }
 0x3e6   : > { %2691 = vrot.lane.b32.xlu1 %v2634_v29, %s6926_s23  ;;  %3197 = vrot.lane.b32.xlu0 %v3083_v51, %s6825_s7 }
 0x3e8   : > { %v6057_v36 = vpop.permute.xlu1 %2808 }
 0x3e9   : > { %7076 = vst [vmem:[#allocation35_spill] sm:$0xff] %v6057_v36 }
 0x3ea   : > { %3167 = vrot.lane.b32.xlu1 %v5956_v24, %s6822_s26  ;;  %2747 = vrot.lane.b32.xlu0 %v2633_v37, %s6825_s7 }
 0x3ee   : > { %2715 = vrot.lane.b32.xlu1 %v2633_v37, %s6822_s26  ;;  %3213 = vrot.lane.b32.xlu0 %v3083_v51, %s6827_s1 }
 0x3f2   : > { %3181 = vrot.lane.b32.xlu1 %v3083_v51, %s6824_s11  ;;  %2763 = vrot.lane.b32.xlu0 %v2633_v37, %s6827_s1  ;;  %v7072_v51 = vmov 5  }
 0x3f6   : > { %2733 = vrot.lane.b32.xlu1 %v2634_v29, %s6824_s11  ;;  %3274 = vperm.xlu0 %3812, %v7061_v59   ;;  %s3906_s11 = smov 122  }
 0x3fa   : > { %3199 = vrot.lane.b32.xlu1 %v5956_v24, %s6825_s7  ;;  %3815 = vset.pattern.permute.xlu0 %v7062_v16 }
 0x3fb   : > { %2840 = vperm.xlu0 %3815, %v7063_v19  }
 0x3fe   : > { %2749 = vrot.lane.b32.xlu1 %v2634_v29, %s6825_s7  ;;  %s3905_s7 = smov 123  }
 0x3ff   : > { %3817 = vset.pattern.permute.xlu0 %v7064_v25 }
 0x400   : > { %3348 = vperm.xlu0 %3817, %v1189_v54  }
 0x402   : > { %3215 = vrot.lane.b32.xlu1 %v5956_v24, %s6827_s1 }
 0x404   : > { %3820 = vset.pattern.permute.xlu0 %v7065_v62 }
 0x405   : > { %3396 = vperm.xlu0 %3820, %v1189_v54  }
 0x406   : > { %2765 = vrot.lane.b32.xlu1 %v2634_v29, %s6827_s1  ;;  %s3904_s1 = smov 124  }
 0x409   : > { %3823 = vset.pattern.permute.xlu0 %v7066_v21 }
 0x40a   : > { %2824 = vperm.xlu1 %3813, %v7063_v19   ;;  %3444 = vperm.xlu0 %3823, %v1189_v54  }
 0x40e   : > { %3814 = vset.pattern.permute.xlu1 %v7062_v16  ;;  %3824 = vset.pattern.permute.xlu0 %v7067_v32 }
 0x40f   : > { %3290 = vperm.xlu1 %3814, %v7061_v59  }
 0x413   : > { %3816 = vset.pattern.permute.xlu1 %v7067_v32 }
 0x414   : > { %3332 = vperm.xlu1 %3816, %v1189_v54  }
 0x418   : > { %3327 = vperm.xlu1 %3816, %v1190_v13  }
 0x41c   : > { %3818 = vset.pattern.permute.xlu1 %v7068_v11  ;;  %v7092_v11 = vld [vmem:[#allocation38_spill] sm:$0xff] }
 0x41d   : > { %3364 = vperm.xlu1 %3818, %v1189_v54  }
 0x421   : > { %3819 = vset.pattern.permute.xlu1 %v7062_v16 }
 0x422   : > { %3380 = vperm.xlu1 %3819, %v1189_v54  }
 0x426   : > { %3821 = vset.pattern.permute.xlu1 %v7072_v51 }
 0x427   : > { %3412 = vperm.xlu1 %3821, %v1189_v54  }
 0x42b   : > { %3822 = vset.pattern.permute.xlu1 %v7074_v5 }
 0x42c   : > { %3428 = vperm.xlu1 %3822, %v1189_v54  }
 0x430   : > { %v3093_v22 = vpop.permute.xlu0 %3092 }
 0x431   : > { %v3091_v20 = vpop.permute.xlu1 %3090 }
 0x432   : > { %v3094_v54 = vsel %vm7077_vm6, %v3091_v20, %v3093_v22  ;;  %v3095_v21 = vsel %vm7078_vm8, %v3093_v22, %v3091_v20  ;;  %v3156_v22 = vsel %vm7060_vm10, %v5956_v24, 0.0  ;;  %v7083_v20 = vld [vmem:[#allocation51_spill] sm:$0xff]  ;;  %vm7086_vm10 = vmmov %vm7084_vm12  ;;  %vm7089_vm8 = vnez %v7088_v47 }
 0x433   : > { %v3096_v51 = vsel %vm6860_vm0, %v3095_v21, 0.0  ;;  %v3097_v6 = vsel %vm6862_vm2, %v3094_v54, 0.0  ;;  %v6091_v24 = vmul.f32 %v5953_v42, %v3156_v22  ;;  %vm7087_vm6 = vmmov %vm7086_vm10 }
 0x434   : > { %v3108_v58 = vpop.permute.xlu0 %3107  ;;  %v3103_v0 = vmul.f32 %v7083_v20, %v3096_v51  ;;  %v3104_v57 = vmul.f32 %v7083_v20, %v3097_v6 }
 0x436   : > { %v3105_v51 = vadd.f32 %v3103_v0, %v3088_v7  ;;  %v3106_v20 = vadd.f32 %v3104_v57, %v3088_v7 }
 0x438   : > { %v2641_v10 = vpop.permute.xlu1 %2640  ;;  %v2658_v9 = vpop.permute.xlu0 %2657 }
 0x43c   : > { %v2643_v50 = vpop.permute.xlu1 %2642  ;;  %v3124_v37 = vpop.permute.xlu0 %3123 }
 0x43d   : > { %v2644_v34 = vsel %vm7081_vm5, %v2641_v10, %v2643_v50  ;;  %v2645_v60 = vsel %vm7082_vm1, %v2643_v50, %v2641_v10 }
 0x43e   : > { %v2646_v38 = vsel %vm6860_vm0, %v2645_v60, 0.0  ;;  %v2647_v10 = vsel %vm6862_vm2, %v2644_v34, 0.0  ;;  %vm7093_vm2 = vcmp.lt.s32.totalorder %v4438_v3, 15 }
 0x43f   : > { %v2653_v34 = vmul.f32 %v7092_v11, %v2646_v38  ;;  %v2654_v5 = vmul.f32 %v7092_v11, %v2647_v10  ;;  %vm7094_vm5 = vmmov %vm7093_vm2 }
 0x440   : > { %v3110_v29 = vpop.permute.xlu1 %3109  ;;  %v2676_v23 = vpop.permute.xlu0 %2675  ;;  %vm7095_vm1 = vmmov %vm7093_vm2 }
 0x441   : > { %v3111_v54 = vsel %vm7084_vm12, %v3108_v58, %v3110_v29  ;;  %v3112_v21 = vsel %vm7085_vm15, %v3110_v29, %v3108_v58  ;;  %v7090_v29 = vld [vmem:[#allocation66_spill] sm:$0xff]  ;;  %vm7096_vm12 = vmmov %vm7095_vm1  ;;  %vm7098_vm15 = vcmp.lt.s32.totalorder %v4438_v3, 1 }
 0x442   : > { %v3113_v58 = vsel %vm7089_vm8, %v3112_v21, 0.0  ;;  %vm7091_vm0 = vnez %v7090_v29 }
 0x443   : > { %v3114_v60 = vsel %vm7091_vm0, %v3111_v54, 0.0  ;;  %v7097_v54 = vld [vmem:[#allocation45_spill] sm:$0xff] }
 0x444   : > { %v2660_v26 = vpop.permute.xlu1 %2659  ;;  %v3142_v59 = vpop.permute.xlu0 %3141  ;;  %v3119_v21 = vmul.f32 %v7097_v54, %v3113_v58  ;;  %v3120_v10 = vmul.f32 %v7097_v54, %v3114_v60 }
 0x445   : > { %v2661_v6 = vsel %vm7086_vm10, %v2658_v9, %v2660_v26  ;;  %v2662_v50 = vsel %vm7087_vm6, %v2660_v26, %v2658_v9  ;;  %vm7099_vm10 = vmmov %vm7098_vm15 }
 0x446   : > { %v2663_v0 = vsel %vm7089_vm8, %v2662_v50, 0.0  ;;  %v2664_v7 = vsel %vm7091_vm0, %v2661_v6, 0.0  ;;  %vm7100_vm6 = vmmov %vm7099_vm10  ;;  %vm7103_vm0 = vnez %v7004_v31 }
 0x447   : > { %vm7101_vm8 = vmmov %vm7100_vm6  ;;  %v2669_v50 = vmul.f32 %v6049_v12, %v2663_v0  ;;  %v2670_v58 = vmul.f32 %v6049_v12, %v2664_v7  ;;  %v3122_v7 = vadd.f32 %v3120_v10, %v3106_v20 }
 0x448   : > { %v3126_v16 = vpop.permute.xlu1 %3125  ;;  %v6059_v25 = vpop.permute.xlu0 %3165 }
 0x449   : > { %v3127_v42 = vsel %vm7093_vm2, %v3124_v37, %v3126_v16  ;;  %v3128_v22 = vsel %vm7094_vm5, %v3126_v16, %v3124_v37  ;;  %vm7104_vm2 = vnez %v6671_v28 }
 0x44a   : > { %v3129_v16 = vsel %vm6878_vm9, %v3128_v22, 0.0  ;;  %v3130_v6 = vsel %vm7003_vm7, %v3127_v42, 0.0  ;;  %v7105_v22 = vld [vmem:[#allocation53_spill] sm:$0xff] }
 0x44b   : > { %v3135_v0 = vmul.f32 %v7105_v22, %v3129_v16  ;;  %v3136_v12 = vmul.f32 %v7105_v22, %v3130_v6 }
 0x44c   : > { %v2674_v19 = vpop.permute.xlu1 %2673  ;;  %v6065_v32 = vpop.permute.xlu0 %2717 }
 0x44d   : > { %v2677_v57 = vsel %vm7095_vm1, %v2674_v19, %v2676_v23  ;;  %v2678_v38 = vsel %vm7096_vm12, %v2676_v23, %v2674_v19  ;;  %vm7110_vm12 = vcmp.lt.s32.totalorder %v4438_v3, 113 }
 0x44e   : > { %v2679_v29 = vsel %vm6878_vm9, %v2678_v38, 0.0  ;;  %vm7106_vm9 = vcmp.lt.s32.totalorder %v4438_v3, 127 }
 0x450   : > { %v3140_v62 = vpop.permute.xlu1 %3139  ;;  %v6080_v2 = vpop.permute.xlu0 %3183 }
 0x451   : > { %v3143_v47 = vsel %vm7098_vm15, %v3140_v62, %v3142_v59  ;;  %v3144_v37 = vsel %vm7099_vm10, %v3142_v59, %v3140_v62  ;;  %v2680_v59 = vsel %vm7003_vm7, %v2677_v57, 0.0  ;;  %v7102_v62 = vld [vmem:[#allocation55_spill] sm:$0xff]  ;;  %vm7107_vm7 = vmmov %vm7106_vm9  ;;  %vm7112_vm10 = vnez %v6668_v15 }
 0x452   : > { %v2655_v60 = vadd.f32 %v2653_v34, %v7102_v62  ;;  %v2656_v11 = vadd.f32 %v2654_v5, %v7102_v62  ;;  %v3145_v42 = vsel %vm7103_vm0, %v3144_v37, 0.0  ;;  %v3121_v34 = vadd.f32 %v3119_v21, %v3105_v51  ;;  %vm7108_vm5 = vmmov %vm7107_vm7 }
 0x453   : > { %v2685_v5 = vmul.f32 %v5939_v1, %v2679_v29  ;;  %v2686_v57 = vmul.f32 %v5939_v1, %v2680_v59  ;;  %v3151_v37 = vmul.f32 %v5843_v56, %v3145_v42  ;;  %v3138_v21 = vadd.f32 %v3136_v12, %v3122_v7  ;;  %vm7109_vm1 = vmmov %vm7108_vm5 }
 0x454   : > { %v2690_v13 = vpop.permute.xlu1 %2689  ;;  %v6115_v9 = vpop.permute.xlu0 %2731  ;;  %v2671_v54 = vadd.f32 %v2669_v50, %v2655_v60  ;;  %v3137_v20 = vadd.f32 %v3135_v0, %v3121_v34  ;;  %vm7111_vm15 = vmmov %vm7110_vm12 }
 0x458   : > { %v2692_v36 = vpop.permute.xlu1 %2691  ;;  %v3198_v38 = vpop.permute.xlu0 %3197 }
 0x459   : > { %v2693_v23 = vsel %vm7100_vm6, %v2690_v13, %v2692_v36  ;;  %v2694_v19 = vsel %vm7101_vm8, %v2692_v36, %v2690_v13  ;;  %v3146_v36 = vsel %vm7104_vm2, %v3143_v47, 0.0  ;;  %v2672_v47 = vadd.f32 %v2670_v58, %v2656_v11 }
 0x45a   : > { %v2695_v52 = vsel %vm7103_vm0, %v2694_v19, 0.0  ;;  %v2696_v45 = vsel %vm7104_vm2, %v2693_v23, 0.0  ;;  %v3152_v16 = vmul.f32 %v5843_v56, %v3146_v36  ;;  %vm7113_vm6 = vnez %v6728_v53 }
 0x45b   : > { %v2701_v6 = vmul.f32 %v5869_v43, %v2695_v52  ;;  %v2702_v31 = vmul.f32 %v5869_v43, %v2696_v45  ;;  %v2687_v43 = vadd.f32 %v2685_v5, %v2671_v54  ;;  %v2688_v23 = vadd.f32 %v2686_v57, %v2672_v47 }
 0x45c   : > { %v3168_v27 = vpop.permute.xlu1 %3167  ;;  %v3154_v50 = vadd.f32 %v3152_v16, %v3138_v21  ;;  %vm7114_vm8 = vnez %v6739_v63  ;;  %vm7115_vm0 = vcmp.lt.s32.totalorder %v4438_v3, 112 }
 0x45d   : > { %v3169_v28 = vsel %vm7106_vm9, %v6059_v25, %v3168_v27  ;;  %v3170_v51 = vsel %vm7107_vm7, %v3168_v27, %v6059_v25  ;;  %v3153_v27 = vadd.f32 %v3151_v37, %v3137_v20  ;;  %v2703_v59 = vadd.f32 %v2701_v6, %v2687_v43  ;;  %vm7116_vm2 = vmmov %vm7115_vm0 }
 0x45e   : > { %v3171_v58 = vsel %vm7029_vm13, %v3169_v28, 0.0  ;;  %v3172_v29 = vsel %vm7112_vm10, %v3170_v51, 0.0  ;;  %vm7118_vm9 = vmmov %vm7110_vm12  ;;  %v3164_v52 = vadd.f32 %v6091_v24, %v3154_v50 }
 0x45f   : > { %v3177_v22 = vmul.f32 %v6012_v14, %v3171_v58  ;;  %v3178_v40 = vmul.f32 %v6012_v14, %v3172_v29  ;;  %v3163_v12 = vadd.f32 %v5965_v39, %v3153_v27  ;;  %vm7119_vm7 = vmmov %vm7115_vm0  ;;  %v2713_v37 = vadd.f32 %v5973_v55, %v2703_v59 }
 0x460   : > { %v2716_v26 = vpop.permute.xlu1 %2715 }
 0x461   : > { %v2719_v10 = vsel %vm7108_vm5, %v2716_v26, %v6065_v32  ;;  %v2720_v56 = vsel %vm7109_vm1, %v6065_v32, %v2716_v26  ;;  %v2704_v32 = vadd.f32 %v2702_v31, %v2688_v23  ;;  %v2748_v26 = vpop.permute.xlu0 %2747  ;;  %vm7120_vm5 = vmmov %vm7115_vm0  ;;  %v3180_v54 = vadd.f32 %v3178_v40, %v3164_v52 }
 0x462   : > { %v2721_v62 = vsel %vm7029_vm13, %v2719_v10, 0.0  ;;  %v2722_v60 = vsel %vm7112_vm10, %v2720_v56, 0.0  ;;  %vm7117_vm13 = vmmov %vm7110_vm12  ;;  %vm7121_vm1 = vcmp.lt.s32.totalorder %v4438_v3, 111 }
 0x463   : > { %v2727_v45 = vmul.f32 %v6018_v41, %v2721_v62  ;;  %v2728_v34 = vmul.f32 %v6018_v41, %v2722_v60  ;;  %v2714_v47 = vadd.f32 %v5975_v61, %v2704_v32 }
 0x464   : > { %v3182_v13 = vpop.permute.xlu1 %3181 }
 0x465   : > { %v3185_v19 = vsel %vm7110_vm12, %v3182_v13, %v6080_v2  ;;  %v3186_v25 = vsel %vm7111_vm15, %v6080_v2, %v3182_v13  ;;  %v3214_v16 = vpop.permute.xlu0 %3213  ;;  %v2729_v28 = vadd.f32 %v2727_v45, %v2713_v37  ;;  %v2730_v51 = vadd.f32 %v2728_v34, %v2714_v47  ;;  %vm7122_vm12 = vmmov %vm7121_vm1 }
 0x466   : > { %v3187_v2 = vsel %vm7113_vm6, %v3185_v19, 0.0  ;;  %v3188_v42 = vsel %vm7114_vm8, %v3186_v25, 0.0 }
 0x467   : > { %v3193_v7 = vmul.f32 %v6022_v48, %v3187_v2  ;;  %v3194_v14 = vmul.f32 %v6022_v48, %v3188_v42  ;;  %v3179_v48 = vadd.f32 %v3177_v22, %v3163_v12 }
 0x468   : > { %v2734_v1 = vpop.permute.xlu1 %2733 }
 0x469   : > { %v2735_v15 = vsel %vm7117_vm13, %v6115_v9, %v2734_v1  ;;  %v2736_v0 = vsel %vm7118_vm9, %v2734_v1, %v6115_v9  ;;  %v3195_v21 = vadd.f32 %v3193_v7, %v3179_v48  ;;  %v3196_v55 = vadd.f32 %v3194_v14, %v3180_v54  ;;  %v2764_v27 = vpop.permute.xlu0 %2763  ;;  %v7128_v54 = vld [vmem:[#allocation82_spill] sm:$0xff] }
 0x46a   : > { %v2737_v39 = vsel %vm7113_vm6, %v2735_v15, 0.0  ;;  %v2738_v24 = vsel %vm7114_vm8, %v2736_v0, 0.0 }
 0x46b   : > { %v2743_v1 = vmul.f32 %v6028_v8, %v2737_v39  ;;  %v2744_v20 = vmul.f32 %v6028_v8, %v2738_v24 }
 0x46c   : > { %v3200_v11 = vpop.permute.xlu1 %3199 }
 0x46d   : > { %v3201_v36 = vsel %vm7115_vm0, %v3198_v38, %v3200_v11  ;;  %v3202_v13 = vsel %vm7116_vm2, %v3200_v11, %v3198_v38  ;;  %v2745_v50 = vadd.f32 %v2743_v1, %v2729_v28  ;;  %v2746_v58 = vadd.f32 %v2744_v20, %v2730_v51  ;;  %v7130_v28 = vld [vmem:[#allocation88_spill] sm:$0xff] }
 0x46e   : > { %v3203_v5 = vsel %vm4685_vm14, %v3201_v36, 0.0  ;;  %v3204_v57 = vsel %vm4794_vm4, %v3202_v13, 0.0  ;;  %v7131_v1 = vld [vmem:[#allocation28_spill] sm:$0xff] }
 0x46f   : > { %v3209_v6 = vmul.f32 %v6025_v17, %v3203_v5  ;;  %v3210_v53 = vmul.f32 %v6025_v17, %v3204_v57  ;;  %v7126_v57 = vld [vmem:[#allocation26_spill] sm:$0xff] }
 0x470   : > { %v2750_v38 = vpop.permute.xlu1 %2749 }
 0x471   : > { %v2751_v41 = vsel %vm7119_vm7, %v2748_v26, %v2750_v38  ;;  %v2752_v9 = vsel %vm7120_vm5, %v2750_v38, %v2748_v26  ;;  %v3211_v8 = vadd.f32 %v3209_v6, %v3195_v21  ;;  %v3212_v23 = vadd.f32 %v3210_v53, %v3196_v55  ;;  %v7129_v53 = vld [vmem:[#allocation29_spill] sm:$0xff] }
 0x472   : > { %v2753_v63 = vsel %vm4685_vm14, %v2751_v41, 0.0  ;;  %v2754_v31 = vsel %vm4794_vm4, %v2752_v9, 0.0  ;;  %vm7123_vm14 = vmmov %vm7121_vm1  ;;  %v7127_v9 = vld [vmem:[#allocation68_spill] sm:$0xff] }
 0x473   : > { %v2759_v35 = vmul.f32 %v6036_v44, %v2753_v63  ;;  %v2760_v30 = vmul.f32 %v6036_v44, %v2754_v31  ;;  %vm7124_vm4 = vmmov %vm7121_vm1 }
 0x474   : > { %v3216_v61 = vpop.permute.xlu1 %3215 }
 0x475   : > { %v3217_v10 = vsel %vm7121_vm1, %v3214_v16, %v3216_v61  ;;  %v3218_v17 = vsel %vm7122_vm12, %v3216_v61, %v3214_v16  ;;  %v2761_v62 = vadd.f32 %v2759_v35, %v2745_v50  ;;  %v2762_v60 = vadd.f32 %v2760_v30, %v2746_v58  ;;  %v3275_v14 = vpop.permute.xlu0 %3274  ;;  %v7132_v61 = vld [vmem:[#allocation35_spill] sm:$0xff]  ;;  %v7133_v35 = vld [vmem:[#allocation64_spill] sm:$0xff] }
 0x476   : > { %v3219_v56 = vsel %vm5035_vm3, %v3217_v10, 0.0  ;;  %v3220_v43 = vsel %vm5051_vm11, %v3218_v17, 0.0 }
 0x477   : > { %v3225_v19 = vmul.f32 %v6033_v49, %v3219_v56  ;;  %v3226_v25 = vmul.f32 %v6033_v49, %v3220_v43 }
 0x478   : > { %v2766_v29 = vpop.permute.xlu1 %2765 }
 0x479   : > { %v3227_v59 = vadd.f32 %v3225_v19, %v3211_v8  ;;  %v3228_v32 = vadd.f32 %v3226_v25, %v3212_v23  ;;  %v2767_v44 = vsel %vm7123_vm14, %v2764_v27, %v2766_v29  ;;  %v2768_v26 = vsel %vm7124_vm4, %v2766_v29, %v2764_v27 }
 0x47a   : > { %v2769_v11 = vsel %vm5035_vm3, %v2767_v44, 0.0  ;;  %v2770_v49 = vsel %vm5051_vm11, %v2768_v26, 0.0  ;;  %v2841_v23 = vpop.permute.xlu0 %2840 }
 0x47b   : > { %v3231_v2 = vmul.f32 0.01, %v3227_v59  ;;  %v3232_v42 = vmul.f32 0.01, %v3228_v32  ;;  %v2775_v36 = vmul.f32 %v6039_v46, %v2769_v11  ;;  %v2776_v13 = vmul.f32 %v6039_v46, %v2770_v49 }
 0x47c   : > { %vm3229_vm15 = vcmp.gt.f32.partialorder %v3227_v59, 0.0  ;;  %vm3230_vm10 = vcmp.gt.f32.partialorder %v3228_v32, 0.0 }
 0x47d   : > { %v2777_v22 = vadd.f32 %v2775_v36, %v2761_v62  ;;  %v2778_v40 = vadd.f32 %v2776_v13, %v2762_v60  ;;  %v3233_v3 = vsel %vm3229_vm15, %v3227_v59, %v3231_v2  ;;  %v3234_v15 = vsel %vm3230_vm10, %v3228_v32, %v3232_v42 }
 0x47e   : > { %v3248_v0 = vrot.slane %v3233_v3, %v7043_v18  ;;  %v3252_v4 = vrot.slane %v3234_v15, %v7043_v18  ;;  %v3264_v24 = vrot.slane %v3233_v3, %v7126_v57  ;;  %v3268_v41 = vrot.slane %v3234_v15, %v7126_v57 }
 0x47f   : > { %v2781_v12 = vmul.f32 0.01, %v2777_v22  ;;  %v2782_v52 = vmul.f32 0.01, %v2778_v40  ;;  %vm2779_vm3 = vcmp.gt.f32.partialorder %v2777_v22, 0.0  ;;  %vm2780_vm11 = vcmp.gt.f32.partialorder %v2778_v40, 0.0 }
 0x480   : > { %v3253_v45 = vmul.f32 %v3248_v0, %v7125_v33  ;;  %v3254_v34 = vmul.f32 %v3252_v4, %v7125_v33  ;;  %v3269_v30 = vmul.f32 %v3264_v24, %v7133_v35  ;;  %v3270_v56 = vmul.f32 %v3268_v41, %v7133_v35 }
 0x481   : > { %v2783_v7 = vsel %vm2779_vm3, %v2777_v22, %v2781_v12  ;;  %v2784_v46 = vsel %vm2780_vm11, %v2778_v40, %v2782_v52  ;;  %v3280_v43 = vrot.slane %v3233_v3, %v7131_v1  ;;  %v3284_v8 = vrot.slane %v3234_v15, %v7131_v1 }
 0x482   : > { %v2802_v5 = vrot.slane %v2784_v46, %v7043_v18  ;;  %v2818_v38 = vrot.slane %v2784_v46, %v7126_v57  ;;  %v2798_v39 = vrot.slane %v2783_v7, %v7043_v18  ;;  %v3255_v47 = vadd.f32 %v3253_v45, %v7128_v54 }
 0x483   : > { %v3256_v37 = vadd.f32 %v3254_v34, %v7128_v54  ;;  %v2814_v6 = vrot.slane %v2783_v7, %v7126_v57  ;;  %v2846_v63 = vrot.slane %v2783_v7, %v7129_v53  ;;  %v2850_v31 = vrot.slane %v2784_v46, %v7129_v53  ;;  %v3830_v54 = vld [vmem:[%s4180_s18 + $0x8] sm:$0xff] }
 0x484   : > { %v2804_v48 = vmul.f32 %v2802_v5, %v7127_v9  ;;  %v2803_v16 = vmul.f32 %v2798_v39, %v7127_v9  ;;  %v2834_v20 = vrot.slane %v2784_v46, %v7131_v1  ;;  %v2820_v21 = vmul.f32 %v2818_v38, %v7132_v61 }
 0x485   : > { %v2819_v10 = vmul.f32 %v2814_v6, %v7132_v61  ;;  %v2830_v17 = vrot.slane %v2783_v7, %v7131_v1  ;;  %v3271_v29 = vadd.f32 %v3269_v30, %v3255_v47  ;;  %v3272_v59 = vadd.f32 %v3270_v56, %v3256_v37  ;;  %v3831_v37 = vld [vmem:[%s4180_s18] sm:$0xff]  ;;  %s3903_s18 = smov 125  }
 0x486   : > { %v2806_v51 = vadd.f32 %v2804_v48, %v7130_v28  ;;  %v2805_v55 = vadd.f32 %v2803_v16, %v7130_v28  ;;  %v2851_v32 = vmul.f32 %v2846_v63, %v2841_v23  ;;  %v2852_v44 = vmul.f32 %v2850_v31, %v2841_v23  ;;  %v7134_v23 = vld [vmem:[#allocation30_spill] sm:$0xff] }
 0x487   : > { %v3285_v60 = vmul.f32 %v3280_v43, %v3275_v14  ;;  %v3286_v11 = vmul.f32 %v3284_v8, %v3275_v14  ;;  %v3296_v49 = vrot.slane %v3233_v3, %v7129_v53  ;;  %v3300_v2 = vrot.slane %v3234_v15, %v7129_v53 }
 0x488   : > { %v2822_v25 = vadd.f32 %v2820_v21, %v2806_v51  ;;  %v2821_v27 = vadd.f32 %v2819_v10, %v2805_v55 }
 0x489   : > { %v2825_v19 = vpop.permute.xlu1 %2824  ;;  %v3287_v22 = vadd.f32 %v3285_v60, %v3271_v29  ;;  %v3288_v40 = vadd.f32 %v3286_v11, %v3272_v59  ;;  %v7135_v11 = vld [vmem:[#allocation31_spill] sm:$0xff] }
 0x48a   : > { %v2835_v50 = vmul.f32 %v2830_v17, %v2825_v19  ;;  %v2836_v58 = vmul.f32 %v2834_v20, %v2825_v19  ;;  %v3349_v20 = vpop.permute.xlu0 %3348 }
 0x48c   : > { %v2837_v26 = vadd.f32 %v2835_v50, %v2821_v27  ;;  %v2838_v62 = vadd.f32 %v2836_v58, %v2822_v25 }
 0x48e   : > { %v2853_v42 = vadd.f32 %v2851_v32, %v2837_v26  ;;  %v2854_v36 = vadd.f32 %v2852_v44, %v2838_v62  ;;  %v3291_v13 = vpop.permute.xlu1 %3290  ;;  %v3397_v32 = vpop.permute.xlu0 %3396 }
 0x48f   : > { %v3301_v0 = vmul.f32 %v3296_v49, %v3291_v13  ;;  %v3302_v4 = vmul.f32 %v3300_v2, %v3291_v13 }
 0x490   : > { %vm2855_vm6 = vcmp.gt.f32.partialorder %v2853_v42, 0.0  ;;  %vm2856_vm8 = vcmp.gt.f32.partialorder %v2854_v36, 0.0  ;;  %v2857_v12 = vmul.f32 0.01, %v2853_v42  ;;  %v2858_v52 = vmul.f32 0.01, %v2854_v36 }
 0x491   : > { %v3303_v33 = vadd.f32 %v3301_v0, %v3287_v22  ;;  %v3304_v45 = vadd.f32 %v3302_v4, %v3288_v40  ;;  %v7136_v40 = vld [vmem:[#allocation34_spill] sm:$0xff] }
 0x492   : > { %v2859_v34 = vsel %vm2855_vm6, %v2853_v42, %v2857_v12  ;;  %v2860_v7 = vsel %vm2856_vm8, %v2854_v36, %v2858_v52 }
 0x493   : > { %3311 = vst [vmem:[#allocation2] sm:$0xf] %v2859_v34  ;;  %3312 = vst [vmem:[#allocation2 + $0x8] sm:$0xf] %v2860_v7  ;;  %vm3305_vm0 = vcmp.gt.f32.partialorder %v3303_v33, 0.0  ;;  %vm3306_vm2 = vcmp.gt.f32.partialorder %v3304_v45, 0.0  ;;  %v3333_v46 = vpop.permute.xlu1 %3332 }
 0x494   : > { %v3307_v3 = vmul.f32 0.01, %v3303_v33  ;;  %v3308_v15 = vmul.f32 0.01, %v3304_v45  ;;  %v7137_v7 = vld [vmem:[#allocation33_spill] sm:$0xff] }
 0x496   : > { %v3309_v14 = vsel %vm3305_vm0, %v3303_v33, %v3307_v3  ;;  %v3310_v5 = vsel %vm3306_vm2, %v3304_v45, %v3308_v15 }
 0x497   : > { %v3315_v38 = vrot.slane %v3309_v14, 4  ;;  %v3316_v39 = vrot.slane %v3310_v5, 4  ;;  %v3328_v24 = vpop.permute.xlu1 %3327 }
 0x499   : > { %3319 = vst [vmem:[#allocation2] sm:$0xf0] %v3315_v38  ;;  %3320 = vst [vmem:[#allocation2 + $0x8] sm:$0xf0] %v3316_v39 }
 0x49c   : > { %v3365_v41 = vpop.permute.xlu1 %3364 }
 0x4a0   : > { %v3322_v9 = vld [vmem:[#allocation2 + $0x8] sm:$0xff]  ;;  %v3321_v48 = vld [vmem:[#allocation2] sm:$0xff] }
 0x4a1   : > { %v3324_v47 = vadd.f32 %v3830_v54, %v3322_v9  ;;  %v3323_v16 = vadd.f32 %v3831_v37, %v3321_v48  ;;  %v3381_v6 = vpop.permute.xlu1 %3380 }
 0x4a3   : > { %v3342_v63 = vrot.slane %v3324_v47, %v7043_v18  ;;  %v3338_v31 = vrot.slane %v3323_v16, %v7043_v18  ;;  %v3354_v28 = vrot.slane %v3323_v16, %v7126_v57  ;;  %v3358_v51 = vrot.slane %v3324_v47, %v7126_v57 }
 0x4a4   : > { %v3374_v55 = vrot.slane %v3324_v47, %v7131_v1  ;;  %v3370_v10 = vrot.slane %v3323_v16, %v7131_v1  ;;  %v3390_v43 = vrot.slane %v3324_v47, %v7129_v53  ;;  %v3386_v8 = vrot.slane %v3323_v16, %v7129_v53 }
 0x4a5   : > { %v3343_v61 = vmul.f32 %v3338_v31, %v3333_v46  ;;  %v3344_v21 = vmul.f32 %v3342_v63, %v3333_v46  ;;  %v3359_v17 = vmul.f32 %v3354_v28, %v3349_v20  ;;  %v3360_v35 = vmul.f32 %v3358_v51, %v3349_v20  ;;  %v3445_v46 = vpop.permute.xlu0 %3444  ;;  %v1191_v20 = vld [vmem:[%s4101_s24] sm:$0xff] }
 0x4a6   : > { %v3402_v19 = vrot.slane %v3323_v16, %v7134_v23  ;;  %v3406_v25 = vrot.slane %v3324_v47, %v7134_v23  ;;  %v3413_v27 = vpop.permute.xlu1 %3412  ;;  %v3375_v29 = vmul.f32 %v3370_v10, %v3365_v41  ;;  %v3376_v59 = vmul.f32 %v3374_v55, %v3365_v41 }
 0x4a7   : > { %v3345_v30 = vadd.f32 %v3343_v61, %v3328_v24  ;;  %v3346_v56 = vadd.f32 %v3344_v21, %v3328_v24  ;;  %v3391_v62 = vmul.f32 %v3386_v8, %v3381_v6  ;;  %v3392_v60 = vmul.f32 %v3390_v43, %v3381_v6 }
 0x4a8   : > { %v3422_v49 = vrot.slane %v3324_v47, %v7135_v11  ;;  %v3418_v2 = vrot.slane %v3323_v16, %v7135_v11  ;;  %v3407_v42 = vmul.f32 %v3402_v19, %v3397_v32  ;;  %v3408_v36 = vmul.f32 %v3406_v25, %v3397_v32 }
 0x4a9   : > { %v3361_v50 = vadd.f32 %v3359_v17, %v3345_v30  ;;  %v3362_v58 = vadd.f32 %v3360_v35, %v3346_v56  ;;  %v3450_v0 = vrot.slane %v3323_v16, %v7136_v40  ;;  %v3454_v4 = vrot.slane %v3324_v47, %v7136_v40 }
 0x4aa   : > { %v3423_v12 = vmul.f32 %v3418_v2, %v3413_v27  ;;  %v3424_v52 = vmul.f32 %v3422_v49, %v3413_v27  ;;  %v3438_v3 = vrot.slane %v3324_v47, %v7137_v7  ;;  %v3434_v15 = vrot.slane %v3323_v16, %v7137_v7 }
 0x4ab   : > { %v3377_v44 = vadd.f32 %v3375_v29, %v3361_v50  ;;  %v3378_v26 = vadd.f32 %v3376_v59, %v3362_v58  ;;  %v3429_v33 = vpop.permute.xlu1 %3428  ;;  %v3455_v24 = vmul.f32 %v3450_v0, %v3445_v46  ;;  %v3456_v41 = vmul.f32 %v3454_v4, %v3445_v46 }
 0x4ac   : > { %v3439_v38 = vmul.f32 %v3434_v15, %v3429_v33  ;;  %v3440_v39 = vmul.f32 %v3438_v3, %v3429_v33 }
 0x4ad   : > { %v3393_v13 = vadd.f32 %v3391_v62, %v3377_v44  ;;  %v3394_v22 = vadd.f32 %v3392_v60, %v3378_v26 }
 0x4af   : > { %v3410_v45 = vadd.f32 %v3408_v36, %v3394_v22  ;;  %v3409_v34 = vadd.f32 %v3407_v42, %v3393_v13 }
 0x4b1   : > { %v3425_v14 = vadd.f32 %v3423_v12, %v3409_v34  ;;  %v3426_v5 = vadd.f32 %v3424_v52, %v3410_v45 }
 0x4b3   : > { %v3441_v9 = vadd.f32 %v3439_v38, %v3425_v14  ;;  %v3442_v48 = vadd.f32 %v3440_v39, %v3426_v5 }
 0x4b5   : > { %v3457_v54 = vadd.f32 %v3455_v24, %v3441_v9  ;;  %v3458_v37 = vadd.f32 %v3456_v41, %v3442_v48 }
 0x4b7   : > { %vm3459_vm13 = vcmp.gt.f32.partialorder %v3457_v54, 0.0  ;;  %vm3460_vm9 = vcmp.gt.f32.partialorder %v3458_v37, 0.0  ;;  %v3461_v6 = vmul.f32 0.01, %v3457_v54  ;;  %v3462_v63 = vmul.f32 0.01, %v3458_v37 }
 0x4b9   : > { %v3463_v31 = vsel %vm3459_vm13, %v3457_v54, %v3461_v6  ;;  %v3464_v47 = vsel %vm3460_vm9, %v3458_v37, %v3462_v63 }
 0x4ba   : > { %v3465_v28 = vadd.f32 %v3464_v47, %v3463_v31 }
 0x4bc   : > { %3466 = vadd.xlane.f32.xlu1 %v3465_v28 }
 0x549   : > { %v3467_v16 = vpop.xlane.xlu1 %3466 }
 0x54a   : > { %v3469_v51 = vmul.f32 0.00390625, %v3467_v16 }
 0x54c   : > { %v3479_v61 = vrot.slane %v3469_v51, %v7126_v57  ;;  %v3473_v21 = vrot.slane %v3469_v51, %v7043_v18  ;;  %v3489_v10 = vrot.slane %v3469_v51, %v7131_v1  ;;  %v3499_v30 = vrot.slane %v3469_v51, %v7129_v53 }
 0x54d   : > { %v3509_v43 = vrot.slane %v3469_v51, %v7134_v23  ;;  %v3519_v57 = vrot.slane %v3469_v51, %v7135_v11  ;;  %v3529_v1 = vrot.slane %v3469_v51, %v7137_v7  ;;  %v3539_v53 = vrot.slane %v3469_v51, %v7136_v40 }
 0x54e   : > { %v3480_v55 = vmul.f32 %v3479_v61, %v1191_v20  ;;  %v3474_v17 = vmul.f32 %v3473_v21, %v1191_v20  ;;  %v3490_v35 = vmul.f32 %v3489_v10, %v1191_v20  ;;  %v3500_v56 = vmul.f32 %v3499_v30, %v1191_v20 }
 0x54f   : > { %v3510_v8 = vmul.f32 %v3509_v43, %v1191_v20  ;;  %v3520_v18 = vmul.f32 %v3519_v57, %v1191_v20  ;;  %v3530_v19 = vmul.f32 %v3529_v1, %v1191_v20  ;;  %v3540_v25 = vmul.f32 %v3539_v53, %v1191_v20 }
 0x550   : > { %3482 = vrot.lane.b32.xlu0 %v3480_v55, %s6822_s26  ;;  %s1154_s26 = scalar_lea.vmem %s4106_s19, %s7138_s0 }
 0x554   : > { %3492 = vrot.lane.b32.xlu0 %v3490_v35, %s6927_s22  ;;  %s3907_s22 = smov 121  }
 0x558   : > { %3502 = vrot.lane.b32.xlu0 %v3500_v56, %s3903_s18 }
 0x55c   : > { %3512 = vrot.lane.b32.xlu0 %v3510_v8, %s3904_s1 }
 0x560   : > { %3522 = vrot.lane.b32.xlu0 %v3520_v18, %s3905_s7 }
 0x564   : > { %3532 = vrot.lane.b32.xlu0 %v3530_v19, %s3906_s11 }
 0x568   : > { %3542 = vrot.lane.b32.xlu0 %v3540_v25, %s3907_s22 }
 0x5c2   : > { %v3483_v23 = vpop.permute.xlu0 %3482 }
 0x5c3   : > { %v3485_v29 = vadd.f32 %v3483_v23, %v3474_v17 }
 0x5c6   : > { %v3493_v27 = vpop.permute.xlu0 %3492 }
 0x5c7   : > { %v3495_v59 = vadd.f32 %v3493_v27, %v3485_v29 }
 0x5ca   : > { %v3503_v50 = vpop.permute.xlu0 %3502 }
 0x5cb   : > { %v3505_v44 = vadd.f32 %v3503_v50, %v3495_v59 }
 0x5ce   : > { %v3513_v58 = vpop.permute.xlu0 %3512 }
 0x5cf   : > { %v3515_v26 = vadd.f32 %v3513_v58, %v3505_v44 }
 0x5d2   : > { %v3523_v32 = vpop.permute.xlu0 %3522 }
 0x5d3   : > { %v3525_v60 = vadd.f32 %v3523_v32, %v3515_v26 }
 0x5d6   : > { %v3533_v62 = vpop.permute.xlu0 %3532 }
 0x5d7   : > { %v3535_v11 = vadd.f32 %v3533_v62, %v3525_v60 }
 0x5da   : > { %v3543_v49 = vpop.permute.xlu0 %3542 }
 0x5db   : > { %v3545_v2 = vadd.f32 %v3543_v49, %v3535_v11 }
 0x5dd   : > { %v3546_v42 = vsub.f32 0.0, %v3545_v2 }
 0x5df   : > { %v3547_v36 = vmul.f32 1.442695, %v3546_v42 }
 0x5e1   : > { %3825 = vpow2.f32 %v3547_v36 }
 0x5eb   : > { %v3826_v13 = vpop.eup %3825 }
 0x5ec   : > { %v3549_v22 = vadd.f32 1.0, %v3826_v13 }
 0x5ee   : > { %3827 = vrcp.f32 %v3549_v22 }
 0x5f8   : > { %v3828_v40 = vpop.eup %3827 }
 0x5f9   : > { %3553 = vperm.xlu0 %3824, %v3828_v40  }
 0x678   : > { %v3554_v0 = vpop.permute.xlu0 %3553 }
 0x679   : > { %v3556_v4 = vmul.f32 %v3554_v0, %v3463_v31  ;;  %v3557_v12 = vmul.f32 %v3554_v0, %v3464_v47 }
 0x67b   : > { %3558 = vst [vmem:[%s1154_s26] sm:$0xff] %v3556_v4  ;;  %3559 = vst [vmem:[%s1154_s26 + $0x8] sm:$0xff] %v3557_v12 }
 0x67c PF: > { %s87_s15 = sadd.s32 1, %s3838_s15  }
 0x67d   : > { %p84_p4 = scmp.ge.s32.totalorder %s87_s15, 4  }
 0x67f   :  { %86 = sbr.rel (!%p84_p4) target bundleno = 64 (0x40), region = 240 }

</bundles_post_ra>
